<compile_context>
chip_gen: v7x
topology: tpu7x:2x2x1
jax: 0.10.0
libtpu: 0.0.40
codegen_flags: <defaults>
</compile_context>

<pallas_src>
import numpy as np

import jax
import jax.numpy as jnp
from jax.experimental import pallas as pl
from jax.experimental.pallas import tpu as pltpu

_NEG = np.float32(-1e30)  # pad bias for the 128-lane-padded fc3 (exp -> 0)


def _round_up(v, m):
    return ((v + m - 1) // m) * m


# ---------------------------------------------------------------------------
# Fused forward kernel: phase-sliced Toeplitz convs + fc tail, all 2D values.
# ---------------------------------------------------------------------------
def _fused_forward_kernel(x_ref, w1_ref, b1_ref, w2_ref, b2_ref,
                          fc1w_ref, fc1b_ref, fc2w_ref, fc2b_ref,
                          fc3w_ref, fc3b_ref, o_ref):
    f32, bf16 = jnp.float32, jnp.bfloat16
    x = x_ref[...]                                              # (tb, 896) bf16

    # conv1 + ReLU + 2x2 maxpool: 4 per-phase Toeplitz matmuls with the pool
    # max folded in, so the (tb, 3584) pre-pool activation never exists.
    p1 = None
    for ph in range(4):
        h = jnp.dot(x, w1_ref[ph], preferred_element_type=f32)   # (tb, 896)
        h = jnp.maximum(h + b1_ref[...], 0.0)
        p1 = h if p1 is None else jnp.maximum(p1, h)
    p1 = p1.astype(bf16)

    # conv2 + ReLU + 2x2 maxpool, same phase-sliced trick ((tb, 256) slabs).
    p2 = None
    for ph in range(4):
        h = jnp.dot(p1, w2_ref[ph], preferred_element_type=f32)  # (tb, 256)
        h = jnp.maximum(h + b2_ref[...], 0.0)
        p2 = h if p2 is None else jnp.maximum(p2, h)

    # conv2_drop / F.dropout: identity in eval mode.
    z = jnp.dot(p2.astype(bf16), fc1w_ref[...], preferred_element_type=f32)
    z = jnp.maximum(z + fc1b_ref[...], 0.0)                      # (tb, nn_pad)
    z = jnp.dot(z.astype(bf16), fc2w_ref[...], preferred_element_type=f32)
    z = jnp.maximum(z + fc2b_ref[...], 0.0)                      # (tb, 128)
    z = jnp.dot(z.astype(bf16), fc3w_ref[...], preferred_element_type=f32)
    z = z + fc3b_ref[...]                                        # (tb, 128)

    # log_softmax kept in f32: pad lanes carry bias -1e30 -> exp underflows to 0.
    z = z - jnp.max(z, axis=-1, keepdims=True)
    z = z - jnp.log(jnp.sum(jnp.exp(z), axis=-1, keepdims=True))
    o_ref[...] = z                                               # (tb, 128) f32


def _choose_tile(batch):
    """Batch tile: 128 on v5e (4x128 MXU, 1 vst slot), 256 on v6e/v7x;
    small batches round up to a multiple of 16 (bf16 sublane packing)."""
    target = 256
    try:
        kind = jax.devices()[0].device_kind.lower()
        if ("v5e" in kind) or ("v5 lite" in kind) or ("v5lite" in kind):
            target = 128
    except Exception:
        pass
    if batch >= target:
        return target
    return max(16, _round_up(batch, 16))


def fused_forward_padded(kp, x_pad, tb):
    """x_pad: (Bp, 896) bf16 -> (Bp, 128) padded log-probs (cols 0..9 valid)."""
    Bp = x_pad.shape[0]
    weights = (kp["w1t"], kp["b1"], kp["w2t"], kp["b2"],
               kp["fc1w"], kp["fc1b"], kp["fc2w"], kp["fc2b"],
               kp["fc3w"], kp["fc3b"])

    def full(a):
        # Whole-array resident block; constant index map => DMA'd once per call.
        return pl.BlockSpec(a.shape, lambda b: (0,) * a.ndim)

    nn_pad = kp["fc1w"].shape[1]
    flops = 2 * Bp * (4 * 896 * 896 + 4 * 896 * 256
                      + 256 * nn_pad + nn_pad * 128 + 128 * 128)
    # Note: slightly undercounts on v7x where each TC DMAs its own weight copy.
    bytes_accessed = (int(x_pad.size) * x_pad.dtype.itemsize
                      + sum(int(w.size) * w.dtype.itemsize for w in weights)
                      + Bp * 128 * 4)
    cost = pl.CostEstimate(flops=int(flops), transcendentals=int(129 * Bp),
                           bytes_accessed=int(bytes_accessed))

    return pl.pallas_call(
        _fused_forward_kernel,
        out_shape=jax.ShapeDtypeStruct((Bp, 128), jnp.float32),
        grid=(Bp // tb,),
        in_specs=[pl.BlockSpec((tb, 896), lambda b: (b, 0))]
                 + [full(w) for w in weights],
        out_specs=pl.BlockSpec((tb, 128), lambda b: (b, 0)),
        compiler_params=pltpu.CompilerParams(
            dimension_semantics=("parallel",),
            vmem_limit_bytes=40 * 1024 * 1024),
        cost_estimate=cost,
    )(x_pad, *weights)


@jax.jit
def forward(kparams, x_nchw):
    """Inference forward matching MyNetwork.forward (eval mode)."""
    B = x_nchw.shape[0]
    tb = _choose_tile(B)
    Bp = _round_up(B, tb)
    x = x_nchw.astype(jnp.bfloat16).reshape(B, 28 * 28)
    x_pad = jnp.pad(x, ((0, Bp - B), (0, 896 - 784)))   # lane/batch padding
    return fused_forward_padded(kparams, x_pad, tb)[:B, :10]


# ---------------------------------------------------------------------------
# Parameter handling: PyTorch-layout params -> fused-kernel layout (done once).
# ---------------------------------------------------------------------------
def init_params(key, num_neurons=120):
    ks = jax.random.split(key, 10)
    s = 0.1
    return {
        "conv1_w": jax.random.normal(ks[0], (6, 1, 5, 5), jnp.float32) * s,
        "conv1_b": jax.random.normal(ks[1], (6,), jnp.float32) * s,
        "conv2_w": jax.random.normal(ks[2], (16, 6, 5, 5), jnp.float32) * s,
        "conv2_b": jax.random.normal(ks[3], (16,), jnp.float32) * s,
        "fc1_w": jax.random.normal(ks[4], (num_neurons, 16 * 4 * 4), jnp.float32) * s,
        "fc1_b": jax.random.normal(ks[5], (num_neurons,), jnp.float32) * s,
        "fc2_w": jax.random.normal(ks[6], (84, num_neurons), jnp.float32) * s,
        "fc2_b": jax.random.normal(ks[7], (84,), jnp.float32) * s,
        "fc3_w": jax.random.normal(ks[8], (10, 84), jnp.float32) * s,
        "fc3_b": jax.random.normal(ks[9], (10,), jnp.float32) * s,
    }


def prepare_params(params):
    """Build the fused-kernel weights (phase-sliced Toeplitz convs, permuted
    and 128-lane-padded fcs), stored as bf16 matmul operands + f32 biases."""
    w1 = np.asarray(params["conv1_w"], np.float32)       # (6,1,5,5)
    b1 = np.asarray(params["conv1_b"], np.float32)       # (6,)
    w2 = np.asarray(params["conv2_w"], np.float32)       # (16,6,5,5)
    b2 = np.asarray(params["conv2_b"], np.float32)       # (16,)

    # conv1: w1t[ph, p, (r*12+c)*6 + co]; p = flattened 28x28 pixel (rows
    # padded 784->896 with zeros), ph = dy*2+dx pool phase, cols 864->896 pad.
    w1t = np.zeros((4, 896, 896), np.float32)
    b1t = np.zeros((896,), np.float32)
    b1t[:864] = np.tile(b1, 144)
    r = np.arange(12)[:, None]
    c = np.arange(12)[None, :]
    co = np.arange(6)
    for dy in range(2):
        for dx in range(2):
            ph = 2 * dy + dx
            colb = (r * 12 + c) * 6                               # (12,12)
            for i in range(5):
                for j in range(5):
                    p = (2 * r + dy + i) * 28 + (2 * c + dx + j)  # (12,12)
                    w1t[ph, p[:, :, None], colb[:, :, None] + co] = w1[:, 0, i, j]

    # conv2: w2t[ph, (h*12+w)*6 + ci, (r2*4+c2)*16 + co]; rows 864->896 pad.
    w2t = np.zeros((4, 896, 256), np.float32)
    b2t = np.tile(b2, 16).astype(np.float32)
    r2 = np.arange(4)[:, None]
    c2 = np.arange(4)[None, :]
    co2 = np.arange(16)
    for ey in range(2):
        for ex in range(2):
            ph = 2 * ey + ex
            colb = (r2 * 4 + c2) * 16                             # (4,4)
            for i in range(5):
                for j in range(5):
                    for ci in range(6):
                        q = ((2 * r2 + ey + i) * 12 + (2 * c2 + ex + j)) * 6 + ci
                        w2t[ph, q[:, :, None], colb[:, :, None] + co2] = w2[:, ci, i, j]

    # fc1: fold torch's NCHW flatten (feature = ch*16 + s2) into the weight
    # rows so the kernel feeds p2 ordered s2*16 + ch; pad N to 128 multiple.
    fc1 = np.asarray(params["fc1_w"], np.float32)                 # (nn, 256)
    nn_ = fc1.shape[0]
    nn_pad = max(128, _round_up(nn_, 128))
    fc1k = fc1.T.reshape(16, 16, nn_).transpose(1, 0, 2).reshape(256, nn_)
    fc1w = np.zeros((256, nn_pad), np.float32)
    fc1w[:, :nn_] = fc1k
    fc1b = np.zeros((nn_pad,), np.float32)
    fc1b[:nn_] = np.asarray(params["fc1_b"], np.float32)

    # fc2: pad K rows nn -> nn_pad (zeros), output lanes 84 -> 128 (zeros).
    fc2 = np.asarray(params["fc2_w"], np.float32)                 # (84, nn)
    fc2w = np.zeros((nn_pad, 128), np.float32)
    fc2w[:nn_, :84] = fc2.T
    fc2b = np.zeros((128,), np.float32)
    fc2b[:84] = np.asarray(params["fc2_b"], np.float32)

    # fc3: pad K rows 84 -> 128 (zeros), output lanes 10 -> 128 with -1e30 bias
    # so pad lanes vanish under log_softmax and are sliced off in the wrapper.
    fc3 = np.asarray(params["fc3_w"], np.float32)                 # (10, 84)
    fc3w = np.zeros((128, 128), np.float32)
    fc3w[:84, :10] = fc3.T
    fc3b = np.full((128,), _NEG, np.float32)
    fc3b[:10] = np.asarray(params["fc3_b"], np.float32)

    bf16 = jnp.bfloat16
    return {
        "w1t": jnp.asarray(w1t, bf16), "b1": jnp.asarray(b1t[None, :]),
        "w2t": jnp.asarray(w2t, bf16), "b2": jnp.asarray(b2t[None, :]),
        "fc1w": jnp.asarray(fc1w, bf16), "fc1b": jnp.asarray(fc1b[None, :]),
        "fc2w": jnp.asarray(fc2w, bf16), "fc2b": jnp.asarray(fc2b[None, :]),
        "fc3w": jnp.asarray(fc3w, bf16), "fc3b": jnp.asarray(fc3b[None, :]),
    }


# ---------------------------------------------------------------------------
# Pure-JAX (non-Pallas) reference, used only for the numeric self-check.
# ---------------------------------------------------------------------------
def _maxpool2x2_nchw(y):
    B, C, H, W = y.shape
    return y.reshape(B, C, H // 2, 2, W // 2, 2).max(axis=(3, 5))


def reference_forward(params, x_nchw):
    x = x_nchw.astype(jnp.float32)
    dn = ("NCHW", "OIHW", "NCHW")
    y = jax.lax.conv_general_dilated(x, params["conv1_w"], (1, 1), "VALID",
                                     dimension_numbers=dn)
    y = jax.nn.relu(y + params["conv1_b"][None, :, None, None])
    y = _maxpool2x2_nchw(y)
    y = jax.lax.conv_general_dilated(y, params["conv2_w"], (1, 1), "VALID",
                                     dimension_numbers=dn)
    y = jax.nn.relu(y + params["conv2_b"][None, :, None, None])
    y = _maxpool2x2_nchw(y)
    y = y.reshape(y.shape[0], -1)                       # torch x.view(-1, 256)
    y = jax.nn.relu(y @ params["fc1_w"].T + params["fc1_b"])
    y = jax.nn.relu(y @ params["fc2_w"].T + params["fc2_b"])
    y = y @ params["fc3_w"].T + params["fc3_b"]
    return jax.nn.log_softmax(y, axis=-1)


if __name__ == "__main__":
    key = jax.random.PRNGKey(0)
    pkey, xkey = jax.random.split(key)
    params = init_params(pkey)           # PyTorch-layout parameters
    kparams = prepare_params(params)     # fused-kernel layout (built once)

    # FashionMNIST-shaped input (fc1's 16*4*4 implies 1x28x28), batch = 2.
    x = jax.random.normal(xkey, (2, 1, 28, 28), jnp.float32)

    out = jax.block_until_ready(forward(kparams, x))
    assert out.shape == (2, 10) and out.dtype == jnp.float32
    # log_softmax rows must exponentiate-sum to ~1 (log_softmax is f32).
    assert bool(jnp.all(jnp.abs(jnp.sum(jnp.exp(out), axis=1) - 1.0) < 1e-4))
    # Numerical check vs the pure-JAX f32 reference of the PyTorch module.
    # bf16 matmul operands (f32 accumulation) add a small numeric drift.
    ref = jax.block_until_ready(reference_forward(params, x))
    max_err = float(jnp.max(jnp.abs(out - ref)))
    assert max_err < 1e-1, max_err
    print("KERNEL_OK")
</pallas_src>

<mosaic_0001>
module attributes {stable_mosaic.version = 11 : i64} {
  func.func @_fused_forward_kernel(%arg0: i32, %arg1: memref<16x896xbf16, #tpu.memory_space<vmem>>, %arg2: memref<4x896x896xbf16, #tpu.memory_space<vmem>>, %arg3: memref<1x896xf32, #tpu.memory_space<vmem>>, %arg4: memref<4x896x256xbf16, #tpu.memory_space<vmem>>, %arg5: memref<1x256xf32, #tpu.memory_space<vmem>>, %arg6: memref<256x128xbf16, #tpu.memory_space<vmem>>, %arg7: memref<1x128xf32, #tpu.memory_space<vmem>>, %arg8: memref<128x128xbf16, #tpu.memory_space<vmem>>, %arg9: memref<1x128xf32, #tpu.memory_space<vmem>>, %arg10: memref<128x128xbf16, #tpu.memory_space<vmem>>, %arg11: memref<1x128xf32, #tpu.memory_space<vmem>>, %arg12: memref<16x128xf32, #tpu.memory_space<vmem>>) attributes {dimension_semantics = [#tpu.dimension_semantics<parallel>], iteration_bounds = array<i64: 1>, scalar_prefetch = 0 : i64, scratch_operands = 0 : i64, tpu.core_type = #tpu.core_type<tc>, window_params = [{transform_indices = @transform_0, window_bounds = array<i64: 16, 896>}, {pipeline_mode = #tpu.pipeline_mode<synchronous>, transform_indices = @transform_1, window_bounds = array<i64: 4, 896, 896>}, {pipeline_mode = #tpu.pipeline_mode<synchronous>, transform_indices = @transform_2, window_bounds = array<i64: 1, 896>}, {pipeline_mode = #tpu.pipeline_mode<synchronous>, transform_indices = @transform_3, window_bounds = array<i64: 4, 896, 256>}, {pipeline_mode = #tpu.pipeline_mode<synchronous>, transform_indices = @transform_4, window_bounds = array<i64: 1, 256>}, {pipeline_mode = #tpu.pipeline_mode<synchronous>, transform_indices = @transform_5, window_bounds = array<i64: 256, 128>}, {pipeline_mode = #tpu.pipeline_mode<synchronous>, transform_indices = @transform_6, window_bounds = array<i64: 1, 128>}, {pipeline_mode = #tpu.pipeline_mode<synchronous>, transform_indices = @transform_7, window_bounds = array<i64: 128, 128>}, {pipeline_mode = #tpu.pipeline_mode<synchronous>, transform_indices = @transform_8, window_bounds = array<i64: 1, 128>}, {pipeline_mode = #tpu.pipeline_mode<synchronous>, transform_indices = @transform_9, window_bounds = array<i64: 128, 128>}, {pipeline_mode = #tpu.pipeline_mode<synchronous>, transform_indices = @transform_10, window_bounds = array<i64: 1, 128>}, {transform_indices = @transform_11, window_bounds = array<i64: 16, 128>}]} {
    %c0 = arith.constant 0 : index
    %c0_0 = arith.constant 0 : index
    %0 = vector.load %arg1[%c0, %c0_0] : memref<16x896xbf16, #tpu.memory_space<vmem>>, vector<16x896xbf16>
    %c0_1 = arith.constant 0 : index
    %c0_2 = arith.constant 0 : index
    %c0_3 = arith.constant 0 : index
    %1 = vector.load %arg2[%c0_1, %c0_2, %c0_3] : memref<4x896x896xbf16, #tpu.memory_space<vmem>>, vector<1x896x896xbf16>
    %2 = vector.shape_cast %1 : vector<1x896x896xbf16> to vector<896x896xbf16>
    %cst = arith.constant dense<0.000000e+00> : vector<16x896xf32>
    %3 = tpu.matmul %0, %2, %cst {dimension_numbers = #tpu.dot_dimension_numbers<[1], [0], [0], [1], [0, 0, 1, 1], [], []>} : vector<16x896xbf16>, vector<896x896xbf16>, vector<16x896xf32> -> vector<16x896xf32>
    %c0_4 = arith.constant 0 : index
    %c0_5 = arith.constant 0 : index
    %4 = vector.load %arg3[%c0_4, %c0_5] : memref<1x896xf32, #tpu.memory_space<vmem>>, vector<1x896xf32>
    %5 = vector.broadcast %4 : vector<1x896xf32> to vector<16x896xf32>
    %6 = arith.addf %3, %5 : vector<16x896xf32>
    %cst_6 = arith.constant 0.000000e+00 : f32
    %7 = vector.broadcast %cst_6 : f32 to vector<16x896xf32>
    %8 = arith.maximumf %6, %7 : vector<16x896xf32>
    %c1 = arith.constant 1 : index
    %c0_7 = arith.constant 0 : index
    %c0_8 = arith.constant 0 : index
    %9 = vector.load %arg2[%c1, %c0_7, %c0_8] : memref<4x896x896xbf16, #tpu.memory_space<vmem>>, vector<1x896x896xbf16>
    %10 = vector.shape_cast %9 : vector<1x896x896xbf16> to vector<896x896xbf16>
    %cst_9 = arith.constant dense<0.000000e+00> : vector<16x896xf32>
    %11 = tpu.matmul %0, %10, %cst_9 {dimension_numbers = #tpu.dot_dimension_numbers<[1], [0], [0], [1], [0, 0, 1, 1], [], []>} : vector<16x896xbf16>, vector<896x896xbf16>, vector<16x896xf32> -> vector<16x896xf32>
    %c0_10 = arith.constant 0 : index
    %c0_11 = arith.constant 0 : index
    %12 = vector.load %arg3[%c0_10, %c0_11] : memref<1x896xf32, #tpu.memory_space<vmem>>, vector<1x896xf32>
    %13 = vector.broadcast %12 : vector<1x896xf32> to vector<16x896xf32>
    %14 = arith.addf %11, %13 : vector<16x896xf32>
    %cst_12 = arith.constant 0.000000e+00 : f32
    %15 = vector.broadcast %cst_12 : f32 to vector<16x896xf32>
    %16 = arith.maximumf %14, %15 : vector<16x896xf32>
    %17 = arith.maximumf %8, %16 : vector<16x896xf32>
    %c2 = arith.constant 2 : index
    %c0_13 = arith.constant 0 : index
    %c0_14 = arith.constant 0 : index
    %18 = vector.load %arg2[%c2, %c0_13, %c0_14] : memref<4x896x896xbf16, #tpu.memory_space<vmem>>, vector<1x896x896xbf16>
    %19 = vector.shape_cast %18 : vector<1x896x896xbf16> to vector<896x896xbf16>
    %cst_15 = arith.constant dense<0.000000e+00> : vector<16x896xf32>
    %20 = tpu.matmul %0, %19, %cst_15 {dimension_numbers = #tpu.dot_dimension_numbers<[1], [0], [0], [1], [0, 0, 1, 1], [], []>} : vector<16x896xbf16>, vector<896x896xbf16>, vector<16x896xf32> -> vector<16x896xf32>
    %c0_16 = arith.constant 0 : index
    %c0_17 = arith.constant 0 : index
    %21 = vector.load %arg3[%c0_16, %c0_17] : memref<1x896xf32, #tpu.memory_space<vmem>>, vector<1x896xf32>
    %22 = vector.broadcast %21 : vector<1x896xf32> to vector<16x896xf32>
    %23 = arith.addf %20, %22 : vector<16x896xf32>
    %cst_18 = arith.constant 0.000000e+00 : f32
    %24 = vector.broadcast %cst_18 : f32 to vector<16x896xf32>
    %25 = arith.maximumf %23, %24 : vector<16x896xf32>
    %26 = arith.maximumf %17, %25 : vector<16x896xf32>
    %c3 = arith.constant 3 : index
    %c0_19 = arith.constant 0 : index
    %c0_20 = arith.constant 0 : index
    %27 = vector.load %arg2[%c3, %c0_19, %c0_20] : memref<4x896x896xbf16, #tpu.memory_space<vmem>>, vector<1x896x896xbf16>
    %28 = vector.shape_cast %27 : vector<1x896x896xbf16> to vector<896x896xbf16>
    %cst_21 = arith.constant dense<0.000000e+00> : vector<16x896xf32>
    %29 = tpu.matmul %0, %28, %cst_21 {dimension_numbers = #tpu.dot_dimension_numbers<[1], [0], [0], [1], [0, 0, 1, 1], [], []>} : vector<16x896xbf16>, vector<896x896xbf16>, vector<16x896xf32> -> vector<16x896xf32>
    %c0_22 = arith.constant 0 : index
    %c0_23 = arith.constant 0 : index
    %30 = vector.load %arg3[%c0_22, %c0_23] : memref<1x896xf32, #tpu.memory_space<vmem>>, vector<1x896xf32>
    %31 = vector.broadcast %30 : vector<1x896xf32> to vector<16x896xf32>
    %32 = arith.addf %29, %31 : vector<16x896xf32>
    %cst_24 = arith.constant 0.000000e+00 : f32
    %33 = vector.broadcast %cst_24 : f32 to vector<16x896xf32>
    %34 = arith.maximumf %32, %33 : vector<16x896xf32>
    %35 = arith.maximumf %26, %34 : vector<16x896xf32>
    %36 = arith.truncf %35 : vector<16x896xf32> to vector<16x896xbf16>
    %c0_25 = arith.constant 0 : index
    %c0_26 = arith.constant 0 : index
    %c0_27 = arith.constant 0 : index
    %37 = vector.load %arg4[%c0_25, %c0_26, %c0_27] : memref<4x896x256xbf16, #tpu.memory_space<vmem>>, vector<1x896x256xbf16>
    %38 = vector.shape_cast %37 : vector<1x896x256xbf16> to vector<896x256xbf16>
    %cst_28 = arith.constant dense<0.000000e+00> : vector<16x256xf32>
    %39 = tpu.matmul %36, %38, %cst_28 {dimension_numbers = #tpu.dot_dimension_numbers<[1], [0], [0], [1], [0, 0, 1, 1], [], []>} : vector<16x896xbf16>, vector<896x256xbf16>, vector<16x256xf32> -> vector<16x256xf32>
    %c0_29 = arith.constant 0 : index
    %c0_30 = arith.constant 0 : index
    %40 = vector.load %arg5[%c0_29, %c0_30] : memref<1x256xf32, #tpu.memory_space<vmem>>, vector<1x256xf32>
    %41 = vector.broadcast %40 : vector<1x256xf32> to vector<16x256xf32>
    %42 = arith.addf %39, %41 : vector<16x256xf32>
    %cst_31 = arith.constant 0.000000e+00 : f32
    %43 = vector.broadcast %cst_31 : f32 to vector<16x256xf32>
    %44 = arith.maximumf %42, %43 : vector<16x256xf32>
    %c1_32 = arith.constant 1 : index
    %c0_33 = arith.constant 0 : index
    %c0_34 = arith.constant 0 : index
    %45 = vector.load %arg4[%c1_32, %c0_33, %c0_34] : memref<4x896x256xbf16, #tpu.memory_space<vmem>>, vector<1x896x256xbf16>
    %46 = vector.shape_cast %45 : vector<1x896x256xbf16> to vector<896x256xbf16>
    %cst_35 = arith.constant dense<0.000000e+00> : vector<16x256xf32>
    %47 = tpu.matmul %36, %46, %cst_35 {dimension_numbers = #tpu.dot_dimension_numbers<[1], [0], [0], [1], [0, 0, 1, 1], [], []>} : vector<16x896xbf16>, vector<896x256xbf16>, vector<16x256xf32> -> vector<16x256xf32>
    %c0_36 = arith.constant 0 : index
    %c0_37 = arith.constant 0 : index
    %48 = vector.load %arg5[%c0_36, %c0_37] : memref<1x256xf32, #tpu.memory_space<vmem>>, vector<1x256xf32>
    %49 = vector.broadcast %48 : vector<1x256xf32> to vector<16x256xf32>
    %50 = arith.addf %47, %49 : vector<16x256xf32>
    %cst_38 = arith.constant 0.000000e+00 : f32
    %51 = vector.broadcast %cst_38 : f32 to vector<16x256xf32>
    %52 = arith.maximumf %50, %51 : vector<16x256xf32>
    %53 = arith.maximumf %44, %52 : vector<16x256xf32>
    %c2_39 = arith.constant 2 : index
    %c0_40 = arith.constant 0 : index
    %c0_41 = arith.constant 0 : index
    %54 = vector.load %arg4[%c2_39, %c0_40, %c0_41] : memref<4x896x256xbf16, #tpu.memory_space<vmem>>, vector<1x896x256xbf16>
    %55 = vector.shape_cast %54 : vector<1x896x256xbf16> to vector<896x256xbf16>
    %cst_42 = arith.constant dense<0.000000e+00> : vector<16x256xf32>
    %56 = tpu.matmul %36, %55, %cst_42 {dimension_numbers = #tpu.dot_dimension_numbers<[1], [0], [0], [1], [0, 0, 1, 1], [], []>} : vector<16x896xbf16>, vector<896x256xbf16>, vector<16x256xf32> -> vector<16x256xf32>
    %c0_43 = arith.constant 0 : index
    %c0_44 = arith.constant 0 : index
    %57 = vector.load %arg5[%c0_43, %c0_44] : memref<1x256xf32, #tpu.memory_space<vmem>>, vector<1x256xf32>
    %58 = vector.broadcast %57 : vector<1x256xf32> to vector<16x256xf32>
    %59 = arith.addf %56, %58 : vector<16x256xf32>
    %cst_45 = arith.constant 0.000000e+00 : f32
    %60 = vector.broadcast %cst_45 : f32 to vector<16x256xf32>
    %61 = arith.maximumf %59, %60 : vector<16x256xf32>
    %62 = arith.maximumf %53, %61 : vector<16x256xf32>
    %c3_46 = arith.constant 3 : index
    %c0_47 = arith.constant 0 : index
    %c0_48 = arith.constant 0 : index
    %63 = vector.load %arg4[%c3_46, %c0_47, %c0_48] : memref<4x896x256xbf16, #tpu.memory_space<vmem>>, vector<1x896x256xbf16>
    %64 = vector.shape_cast %63 : vector<1x896x256xbf16> to vector<896x256xbf16>
    %cst_49 = arith.constant dense<0.000000e+00> : vector<16x256xf32>
    %65 = tpu.matmul %36, %64, %cst_49 {dimension_numbers = #tpu.dot_dimension_numbers<[1], [0], [0], [1], [0, 0, 1, 1], [], []>} : vector<16x896xbf16>, vector<896x256xbf16>, vector<16x256xf32> -> vector<16x256xf32>
    %c0_50 = arith.constant 0 : index
    %c0_51 = arith.constant 0 : index
    %66 = vector.load %arg5[%c0_50, %c0_51] : memref<1x256xf32, #tpu.memory_space<vmem>>, vector<1x256xf32>
    %67 = vector.broadcast %66 : vector<1x256xf32> to vector<16x256xf32>
    %68 = arith.addf %65, %67 : vector<16x256xf32>
    %cst_52 = arith.constant 0.000000e+00 : f32
    %69 = vector.broadcast %cst_52 : f32 to vector<16x256xf32>
    %70 = arith.maximumf %68, %69 : vector<16x256xf32>
    %71 = arith.maximumf %62, %70 : vector<16x256xf32>
    %72 = arith.truncf %71 : vector<16x256xf32> to vector<16x256xbf16>
    %c0_53 = arith.constant 0 : index
    %c0_54 = arith.constant 0 : index
    %73 = vector.load %arg6[%c0_53, %c0_54] : memref<256x128xbf16, #tpu.memory_space<vmem>>, vector<256x128xbf16>
    %cst_55 = arith.constant dense<0.000000e+00> : vector<16x128xf32>
    %74 = tpu.matmul %72, %73, %cst_55 {dimension_numbers = #tpu.dot_dimension_numbers<[1], [0], [0], [1], [0, 0, 1, 1], [], []>} : vector<16x256xbf16>, vector<256x128xbf16>, vector<16x128xf32> -> vector<16x128xf32>
    %c0_56 = arith.constant 0 : index
    %c0_57 = arith.constant 0 : index
    %75 = vector.load %arg7[%c0_56, %c0_57] : memref<1x128xf32, #tpu.memory_space<vmem>>, vector<1x128xf32>
    %76 = vector.broadcast %75 : vector<1x128xf32> to vector<16x128xf32>
    %77 = arith.addf %74, %76 : vector<16x128xf32>
    %cst_58 = arith.constant 0.000000e+00 : f32
    %78 = vector.broadcast %cst_58 : f32 to vector<16x128xf32>
    %79 = arith.maximumf %77, %78 : vector<16x128xf32>
    %80 = arith.truncf %79 : vector<16x128xf32> to vector<16x128xbf16>
    %c0_59 = arith.constant 0 : index
    %c0_60 = arith.constant 0 : index
    %81 = vector.load %arg8[%c0_59, %c0_60] : memref<128x128xbf16, #tpu.memory_space<vmem>>, vector<128x128xbf16>
    %cst_61 = arith.constant dense<0.000000e+00> : vector<16x128xf32>
    %82 = tpu.matmul %80, %81, %cst_61 {dimension_numbers = #tpu.dot_dimension_numbers<[1], [0], [0], [1], [0, 0, 1, 1], [], []>} : vector<16x128xbf16>, vector<128x128xbf16>, vector<16x128xf32> -> vector<16x128xf32>
    %c0_62 = arith.constant 0 : index
    %c0_63 = arith.constant 0 : index
    %83 = vector.load %arg9[%c0_62, %c0_63] : memref<1x128xf32, #tpu.memory_space<vmem>>, vector<1x128xf32>
    %84 = vector.broadcast %83 : vector<1x128xf32> to vector<16x128xf32>
    %85 = arith.addf %82, %84 : vector<16x128xf32>
    %cst_64 = arith.constant 0.000000e+00 : f32
    %86 = vector.broadcast %cst_64 : f32 to vector<16x128xf32>
    %87 = arith.maximumf %85, %86 : vector<16x128xf32>
    %88 = arith.truncf %87 : vector<16x128xf32> to vector<16x128xbf16>
    %c0_65 = arith.constant 0 : index
    %c0_66 = arith.constant 0 : index
    %89 = vector.load %arg10[%c0_65, %c0_66] : memref<128x128xbf16, #tpu.memory_space<vmem>>, vector<128x128xbf16>
    %cst_67 = arith.constant dense<0.000000e+00> : vector<16x128xf32>
    %90 = tpu.matmul %88, %89, %cst_67 {dimension_numbers = #tpu.dot_dimension_numbers<[1], [0], [0], [1], [0, 0, 1, 1], [], []>} : vector<16x128xbf16>, vector<128x128xbf16>, vector<16x128xf32> -> vector<16x128xf32>
    %c0_68 = arith.constant 0 : index
    %c0_69 = arith.constant 0 : index
    %91 = vector.load %arg11[%c0_68, %c0_69] : memref<1x128xf32, #tpu.memory_space<vmem>>, vector<1x128xf32>
    %92 = vector.broadcast %91 : vector<1x128xf32> to vector<16x128xf32>
    %93 = arith.addf %90, %92 : vector<16x128xf32>
    %cst_70 = arith.constant dense<0xFF800000> : vector<16xf32>
    %94 = vector.multi_reduction <maximumf>, %93, %cst_70 [1] : vector<16x128xf32> to vector<16xf32>
    %95 = vector.shape_cast %94 : vector<16xf32> to vector<16x1xf32>
    %96 = vector.broadcast %95 : vector<16x1xf32> to vector<16x128xf32>
    %97 = arith.subf %93, %96 : vector<16x128xf32>
    %98 = math.exp %97 : vector<16x128xf32>
    %cst_71 = arith.constant dense<0.000000e+00> : vector<16xf32>
    %99 = vector.multi_reduction <add>, %98, %cst_71 [1] : vector<16x128xf32> to vector<16xf32>
    %100 = vector.shape_cast %99 : vector<16xf32> to vector<16x1xf32>
    %101 = math.log %100 : vector<16x1xf32>
    %102 = vector.broadcast %101 : vector<16x1xf32> to vector<16x128xf32>
    %103 = arith.subf %97, %102 : vector<16x128xf32>
    %c0_72 = arith.constant 0 : index
    %c0_73 = arith.constant 0 : index
    %104 = vector.load %arg12[%c0_72, %c0_73] : memref<16x128xf32, #tpu.memory_space<vmem>>, vector<16x128xf32>
    tpu.vector_store %arg12[%c0_72, %c0_73], %103 {strides = array<i32>} : memref<16x128xf32, #tpu.memory_space<vmem>>, vector<16x128xf32>,
    return
  }
  func.func @transform_0(%arg0: i32) -> (i32, i32) {
    %c0_i32 = arith.constant 0 : i32
    %c0_i32_0 = arith.constant 0 : i32
    return %arg0, %c0_i32 : i32, i32
  }
  func.func @transform_1(%arg0: i32) -> (i32, i32, i32) {
    %c0_i32 = arith.constant 0 : i32
    %c0_i32_0 = arith.constant 0 : i32
    %c0_i32_1 = arith.constant 0 : i32
    %c0_i32_2 = arith.constant 0 : i32
    return %c0_i32, %c0_i32_0, %c0_i32_1 : i32, i32, i32
  }
  func.func @transform_2(%arg0: i32) -> (i32, i32) {
    %c0_i32 = arith.constant 0 : i32
    %c0_i32_0 = arith.constant 0 : i32
    %c0_i32_1 = arith.constant 0 : i32
    return %c0_i32, %c0_i32_0 : i32, i32
  }
  func.func @transform_3(%arg0: i32) -> (i32, i32, i32) {
    %c0_i32 = arith.constant 0 : i32
    %c0_i32_0 = arith.constant 0 : i32
    %c0_i32_1 = arith.constant 0 : i32
    %c0_i32_2 = arith.constant 0 : i32
    return %c0_i32, %c0_i32_0, %c0_i32_1 : i32, i32, i32
  }
  func.func @transform_4(%arg0: i32) -> (i32, i32) {
    %c0_i32 = arith.constant 0 : i32
    %c0_i32_0 = arith.constant 0 : i32
    %c0_i32_1 = arith.constant 0 : i32
    return %c0_i32, %c0_i32_0 : i32, i32
  }
  func.func @transform_5(%arg0: i32) -> (i32, i32) {
    %c0_i32 = arith.constant 0 : i32
    %c0_i32_0 = arith.constant 0 : i32
    %c0_i32_1 = arith.constant 0 : i32
    return %c0_i32, %c0_i32_0 : i32, i32
  }
  func.func @transform_6(%arg0: i32) -> (i32, i32) {
    %c0_i32 = arith.constant 0 : i32
    %c0_i32_0 = arith.constant 0 : i32
    %c0_i32_1 = arith.constant 0 : i32
    return %c0_i32, %c0_i32_0 : i32, i32
  }
  func.func @transform_7(%arg0: i32) -> (i32, i32) {
    %c0_i32 = arith.constant 0 : i32
    %c0_i32_0 = arith.constant 0 : i32
    %c0_i32_1 = arith.constant 0 : i32
    return %c0_i32, %c0_i32_0 : i32, i32
  }
  func.func @transform_8(%arg0: i32) -> (i32, i32) {
    %c0_i32 = arith.constant 0 : i32
    %c0_i32_0 = arith.constant 0 : i32
    %c0_i32_1 = arith.constant 0 : i32
    return %c0_i32, %c0_i32_0 : i32, i32
  }
  func.func @transform_9(%arg0: i32) -> (i32, i32) {
    %c0_i32 = arith.constant 0 : i32
    %c0_i32_0 = arith.constant 0 : i32
    %c0_i32_1 = arith.constant 0 : i32
    return %c0_i32, %c0_i32_0 : i32, i32
  }
  func.func @transform_10(%arg0: i32) -> (i32, i32) {
    %c0_i32 = arith.constant 0 : i32
    %c0_i32_0 = arith.constant 0 : i32
    %c0_i32_1 = arith.constant 0 : i32
    return %c0_i32, %c0_i32_0 : i32, i32
  }
  func.func @transform_11(%arg0: i32) -> (i32, i32) {
    %c0_i32 = arith.constant 0 : i32
    %c0_i32_0 = arith.constant 0 : i32
    return %arg0, %c0_i32 : i32, i32
  }
}

</mosaic_0001>

<bundles_post_ra>
// kernel: forward.1
= control target key start
LH: loop header
LB: loop body
LE: loop exit
PB: predicated region body
PF: predicated region fallthrough
CT: control target
= control target key end

     0   :  { %16 = vsyncpa [#allocation3], 0  ;;  %s23775_s0 = inlined_call_operand.vmem [shape: bf16[16,896], index: 0, kind: input, shape index: {}]   ;;  %s23776_s1 = inlined_call_operand.hbm [shape: bf16[4,896,896], index: 1, kind: input, shape index: {}]   ;;  %s23777_s2 = inlined_call_operand.hbm [shape: f32[1,896], index: 2, kind: input, shape index: {}]   ;;  %s23778_s3 = inlined_call_operand.hbm [shape: bf16[4,896,256], index: 3, kind: input, shape index: {}]   ;;  %s23779_s4 = inlined_call_operand.hbm [shape: f32[1,256], index: 4, kind: input, shape index: {}]   ;;  %s23780_s5 = inlined_call_operand.hbm [shape: bf16[256,128], index: 5, kind: input, shape index: {}]   ;;  %s23781_s6 = inlined_call_operand.hbm [shape: f32[1,128], index: 6, kind: input, shape index: {}]   ;;  %s23782_s7 = inlined_call_operand.hbm [shape: bf16[128,128], index: 7, kind: input, shape index: {}]   ;;  %s23783_s8 = inlined_call_operand.hbm [shape: f32[1,128], index: 8, kind: input, shape index: {}]   ;;  %s23784_s9 = inlined_call_operand.hbm [shape: bf16[128,128], index: 9, kind: input, shape index: {}]   ;;  %s23785_s10 = inlined_call_operand.hbm [shape: f32[1,128], index: 10, kind: input, shape index: {}]   ;;  %s23786_s11 = inlined_call_operand.vmem [shape: f32[16,128], index: 11, kind: output, shape index: {}]  }
   0x1   :  { %17 = vsyncpa [#allocation5], 0 }
   0x2   :  { %18 = vsyncpa [#allocation8], 0 }
   0x3   :  { %19 = vsyncpa [#allocation11], 0 }
   0x4   :  { %20 = vsyncpa [#allocation14], 0 }
   0x5   :  { %21 = vsyncpa [#allocation17], 0  ;;  %s22825_s17 = smov [#allocation4]   ;;  %s22826_s19 = smov [#allocation7]  }
   0x6   :  { %s42_s18 = sshll.u32 %s22825_s17, 4  ;;  %s64_s20 = sshll.u32 %s22826_s19, 4  ;;  %s43_s18 = int_to_ptr.vmem [resolvable:$true] %s42_s18  ;;  %s65_s20 = int_to_ptr.vmem [resolvable:$true] %s64_s20 }
   0x7   :  { %s22593_s23 = scalar_lea.hbm %s23777_s2, 112 }
   0x8   :  { %p22594_p0 = scmp.ne.s32.totalorder %s23777_s2, %s22593_s23  ;;  %p22597_p1 = scmp.lt.u32.totalorder %s22593_s23, %s23777_s2 }
   0xa   :  { %p22599_p2 = pnand %p22597_p1, %p22594_p0 }
   0xc   :  { %22602 = shalt.err (!%p22599_p2)
}
   0xd   :  { %s22603_s28 = scalar_lea.vmem %s43_s18, 112  ;;  %s22607_s29 = scalar_lea.vmem %s43_s18, 128 }
   0xe   :  { %p22604_p3 = scmp.ne.s32.totalorder %s43_s18, %s22603_s28  ;;  %p22608_p4 = scmp.lt.s32.totalorder %s43_s18, %s43_s18 }
   0xf   :  { %p22609_p5 = scmp.lt.s32.totalorder %s22607_s29, %s22603_s28 }
  0x11   :  { %p22610_p6 = por %p22609_p5, %p22608_p4 }
  0x13   :  { %p22611_p7 = pnand %p22610_p6, %p22604_p3 }
  0x15   :  { %22614 = shalt.err (!%p22611_p7)
}
  0x16   :  { %45 = dma.hbm_to_vmem [thread:$0]  %s23777_s2, 112, %s43_s18, [#allocation5]  }
  0x17   :  { %s22615_s15 = scalar_lea.hbm %s23779_s4, 32 }
  0x18   :  { %p22616_p8 = scmp.ne.s32.totalorder %s23779_s4, %s22615_s15  ;;  %p22619_p9 = scmp.lt.u32.totalorder %s22615_s15, %s23779_s4 }
  0x1a   :  { %p22621_p10 = pnand %p22619_p9, %p22616_p8 }
  0x1c   :  { %22624 = shalt.err (!%p22621_p10)
}
  0x1d   :  { %s22625_s22 = scalar_lea.vmem %s65_s20, 32  ;;  %p22630_p12 = scmp.lt.s32.totalorder %s65_s20, %s65_s20 }
  0x1e   :  { %p22626_p11 = scmp.ne.s32.totalorder %s65_s20, %s22625_s22  ;;  %p22631_p13 = scmp.lt.s32.totalorder %s22625_s22, %s22625_s22 }
  0x20   :  { %p22632_p0 = por %p22631_p13, %p22630_p12 }
  0x22   :  { %p22633_p1 = pnand %p22632_p0, %p22626_p11 }
  0x24   :  { %22636 = shalt.err (!%p22633_p1)
}
  0x25   :  { %67 = dma.hbm_to_vmem [thread:$0]  %s23779_s4, 32, %s65_s20, [#allocation8]  }
  0x26   :  { %s22827_s23 = smov [#allocation10]   ;;  %s22828_s25 = smov [#allocation13]  }
  0x27   :  { %s86_s24 = sshll.u32 %s22827_s23, 4  ;;  %s108_s26 = sshll.u32 %s22828_s25, 4  ;;  %s87_s24 = int_to_ptr.vmem [resolvable:$true] %s86_s24  ;;  %s109_s26 = int_to_ptr.vmem [resolvable:$true] %s108_s26 }
  0x28   :  { %s22637_s29 = scalar_lea.hbm %s23781_s6, 16 }
  0x29   :  { %p22638_p2 = scmp.ne.s32.totalorder %s23781_s6, %s22637_s29  ;;  %p22641_p3 = scmp.lt.u32.totalorder %s22637_s29, %s23781_s6 }
  0x2b   :  { %p22643_p4 = pnand %p22641_p3, %p22638_p2 }
  0x2d   :  { %22646 = shalt.err (!%p22643_p4)
}
  0x2e   :  { %s22647_s4 = scalar_lea.vmem %s87_s24, 16  ;;  %s22651_s20 = scalar_lea.vmem %s87_s24, 32 }
  0x2f   :  { %p22648_p5 = scmp.ne.s32.totalorder %s87_s24, %s22647_s4  ;;  %p22652_p6 = scmp.lt.s32.totalorder %s87_s24, %s87_s24 }
  0x30   :  { %p22653_p7 = scmp.lt.s32.totalorder %s22651_s20, %s22647_s4 }
  0x32   :  { %p22654_p8 = por %p22653_p7, %p22652_p6 }
  0x34   :  { %p22655_p9 = pnand %p22654_p8, %p22648_p5 }
  0x36   :  { %22658 = shalt.err (!%p22655_p9)
}
  0x37   :  { %89 = dma.hbm_to_vmem [thread:$0]  %s23781_s6, 16, %s87_s24, [#allocation11]  }
  0x38   :  { %s22659_s21 = scalar_lea.hbm %s23783_s8, 16 }
  0x39   :  { %p22660_p10 = scmp.ne.s32.totalorder %s23783_s8, %s22659_s21  ;;  %p22663_p11 = scmp.lt.u32.totalorder %s22659_s21, %s23783_s8 }
  0x3b   :  { %p22665_p12 = pnand %p22663_p11, %p22660_p10 }
  0x3d   :  { %22668 = shalt.err (!%p22665_p12)
}
  0x3e   :  { %s22669_s25 = scalar_lea.vmem %s109_s26, 16  ;;  %s22673_s27 = scalar_lea.vmem %s109_s26, 32 }
  0x3f   :  { %p22670_p13 = scmp.ne.s32.totalorder %s109_s26, %s22669_s25  ;;  %p22674_p0 = scmp.lt.s32.totalorder %s109_s26, %s109_s26 }
  0x40   :  { %p22675_p1 = scmp.lt.s32.totalorder %s22673_s27, %s22669_s25 }
  0x42   :  { %p22676_p2 = por %p22675_p1, %p22674_p0 }
  0x44   :  { %p22677_p3 = pnand %p22676_p2, %p22670_p13 }
  0x46   :  { %22680 = shalt.err (!%p22677_p3)
}
  0x47   :  { %111 = dma.hbm_to_vmem [thread:$0]  %s23783_s8, 16, %s109_s26, [#allocation14]  }
  0x48   :  { %s22829_s28 = smov [#allocation2]   ;;  %s22681_s13 = scalar_lea.hbm %s23776_s1, 200704 }
  0x49   :  { %s29_s29 = sshll.u32 %s22829_s28, 4  ;;  %p22682_p4 = scmp.ne.s32.totalorder %s23776_s1, %s22681_s13  ;;  %s30_s29 = int_to_ptr.vmem [resolvable:$true] %s29_s29 }
  0x4a   :  { %p22685_p5 = scmp.lt.u32.totalorder %s22681_s13, %s23776_s1 }
  0x4c   :  { %p22687_p6 = pnand %p22685_p5, %p22682_p4 }
  0x4e   :  { %22690 = shalt.err (!%p22687_p6)
}
  0x4f   :  { %s22691_s16 = scalar_lea.vmem %s30_s29, 200704  ;;  %p22696_p8 = scmp.lt.s32.totalorder %s30_s29, %s30_s29 }
  0x50   :  { %p22692_p7 = scmp.ne.s32.totalorder %s30_s29, %s22691_s16  ;;  %p22697_p9 = scmp.lt.s32.totalorder %s22691_s16, %s22691_s16 }
  0x52   :  { %p22698_p10 = por %p22697_p9, %p22696_p8 }
  0x54   :  { %p22699_p11 = pnand %p22698_p10, %p22692_p7 }
  0x56   :  { %22702 = shalt.err (!%p22699_p11)
}
  0x57   :  { %s22830_s8 = smov 448   ;;  %s22831_s26 = smov 28  }
  0x58   :  { %35 = dma.hbm_to_vmem [thread:$0]  %s23776_s1, 200704, %s30_s29, [#allocation3], %s22830_s8, %s22830_s8, %s22831_s26  }
  0x59   :  { %s22832_s21 = smov [#allocation6]   ;;  %s22703_s23 = scalar_lea.hbm %s23778_s3, 57344 }
  0x5a   :  { %s51_s22 = sshll.u32 %s22832_s21, 4  ;;  %p22704_p12 = scmp.ne.s32.totalorder %s23778_s3, %s22703_s23  ;;  %s52_s22 = int_to_ptr.vmem [resolvable:$true] %s51_s22 }
  0x5b   :  { %p22707_p13 = scmp.lt.u32.totalorder %s22703_s23, %s23778_s3 }
  0x5d   :  { %p22709_p0 = pnand %p22707_p13, %p22704_p12 }
  0x5f   :  { %22712 = shalt.err (!%p22709_p0)
}
  0x60   :  { %s22713_s28 = scalar_lea.vmem %s52_s22, 57344  ;;  %p22718_p2 = scmp.lt.s32.totalorder %s52_s22, %s52_s22 }
  0x61   :  { %p22714_p1 = scmp.ne.s32.totalorder %s52_s22, %s22713_s28  ;;  %p22719_p3 = scmp.lt.s32.totalorder %s22713_s28, %s22713_s28 }
  0x63   :  { %p22720_p4 = por %p22719_p3, %p22718_p2 }
  0x65   :  { %p22721_p5 = pnand %p22720_p4, %p22714_p1 }
  0x67   :  { %22724 = shalt.err (!%p22721_p5)
}
  0x68   :  { %s22833_s1 = smov 128   ;;  %s22834_s29 = smov 8  }
  0x69   :  { %57 = dma.hbm_to_vmem [thread:$0]  %s23778_s3, 57344, %s52_s22, [#allocation5], %s22833_s1, %s22833_s1, %s22834_s29  }
  0x6a   :  { %s22835_s13 = smov [#allocation9]   ;;  %s22725_s15 = scalar_lea.hbm %s23780_s5, 2048 }
  0x6b   :  { %s73_s14 = sshll.u32 %s22835_s13, 4  ;;  %p22726_p6 = scmp.ne.s32.totalorder %s23780_s5, %s22725_s15  ;;  %s74_s14 = int_to_ptr.vmem [resolvable:$true] %s73_s14 }
  0x6c   :  { %p22729_p7 = scmp.lt.u32.totalorder %s22725_s15, %s23780_s5 }
  0x6e   :  { %p22731_p8 = pnand %p22729_p7, %p22726_p6 }
  0x70   :  { %22734 = shalt.err (!%p22731_p8)
}
  0x71   :  { %s22735_s19 = scalar_lea.vmem %s74_s14, 2048  ;;  %p22740_p10 = scmp.lt.s32.totalorder %s74_s14, %s74_s14 }
  0x72   :  { %p22736_p9 = scmp.ne.s32.totalorder %s74_s14, %s22735_s19  ;;  %p22741_p11 = scmp.lt.s32.totalorder %s22735_s19, %s22735_s19 }
  0x74   :  { %p22742_p12 = por %p22741_p11, %p22740_p10 }
  0x76   :  { %p22743_p13 = pnand %p22742_p12, %p22736_p9 }
  0x78   :  { %22746 = shalt.err (!%p22743_p13)
}
  0x79   :  { %s22836_s3 = smov 64   ;;  %s22837_s21 = smov 4  }
  0x7a   :  { %79 = dma.hbm_to_vmem [thread:$0]  %s23780_s5, 2048, %s74_s14, [#allocation8], %s22836_s3, %s22836_s3, %s22837_s21  }
  0x7b   :  { %s22838_s18 = smov [#allocation12]   ;;  %s22839_s25 = smov [#allocation15]  }
  0x7c   :  { %s95_s23 = sshll.u32 %s22838_s18, 4  ;;  %s117_s27 = sshll.u32 %s22839_s25, 4  ;;  %s96_s23 = int_to_ptr.vmem [resolvable:$true] %s95_s23  ;;  %s118_s27 = int_to_ptr.vmem [resolvable:$true] %s117_s27 }
  0x7d   :  { %s22747_s28 = scalar_lea.hbm %s23782_s7, 1024 }
  0x7e   :  { %p22748_p0 = scmp.ne.s32.totalorder %s23782_s7, %s22747_s28  ;;  %p22751_p1 = scmp.lt.u32.totalorder %s22747_s28, %s23782_s7 }
  0x80   :  { %p22753_p2 = pnand %p22751_p1, %p22748_p0 }
  0x82   :  { %22756 = shalt.err (!%p22753_p2)
}
  0x83   :  { %s22757_s5 = scalar_lea.vmem %s96_s23, 1024  ;;  %p22762_p4 = scmp.lt.s32.totalorder %s96_s23, %s96_s23 }
  0x84   :  { %p22758_p3 = scmp.ne.s32.totalorder %s96_s23, %s22757_s5  ;;  %p22763_p5 = scmp.lt.s32.totalorder %s22757_s5, %s22757_s5 }
  0x86   :  { %p22764_p6 = por %p22763_p5, %p22762_p4 }
  0x88   :  { %p22765_p7 = pnand %p22764_p6, %p22758_p3 }
  0x8a   :  { %22768 = shalt.err (!%p22765_p7)
}
  0x8b   :  { %101 = dma.hbm_to_vmem [thread:$0]  %s23782_s7, 1024, %s96_s23, [#allocation11], %s22836_s3, %s22836_s3, %s22837_s21  }
  0x8c   :  { %s22769_s15 = scalar_lea.hbm %s23784_s9, 1024 }
  0x8d   :  { %p22770_p8 = scmp.ne.s32.totalorder %s23784_s9, %s22769_s15  ;;  %p22773_p9 = scmp.lt.u32.totalorder %s22769_s15, %s23784_s9 }
  0x8f   :  { %p22775_p10 = pnand %p22773_p9, %p22770_p8 }
  0x91   :  { %22778 = shalt.err (!%p22775_p10)
}
  0x92   :  { %s22779_s19 = scalar_lea.vmem %s118_s27, 1024  ;;  %p22784_p12 = scmp.lt.s32.totalorder %s118_s27, %s118_s27 }
  0x93   :  { %p22780_p11 = scmp.ne.s32.totalorder %s118_s27, %s22779_s19  ;;  %p22785_p13 = scmp.lt.s32.totalorder %s22779_s19, %s22779_s19 }
  0x95   :  { %p22786_p0 = por %p22785_p13, %p22784_p12 }
  0x97   :  { %p22787_p1 = pnand %p22786_p0, %p22780_p11 }
  0x99   :  { %22790 = shalt.err (!%p22787_p1)
}
  0x9a   :  { %123 = dma.hbm_to_vmem [thread:$0]  %s23784_s9, 1024, %s118_s27, [#allocation14], %s22836_s3, %s22836_s3, %s22837_s21  }
  0x9b   :  { %s22840_s2 = smov [#allocation16]   ;;  %s22791_s6 = scalar_lea.hbm %s23785_s10, 16 }
  0x9c   :  { %s130_s18 = sshll.u32 %s22840_s2, 4  ;;  %p22792_p2 = scmp.ne.s32.totalorder %s23785_s10, %s22791_s6  ;;  %s131_s18 = int_to_ptr.vmem [resolvable:$true] %s130_s18 }
  0x9d   :  { %p22795_p3 = scmp.lt.u32.totalorder %s22791_s6, %s23785_s10 }
  0x9f   :  { %p22797_p4 = pnand %p22795_p3, %p22792_p2 }
  0xa1   :  { %22800 = shalt.err (!%p22797_p4)
}
  0xa2   :  { %s22801_s30 = scalar_lea.vmem %s131_s18, 16  ;;  %s22805_s9 = scalar_lea.vmem %s131_s18, 32 }
  0xa3   :  { %p22802_p5 = scmp.ne.s32.totalorder %s131_s18, %s22801_s30  ;;  %p22806_p6 = scmp.lt.s32.totalorder %s131_s18, %s131_s18 }
  0xa4   :  { %p22807_p7 = scmp.lt.s32.totalorder %s22805_s9, %s22801_s30 }
  0xa6   :  { %p22808_p8 = por %p22807_p7, %p22806_p6 }
  0xa8   :  { %p22809_p9 = pnand %p22808_p8, %p22802_p5 }
  0xaa   :  { %22812 = shalt.err (!%p22809_p9)
}
  0xab   :  { %133 = dma.hbm_to_vmem [thread:$0]  %s23785_s10, 16, %s131_s18, [#allocation17]  }
  0xac   :  { %22813 = dma.done.wait [#allocation3], 200704  }
  0xad   :  { %22814 = vsyncadd [#allocation3], 4294766592 }
  0xae   :  { %22815 = dma.done.wait [#allocation5], 57456  }
  0xaf   :  { %22816 = vsyncadd [#allocation5], 4294909840 }
  0xb0   :  { %22817 = dma.done.wait [#allocation8], 2080  }
  0xb1   :  { %22818 = vsyncadd [#allocation8], 4294965216 }
  0xb2   :  { %22819 = dma.done.wait [#allocation11], 1040  }
  0xb3   :  { %22820 = vsyncadd [#allocation11], 4294966256 }
  0xb4   :  { %22821 = dma.done.wait [#allocation14], 1040  }
  0xb5   :  { %22822 = vsyncadd [#allocation14], 4294966256 }
  0xb6   :  { %22823 = dma.done.wait [#allocation17], 16  }
  0xb7   :  { %22824 = vsyncadd [#allocation17], 4294967280  ;;  %v19582_v0 = vld [vmem:[#allocation2 + $0x4] ss:$28 sps:$4 sm:$0xff]   ;;  %v19584_v1 = vld [vmem:[#allocation2 + $0xc] ss:$28 sps:$4 sm:$0xff]  }
  0xb8   :  { %2710 = vmatprep.subr.bf16.mxu0 %v19582_v0  ;;  %v19586_v2 = vld [vmem:[#allocation2] ss:$28 sps:$4 sm:$0xff]   ;;  %v19587_v3 = vld [vmem:[#allocation2 + $0x8] ss:$28 sps:$4 sm:$0xff]   ;;  %2882 = vmatprep.subr.bf16.mxu1 %v19584_v1  ;;  %v19592_v6 = vld [vmem:[#allocation2 + $0x38] ss:$28 sps:$4 sm:$0xff]  }
  0xb9   :  { %v19588_v4 = vld [vmem:[#allocation2 + $0x3c] ss:$28 sps:$4 sm:$0xff]   ;;  %2711 = vmatpush1.bf16.msra.mxu0 %v19586_v2  ;;  %2883 = vmatpush1.bf16.msra.mxu1 %v19587_v3  ;;  %v19590_v5 = vld [vmem:[#allocation2 + $0x44] ss:$28 sps:$4 sm:$0xff]   ;;  %v19594_v8 = vld [vmem:[#allocation2 + $0x74] ss:$28 sps:$4 sm:$0xff]  }
  0xba   :  { %2712 = vmatprep.subr.bf16.mxu0 %v19588_v4  ;;  %v19593_v7 = vld [vmem:[#allocation2 + $0x40] ss:$28 sps:$4 sm:$0xff]   ;;  %2884 = vmatprep.subr.bf16.mxu1 %v19590_v5  ;;  %v19598_v10 = vld [vmem:[#allocation2 + $0x70] ss:$28 sps:$4 sm:$0xff]   ;;  %v19599_v11 = vld [vmem:[#allocation2 + $0x78] ss:$28 sps:$4 sm:$0xff]  }
  0xbb   :  { %v19596_v9 = vld [vmem:[#allocation2 + $0x7c] ss:$28 sps:$4 sm:$0xff]   ;;  %v19600_v12 = vld [vmem:[#allocation2 + $0xac] ss:$28 sps:$4 sm:$0xff]   ;;  %v19602_v13 = vld [vmem:[#allocation2 + $0xb4] ss:$28 sps:$4 sm:$0xff]  }
  0xbc   :  { %v19604_v14 = vld [vmem:[#allocation2 + $0xa8] ss:$28 sps:$4 sm:$0xff]   ;;  %v19605_v15 = vld [vmem:[#allocation2 + $0xb0] ss:$28 sps:$4 sm:$0xff]   ;;  %v19610_v18 = vld [vmem:[#allocation2 + $0xe0] ss:$28 sps:$4 sm:$0xff]  }
  0xbd   :  { %2713 = vmatpush1.bf16.msra.mxu0 %v19592_v6  ;;  %2885 = vmatpush1.bf16.msra.mxu1 %v19593_v7  ;;  %v19606_v16 = vld [vmem:[#allocation2 + $0xe4] ss:$28 sps:$4 sm:$0xff]   ;;  %v19608_v17 = vld [vmem:[#allocation2 + $0xec] ss:$28 sps:$4 sm:$0xff]   ;;  %v19612_v20 = vld [vmem:[#allocation2 + $0x11c] ss:$28 sps:$4 sm:$0xff]  }
  0xbe   :  { %2714 = vmatprep.subr.bf16.mxu0 %v19594_v8  ;;  %2886 = vmatprep.subr.bf16.mxu1 %v19596_v9  ;;  %v19611_v19 = vld [vmem:[#allocation2 + $0xe8] ss:$28 sps:$4 sm:$0xff]   ;;  %v19616_v22 = vld [vmem:[#allocation2 + $0x118] ss:$28 sps:$4 sm:$0xff]   ;;  %v19617_v23 = vld [vmem:[#allocation2 + $0x120] ss:$28 sps:$4 sm:$0xff]  }
  0xbf   :  { %v19614_v21 = vld [vmem:[#allocation2 + $0x124] ss:$28 sps:$4 sm:$0xff]   ;;  %v19618_v24 = vld [vmem:[#allocation2 + $0x154] ss:$28 sps:$4 sm:$0xff]   ;;  %v19620_v25 = vld [vmem:[#allocation2 + $0x15c] ss:$28 sps:$4 sm:$0xff]  }
  0xc0   :  { %v19622_v26 = vld [vmem:[#allocation2 + $0x150] ss:$28 sps:$4 sm:$0xff]   ;;  %v19623_v27 = vld [vmem:[#allocation2 + $0x158] ss:$28 sps:$4 sm:$0xff]   ;;  %v19628_v30 = vld [vmem:[#allocation2 + $0x188] ss:$28 sps:$4 sm:$0xff]  }
  0xc1   :  { %2715 = vmatpush1.bf16.msra.mxu0 %v19598_v10  ;;  %2887 = vmatpush1.bf16.msra.mxu1 %v19599_v11  ;;  %v19624_v28 = vld [vmem:[#allocation2 + $0x18c] ss:$28 sps:$4 sm:$0xff]   ;;  %v19626_v29 = vld [vmem:[#allocation2 + $0x194] ss:$28 sps:$4 sm:$0xff]   ;;  %v19630_v32 = vld [vmem:[#allocation2 + $0x1c4] ss:$28 sps:$4 sm:$0xff]  }
  0xc2   :  { %2716 = vmatprep.subr.bf16.mxu0 %v19600_v12  ;;  %2888 = vmatprep.subr.bf16.mxu1 %v19602_v13  ;;  %v19629_v31 = vld [vmem:[#allocation2 + $0x190] ss:$28 sps:$4 sm:$0xff]   ;;  %v19634_v34 = vld [vmem:[#allocation2 + $0x1c0] ss:$28 sps:$4 sm:$0xff]   ;;  %v19635_v35 = vld [vmem:[#allocation2 + $0x1c8] ss:$28 sps:$4 sm:$0xff]  }
  0xc3   :  { %v19632_v33 = vld [vmem:[#allocation2 + $0x1cc] ss:$28 sps:$4 sm:$0xff]   ;;  %v19636_v36 = vld [vmem:[#allocation2 + $0x1fc] ss:$28 sps:$4 sm:$0xff]   ;;  %v19638_v37 = vld [vmem:[#allocation2 + $0x204] ss:$28 sps:$4 sm:$0xff]  }
  0xc4   :  { %v19640_v38 = vld [vmem:[#allocation2 + $0x1f8] ss:$28 sps:$4 sm:$0xff]   ;;  %v19641_v39 = vld [vmem:[#allocation2 + $0x200] ss:$28 sps:$4 sm:$0xff]   ;;  %v19646_v42 = vld [vmem:[#allocation2 + $0x230] ss:$28 sps:$4 sm:$0xff]  }
  0xc5   :  { %2717 = vmatpush1.bf16.msra.mxu0 %v19604_v14  ;;  %2889 = vmatpush1.bf16.msra.mxu1 %v19605_v15  ;;  %v19642_v40 = vld [vmem:[#allocation2 + $0x234] ss:$28 sps:$4 sm:$0xff]   ;;  %v19644_v41 = vld [vmem:[#allocation2 + $0x23c] ss:$28 sps:$4 sm:$0xff]   ;;  %v19648_v44 = vld [vmem:[#allocation2 + $0x26c] ss:$28 sps:$4 sm:$0xff]  }
  0xc6   :  { %2718 = vmatprep.subr.bf16.mxu0 %v19606_v16  ;;  %2890 = vmatprep.subr.bf16.mxu1 %v19608_v17  ;;  %v19647_v43 = vld [vmem:[#allocation2 + $0x238] ss:$28 sps:$4 sm:$0xff]   ;;  %v19652_v46 = vld [vmem:[#allocation2 + $0x268] ss:$28 sps:$4 sm:$0xff]   ;;  %v19653_v48 = vld [vmem:[#allocation2 + $0x270] ss:$28 sps:$4 sm:$0xff]  }
  0xc7   :  { %v19650_v45 = vld [vmem:[#allocation2 + $0x274] ss:$28 sps:$4 sm:$0xff]   ;;  %v19678_v47 = vld [vmem:[%s23775_s0 + $0x4] ss:$28 sps:$4 sm:$0xff]   ;;  %v19656_v50 = vld [vmem:[#allocation2 + $0x2ac] ss:$28 sps:$4 sm:$0xff]  }
  0xc8   :  { %v19654_v49 = vld [vmem:[#allocation2 + $0x2a4] ss:$28 sps:$4 sm:$0xff]   ;;  %2742 = vmatprep.mubr.bf16.mxu0 %v19678_v47  ;;  %2914 = vmatprep.mubr.bf16.mxu1 %v19678_v47  ;;  %v19660_v53 = vld [vmem:[#allocation2 + $0x2dc] ss:$28 sps:$4 sm:$0xff]   ;;  %v19666_v57 = vld [vmem:[#allocation2 + $0x314] ss:$28 sps:$4 sm:$0xff]  }
  0xc9   :  { %2719 = vmatpush1.bf16.msra.mxu0 %v19610_v18  ;;  %2891 = vmatpush1.bf16.msra.mxu1 %v19611_v19  ;;  %v19658_v51 = vld [vmem:[#allocation2 + $0x2a0] ss:$28 sps:$4 sm:$0xff]   ;;  %v19659_v52 = vld [vmem:[#allocation2 + $0x2a8] ss:$28 sps:$4 sm:$0xff]   ;;  %v19664_v55 = vld [vmem:[#allocation2 + $0x2d8] ss:$28 sps:$4 sm:$0xff]  }
  0xca   :  { %2720 = vmatprep.subr.bf16.mxu0 %v19612_v20  ;;  %2892 = vmatprep.subr.bf16.mxu1 %v19614_v21  ;;  %v19662_v54 = vld [vmem:[#allocation2 + $0x2e4] ss:$28 sps:$4 sm:$0xff]   ;;  %v19668_v58 = vld [vmem:[#allocation2 + $0x31c] ss:$28 sps:$4 sm:$0xff]   ;;  %v19670_v59 = vld [vmem:[#allocation2 + $0x310] ss:$28 sps:$4 sm:$0xff]  }
  0xcb   :  { %v19665_v56 = vld [vmem:[#allocation2 + $0x2e0] ss:$28 sps:$4 sm:$0xff]   ;;  %v19671_v60 = vld [vmem:[#allocation2 + $0x318] ss:$28 sps:$4 sm:$0xff]   ;;  %v19672_v61 = vld [vmem:[#allocation2 + $0x34c] ss:$28 sps:$4 sm:$0xff]  }
  0xcc   :  { %v19674_v62 = vld [vmem:[#allocation2 + $0x354] ss:$28 sps:$4 sm:$0xff]   ;;  %v19676_v63 = vld [vmem:[#allocation2 + $0x348] ss:$28 sps:$4 sm:$0xff]   ;;  %v19680_v3 = vld [vmem:[#allocation2 + $0x380] ss:$28 sps:$4 sm:$0xff]  }
  0xcd   :  { %2721 = vmatpush1.bf16.msra.mxu0 %v19616_v22  ;;  %2893 = vmatpush1.bf16.msra.mxu1 %v19617_v23  ;;  %v19677_v0 = vld [vmem:[#allocation2 + $0x350] ss:$28 sps:$4 sm:$0xff]   ;;  %v19682_v1 = vld [vmem:[#allocation2 + $0x384] ss:$28 sps:$4 sm:$0xff]   ;;  %v19689_v6 = vld [vmem:[#allocation2 + $0x3bc] ss:$28 sps:$4 sm:$0xff]  }
  0xce   :  { %2722 = vmatprep.subr.bf16.mxu0 %v19618_v24  ;;  %2894 = vmatprep.subr.bf16.mxu1 %v19620_v25  ;;  %v19685_v2 = vld [vmem:[#allocation2 + $0x38c] ss:$28 sps:$4 sm:$0xff]   ;;  %v19686_v5 = vld [vmem:[%s23775_s0] ss:$28 sps:$4 sm:$0xff]   ;;  %v19687_v8 = vld [vmem:[#allocation2 + $0x3b8] ss:$28 sps:$4 sm:$0xff]  }
  0xcf   :  { %v19683_v4 = vld [vmem:[#allocation2 + $0x388] ss:$28 sps:$4 sm:$0xff]   ;;  %v19690_v9 = vld [vmem:[#allocation2 + $0x3c0] ss:$28 sps:$4 sm:$0xff]   ;;  %v19695_v10 = vld [vmem:[#allocation2 + $0x3f4] ss:$28 sps:$4 sm:$0xff]  }
  0xd0   :  { %v19692_v7 = vld [vmem:[#allocation2 + $0x3c4] ss:$28 sps:$4 sm:$0xff]   ;;  %v19698_v11 = vld [vmem:[#allocation2 + $0x3fc] ss:$28 sps:$4 sm:$0xff]   ;;  %v19693_v12 = vld [vmem:[#allocation2 + $0x3f0] ss:$28 sps:$4 sm:$0xff]  }
  0xd1   :  { %2723 = vmatpush1.bf16.msra.mxu0 %v19622_v26  ;;  %2895 = vmatpush1.bf16.msra.mxu1 %v19623_v27  ;;  %v19696_v13 = vld [vmem:[#allocation2 + $0x3f8] ss:$28 sps:$4 sm:$0xff]   ;;  %v19701_v14 = vld [vmem:[#allocation2 + $0x42c] ss:$28 sps:$4 sm:$0xff]   ;;  %v19707_v18 = vld [vmem:[#allocation2 + $0x464] ss:$28 sps:$4 sm:$0xff]  }
  0xd2   :  { %2724 = vmatprep.subr.bf16.mxu0 %v19624_v28  ;;  %2896 = vmatprep.subr.bf16.mxu1 %v19626_v29  ;;  %v19704_v15 = vld [vmem:[#allocation2 + $0x434] ss:$28 sps:$4 sm:$0xff]   ;;  %v19699_v16 = vld [vmem:[#allocation2 + $0x428] ss:$28 sps:$4 sm:$0xff]   ;;  %v19705_v20 = vld [vmem:[#allocation2 + $0x460] ss:$28 sps:$4 sm:$0xff]  }
  0xd3   :  { %v19702_v17 = vld [vmem:[#allocation2 + $0x430] ss:$28 sps:$4 sm:$0xff]   ;;  %v19708_v21 = vld [vmem:[#allocation2 + $0x468] ss:$28 sps:$4 sm:$0xff]   ;;  %v19713_v22 = vld [vmem:[#allocation2 + $0x49c] ss:$28 sps:$4 sm:$0xff]  }
  0xd4   :  { %v19710_v19 = vld [vmem:[#allocation2 + $0x46c] ss:$28 sps:$4 sm:$0xff]   ;;  %v19716_v23 = vld [vmem:[#allocation2 + $0x4a4] ss:$28 sps:$4 sm:$0xff]   ;;  %v19711_v24 = vld [vmem:[#allocation2 + $0x498] ss:$28 sps:$4 sm:$0xff]  }
  0xd5   :  { %2725 = vmatpush1.bf16.msra.mxu0 %v19628_v30  ;;  %2897 = vmatpush1.bf16.msra.mxu1 %v19629_v31  ;;  %v19714_v25 = vld [vmem:[#allocation2 + $0x4a0] ss:$28 sps:$4 sm:$0xff]   ;;  %v19719_v26 = vld [vmem:[#allocation2 + $0x4d4] ss:$28 sps:$4 sm:$0xff]   ;;  %v19777_v29 = vld [vmem:[%s23775_s0 + $0xc] ss:$28 sps:$4 sm:$0xff]  }
  0xd6   :  { %2726 = vmatprep.subr.bf16.mxu0 %v19630_v32  ;;  %2898 = vmatprep.subr.bf16.mxu1 %v19632_v33  ;;  %v19722_v27 = vld [vmem:[#allocation2 + $0x4dc] ss:$28 sps:$4 sm:$0xff]   ;;  %v19717_v28 = vld [vmem:[#allocation2 + $0x4d0] ss:$28 sps:$4 sm:$0xff]   ;;  %v19723_v33 = vld [vmem:[#allocation2 + $0x508] ss:$28 sps:$4 sm:$0xff]  }
  0xd7   :  { %v19720_v30 = vld [vmem:[#allocation2 + $0x4d8] ss:$28 sps:$4 sm:$0xff]   ;;  %v19725_v31 = vld [vmem:[#allocation2 + $0x50c] ss:$28 sps:$4 sm:$0xff]   ;;  %vm22843_vm0 = vmmov 0  }
  0xd8   :  { %v19728_v32 = vld [vmem:[#allocation2 + $0x514] ss:$28 sps:$4 sm:$0xff]   ;;  %v19749_v47 = vld [vmem:[#allocation2 + $0x5ec] ss:$28 sps:$4 sm:$0xff]  }
  0xd9   :  { %2727 = vmatpush1.bf16.msra.mxu0 %v19634_v34  ;;  %2899 = vmatpush1.bf16.msra.mxu1 %v19635_v35  ;;  %v19726_v34 = vld [vmem:[#allocation2 + $0x510] ss:$28 sps:$4 sm:$0xff]   ;;  %v19731_v35 = vld [vmem:[#allocation2 + $0x544] ss:$28 sps:$4 sm:$0xff]  }
  0xda   :  { %2728 = vmatprep.subr.bf16.mxu0 %v19636_v36  ;;  %2900 = vmatprep.subr.bf16.mxu1 %v19638_v37  ;;  %v19734_v36 = vld [vmem:[#allocation2 + $0x54c] ss:$28 sps:$4 sm:$0xff]   ;;  %v19729_v37 = vld [vmem:[#allocation2 + $0x540] ss:$28 sps:$4 sm:$0xff]  }
  0xdd   :  { %2729 = vmatpush1.bf16.msra.mxu0 %v19640_v38  ;;  %2901 = vmatpush1.bf16.msra.mxu1 %v19641_v39  ;;  %v19732_v38 = vld [vmem:[#allocation2 + $0x548] ss:$28 sps:$4 sm:$0xff]   ;;  %v19737_v39 = vld [vmem:[#allocation2 + $0x57c] ss:$28 sps:$4 sm:$0xff]  }
  0xde   :  { %2730 = vmatprep.subr.bf16.mxu0 %v19642_v40  ;;  %2902 = vmatprep.subr.bf16.mxu1 %v19644_v41  ;;  %v19740_v40 = vld [vmem:[#allocation2 + $0x584] ss:$28 sps:$4 sm:$0xff]   ;;  %v19735_v41 = vld [vmem:[#allocation2 + $0x578] ss:$28 sps:$4 sm:$0xff]  }
  0xe1   :  { %2731 = vmatpush1.bf16.msra.mxu0 %v19646_v42  ;;  %2903 = vmatpush1.bf16.msra.mxu1 %v19647_v43  ;;  %v19738_v42 = vld [vmem:[#allocation2 + $0x580] ss:$28 sps:$4 sm:$0xff]   ;;  %v19743_v43 = vld [vmem:[#allocation2 + $0x5b4] ss:$28 sps:$4 sm:$0xff]  }
  0xe2   :  { %2732 = vmatprep.subr.bf16.mxu0 %v19648_v44  ;;  %2904 = vmatprep.subr.bf16.mxu1 %v19650_v45  ;;  %v19746_v44 = vld [vmem:[#allocation2 + $0x5bc] ss:$28 sps:$4 sm:$0xff]   ;;  %v19741_v45 = vld [vmem:[#allocation2 + $0x5b0] ss:$28 sps:$4 sm:$0xff]  }
  0xe5   :  { %2733 = vmatpush1.bf16.msra.mxu0 %v19652_v46  ;;  %2905 = vmatpush1.bf16.msra.mxu1 %v19653_v48  ;;  %v19744_v46 = vld [vmem:[#allocation2 + $0x5b8] ss:$28 sps:$4 sm:$0xff]  }
  0xe6   :  { %2734 = vmatprep.subr.bf16.mxu0 %v19654_v49  ;;  %2906 = vmatprep.subr.bf16.mxu1 %v19656_v50  ;;  %v19752_v48 = vld [vmem:[#allocation2 + $0x5f4] ss:$28 sps:$4 sm:$0xff]   ;;  %v19747_v49 = vld [vmem:[#allocation2 + $0x5e8] ss:$28 sps:$4 sm:$0xff]  }
  0xe7   :  { %v19750_v50 = vld [vmem:[#allocation2 + $0x5f0] ss:$28 sps:$4 sm:$0xff]  }
  0xe9   :  { %2735 = vmatpush1.bf16.msra.mxu0 %v19658_v51  ;;  %2907 = vmatpush1.bf16.msra.mxu1 %v19659_v52  ;;  %v19755_v51 = vld [vmem:[#allocation2 + $0x624] ss:$28 sps:$4 sm:$0xff]   ;;  %v19758_v52 = vld [vmem:[#allocation2 + $0x62c] ss:$28 sps:$4 sm:$0xff]  }
  0xea   :  { %2736 = vmatprep.subr.bf16.mxu0 %v19660_v53  ;;  %2908 = vmatprep.subr.bf16.mxu1 %v19662_v54  ;;  %v19753_v53 = vld [vmem:[#allocation2 + $0x620] ss:$28 sps:$4 sm:$0xff]   ;;  %v19756_v54 = vld [vmem:[#allocation2 + $0x628] ss:$28 sps:$4 sm:$0xff]  }
  0xed   :  { %2737 = vmatpush1.bf16.msra.mxu0 %v19664_v55  ;;  %2909 = vmatpush1.bf16.msra.mxu1 %v19665_v56  ;;  %v19761_v55 = vld [vmem:[#allocation2 + $0x65c] ss:$28 sps:$4 sm:$0xff]   ;;  %v19764_v56 = vld [vmem:[#allocation2 + $0x664] ss:$28 sps:$4 sm:$0xff]  }
  0xee   :  { %2738 = vmatprep.subr.bf16.mxu0 %v19666_v57  ;;  %2910 = vmatprep.subr.bf16.mxu1 %v19668_v58  ;;  %v19759_v57 = vld [vmem:[#allocation2 + $0x658] ss:$28 sps:$4 sm:$0xff]   ;;  %v19762_v58 = vld [vmem:[#allocation2 + $0x660] ss:$28 sps:$4 sm:$0xff]  }
  0xf1   :  { %2739 = vmatpush1.bf16.msra.mxu0 %v19670_v59  ;;  %2911 = vmatpush1.bf16.msra.mxu1 %v19671_v60  ;;  %v19767_v59 = vld [vmem:[#allocation2 + $0x694] ss:$28 sps:$4 sm:$0xff]   ;;  %v19770_v60 = vld [vmem:[#allocation2 + $0x69c] ss:$28 sps:$4 sm:$0xff]  }
  0xf2   :  { %2740 = vmatprep.subr.bf16.mxu0 %v19672_v61  ;;  %2912 = vmatprep.subr.bf16.mxu1 %v19674_v62  ;;  %v19765_v61 = vld [vmem:[#allocation2 + $0x690] ss:$28 sps:$4 sm:$0xff]   ;;  %v19768_v62 = vld [vmem:[#allocation2 + $0x698] ss:$28 sps:$4 sm:$0xff]  }
  0xf5   :  { %2741 = vmatpush1.bf16.msra.mxu0 %v19676_v63  ;;  %2913 = vmatpush1.bf16.msra.mxu1 %v19677_v0  ;;  %v19773_v63 = vld [vmem:[#allocation2 + $0x6cc] ss:$28 sps:$4 sm:$0xff]   ;;  %v19776_v0 = vld [vmem:[#allocation2 + $0x6d4] ss:$28 sps:$4 sm:$0xff]  }
  0xf6   :  { %2753 = vmatprep.subr.bf16.mxu0 %v19682_v1  ;;  %2925 = vmatprep.subr.bf16.mxu1 %v19685_v2  ;;  %v19771_v1 = vld [vmem:[#allocation2 + $0x6c8] ss:$28 sps:$4 sm:$0xff]   ;;  %v19774_v2 = vld [vmem:[#allocation2 + $0x6d0] ss:$28 sps:$4 sm:$0xff]  }
  0xf8   :  { %2743 = vmatmul.mubr.bf16.vlgmr.msra.gmra.mrb[0].mxu0 %v19686_v5  ;;  %2915 = vmatmul.mubr.bf16.vlgmr.msra.gmra.mrb[0].mxu1 %v19686_v5  ;;  %v19779_v5 = vld [vmem:[#allocation2 + $0x700] ss:$28 sps:$4 sm:$0xff]  }
  0xf9   :  { %2754 = vmatpush1.bf16.msra.mxu0 %v19680_v3  ;;  %2926 = vmatpush1.bf16.msra.mxu1 %v19683_v4  ;;  %v19781_v3 = vld [vmem:[#allocation2 + $0x704] ss:$28 sps:$4 sm:$0xff]   ;;  %v19784_v4 = vld [vmem:[#allocation2 + $0x70c] ss:$28 sps:$4 sm:$0xff]  }
  0xfa   :  { %2755 = vmatprep.subr.bf16.mxu0 %v19689_v6  ;;  %2927 = vmatprep.subr.bf16.mxu1 %v19692_v7  ;;  %v19782_v6 = vld [vmem:[#allocation2 + $0x708] ss:$28 sps:$4 sm:$0xff]  }
  0xfb   :  { %2785 = vmatprep.mubr.bf16.mxu0 %v19777_v29  ;;  %2957 = vmatprep.mubr.bf16.mxu1 %v19777_v29  ;;  %v19785_v7 = vld [vmem:[%s23775_s0 + $0x8] ss:$28 sps:$4 sm:$0xff]   ;;  %v19818_v29 = vld [vmem:[#allocation2 + $0x854] ss:$28 sps:$4 sm:$0xff]  }
  0xfd   :  { %2756 = vmatpush1.bf16.msra.mxu0 %v19687_v8  ;;  %2928 = vmatpush1.bf16.msra.mxu1 %v19690_v9  ;;  %v19788_v8 = vld [vmem:[#allocation2 + $0x73c] ss:$28 sps:$4 sm:$0xff]   ;;  %v19791_v9 = vld [vmem:[#allocation2 + $0x744] ss:$28 sps:$4 sm:$0xff]  }
  0xfe   :  { %2757 = vmatprep.subr.bf16.mxu0 %v19695_v10  ;;  %2929 = vmatprep.subr.bf16.mxu1 %v19698_v11  ;;  %v19786_v10 = vld [vmem:[#allocation2 + $0x738] ss:$28 sps:$4 sm:$0xff]  }
  0xff   :  { %v19876_v11 = vld [vmem:[%s23775_s0 + $0x14] ss:$28 sps:$4 sm:$0xff]  }
 0x101   :  { %2758 = vmatpush1.bf16.msra.mxu0 %v19693_v12  ;;  %2930 = vmatpush1.bf16.msra.mxu1 %v19696_v13  ;;  %v19789_v12 = vld [vmem:[#allocation2 + $0x740] ss:$28 sps:$4 sm:$0xff]   ;;  %v19794_v13 = vld [vmem:[#allocation2 + $0x774] ss:$28 sps:$4 sm:$0xff]  }
 0x102   :  { %2759 = vmatprep.subr.bf16.mxu0 %v19701_v14  ;;  %2931 = vmatprep.subr.bf16.mxu1 %v19704_v15  ;;  %v19797_v14 = vld [vmem:[#allocation2 + $0x77c] ss:$28 sps:$4 sm:$0xff]   ;;  %v19792_v15 = vld [vmem:[#allocation2 + $0x770] ss:$28 sps:$4 sm:$0xff]  }
 0x105   :  { %2760 = vmatpush1.bf16.msra.mxu0 %v19699_v16  ;;  %2932 = vmatpush1.bf16.msra.mxu1 %v19702_v17  ;;  %v19795_v16 = vld [vmem:[#allocation2 + $0x778] ss:$28 sps:$4 sm:$0xff]   ;;  %v19800_v17 = vld [vmem:[#allocation2 + $0x7ac] ss:$28 sps:$4 sm:$0xff]  }
 0x106   :  { %2761 = vmatprep.subr.bf16.mxu0 %v19707_v18  ;;  %2933 = vmatprep.subr.bf16.mxu1 %v19710_v19  ;;  %v19803_v18 = vld [vmem:[#allocation2 + $0x7b4] ss:$28 sps:$4 sm:$0xff]   ;;  %v19798_v19 = vld [vmem:[#allocation2 + $0x7a8] ss:$28 sps:$4 sm:$0xff]  }
 0x109   :  { %2762 = vmatpush1.bf16.msra.mxu0 %v19705_v20  ;;  %2934 = vmatpush1.bf16.msra.mxu1 %v19708_v21  ;;  %v19801_v20 = vld [vmem:[#allocation2 + $0x7b0] ss:$28 sps:$4 sm:$0xff]   ;;  %v19806_v21 = vld [vmem:[#allocation2 + $0x7e4] ss:$28 sps:$4 sm:$0xff]  }
 0x10a   :  { %2763 = vmatprep.subr.bf16.mxu0 %v19713_v22  ;;  %2935 = vmatprep.subr.bf16.mxu1 %v19716_v23  ;;  %v19809_v22 = vld [vmem:[#allocation2 + $0x7ec] ss:$28 sps:$4 sm:$0xff]   ;;  %v19804_v23 = vld [vmem:[#allocation2 + $0x7e0] ss:$28 sps:$4 sm:$0xff]  }
 0x10d   :  { %2764 = vmatpush1.bf16.msra.mxu0 %v19711_v24  ;;  %2936 = vmatpush1.bf16.msra.mxu1 %v19714_v25  ;;  %v19807_v24 = vld [vmem:[#allocation2 + $0x7e8] ss:$28 sps:$4 sm:$0xff]   ;;  %v19812_v25 = vld [vmem:[#allocation2 + $0x81c] ss:$28 sps:$4 sm:$0xff]  }
 0x10e   :  { %2765 = vmatprep.subr.bf16.mxu0 %v19719_v26  ;;  %2937 = vmatprep.subr.bf16.mxu1 %v19722_v27  ;;  %v19815_v26 = vld [vmem:[#allocation2 + $0x824] ss:$28 sps:$4 sm:$0xff]   ;;  %v19810_v27 = vld [vmem:[#allocation2 + $0x818] ss:$28 sps:$4 sm:$0xff]  }
 0x111   :  { %2766 = vmatpush1.bf16.msra.mxu0 %v19717_v28  ;;  %2938 = vmatpush1.bf16.msra.mxu1 %v19720_v30  ;;  %v19813_v28 = vld [vmem:[#allocation2 + $0x820] ss:$28 sps:$4 sm:$0xff]  }
 0x112   :  { %2767 = vmatprep.subr.bf16.mxu0 %v19725_v31  ;;  %2939 = vmatprep.subr.bf16.mxu1 %v19728_v32  ;;  %v19821_v30 = vld [vmem:[#allocation2 + $0x85c] ss:$28 sps:$4 sm:$0xff]   ;;  %v19816_v31 = vld [vmem:[#allocation2 + $0x850] ss:$28 sps:$4 sm:$0xff]  }
 0x113   :  { %v19819_v32 = vld [vmem:[#allocation2 + $0x858] ss:$28 sps:$4 sm:$0xff]  }
 0x115   :  { %2768 = vmatpush1.bf16.msra.mxu0 %v19723_v33  ;;  %2940 = vmatpush1.bf16.msra.mxu1 %v19726_v34  ;;  %v19824_v33 = vld [vmem:[#allocation2 + $0x88c] ss:$28 sps:$4 sm:$0xff]   ;;  %v19827_v34 = vld [vmem:[#allocation2 + $0x894] ss:$28 sps:$4 sm:$0xff]  }
 0x116   :  { %2769 = vmatprep.subr.bf16.mxu0 %v19731_v35  ;;  %2941 = vmatprep.subr.bf16.mxu1 %v19734_v36  ;;  %v19822_v35 = vld [vmem:[#allocation2 + $0x888] ss:$28 sps:$4 sm:$0xff]   ;;  %v19825_v36 = vld [vmem:[#allocation2 + $0x890] ss:$28 sps:$4 sm:$0xff]  }
 0x119   :  { %2770 = vmatpush1.bf16.msra.mxu0 %v19729_v37  ;;  %2942 = vmatpush1.bf16.msra.mxu1 %v19732_v38  ;;  %v19830_v37 = vld [vmem:[#allocation2 + $0x8c4] ss:$28 sps:$4 sm:$0xff]   ;;  %v19833_v38 = vld [vmem:[#allocation2 + $0x8cc] ss:$28 sps:$4 sm:$0xff]  }
 0x11a   :  { %2771 = vmatprep.subr.bf16.mxu0 %v19737_v39  ;;  %2943 = vmatprep.subr.bf16.mxu1 %v19740_v40  ;;  %v19828_v39 = vld [vmem:[#allocation2 + $0x8c0] ss:$28 sps:$4 sm:$0xff]   ;;  %v19831_v40 = vld [vmem:[#allocation2 + $0x8c8] ss:$28 sps:$4 sm:$0xff]  }
 0x11d   :  { %2772 = vmatpush1.bf16.msra.mxu0 %v19735_v41  ;;  %2944 = vmatpush1.bf16.msra.mxu1 %v19738_v42  ;;  %v19836_v41 = vld [vmem:[#allocation2 + $0x8fc] ss:$28 sps:$4 sm:$0xff]   ;;  %v19839_v42 = vld [vmem:[#allocation2 + $0x904] ss:$28 sps:$4 sm:$0xff]  }
 0x11e   :  { %2773 = vmatprep.subr.bf16.mxu0 %v19743_v43  ;;  %2945 = vmatprep.subr.bf16.mxu1 %v19746_v44  ;;  %v19834_v43 = vld [vmem:[#allocation2 + $0x8f8] ss:$28 sps:$4 sm:$0xff]   ;;  %v19837_v44 = vld [vmem:[#allocation2 + $0x900] ss:$28 sps:$4 sm:$0xff]  }
 0x121   :  { %2774 = vmatpush1.bf16.msra.mxu0 %v19741_v45  ;;  %2946 = vmatpush1.bf16.msra.mxu1 %v19744_v46  ;;  %v19842_v45 = vld [vmem:[#allocation2 + $0x934] ss:$28 sps:$4 sm:$0xff]   ;;  %v19845_v46 = vld [vmem:[#allocation2 + $0x93c] ss:$28 sps:$4 sm:$0xff]  }
 0x122   :  { %2775 = vmatprep.subr.bf16.mxu0 %v19749_v47  ;;  %2947 = vmatprep.subr.bf16.mxu1 %v19752_v48  ;;  %v19840_v47 = vld [vmem:[#allocation2 + $0x930] ss:$28 sps:$4 sm:$0xff]   ;;  %v19843_v48 = vld [vmem:[#allocation2 + $0x938] ss:$28 sps:$4 sm:$0xff]  }
 0x125   :  { %2776 = vmatpush1.bf16.msra.mxu0 %v19747_v49  ;;  %2948 = vmatpush1.bf16.msra.mxu1 %v19750_v50  ;;  %v19848_v49 = vld [vmem:[#allocation2 + $0x96c] ss:$28 sps:$4 sm:$0xff]   ;;  %v19851_v50 = vld [vmem:[#allocation2 + $0x974] ss:$28 sps:$4 sm:$0xff]  }
 0x126   :  { %2777 = vmatprep.subr.bf16.mxu0 %v19755_v51  ;;  %2949 = vmatprep.subr.bf16.mxu1 %v19758_v52  ;;  %v19846_v51 = vld [vmem:[#allocation2 + $0x968] ss:$28 sps:$4 sm:$0xff]   ;;  %v19849_v52 = vld [vmem:[#allocation2 + $0x970] ss:$28 sps:$4 sm:$0xff]  }
 0x129   :  { %2778 = vmatpush1.bf16.msra.mxu0 %v19753_v53  ;;  %2950 = vmatpush1.bf16.msra.mxu1 %v19756_v54  ;;  %v19854_v53 = vld [vmem:[#allocation2 + $0x9a4] ss:$28 sps:$4 sm:$0xff]   ;;  %v19857_v54 = vld [vmem:[#allocation2 + $0x9ac] ss:$28 sps:$4 sm:$0xff]  }
 0x12a   :  { %2779 = vmatprep.subr.bf16.mxu0 %v19761_v55  ;;  %2951 = vmatprep.subr.bf16.mxu1 %v19764_v56  ;;  %v19852_v55 = vld [vmem:[#allocation2 + $0x9a0] ss:$28 sps:$4 sm:$0xff]   ;;  %v19855_v56 = vld [vmem:[#allocation2 + $0x9a8] ss:$28 sps:$4 sm:$0xff]  }
 0x12d   :  { %2780 = vmatpush1.bf16.msra.mxu0 %v19759_v57  ;;  %2952 = vmatpush1.bf16.msra.mxu1 %v19762_v58  ;;  %v19860_v57 = vld [vmem:[#allocation2 + $0x9dc] ss:$28 sps:$4 sm:$0xff]   ;;  %v19863_v58 = vld [vmem:[#allocation2 + $0x9e4] ss:$28 sps:$4 sm:$0xff]  }
 0x12e   :  { %2781 = vmatprep.subr.bf16.mxu0 %v19767_v59  ;;  %2953 = vmatprep.subr.bf16.mxu1 %v19770_v60  ;;  %v19858_v59 = vld [vmem:[#allocation2 + $0x9d8] ss:$28 sps:$4 sm:$0xff]   ;;  %v19861_v60 = vld [vmem:[#allocation2 + $0x9e0] ss:$28 sps:$4 sm:$0xff]  }
 0x131   :  { %2782 = vmatpush1.bf16.msra.mxu0 %v19765_v61  ;;  %2954 = vmatpush1.bf16.msra.mxu1 %v19768_v62  ;;  %v19866_v61 = vld [vmem:[#allocation2 + $0xa14] ss:$28 sps:$4 sm:$0xff]   ;;  %v19869_v62 = vld [vmem:[#allocation2 + $0xa1c] ss:$28 sps:$4 sm:$0xff]  }
 0x132   :  { %2783 = vmatprep.subr.bf16.mxu0 %v19773_v63  ;;  %2955 = vmatprep.subr.bf16.mxu1 %v19776_v0  ;;  %v19864_v63 = vld [vmem:[#allocation2 + $0xa10] ss:$28 sps:$4 sm:$0xff]   ;;  %v19867_v0 = vld [vmem:[#allocation2 + $0xa18] ss:$28 sps:$4 sm:$0xff]  }
 0x135   :  { %2784 = vmatpush1.bf16.msra.mxu0 %v19771_v1  ;;  %2956 = vmatpush1.bf16.msra.mxu1 %v19774_v2  ;;  %v19872_v1 = vld [vmem:[#allocation2 + $0xa4c] ss:$28 sps:$4 sm:$0xff]   ;;  %v19875_v2 = vld [vmem:[#allocation2 + $0xa54] ss:$28 sps:$4 sm:$0xff]  }
 0x136   :  { %2796 = vmatprep.subr.bf16.mxu0 %v19781_v3  ;;  %2968 = vmatprep.subr.bf16.mxu1 %v19784_v4  ;;  %v19870_v3 = vld [vmem:[#allocation2 + $0xa48] ss:$28 sps:$4 sm:$0xff]   ;;  %v19873_v4 = vld [vmem:[#allocation2 + $0xa50] ss:$28 sps:$4 sm:$0xff]  }
 0x138   :  { %2786 = vmatmul.mubr.bf16.vlgmr.msra.gmra.mrb[0].mxu0 %v19785_v7  ;;  %2958 = vmatmul.mubr.bf16.vlgmr.msra.gmra.mrb[0].mxu1 %v19785_v7  ;;  %v19878_v7 = vld [vmem:[#allocation2 + $0xa80] ss:$28 sps:$4 sm:$0xff]  }
 0x139   :  { %2797 = vmatpush1.bf16.msra.mxu0 %v19779_v5  ;;  %2969 = vmatpush1.bf16.msra.mxu1 %v19782_v6  ;;  %v19880_v5 = vld [vmem:[#allocation2 + $0xa84] ss:$28 sps:$4 sm:$0xff]   ;;  %v19883_v6 = vld [vmem:[#allocation2 + $0xa8c] ss:$28 sps:$4 sm:$0xff]  }
 0x13a   :  { %2798 = vmatprep.subr.bf16.mxu0 %v19788_v8  ;;  %2970 = vmatprep.subr.bf16.mxu1 %v19791_v9  ;;  %v19881_v8 = vld [vmem:[#allocation2 + $0xa88] ss:$28 sps:$4 sm:$0xff]   ;;  %v23051_v9 = vld [vmem:[%s23775_s0 + $0x10] ss:$28 sps:$4 sm:$0xff]  }
 0x13b   :  { %2828 = vmatprep.mubr.bf16.mxu0 %v19876_v11  ;;  %3000 = vmatprep.mubr.bf16.mxu1 %v19876_v11  ;;  %v19890_v11 = vld [vmem:[#allocation2 + $0xac4] ss:$28 sps:$4 sm:$0xff]  }
 0x13d   :  { %2799 = vmatpush1.bf16.msra.mxu0 %v19786_v10  ;;  %2971 = vmatpush1.bf16.msra.mxu1 %v19789_v12  ;;  %v19887_v10 = vld [vmem:[#allocation2 + $0xabc] ss:$28 sps:$4 sm:$0xff]  }
 0x13e   :  { %2800 = vmatprep.subr.bf16.mxu0 %v19794_v13  ;;  %2972 = vmatprep.subr.bf16.mxu1 %v19797_v14  ;;  %v19885_v12 = vld [vmem:[#allocation2 + $0xab8] ss:$28 sps:$4 sm:$0xff]   ;;  %v19888_v13 = vld [vmem:[#allocation2 + $0xac0] ss:$28 sps:$4 sm:$0xff]  }
 0x13f   :  { %v19893_v14 = vld [vmem:[#allocation2 + $0xaf4] ss:$28 sps:$4 sm:$0xff]  }
 0x141   :  { %2801 = vmatpush1.bf16.msra.mxu0 %v19792_v15  ;;  %2973 = vmatpush1.bf16.msra.mxu1 %v19795_v16  ;;  %v19896_v15 = vld [vmem:[#allocation2 + $0xafc] ss:$28 sps:$4 sm:$0xff]   ;;  %v19891_v16 = vld [vmem:[#allocation2 + $0xaf0] ss:$28 sps:$4 sm:$0xff]  }
 0x142   :  { %2802 = vmatprep.subr.bf16.mxu0 %v19800_v17  ;;  %2974 = vmatprep.subr.bf16.mxu1 %v19803_v18  ;;  %v22841_v17 = vmov 0   ;;  %v19894_v18 = vld [vmem:[#allocation2 + $0xaf8] ss:$28 sps:$4 sm:$0xff]  }
 0x145   :  { %2803 = vmatpush1.bf16.msra.mxu0 %v19798_v19  ;;  %2975 = vmatpush1.bf16.msra.mxu1 %v19801_v20  ;;  %v19899_v19 = vld [vmem:[#allocation2 + $0xb2c] ss:$28 sps:$4 sm:$0xff]   ;;  %v19902_v20 = vld [vmem:[#allocation2 + $0xb34] ss:$28 sps:$4 sm:$0xff]  }
 0x146   :  { %2804 = vmatprep.subr.bf16.mxu0 %v19806_v21  ;;  %2976 = vmatprep.subr.bf16.mxu1 %v19809_v22  ;;  %v19897_v21 = vld [vmem:[#allocation2 + $0xb28] ss:$28 sps:$4 sm:$0xff]   ;;  %v19900_v22 = vld [vmem:[#allocation2 + $0xb30] ss:$28 sps:$4 sm:$0xff]  }
 0x149   :  { %2805 = vmatpush1.bf16.msra.mxu0 %v19804_v23  ;;  %2977 = vmatpush1.bf16.msra.mxu1 %v19807_v24  ;;  %v19905_v23 = vld [vmem:[#allocation2 + $0xb64] ss:$28 sps:$4 sm:$0xff]   ;;  %v19908_v24 = vld [vmem:[#allocation2 + $0xb6c] ss:$28 sps:$4 sm:$0xff]  }
 0x14a   :  { %2806 = vmatprep.subr.bf16.mxu0 %v19812_v25  ;;  %2978 = vmatprep.subr.bf16.mxu1 %v19815_v26  ;;  %v19903_v25 = vld [vmem:[#allocation2 + $0xb60] ss:$28 sps:$4 sm:$0xff]   ;;  %v19906_v26 = vld [vmem:[#allocation2 + $0xb68] ss:$28 sps:$4 sm:$0xff]  }
 0x14d   :  { %2807 = vmatpush1.bf16.msra.mxu0 %v19810_v27  ;;  %2979 = vmatpush1.bf16.msra.mxu1 %v19813_v28  ;;  %v19911_v27 = vld [vmem:[#allocation2 + $0xb9c] ss:$28 sps:$4 sm:$0xff]   ;;  %v19914_v28 = vld [vmem:[#allocation2 + $0xba4] ss:$28 sps:$4 sm:$0xff]  }
 0x14e   :  { %2808 = vmatprep.subr.bf16.mxu0 %v19818_v29  ;;  %2980 = vmatprep.subr.bf16.mxu1 %v19821_v30  ;;  %v19909_v29 = vld [vmem:[#allocation2 + $0xb98] ss:$28 sps:$4 sm:$0xff]   ;;  %v19912_v30 = vld [vmem:[#allocation2 + $0xba0] ss:$28 sps:$4 sm:$0xff]  }
 0x151   :  { %2809 = vmatpush1.bf16.msra.mxu0 %v19816_v31  ;;  %2981 = vmatpush1.bf16.msra.mxu1 %v19819_v32  ;;  %v19917_v31 = vld [vmem:[#allocation2 + $0xbd4] ss:$28 sps:$4 sm:$0xff]   ;;  %v19920_v32 = vld [vmem:[#allocation2 + $0xbdc] ss:$28 sps:$4 sm:$0xff]  }
 0x152   :  { %2810 = vmatprep.subr.bf16.mxu0 %v19824_v33  ;;  %2982 = vmatprep.subr.bf16.mxu1 %v19827_v34  ;;  %v19915_v33 = vld [vmem:[#allocation2 + $0xbd0] ss:$28 sps:$4 sm:$0xff]   ;;  %v19918_v34 = vld [vmem:[#allocation2 + $0xbd8] ss:$28 sps:$4 sm:$0xff]  }
 0x155   :  { %2811 = vmatpush1.bf16.msra.mxu0 %v19822_v35  ;;  %2983 = vmatpush1.bf16.msra.mxu1 %v19825_v36  ;;  %v19923_v35 = vld [vmem:[#allocation2 + $0xc0c] ss:$28 sps:$4 sm:$0xff]   ;;  %v19926_v36 = vld [vmem:[#allocation2 + $0xc14] ss:$28 sps:$4 sm:$0xff]  }
 0x156   :  { %2812 = vmatprep.subr.bf16.mxu0 %v19830_v37  ;;  %2984 = vmatprep.subr.bf16.mxu1 %v19833_v38  ;;  %v19921_v37 = vld [vmem:[#allocation2 + $0xc08] ss:$28 sps:$4 sm:$0xff]   ;;  %v19924_v38 = vld [vmem:[#allocation2 + $0xc10] ss:$28 sps:$4 sm:$0xff]  }
 0x159   :  { %2813 = vmatpush1.bf16.msra.mxu0 %v19828_v39  ;;  %2985 = vmatpush1.bf16.msra.mxu1 %v19831_v40  ;;  %v19930_v39 = vld [vmem:[#allocation2 + $0x14] ss:$28 sps:$4 sm:$0xff]  }
 0x15a   :  { %2814 = vmatprep.subr.bf16.mxu0 %v19836_v41  ;;  %2986 = vmatprep.subr.bf16.mxu1 %v19839_v42  ;;  %v19931_v40 = vld [vmem:[#allocation2 + $0x1d8] ss:$28 sps:$4 sm:$0xff]   ;;  %v19928_v42 = vld [vmem:[#allocation2 + $0x10] ss:$28 sps:$4 sm:$0xff]  }
 0x15b   :  { %v23060_v41 = vld [vmem:[%s23775_s0 + $0x18] ss:$28 sps:$4 sm:$0xff]  }
 0x15d   :  { %2815 = vmatpush1.bf16.msra.mxu0 %v19834_v43  ;;  %2987 = vmatpush1.bf16.msra.mxu1 %v19837_v44  ;;  %v19932_v43 = vld [vmem:[#allocation2 + $0x18] ss:$28 sps:$4 sm:$0xff]   ;;  %v19935_v44 = vld [vmem:[#allocation2 + $0x4c] ss:$28 sps:$4 sm:$0xff]  }
 0x15e   :  { %2816 = vmatprep.subr.bf16.mxu0 %v19842_v45  ;;  %2988 = vmatprep.subr.bf16.mxu1 %v19845_v46  ;;  %v19936_v45 = vld [vmem:[#allocation2 + $0x210] ss:$28 sps:$4 sm:$0xff]   ;;  %v19933_v46 = vld [vmem:[#allocation2 + $0x48] ss:$28 sps:$4 sm:$0xff]  }
 0x161   :  { %2817 = vmatpush1.bf16.msra.mxu0 %v19840_v47  ;;  %2989 = vmatpush1.bf16.msra.mxu1 %v19843_v48  ;;  %v19937_v47 = vld [vmem:[#allocation2 + $0x50] ss:$28 sps:$4 sm:$0xff]   ;;  %v19940_v48 = vld [vmem:[#allocation2 + $0x84] ss:$28 sps:$4 sm:$0xff]  }
 0x162   :  { %2818 = vmatprep.subr.bf16.mxu0 %v19848_v49  ;;  %2990 = vmatprep.subr.bf16.mxu1 %v19851_v50  ;;  %v19941_v49 = vld [vmem:[#allocation2 + $0x248] ss:$28 sps:$4 sm:$0xff]   ;;  %v19938_v50 = vld [vmem:[#allocation2 + $0x80] ss:$28 sps:$4 sm:$0xff]  }
 0x165   :  { %2819 = vmatpush1.bf16.msra.mxu0 %v19846_v51  ;;  %2991 = vmatpush1.bf16.msra.mxu1 %v19849_v52  ;;  %v23067_v51 = vld [vmem:[%s23775_s0 + $0x4] ss:$28 sps:$4 sm:$0xff]  }
 0x166   :  { %2820 = vmatprep.subr.bf16.mxu0 %v19854_v53  ;;  %2992 = vmatprep.subr.bf16.mxu1 %v19857_v54  ;;  %v19942_v52 = vld [vmem:[#allocation2 + $0x88] ss:$28 sps:$4 sm:$0xff]   ;;  %v19945_v53 = vld [vmem:[#allocation2 + $0xbc] ss:$28 sps:$4 sm:$0xff]  }
 0x167   :  { %v19946_v54 = vld [vmem:[#allocation2 + $0x280] ss:$28 sps:$4 sm:$0xff]  }
 0x169   :  { %2821 = vmatpush1.bf16.msra.mxu0 %v19852_v55  ;;  %2993 = vmatpush1.bf16.msra.mxu1 %v19855_v56  ;;  %v19943_v55 = vld [vmem:[#allocation2 + $0xb8] ss:$28 sps:$4 sm:$0xff]   ;;  %v19947_v56 = vld [vmem:[#allocation2 + $0xc0] ss:$28 sps:$4 sm:$0xff]  }
 0x16a   :  { %2822 = vmatprep.subr.bf16.mxu0 %v19860_v57  ;;  %2994 = vmatprep.subr.bf16.mxu1 %v19863_v58  ;;  %v19950_v57 = vld [vmem:[#allocation2 + $0xf4] ss:$28 sps:$4 sm:$0xff]  }
 0x16b   :  { %v19951_v58 = vld [vmem:[#allocation2 + $0x2b8] ss:$28 sps:$4 sm:$0xff]  }
 0x16d   :  { %2823 = vmatpush1.bf16.msra.mxu0 %v19858_v59  ;;  %2995 = vmatpush1.bf16.msra.mxu1 %v19861_v60  ;;  %v19948_v59 = vld [vmem:[#allocation2 + $0xf0] ss:$28 sps:$4 sm:$0xff]   ;;  %v19952_v60 = vld [vmem:[#allocation2 + $0xf8] ss:$28 sps:$4 sm:$0xff]  }
 0x16e   :  { %2824 = vmatprep.subr.bf16.mxu0 %v19866_v61  ;;  %2996 = vmatprep.subr.bf16.mxu1 %v19869_v62  ;;  %v19955_v61 = vld [vmem:[#allocation2 + $0x12c] ss:$28 sps:$4 sm:$0xff]  }
 0x16f   :  { %v19956_v62 = vld [vmem:[#allocation2 + $0x2f0] ss:$28 sps:$4 sm:$0xff]  }
 0x171   :  { %2825 = vmatpush1.bf16.msra.mxu0 %v19864_v63  ;;  %2997 = vmatpush1.bf16.msra.mxu1 %v19867_v0  ;;  %v19953_v63 = vld [vmem:[#allocation2 + $0x128] ss:$28 sps:$4 sm:$0xff]   ;;  %v19957_v0 = vld [vmem:[#allocation2 + $0x130] ss:$28 sps:$4 sm:$0xff]  }
 0x172   :  { %2826 = vmatprep.subr.bf16.mxu0 %v19872_v1  ;;  %2998 = vmatprep.subr.bf16.mxu1 %v19875_v2  ;;  %v19960_v1 = vld [vmem:[#allocation2 + $0x164] ss:$28 sps:$4 sm:$0xff]  }
 0x173   :  { %v19961_v2 = vld [vmem:[#allocation2 + $0x328] ss:$28 sps:$4 sm:$0xff]  }
 0x175   :  { %2827 = vmatpush1.bf16.msra.mxu0 %v19870_v3  ;;  %2999 = vmatpush1.bf16.msra.mxu1 %v19873_v4  ;;  %v19958_v3 = vld [vmem:[#allocation2 + $0x160] ss:$28 sps:$4 sm:$0xff]   ;;  %v19962_v4 = vld [vmem:[#allocation2 + $0x168] ss:$28 sps:$4 sm:$0xff]  }
 0x176   :  { %2839 = vmatprep.subr.bf16.mxu0 %v19880_v5  ;;  %3011 = vmatprep.subr.bf16.mxu1 %v19883_v6  ;;  %v19965_v5 = vld [vmem:[#allocation2 + $0x19c] ss:$28 sps:$4 sm:$0xff]  }
 0x177   :  { %v19966_v6 = vld [vmem:[#allocation2 + $0x360] ss:$28 sps:$4 sm:$0xff]  }
 0x178   :  { %2829 = vmatmul.mubr.bf16.vlgmr.msra.gmra.mrb[0].mxu0 %v23051_v9  ;;  %3001 = vmatmul.mubr.bf16.vlgmr.msra.gmra.mrb[0].mxu1 %v23051_v9 }
 0x179   :  { %2840 = vmatpush1.bf16.msra.mxu0 %v19878_v7  ;;  %3012 = vmatpush1.bf16.msra.mxu1 %v19881_v8  ;;  %v19963_v7 = vld [vmem:[#allocation2 + $0x198] ss:$28 sps:$4 sm:$0xff]   ;;  %v19967_v8 = vld [vmem:[#allocation2 + $0x1a0] ss:$28 sps:$4 sm:$0xff]  }
 0x17a   :  { %2841 = vmatprep.subr.bf16.mxu0 %v19887_v10  ;;  %3013 = vmatprep.subr.bf16.mxu1 %v19890_v11  ;;  %v19970_v10 = vld [vmem:[#allocation2 + $0x1d4] ss:$28 sps:$4 sm:$0xff]  }
 0x17b   :  { %2871 = vmatprep.mubr.bf16.mxu0 %v22841_v17  ;;  %3043 = vmatprep.mubr.bf16.mxu1 %v22841_v17  ;;  %v19971_v11 = vld [vmem:[#allocation2 + $0x558] ss:$28 sps:$4 sm:$0xff]  }
 0x17d   :  { %2842 = vmatpush1.bf16.msra.mxu0 %v19885_v12  ;;  %3014 = vmatpush1.bf16.msra.mxu1 %v19888_v13  ;;  %v19968_v12 = vld [vmem:[#allocation2 + $0x1d0] ss:$28 sps:$4 sm:$0xff]   ;;  %v19972_v13 = vld [vmem:[#allocation2 + $0x398] ss:$28 sps:$4 sm:$0xff]  }
 0x17e   :  { %2843 = vmatprep.subr.bf16.mxu0 %v19893_v14  ;;  %3015 = vmatprep.subr.bf16.mxu1 %v19896_v15  ;;  %v19975_v14 = vld [vmem:[#allocation2 + $0x20c] ss:$28 sps:$4 sm:$0xff]  }
 0x17f   :  { %v19976_v15 = vld [vmem:[#allocation2 + $0x590] ss:$28 sps:$4 sm:$0xff]  }
 0x181   :  { %2844 = vmatpush1.bf16.msra.mxu0 %v19891_v16  ;;  %3016 = vmatpush1.bf16.msra.mxu1 %v19894_v18  ;;  %v23074_v16 = vld [vmem:[%s23775_s0] ss:$28 sps:$4 sm:$0xff]   ;;  %v19973_v18 = vld [vmem:[#allocation2 + $0x208] ss:$28 sps:$4 sm:$0xff]  }
 0x182   :  { %2845 = vmatprep.subr.bf16.mxu0 %v19899_v19  ;;  %3017 = vmatprep.subr.bf16.mxu1 %v19902_v20  ;;  %v19977_v19 = vld [vmem:[#allocation2 + $0x3d0] ss:$28 sps:$4 sm:$0xff]   ;;  %v19980_v20 = vld [vmem:[#allocation2 + $0x244] ss:$28 sps:$4 sm:$0xff]  }
 0x185   :  { %2846 = vmatpush1.bf16.msra.mxu0 %v19897_v21  ;;  %3018 = vmatpush1.bf16.msra.mxu1 %v19900_v22  ;;  %v19981_v21 = vld [vmem:[#allocation2 + $0x5c8] ss:$28 sps:$4 sm:$0xff]  }
 0x186   :  { %2847 = vmatprep.subr.bf16.mxu0 %v19905_v23  ;;  %3019 = vmatprep.subr.bf16.mxu1 %v19908_v24  ;;  %v23080_v22 = vld [vmem:[%s23775_s0 + $0xc] ss:$28 sps:$4 sm:$0xff]   ;;  %v19978_v23 = vld [vmem:[#allocation2 + $0x240] ss:$28 sps:$4 sm:$0xff]  }
 0x187   :  { %v19982_v24 = vld [vmem:[#allocation2 + $0x408] ss:$28 sps:$4 sm:$0xff]  }
 0x189   :  { %2848 = vmatpush1.bf16.msra.mxu0 %v19903_v25  ;;  %3020 = vmatpush1.bf16.msra.mxu1 %v19906_v26  ;;  %v19985_v25 = vld [vmem:[#allocation2 + $0x27c] ss:$28 sps:$4 sm:$0xff]  }
 0x18a   :  { %2849 = vmatprep.subr.bf16.mxu0 %v19911_v27  ;;  %3021 = vmatprep.subr.bf16.mxu1 %v19914_v28  ;;  %v19986_v26 = vld [vmem:[#allocation2 + $0x600] ss:$28 sps:$4 sm:$0xff]   ;;  %v19983_v27 = vld [vmem:[#allocation2 + $0x278] ss:$28 sps:$4 sm:$0xff]  }
 0x18b   :  { %v19987_v28 = vld [vmem:[#allocation2 + $0x440] ss:$28 sps:$4 sm:$0xff]  }
 0x18d   :  { %2850 = vmatpush1.bf16.msra.mxu0 %v19909_v29  ;;  %3022 = vmatpush1.bf16.msra.mxu1 %v19912_v30  ;;  %v19990_v29 = vld [vmem:[#allocation2 + $0x2b4] ss:$28 sps:$4 sm:$0xff]  }
 0x18e   :  { %2851 = vmatprep.subr.bf16.mxu0 %v19917_v31  ;;  %3023 = vmatprep.subr.bf16.mxu1 %v19920_v32  ;;  %v19991_v30 = vld [vmem:[#allocation2 + $0x638] ss:$28 sps:$4 sm:$0xff]   ;;  %v19988_v31 = vld [vmem:[#allocation2 + $0x2b0] ss:$28 sps:$4 sm:$0xff]  }
 0x18f   :  { %v19992_v32 = vld [vmem:[#allocation2 + $0x478] ss:$28 sps:$4 sm:$0xff]  }
 0x191   :  { %2852 = vmatpush1.bf16.msra.mxu0 %v19915_v33  ;;  %3024 = vmatpush1.bf16.msra.mxu1 %v19918_v34  ;;  %v19995_v33 = vld [vmem:[#allocation2 + $0x2ec] ss:$28 sps:$4 sm:$0xff]  }
 0x192   :  { %2853 = vmatprep.subr.bf16.mxu0 %v19923_v35  ;;  %3025 = vmatprep.subr.bf16.mxu1 %v19926_v36  ;;  %v19996_v34 = vld [vmem:[#allocation2 + $0x670] ss:$28 sps:$4 sm:$0xff]   ;;  %v19993_v35 = vld [vmem:[#allocation2 + $0x2e8] ss:$28 sps:$4 sm:$0xff]  }
 0x193   :  { %v19997_v36 = vld [vmem:[#allocation2 + $0x4b0] ss:$28 sps:$4 sm:$0xff]  }
 0x195   :  { %2854 = vmatpush1.bf16.msra.mxu0 %v19921_v37  ;;  %3026 = vmatpush1.bf16.msra.mxu1 %v19924_v38  ;;  %v20000_v37 = vld [vmem:[#allocation2 + $0x324] ss:$28 sps:$4 sm:$0xff]  }
 0x196   :  { %3054 = vmatprep.subr.bf16.mxu0 %v19930_v39  ;;  %18847 = vmatprep.subr.bf16.mxu1 %v19931_v40  ;;  %v20001_v38 = vld [vmem:[#allocation2 + $0x6a8] ss:$28 sps:$4 sm:$0xff]   ;;  %v19998_v39 = vld [vmem:[#allocation2 + $0x320] ss:$28 sps:$4 sm:$0xff]  }
 0x197   :  { %v20002_v40 = vld [vmem:[#allocation2 + $0x4e8] ss:$28 sps:$4 sm:$0xff]  }
 0x198   :  { %2872 = vmatmul.mubr.bf16.vlgmr.msra.gmra.mrb[0].mxu0 %v23060_v41  ;;  %3044 = vmatmul.mubr.bf16.vlgmr.msra.gmra.mrb[0].mxu1 %v23060_v41 }
 0x199   :  { %3055 = vmatpush1.bf16.msra.mxu0 %v19928_v42  ;;  %18848 = vmatpush3.bf16.msra.mxu1 %v19932_v43  ;;  %v20005_v42 = vld [vmem:[#allocation2 + $0x35c] ss:$28 sps:$4 sm:$0xff]  }
 0x19a   :  { %3056 = vmatprep.subr.bf16.mxu0 %v19935_v44  ;;  %18849 = vmatprep.subr.bf16.mxu1 %v19936_v45  ;;  %v20006_v43 = vld [vmem:[#allocation2 + $0x6e0] ss:$28 sps:$4 sm:$0xff]   ;;  %v20003_v44 = vld [vmem:[#allocation2 + $0x358] ss:$28 sps:$4 sm:$0xff]  }
 0x19b   :  { %3258 = vmatprep.mubr.bf16.mxu1 %v23067_v51  ;;  %3086 = vmatprep.mubr.bf16.mxu0 %v23067_v51  ;;  %v20007_v45 = vld [vmem:[#allocation2 + $0x520] ss:$28 sps:$4 sm:$0xff]  }
 0x19d   :  { %3057 = vmatpush1.bf16.msra.mxu0 %v19933_v46  ;;  %18850 = vmatpush3.bf16.msra.mxu1 %v19937_v47  ;;  %v20010_v46 = vld [vmem:[#allocation2 + $0x394] ss:$28 sps:$4 sm:$0xff]  }
 0x19e   :  { %3058 = vmatprep.subr.bf16.mxu0 %v19940_v48  ;;  %18851 = vmatprep.subr.bf16.mxu1 %v19941_v49  ;;  %v20011_v47 = vld [vmem:[#allocation2 + $0x8d8] ss:$28 sps:$4 sm:$0xff]   ;;  %v20008_v48 = vld [vmem:[#allocation2 + $0x390] ss:$28 sps:$4 sm:$0xff]  }
 0x19f   :  { %v20012_v49 = vld [vmem:[#allocation2 + $0x718] ss:$28 sps:$4 sm:$0xff]  }
 0x1a1   :  { %3059 = vmatpush1.bf16.msra.mxu0 %v19938_v50  ;;  %18852 = vmatpush3.bf16.msra.mxu1 %v19942_v52  ;;  %v20015_v50 = vld [vmem:[#allocation2 + $0x3cc] ss:$28 sps:$4 sm:$0xff]  }
 0x1a2   :  { %3060 = vmatprep.subr.bf16.mxu0 %v19945_v53  ;;  %18853 = vmatprep.subr.bf16.mxu1 %v19946_v54  ;;  %v20016_v52 = vld [vmem:[#allocation2 + $0x910] ss:$28 sps:$4 sm:$0xff]   ;;  %v23086_v53 = vld [vmem:[%s23775_s0 + $0x8] ss:$28 sps:$4 sm:$0xff]  }
 0x1a3   :  { %v20013_v54 = vld [vmem:[#allocation2 + $0x3c8] ss:$28 sps:$4 sm:$0xff]  }
 0x1a5   :  { %3061 = vmatpush1.bf16.msra.mxu0 %v19943_v55  ;;  %18854 = vmatpush3.bf16.msra.mxu1 %v19947_v56  ;;  %v20017_v55 = vld [vmem:[#allocation2 + $0x750] ss:$28 sps:$4 sm:$0xff]   ;;  %v20020_v56 = vld [vmem:[#allocation2 + $0x404] ss:$28 sps:$4 sm:$0xff]  }
 0x1a6   :  { %3062 = vmatprep.subr.bf16.mxu0 %v19950_v57  ;;  %18855 = vmatprep.subr.bf16.mxu1 %v19951_v58  ;;  %v20021_v57 = vld [vmem:[#allocation2 + $0x948] ss:$28 sps:$4 sm:$0xff]   ;;  %v23093_v58 = vld [vmem:[%s23775_s0 + $0x14] ss:$28 sps:$4 sm:$0xff]  }
 0x1a9   :  { %3063 = vmatpush1.bf16.msra.mxu0 %v19948_v59  ;;  %18856 = vmatpush3.bf16.msra.mxu1 %v19952_v60  ;;  %v20018_v59 = vld [vmem:[#allocation2 + $0x400] ss:$28 sps:$4 sm:$0xff]   ;;  %v20022_v60 = vld [vmem:[#allocation2 + $0x788] ss:$28 sps:$4 sm:$0xff]  }
 0x1aa   :  { %3064 = vmatprep.subr.bf16.mxu0 %v19955_v61  ;;  %18857 = vmatprep.subr.bf16.mxu1 %v19956_v62  ;;  %v20025_v61 = vld [vmem:[#allocation2 + $0x43c] ss:$28 sps:$4 sm:$0xff]  }
 0x1ab   :  { %v20026_v62 = vld [vmem:[#allocation2 + $0x980] ss:$28 sps:$4 sm:$0xff]  }
 0x1ad   :  { %3065 = vmatpush1.bf16.msra.mxu0 %v19953_v63  ;;  %18858 = vmatpush3.bf16.msra.mxu1 %v19957_v0  ;;  %v20023_v63 = vld [vmem:[#allocation2 + $0x438] ss:$28 sps:$4 sm:$0xff]   ;;  %v20027_v0 = vld [vmem:[#allocation2 + $0x7c0] ss:$28 sps:$4 sm:$0xff]  }
 0x1ae   :  { %3066 = vmatprep.subr.bf16.mxu0 %v19960_v1  ;;  %18859 = vmatprep.subr.bf16.mxu1 %v19961_v2  ;;  %v20030_v1 = vld [vmem:[#allocation2 + $0x474] ss:$28 sps:$4 sm:$0xff]  }
 0x1af   :  { %v20031_v2 = vld [vmem:[#allocation2 + $0x9b8] ss:$28 sps:$4 sm:$0xff]  }
 0x1b1   :  { %3067 = vmatpush1.bf16.msra.mxu0 %v19958_v3  ;;  %18860 = vmatpush3.bf16.msra.mxu1 %v19962_v4  ;;  %v20028_v3 = vld [vmem:[#allocation2 + $0x470] ss:$28 sps:$4 sm:$0xff]   ;;  %v20032_v4 = vld [vmem:[#allocation2 + $0x7f8] ss:$28 sps:$4 sm:$0xff]  }
 0x1b2   :  { %3068 = vmatprep.subr.bf16.mxu0 %v19965_v5  ;;  %18861 = vmatprep.subr.bf16.mxu1 %v19966_v6  ;;  %v20035_v5 = vld [vmem:[#allocation2 + $0x4ac] ss:$28 sps:$4 sm:$0xff]  }
 0x1b3   :  { %v20036_v6 = vld [vmem:[#allocation2 + $0x9f0] ss:$28 sps:$4 sm:$0xff]  }
 0x1b5   :  { %3069 = vmatpush1.bf16.msra.mxu0 %v19963_v7  ;;  %18862 = vmatpush3.bf16.msra.mxu1 %v19967_v8  ;;  %v20033_v7 = vld [vmem:[#allocation2 + $0x4a8] ss:$28 sps:$4 sm:$0xff]   ;;  %v20037_v8 = vld [vmem:[#allocation2 + $0x830] ss:$28 sps:$4 sm:$0xff]  }
 0x1b6   :  { %3070 = vmatprep.subr.bf16.mxu0 %v19970_v10  ;;  %18869 = vmatprep.subr.bf16.mxu1 %v19971_v11  ;;  %v20040_v10 = vld [vmem:[#allocation2 + $0x4e4] ss:$28 sps:$4 sm:$0xff]  }
 0x1b7   :  { %v20041_v11 = vld [vmem:[#allocation2 + $0xa28] ss:$28 sps:$4 sm:$0xff]  }
 0x1b8   :  { %3259 = vmatmul.mubr.bf16.vlgmr.msra.gmra.mrb[4].mxu1 %v23074_v16 }
 0x1b9   :  { %3071 = vmatpush1.bf16.msra.mxu0 %v19968_v12  ;;  %18870 = vmatpush3.bf16.msra.mxu1 %v19972_v13  ;;  %v20038_v12 = vld [vmem:[#allocation2 + $0x4e0] ss:$28 sps:$4 sm:$0xff]   ;;  %v20042_v13 = vld [vmem:[#allocation2 + $0x868] ss:$28 sps:$4 sm:$0xff]  }
 0x1ba   :  { %3072 = vmatprep.subr.bf16.mxu0 %v19975_v14  ;;  %18871 = vmatprep.subr.bf16.mxu1 %v19976_v15  ;;  %v20045_v14 = vld [vmem:[#allocation2 + $0x51c] ss:$28 sps:$4 sm:$0xff]  }
 0x1bb   :  { %3299 = vmatprep.mubr.bf16.mxu1 %v23080_v22  ;;  %v20046_v15 = vld [vmem:[#allocation2 + $0xa60] ss:$28 sps:$4 sm:$0xff]  }
 0x1bd   :  { %3073 = vmatpush1.bf16.msra.mxu0 %v19973_v18  ;;  %18872 = vmatpush3.bf16.msra.mxu1 %v19977_v19  ;;  %v20047_v18 = vld [vmem:[#allocation2 + $0x8a0] ss:$28 sps:$4 sm:$0xff]   ;;  %v20050_v19 = vld [vmem:[#allocation2 + $0x554] ss:$28 sps:$4 sm:$0xff]  }
 0x1be   :  { %3074 = vmatprep.subr.bf16.mxu0 %v19980_v20  ;;  %18873 = vmatprep.subr.bf16.mxu1 %v19981_v21  ;;  %v20048_v20 = vld [vmem:[#allocation2 + $0x550] ss:$28 sps:$4 sm:$0xff]   ;;  %v20051_v21 = vld [vmem:[#allocation2 + $0xa98] ss:$28 sps:$4 sm:$0xff]  }
 0x1c1   :  { %3075 = vmatpush1.bf16.msra.mxu0 %v19978_v23  ;;  %18874 = vmatpush3.bf16.msra.mxu1 %v19982_v24  ;;  %v20054_v23 = vld [vmem:[#allocation2 + $0x58c] ss:$28 sps:$4 sm:$0xff]  }
 0x1c2   :  { %3076 = vmatprep.subr.bf16.mxu0 %v19985_v25  ;;  %18875 = vmatprep.subr.bf16.mxu1 %v19986_v26  ;;  %v20052_v24 = vld [vmem:[#allocation2 + $0x588] ss:$28 sps:$4 sm:$0xff]   ;;  %v20055_v25 = vld [vmem:[#allocation2 + $0xad0] ss:$28 sps:$4 sm:$0xff]  }
 0x1c3   :  { %v20058_v26 = vld [vmem:[#allocation2 + $0x5c4] ss:$28 sps:$4 sm:$0xff]  }
 0x1c5   :  { %3077 = vmatpush1.bf16.msra.mxu0 %v19983_v27  ;;  %18876 = vmatpush3.bf16.msra.mxu1 %v19987_v28  ;;  %v20056_v27 = vld [vmem:[#allocation2 + $0x5c0] ss:$28 sps:$4 sm:$0xff]   ;;  %v20059_v28 = vld [vmem:[#allocation2 + $0xb08] ss:$28 sps:$4 sm:$0xff]  }
 0x1c6   :  { %3078 = vmatprep.subr.bf16.mxu0 %v19990_v29  ;;  %18877 = vmatprep.subr.bf16.mxu1 %v19991_v30  ;;  %v20060_v29 = vld [vmem:[#allocation2 + $0x5f8] ss:$28 sps:$4 sm:$0xff]   ;;  %v20063_v30 = vld [vmem:[#allocation2 + $0xb40] ss:$28 sps:$4 sm:$0xff]  }
 0x1c9   :  { %3079 = vmatpush1.bf16.msra.mxu0 %v19988_v31  ;;  %18878 = vmatpush3.bf16.msra.mxu1 %v19992_v32  ;;  %v20066_v31 = vld [vmem:[#allocation2 + $0x634] ss:$28 sps:$4 sm:$0xff]  }
 0x1ca   :  { %3080 = vmatprep.subr.bf16.mxu0 %v19995_v33  ;;  %18879 = vmatprep.subr.bf16.mxu1 %v19996_v34  ;;  %v20064_v32 = vld [vmem:[#allocation2 + $0x630] ss:$28 sps:$4 sm:$0xff]   ;;  %v20067_v33 = vld [vmem:[#allocation2 + $0xb78] ss:$28 sps:$4 sm:$0xff]  }
 0x1cb   :  { %v20070_v34 = vld [vmem:[#allocation2 + $0x66c] ss:$28 sps:$4 sm:$0xff]  }
 0x1cd   :  { %3081 = vmatpush1.bf16.msra.mxu0 %v19993_v35  ;;  %18880 = vmatpush3.bf16.msra.mxu1 %v19997_v36  ;;  %v20068_v35 = vld [vmem:[#allocation2 + $0x668] ss:$28 sps:$4 sm:$0xff]   ;;  %v20071_v36 = vld [vmem:[#allocation2 + $0xbb0] ss:$28 sps:$4 sm:$0xff]  }
 0x1ce   :  { %3082 = vmatprep.subr.bf16.mxu0 %v20000_v37  ;;  %18881 = vmatprep.subr.bf16.mxu1 %v20001_v38  ;;  %v20074_v37 = vld [vmem:[#allocation2 + $0x6a4] ss:$28 sps:$4 sm:$0xff]  }
 0x1cf   :  { %v20072_v38 = vld [vmem:[#allocation2 + $0x6a0] ss:$28 sps:$4 sm:$0xff]  }
 0x1d1   :  { %3083 = vmatpush1.bf16.msra.mxu0 %v19998_v39  ;;  %18882 = vmatpush3.bf16.msra.mxu1 %v20002_v40  ;;  %v20075_v39 = vld [vmem:[#allocation2 + $0xbe8] ss:$28 sps:$4 sm:$0xff]   ;;  %v20078_v40 = vld [vmem:[#allocation2 + $0x6dc] ss:$28 sps:$4 sm:$0xff]  }
 0x1d2   :  { %3084 = vmatprep.subr.bf16.mxu0 %v20005_v42  ;;  %18883 = vmatprep.subr.bf16.mxu1 %v20006_v43  ;;  %v20076_v42 = vld [vmem:[#allocation2 + $0x6d8] ss:$28 sps:$4 sm:$0xff]   ;;  %v20079_v43 = vld [vmem:[#allocation2 + $0xc20] ss:$28 sps:$4 sm:$0xff]  }
 0x1d5   :  { %3085 = vmatpush1.bf16.msra.mxu0 %v20003_v44  ;;  %18884 = vmatpush3.bf16.msra.mxu1 %v20007_v45  ;;  %v20082_v44 = vld [vmem:[#allocation2 + $0x714] ss:$28 sps:$4 sm:$0xff]   ;;  %v20085_v45 = vld [vmem:[#allocation2 + $0xc44] ss:$28 sps:$4 sm:$0xff]  }
 0x1d6   :  { %3097 = vmatprep.subr.bf16.mxu0 %v20010_v46  ;;  %18891 = vmatprep.subr.bf16.mxu1 %v20011_v47  ;;  %v20080_v46 = vld [vmem:[#allocation2 + $0x710] ss:$28 sps:$4 sm:$0xff]   ;;  %v20083_v47 = vld [vmem:[#allocation2 + $0xc40] ss:$28 sps:$4 sm:$0xff]  }
 0x1d8   :  { %3300 = vmatmul.mubr.bf16.vlgmr.msra.gmra.mrb[8].mxu1 %v23086_v53  ;;  %3087 = vmatmul.mubr.bf16.vlgmr.msra.gmra.mrb[4].mxu0 %v23074_v16  ;;  %v20043_v16 = vld [vmem:[#allocation2 + $0x518] ss:$28 sps:$4 sm:$0xff]  }
 0x1d9   :  { %3098 = vmatpush1.bf16.msra.mxu0 %v20008_v48  ;;  %18892 = vmatpush3.bf16.msra.mxu1 %v20012_v49  ;;  %v20088_v48 = vld [vmem:[#allocation2 + $0x74c] ss:$28 sps:$4 sm:$0xff]   ;;  %v20091_v49 = vld [vmem:[#allocation2 + $0xc7c] ss:$28 sps:$4 sm:$0xff]  }
 0x1da   :  { %3099 = vmatprep.subr.bf16.mxu0 %v20015_v50  ;;  %18893 = vmatprep.subr.bf16.mxu1 %v20016_v52  ;;  %v20086_v50 = vld [vmem:[#allocation2 + $0x748] ss:$28 sps:$4 sm:$0xff]   ;;  %v20089_v52 = vld [vmem:[#allocation2 + $0xc78] ss:$28 sps:$4 sm:$0xff]  }
 0x1db   :  { %3340 = vmatprep.mubr.bf16.mxu1 %v23093_v58  ;;  %3129 = vmatprep.mubr.bf16.mxu0 %v23080_v22  ;;  %v22842_v22 = vmov 0.0  }
 0x1dd   :  { %3100 = vmatpush1.bf16.msra.mxu0 %v20013_v54  ;;  %18894 = vmatpush3.bf16.msra.mxu1 %v20017_v55  ;;  %v20094_v54 = vld [vmem:[#allocation2 + $0x784] ss:$28 sps:$4 sm:$0xff]   ;;  %v20097_v55 = vld [vmem:[#allocation2 + $0xcb4] ss:$28 sps:$4 sm:$0xff]  }
 0x1de   :  { %3101 = vmatprep.subr.bf16.mxu0 %v20020_v56  ;;  %18895 = vmatprep.subr.bf16.mxu1 %v20021_v57  ;;  %v20092_v56 = vld [vmem:[#allocation2 + $0x780] ss:$28 sps:$4 sm:$0xff]   ;;  %v20095_v57 = vld [vmem:[#allocation2 + $0xcb0] ss:$28 sps:$4 sm:$0xff]  }
 0x1e1   :  { %3102 = vmatpush1.bf16.msra.mxu0 %v20018_v59  ;;  %18896 = vmatpush3.bf16.msra.mxu1 %v20022_v60  ;;  %v20098_v59 = vld [vmem:[#allocation2 + $0x7b8] ss:$28 sps:$4 sm:$0xff]   ;;  %v20101_v60 = vld [vmem:[#allocation2 + $0xce8] ss:$28 sps:$4 sm:$0xff]  }
 0x1e2   :  { %3103 = vmatprep.subr.bf16.mxu0 %v20025_v61  ;;  %18897 = vmatprep.subr.bf16.mxu1 %v20026_v62  ;;  %v20106_v61 = vld [vmem:[#allocation2 + $0x7f4] ss:$28 sps:$4 sm:$0xff]   ;;  %v20109_v62 = vld [vmem:[#allocation2 + $0xd24] ss:$28 sps:$4 sm:$0xff]  }
 0x1e5   :  { %3104 = vmatpush1.bf16.msra.mxu0 %v20023_v63  ;;  %18898 = vmatpush3.bf16.msra.mxu1 %v20027_v0  ;;  %v20112_v63 = vld [vmem:[#allocation2 + $0x82c] ss:$28 sps:$4 sm:$0xff]   ;;  %v20115_v0 = vld [vmem:[#allocation2 + $0xd5c] ss:$28 sps:$4 sm:$0xff]  }
 0x1e6   :  { %3105 = vmatprep.subr.bf16.mxu0 %v20030_v1  ;;  %18899 = vmatprep.subr.bf16.mxu1 %v20031_v2  ;;  %v20110_v1 = vld [vmem:[#allocation2 + $0x828] ss:$28 sps:$4 sm:$0xff]   ;;  %v20113_v2 = vld [vmem:[#allocation2 + $0xd58] ss:$28 sps:$4 sm:$0xff]  }
 0x1e9   :  { %3106 = vmatpush1.bf16.msra.mxu0 %v20028_v3  ;;  %18900 = vmatpush3.bf16.msra.mxu1 %v20032_v4  ;;  %v20118_v3 = vld [vmem:[#allocation2 + $0x864] ss:$28 sps:$4 sm:$0xff]   ;;  %v20121_v4 = vld [vmem:[#allocation2 + $0xd94] ss:$28 sps:$4 sm:$0xff]  }
 0x1ea   :  { %3107 = vmatprep.subr.bf16.mxu0 %v20035_v5  ;;  %18901 = vmatprep.subr.bf16.mxu1 %v20036_v6  ;;  %v20116_v5 = vld [vmem:[#allocation2 + $0x860] ss:$28 sps:$4 sm:$0xff]   ;;  %v20119_v6 = vld [vmem:[#allocation2 + $0xd90] ss:$28 sps:$4 sm:$0xff]  }
 0x1ed   :  { %3108 = vmatpush1.bf16.msra.mxu0 %v20033_v7  ;;  %18902 = vmatpush3.bf16.msra.mxu1 %v20037_v8  ;;  %v20124_v7 = vld [vmem:[#allocation2 + $0x89c] ss:$28 sps:$4 sm:$0xff]   ;;  %v20127_v8 = vld [vmem:[#allocation2 + $0xdcc] ss:$28 sps:$4 sm:$0xff]  }
 0x1ee   :  { %3109 = vmatprep.subr.bf16.mxu0 %v20040_v10  ;;  %18903 = vmatprep.subr.bf16.mxu1 %v20041_v11  ;;  %v20122_v10 = vld [vmem:[#allocation2 + $0x898] ss:$28 sps:$4 sm:$0xff]   ;;  %v20125_v11 = vld [vmem:[#allocation2 + $0xdc8] ss:$28 sps:$4 sm:$0xff]  }
 0x1f1   :  { %3110 = vmatpush1.bf16.msra.mxu0 %v20038_v12  ;;  %18904 = vmatpush3.bf16.msra.mxu1 %v20042_v13  ;;  %v20130_v12 = vld [vmem:[#allocation2 + $0x8d4] ss:$28 sps:$4 sm:$0xff]   ;;  %v20133_v13 = vld [vmem:[#allocation2 + $0xe04] ss:$28 sps:$4 sm:$0xff]  }
 0x1f2   :  { %3111 = vmatprep.subr.bf16.mxu0 %v20045_v14  ;;  %18905 = vmatprep.subr.bf16.mxu1 %v20046_v15  ;;  %v20128_v14 = vld [vmem:[#allocation2 + $0x8d0] ss:$28 sps:$4 sm:$0xff]   ;;  %v20131_v15 = vld [vmem:[#allocation2 + $0xe00] ss:$28 sps:$4 sm:$0xff]  }
 0x1f5   :  { %3112 = vmatpush1.bf16.msra.mxu0 %v20043_v16  ;;  %18906 = vmatpush3.bf16.msra.mxu1 %v20047_v18  ;;  %v20136_v16 = vld [vmem:[#allocation2 + $0x90c] ss:$28 sps:$4 sm:$0xff]   ;;  %v20139_v18 = vld [vmem:[#allocation2 + $0xe3c] ss:$28 sps:$4 sm:$0xff]  }
 0x1f6   :  { %3113 = vmatprep.subr.bf16.mxu0 %v20050_v19  ;;  %19187 = vmatprep.subr.bf16.mxu1 %v22842_v22  ;;  %v20134_v19 = vld [vmem:[#allocation2 + $0x908] ss:$28 sps:$4 sm:$0xff]  }
 0x1f8   :  { %3341 = vmatmul.mubr.bf16.vlgmr.msra.gmra.mrb[12].mxu1 %v23051_v9  ;;  %v20062_v9 = vld [vmem:[#allocation2 + $0x5fc] ss:$28 sps:$4 sm:$0xff]  }
 0x1f9   :  { %3114 = vmatpush1.bf16.msra.mxu0 %v20048_v20  ;;  %19188 = vmatpush3.bf16.msra.mxu1 %v20051_v21  ;;  %v20137_v20 = vld [vmem:[#allocation2 + $0xe38] ss:$28 sps:$4 sm:$0xff]   ;;  %v20142_v21 = vld [vmem:[#allocation2 + $0x944] ss:$28 sps:$4 sm:$0xff]  }
 0x1fa   :  { %3115 = vmatprep.subr.bf16.mxu0 %v20054_v23  ;;  %19189 = vmatprep.subr.bf16.mxu1 %v22842_v22  ;;  %v20145_v23 = vld [vmem:[#allocation2 + $0xe74] ss:$28 sps:$4 sm:$0xff]  }
 0x1fb   :  { %19203 = vmatprep.mubr.msk.bf16.mxu1 %vm22843_vm0, %v22842_v22 }
 0x1fd   :  { %3116 = vmatpush1.bf16.msra.mxu0 %v20052_v24  ;;  %19190 = vmatpush3.bf16.msra.mxu1 %v20055_v25  ;;  %v20140_v24 = vld [vmem:[#allocation2 + $0x940] ss:$28 sps:$4 sm:$0xff]   ;;  %v20143_v25 = vld [vmem:[#allocation2 + $0xe70] ss:$28 sps:$4 sm:$0xff]  }
 0x1fe   :  { %3117 = vmatprep.subr.bf16.mxu0 %v20058_v26  ;;  %19191 = vmatprep.subr.bf16.mxu1 %v22842_v22  ;;  %v20148_v26 = vld [vmem:[#allocation2 + $0x97c] ss:$28 sps:$4 sm:$0xff]  }
 0x201   :  { %3118 = vmatpush1.bf16.msra.mxu0 %v20056_v27  ;;  %19192 = vmatpush3.bf16.msra.mxu1 %v20059_v28  ;;  %v20151_v27 = vld [vmem:[#allocation2 + $0xeac] ss:$28 sps:$4 sm:$0xff]   ;;  %v20146_v28 = vld [vmem:[#allocation2 + $0x978] ss:$28 sps:$4 sm:$0xff]  }
 0x202   :  { %3119 = vmatprep.subr.bf16.mxu0 %v20062_v9  ;;  %19193 = vmatprep.subr.bf16.mxu1 %v22842_v22  ;;  %v20149_v9 = vld [vmem:[#allocation2 + $0xea8] ss:$28 sps:$4 sm:$0xff]  }
 0x205   :  { %3120 = vmatpush1.bf16.msra.mxu0 %v20060_v29  ;;  %19194 = vmatpush3.bf16.msra.mxu1 %v20063_v30  ;;  %v20154_v29 = vld [vmem:[#allocation2 + $0x9b4] ss:$28 sps:$4 sm:$0xff]   ;;  %v20157_v30 = vld [vmem:[#allocation2 + $0xee4] ss:$28 sps:$4 sm:$0xff]  }
 0x206   :  { %3121 = vmatprep.subr.bf16.mxu0 %v20066_v31  ;;  %19195 = vmatprep.subr.bf16.mxu1 %v22842_v22  ;;  %v20152_v31 = vld [vmem:[#allocation2 + $0x9b0] ss:$28 sps:$4 sm:$0xff]  }
 0x209   :  { %3122 = vmatpush1.bf16.msra.mxu0 %v20064_v32  ;;  %19196 = vmatpush3.bf16.msra.mxu1 %v20067_v33  ;;  %v20155_v32 = vld [vmem:[#allocation2 + $0xee0] ss:$28 sps:$4 sm:$0xff]   ;;  %v20160_v33 = vld [vmem:[#allocation2 + $0x9ec] ss:$28 sps:$4 sm:$0xff]  }
 0x20a   :  { %3123 = vmatprep.subr.bf16.mxu0 %v20070_v34  ;;  %19197 = vmatprep.subr.bf16.mxu1 %v22842_v22  ;;  %v20163_v34 = vld [vmem:[#allocation2 + $0xf1c] ss:$28 sps:$4 sm:$0xff]  }
 0x20d   :  { %3124 = vmatpush1.bf16.msra.mxu0 %v20068_v35  ;;  %19198 = vmatpush3.bf16.msra.mxu1 %v20071_v36  ;;  %v20158_v35 = vld [vmem:[#allocation2 + $0x9e8] ss:$28 sps:$4 sm:$0xff]   ;;  %v20161_v36 = vld [vmem:[#allocation2 + $0xf18] ss:$28 sps:$4 sm:$0xff]  }
 0x20e   :  { %3125 = vmatprep.subr.bf16.mxu0 %v20074_v37  ;;  %19199 = vmatprep.subr.bf16.mxu1 %v22842_v22  ;;  %v20166_v37 = vld [vmem:[#allocation2 + $0xa24] ss:$28 sps:$4 sm:$0xff]  }
 0x211   :  { %3126 = vmatpush1.bf16.msra.mxu0 %v20072_v38  ;;  %19200 = vmatpush3.bf16.msra.mxu1 %v20075_v39  ;;  %v20169_v38 = vld [vmem:[#allocation2 + $0xf54] ss:$28 sps:$4 sm:$0xff]   ;;  %v20164_v39 = vld [vmem:[#allocation2 + $0xa20] ss:$28 sps:$4 sm:$0xff]  }
 0x212   :  { %3127 = vmatprep.subr.bf16.mxu0 %v20078_v40  ;;  %19201 = vmatprep.subr.bf16.mxu1 %v22842_v22  ;;  %v20167_v40 = vld [vmem:[#allocation2 + $0xf50] ss:$28 sps:$4 sm:$0xff]  }
 0x215   :  { %3128 = vmatpush1.bf16.msra.mxu0 %v20076_v42  ;;  %19202 = vmatpush3.bf16.msra.mxu1 %v20079_v43  ;;  %v20172_v42 = vld [vmem:[#allocation2 + $0xa5c] ss:$28 sps:$4 sm:$0xff]   ;;  %v20175_v43 = vld [vmem:[#allocation2 + $0xf8c] ss:$28 sps:$4 sm:$0xff]  }
 0x216   :  { %3140 = vmatprep.subr.bf16.mxu0 %v20082_v44  ;;  %5869 = vmatprep.subr.bf16.mxu1 %v20085_v45  ;;  %v20170_v44 = vld [vmem:[#allocation2 + $0xa58] ss:$28 sps:$4 sm:$0xff]   ;;  %v20173_v45 = vld [vmem:[#allocation2 + $0xf88] ss:$28 sps:$4 sm:$0xff]  }
 0x218   :  { %19204 = vmatmul.mubr.bf16.vlgmr.msra.gmra.mrb[16].mxu1 %v23060_v41  ;;  %3130 = vmatmul.mubr.bf16.vlgmr.msra.gmra.mrb[4].mxu0 %v23086_v53  ;;  %v20100_v41 = vld [vmem:[#allocation2 + $0x7bc] ss:$28 sps:$4 sm:$0xff]   ;;  %v20103_v53 = vld [vmem:[#allocation2 + $0xcec] ss:$28 sps:$4 sm:$0xff]  }
 0x219   :  { %3141 = vmatpush1.bf16.msra.mxu0 %v20080_v46  ;;  %5870 = vmatpush1.bf16.msra.mxu1 %v20083_v47  ;;  %v20178_v46 = vld [vmem:[#allocation2 + $0xa94] ss:$28 sps:$4 sm:$0xff]   ;;  %v20181_v47 = vld [vmem:[#allocation2 + $0xfc4] ss:$28 sps:$4 sm:$0xff]  }
 0x21a   :  { %3142 = vmatprep.subr.bf16.mxu0 %v20088_v48  ;;  %5871 = vmatprep.subr.bf16.mxu1 %v20091_v49  ;;  %v20176_v48 = vld [vmem:[#allocation2 + $0xa90] ss:$28 sps:$4 sm:$0xff]   ;;  %v20179_v49 = vld [vmem:[#allocation2 + $0xfc0] ss:$28 sps:$4 sm:$0xff]  }
 0x21b   :  { %3172 = vmatprep.mubr.bf16.mxu0 %v23093_v58  ;;  %5901 = vmatprep.mubr.bf16.mxu1 %v23067_v51  ;;  %v20104_v58 = vld [vmem:[#allocation2 + $0x7f0] ss:$28 sps:$4 sm:$0xff]   ;;  %v20107_v51 = vld [vmem:[#allocation2 + $0xd20] ss:$28 sps:$4 sm:$0xff]  }
 0x21d   :  { %3143 = vmatpush1.bf16.msra.mxu0 %v20086_v50  ;;  %5872 = vmatpush1.bf16.msra.mxu1 %v20089_v52  ;;  %v20184_v50 = vld [vmem:[#allocation2 + $0xacc] ss:$28 sps:$4 sm:$0xff]   ;;  %v20187_v52 = vld [vmem:[#allocation2 + $0xffc] ss:$28 sps:$4 sm:$0xff]  }
 0x21e   :  { %3144 = vmatprep.subr.bf16.mxu0 %v20094_v54  ;;  %5873 = vmatprep.subr.bf16.mxu1 %v20097_v55  ;;  %v22549_v54 = vld [vmem:[%s23775_s0 + $0x10] ss:$28 sps:$4 sm:$0xff]   ;;  %v23118_v55 = vld [vmem:[%s23775_s0] ss:$28 sps:$4 sm:$0xff]  }
 0x221   :  { %3145 = vmatpush1.bf16.msra.mxu0 %v20092_v56  ;;  %5874 = vmatpush1.bf16.msra.mxu1 %v20095_v57  ;;  %v20182_v56 = vld [vmem:[#allocation2 + $0xac8] ss:$28 sps:$4 sm:$0xff]   ;;  %v20185_v57 = vld [vmem:[#allocation2 + $0xff8] ss:$28 sps:$4 sm:$0xff]  }
 0x222   :  { %3146 = vmatprep.subr.bf16.mxu0 %v20100_v41  ;;  %5875 = vmatprep.subr.bf16.mxu1 %v20103_v53  ;;  %v20190_v41 = vld [vmem:[#allocation2 + $0xb04] ss:$28 sps:$4 sm:$0xff]   ;;  %v20193_v53 = vld [vmem:[#allocation2 + $0x1034] ss:$28 sps:$4 sm:$0xff]  }
 0x225   :  { %3147 = vmatpush1.bf16.msra.mxu0 %v20098_v59  ;;  %5876 = vmatpush1.bf16.msra.mxu1 %v20101_v60  ;;  %v23125_v59 = vld [vmem:[%s23775_s0 + $0xc] ss:$28 sps:$4 sm:$0xff]   ;;  %v20188_v60 = vld [vmem:[#allocation2 + $0xb00] ss:$28 sps:$4 sm:$0xff]  }
 0x226   :  { %3148 = vmatprep.subr.bf16.mxu0 %v20106_v61  ;;  %5877 = vmatprep.subr.bf16.mxu1 %v20109_v62  ;;  %v20191_v61 = vld [vmem:[#allocation2 + $0x1030] ss:$28 sps:$4 sm:$0xff]   ;;  %v20196_v62 = vld [vmem:[#allocation2 + $0xb3c] ss:$28 sps:$4 sm:$0xff]  }
 0x229   :  { %3149 = vmatpush1.bf16.msra.mxu0 %v20104_v58  ;;  %5878 = vmatpush1.bf16.msra.mxu1 %v20107_v51  ;;  %v20199_v58 = vld [vmem:[#allocation2 + $0x106c] ss:$28 sps:$4 sm:$0xff]   ;;  %v20194_v51 = vld [vmem:[#allocation2 + $0xb38] ss:$28 sps:$4 sm:$0xff]  }
 0x22a   :  { %3150 = vmatprep.subr.bf16.mxu0 %v20112_v63  ;;  %5879 = vmatprep.subr.bf16.mxu1 %v20115_v0  ;;  %v20197_v63 = vld [vmem:[#allocation2 + $0x1068] ss:$28 sps:$4 sm:$0xff]   ;;  %v20202_v0 = vld [vmem:[#allocation2 + $0xb74] ss:$28 sps:$4 sm:$0xff]  }
 0x22d   :  { %3151 = vmatpush1.bf16.msra.mxu0 %v20110_v1  ;;  %5880 = vmatpush1.bf16.msra.mxu1 %v20113_v2  ;;  %v20205_v1 = vld [vmem:[#allocation2 + $0x10a4] ss:$28 sps:$4 sm:$0xff]   ;;  %v20200_v2 = vld [vmem:[#allocation2 + $0xb70] ss:$28 sps:$4 sm:$0xff]  }
 0x22e   :  { %3152 = vmatprep.subr.bf16.mxu0 %v20118_v3  ;;  %5881 = vmatprep.subr.bf16.mxu1 %v20121_v4  ;;  %v20203_v3 = vld [vmem:[#allocation2 + $0x10a0] ss:$28 sps:$4 sm:$0xff]   ;;  %v20208_v4 = vld [vmem:[#allocation2 + $0xbac] ss:$28 sps:$4 sm:$0xff]  }
 0x231   :  { %3153 = vmatpush1.bf16.msra.mxu0 %v20116_v5  ;;  %5882 = vmatpush1.bf16.msra.mxu1 %v20119_v6  ;;  %v20211_v5 = vld [vmem:[#allocation2 + $0x10dc] ss:$28 sps:$4 sm:$0xff]   ;;  %v20206_v6 = vld [vmem:[#allocation2 + $0xba8] ss:$28 sps:$4 sm:$0xff]  }
 0x232   :  { %3154 = vmatprep.subr.bf16.mxu0 %v20124_v7  ;;  %5883 = vmatprep.subr.bf16.mxu1 %v20127_v8  ;;  %v20209_v7 = vld [vmem:[#allocation2 + $0x10d8] ss:$28 sps:$4 sm:$0xff]   ;;  %v20214_v8 = vld [vmem:[#allocation2 + $0xbe4] ss:$28 sps:$4 sm:$0xff]  }
 0x235   :  { %3155 = vmatpush1.bf16.msra.mxu0 %v20122_v10  ;;  %5884 = vmatpush1.bf16.msra.mxu1 %v20125_v11  ;;  %v20217_v10 = vld [vmem:[#allocation2 + $0x1114] ss:$28 sps:$4 sm:$0xff]  }
 0x236   :  { %3156 = vmatprep.subr.bf16.mxu0 %v20130_v12  ;;  %5885 = vmatprep.subr.bf16.mxu1 %v20133_v13  ;;  %v20212_v13 = vld [vmem:[#allocation2 + $0xbe0] ss:$28 sps:$4 sm:$0xff]  }
 0x239   :  { %3157 = vmatpush1.bf16.msra.mxu0 %v20128_v14  ;;  %5886 = vmatpush1.bf16.msra.mxu1 %v20131_v15  ;;  %v20215_v14 = vld [vmem:[#allocation2 + $0x1110] ss:$28 sps:$4 sm:$0xff]  }
 0x23a   :  { %3158 = vmatprep.subr.bf16.mxu0 %v20136_v16  ;;  %5887 = vmatprep.subr.bf16.mxu1 %v20139_v18 }
 0x23d   :  { %3159 = vmatpush1.bf16.msra.mxu0 %v20134_v19  ;;  %5888 = vmatpush1.bf16.msra.mxu1 %v20137_v20 }
 0x23e   :  { %3160 = vmatprep.subr.bf16.mxu0 %v20142_v21  ;;  %5889 = vmatprep.subr.bf16.mxu1 %v20145_v23  ;;  %v20220_v23 = vld [vmem:[#allocation2 + $0xc1c] ss:$28 sps:$4 sm:$0xff]  }
 0x241   :  { %3161 = vmatpush1.bf16.msra.mxu0 %v20140_v24  ;;  %5890 = vmatpush1.bf16.msra.mxu1 %v20143_v25  ;;  %v20223_v24 = vld [vmem:[#allocation2 + $0x114c] ss:$28 sps:$4 sm:$0xff]   ;;  %v20218_v25 = vld [vmem:[#allocation2 + $0xc18] ss:$28 sps:$4 sm:$0xff]  }
 0x242   :  { %3162 = vmatprep.subr.bf16.mxu0 %v20148_v26  ;;  %5891 = vmatprep.subr.bf16.mxu1 %v20151_v27  ;;  %v20221_v26 = vld [vmem:[#allocation2 + $0x1148] ss:$28 sps:$4 sm:$0xff]  }
 0x243   :  { %v20226_v27 = vld [vmem:[#allocation2 + $0x1184] ss:$28 sps:$4 sm:$0xff]  }
 0x245   :  { %3163 = vmatpush1.bf16.msra.mxu0 %v20146_v28  ;;  %5892 = vmatpush1.bf16.msra.mxu1 %v20149_v9  ;;  %v20229_v28 = vld [vmem:[#allocation2 + $0xc4c] ss:$28 sps:$4 sm:$0xff]   ;;  %v20224_v9 = vld [vmem:[#allocation2 + $0x1180] ss:$28 sps:$4 sm:$0xff]  }
 0x246   :  { %3164 = vmatprep.subr.bf16.mxu0 %v20154_v29  ;;  %5893 = vmatprep.subr.bf16.mxu1 %v20157_v30  ;;  %v20227_v29 = vld [vmem:[#allocation2 + $0xc48] ss:$28 sps:$4 sm:$0xff]   ;;  %v20232_v30 = vld [vmem:[#allocation2 + $0x11bc] ss:$28 sps:$4 sm:$0xff]  }
 0x249   :  { %3165 = vmatpush1.bf16.msra.mxu0 %v20152_v31  ;;  %5894 = vmatpush1.bf16.msra.mxu1 %v20155_v32  ;;  %v20235_v31 = vld [vmem:[#allocation2 + $0xc84] ss:$28 sps:$4 sm:$0xff]   ;;  %v22552_v32 = vld [vmem:[%s23775_s0 + $0x18] ss:$28 sps:$4 sm:$0xff]  }
 0x24a   :  { %3166 = vmatprep.subr.bf16.mxu0 %v20160_v33  ;;  %5895 = vmatprep.subr.bf16.mxu1 %v20163_v34  ;;  %v20230_v33 = vld [vmem:[#allocation2 + $0x11b8] ss:$28 sps:$4 sm:$0xff]   ;;  %v20233_v34 = vld [vmem:[#allocation2 + $0xc80] ss:$28 sps:$4 sm:$0xff]  }
 0x24d   :  { %3167 = vmatpush1.bf16.msra.mxu0 %v20158_v35  ;;  %5896 = vmatpush1.bf16.msra.mxu1 %v20161_v36  ;;  %v20238_v35 = vld [vmem:[#allocation2 + $0x11f4] ss:$28 sps:$4 sm:$0xff]   ;;  %v20241_v36 = vld [vmem:[#allocation2 + $0xcbc] ss:$28 sps:$4 sm:$0xff]  }
 0x24e   :  { %3168 = vmatprep.subr.bf16.mxu0 %v20166_v37  ;;  %5897 = vmatprep.subr.bf16.mxu1 %v20169_v38  ;;  %v22553_v37 = vld [vmem:[%s23775_s0 + $0x4] ss:$28 sps:$4 sm:$0xff]   ;;  %v20236_v38 = vld [vmem:[#allocation2 + $0x11f0] ss:$28 sps:$4 sm:$0xff]  }
 0x251   :  { %3169 = vmatpush1.bf16.msra.mxu0 %v20164_v39  ;;  %5898 = vmatpush1.bf16.msra.mxu1 %v20167_v40  ;;  %v20239_v39 = vld [vmem:[#allocation2 + $0xcb8] ss:$28 sps:$4 sm:$0xff]   ;;  %v20244_v40 = vld [vmem:[#allocation2 + $0x122c] ss:$28 sps:$4 sm:$0xff]  }
 0x252   :  { %3170 = vmatprep.subr.bf16.mxu0 %v20172_v42  ;;  %5899 = vmatprep.subr.bf16.mxu1 %v20175_v43  ;;  %v20247_v42 = vld [vmem:[#allocation2 + $0xcf4] ss:$28 sps:$4 sm:$0xff]   ;;  %v20242_v43 = vld [vmem:[#allocation2 + $0x1228] ss:$28 sps:$4 sm:$0xff]  }
 0x255   :  { %3171 = vmatpush1.bf16.msra.mxu0 %v20170_v44  ;;  %5900 = vmatpush1.bf16.msra.mxu1 %v20173_v45  ;;  %v20245_v44 = vld [vmem:[#allocation2 + $0xcf0] ss:$28 sps:$4 sm:$0xff]   ;;  %v20250_v45 = vld [vmem:[#allocation2 + $0x1264] ss:$28 sps:$4 sm:$0xff]  }
 0x256   :  { %3183 = vmatprep.subr.bf16.mxu0 %v20178_v46  ;;  %5912 = vmatprep.subr.bf16.mxu1 %v20181_v47  ;;  %v20253_v46 = vld [vmem:[#allocation2 + $0xd2c] ss:$28 sps:$4 sm:$0xff]   ;;  %v20248_v47 = vld [vmem:[#allocation2 + $0x1260] ss:$28 sps:$4 sm:$0xff]  }
 0x258   :  { %3173 = vmatmul.mubr.bf16.vlgmr.msra.gmra.mrb[4].mxu0 %v22549_v54  ;;  %5902 = vmatmul.mubr.bf16.vlgmr.msra.gmra.mrb[20].mxu1 %v23118_v55  ;;  %v20257_v54 = vld [vmem:[#allocation2 + $0xd60] ss:$28 sps:$4 sm:$0xff]  }
 0x259   :  { %3184 = vmatpush1.bf16.msra.mxu0 %v20176_v48  ;;  %5913 = vmatpush1.bf16.msra.mxu1 %v20179_v49  ;;  %v20251_v48 = vld [vmem:[#allocation2 + $0xd28] ss:$28 sps:$4 sm:$0xff]   ;;  %v20256_v49 = vld [vmem:[#allocation2 + $0x129c] ss:$28 sps:$4 sm:$0xff]  }
 0x25a   :  { %3185 = vmatprep.subr.bf16.mxu0 %v20184_v50  ;;  %5914 = vmatprep.subr.bf16.mxu1 %v20187_v52  ;;  %v20259_v50 = vld [vmem:[#allocation2 + $0xd64] ss:$28 sps:$4 sm:$0xff]   ;;  %v20254_v52 = vld [vmem:[#allocation2 + $0x1298] ss:$28 sps:$4 sm:$0xff]  }
 0x25b   :  { %3215 = vmatprep.mubr.bf16.mxu0 %v22841_v17  ;;  %5944 = vmatprep.mubr.bf16.mxu1 %v23125_v59 }
 0x25d   :  { %3186 = vmatpush1.bf16.msra.mxu0 %v20182_v56  ;;  %5915 = vmatpush1.bf16.msra.mxu1 %v20185_v57  ;;  %v20262_v56 = vld [vmem:[#allocation2 + $0x12d4] ss:$28 sps:$4 sm:$0xff]   ;;  %v20265_v57 = vld [vmem:[#allocation2 + $0xd9c] ss:$28 sps:$4 sm:$0xff]  }
 0x25e   :  { %3187 = vmatprep.subr.bf16.mxu0 %v20190_v41  ;;  %5916 = vmatprep.subr.bf16.mxu1 %v20193_v53 }
 0x261   :  { %3188 = vmatpush1.bf16.msra.mxu0 %v20188_v60  ;;  %5917 = vmatpush1.bf16.msra.mxu1 %v20191_v61 }
 0x262   :  { %3189 = vmatprep.subr.bf16.mxu0 %v20196_v62  ;;  %5918 = vmatprep.subr.bf16.mxu1 %v20199_v58  ;;  %v20260_v62 = vld [vmem:[#allocation2 + $0x12d0] ss:$28 sps:$4 sm:$0xff]   ;;  %v20263_v58 = vld [vmem:[#allocation2 + $0xd98] ss:$28 sps:$4 sm:$0xff]  }
 0x265   :  { %3190 = vmatpush1.bf16.msra.mxu0 %v20194_v51  ;;  %5919 = vmatpush1.bf16.msra.mxu1 %v20197_v63  ;;  %v20268_v63 = vld [vmem:[#allocation2 + $0x130c] ss:$28 sps:$4 sm:$0xff]  }
 0x266   :  { %3191 = vmatprep.subr.bf16.mxu0 %v20202_v0  ;;  %5920 = vmatprep.subr.bf16.mxu1 %v20205_v1  ;;  %v20271_v0 = vld [vmem:[#allocation2 + $0xdd4] ss:$28 sps:$4 sm:$0xff]  }
 0x269   :  { %3192 = vmatpush1.bf16.msra.mxu0 %v20200_v2  ;;  %5921 = vmatpush1.bf16.msra.mxu1 %v20203_v3  ;;  %v20266_v2 = vld [vmem:[#allocation2 + $0x1308] ss:$28 sps:$4 sm:$0xff]   ;;  %v20269_v3 = vld [vmem:[#allocation2 + $0xdd0] ss:$28 sps:$4 sm:$0xff]  }
 0x26a   :  { %3193 = vmatprep.subr.bf16.mxu0 %v20208_v4  ;;  %5922 = vmatprep.subr.bf16.mxu1 %v20211_v5  ;;  %v20274_v4 = vld [vmem:[#allocation2 + $0x1344] ss:$28 sps:$4 sm:$0xff]   ;;  %v20277_v5 = vld [vmem:[#allocation2 + $0xe0c] ss:$28 sps:$4 sm:$0xff]  }
 0x26b   :  { %v23128_v11 = vpop.f32.mrb[0].mxu0  ;;  %v23130_v12 = vpop.f32.mrb[0].mxu1 }
 0x26c   :  { %v23132_v15 = vpop.f32.mrb[1].mxu0  ;;  %v23134_v16 = vpop.f32.mrb[1].mxu1 }
 0x26d   :  { %v23136_v18 = vpop.f32.mrb[2].mxu0  ;;  %v23138_v19 = vpop.f32.mrb[2].mxu1  ;;  %3194 = vmatpush1.bf16.msra.mxu0 %v20206_v6  ;;  %5923 = vmatpush1.bf16.msra.mxu1 %v20209_v7  ;;  %v20272_v6 = vld [vmem:[#allocation2 + $0x1340] ss:$28 sps:$4 sm:$0xff]   ;;  %v20275_v7 = vld [vmem:[#allocation2 + $0xe08] ss:$28 sps:$4 sm:$0xff]  }
 0x26e   :  { %v23140_v20 = vpop.f32.mrb[3].mxu0  ;;  %v23142_v21 = vpop.f32.mrb[3].mxu1  ;;  %3195 = vmatprep.subr.bf16.mxu0 %v20214_v8  ;;  %5924 = vmatprep.subr.bf16.mxu1 %v20217_v10  ;;  %v20280_v8 = vld [vmem:[#allocation2 + $0x137c] ss:$28 sps:$4 sm:$0xff]   ;;  %v20283_v10 = vld [vmem:[#allocation2 + $0xe44] ss:$28 sps:$4 sm:$0xff]  }
 0x271   :  { %3196 = vmatpush1.bf16.msra.mxu0 %v20212_v13  ;;  %5925 = vmatpush1.bf16.msra.mxu1 %v20215_v14  ;;  %v23157_v13 = vld [vmem:[%s23775_s0 + $0x8] ss:$28 sps:$4 sm:$0xff]   ;;  %v20278_v14 = vld [vmem:[#allocation2 + $0x1378] ss:$28 sps:$4 sm:$0xff]  }
 0x272   :  { %3197 = vmatprep.subr.bf16.mxu0 %v20220_v23  ;;  %5926 = vmatprep.subr.bf16.mxu1 %v20223_v24  ;;  %v20281_v23 = vld [vmem:[#allocation2 + $0xe40] ss:$28 sps:$4 sm:$0xff]   ;;  %v20286_v24 = vld [vmem:[#allocation2 + $0x13b4] ss:$28 sps:$4 sm:$0xff]  }
 0x275   :  { %3198 = vmatpush1.bf16.msra.mxu0 %v20218_v25  ;;  %5927 = vmatpush1.bf16.msra.mxu1 %v20221_v26  ;;  %v20289_v25 = vld [vmem:[#allocation2 + $0xe7c] ss:$28 sps:$4 sm:$0xff]   ;;  %v23163_v26 = vld [vmem:[%s23775_s0 + $0x14] ss:$28 sps:$4 sm:$0xff]  }
 0x276   :  { %5928 = vmatprep.subr.bf16.mxu1 %v20226_v27  ;;  %6041 = vmatprep.subr.bf16.mxu0 %v20229_v28  ;;  %v623_v27 = vlaneseq  ;;  %v20284_v28 = vld [vmem:[#allocation2 + $0x13b0] ss:$28 sps:$4 sm:$0xff]  }
 0x278   :  { %3216 = vmatmul.mubr.bf16.vlgmr.msra.gmra.mrb[4].mxu0 %v22552_v32  ;;  %v20290_v32 = vld [vmem:[#allocation2 + $0x13e8] ss:$28 sps:$4 sm:$0xff]  }
 0x279   :  { %5929 = vmatpush1.bf16.msra.mxu1 %v20224_v9  ;;  %6042 = vmatpush1.bf16.msra.mxu0 %v20227_v29  ;;  %v20287_v9 = vld [vmem:[#allocation2 + $0xe78] ss:$28 sps:$4 sm:$0xff]   ;;  %v20292_v29 = vld [vmem:[#allocation2 + $0x13ec] ss:$28 sps:$4 sm:$0xff]  }
 0x27a   :  { %5930 = vmatprep.subr.bf16.mxu1 %v20232_v30  ;;  %6043 = vmatprep.subr.bf16.mxu0 %v20235_v31  ;;  %v20295_v30 = vld [vmem:[#allocation2 + $0xeb4] ss:$28 sps:$4 sm:$0xff]   ;;  %v23166_v31 = vshrl.u32 %v623_v27, 7 }
 0x27b   :  { %6073 = vmatprep.mubr.bf16.mxu0 %v22553_v37  ;;  %v20296_v37 = vld [vmem:[#allocation2 + $0x1420] ss:$28 sps:$4 sm:$0xff]   ;;  %v20343_v27 = vld [vmem:[#allocation2 + $0x1074] ss:$28 sps:$4 sm:$0xff]  }
 0x27d   :  { %5931 = vmatpush1.bf16.msra.mxu1 %v20230_v33  ;;  %6044 = vmatpush1.bf16.msra.mxu0 %v20233_v34  ;;  %v20293_v33 = vld [vmem:[#allocation2 + $0xeb0] ss:$28 sps:$4 sm:$0xff]   ;;  %v20298_v34 = vld [vmem:[#allocation2 + $0x1424] ss:$28 sps:$4 sm:$0xff]  }
 0x27e   :  { %5932 = vmatprep.subr.bf16.mxu1 %v20238_v35  ;;  %6045 = vmatprep.subr.bf16.mxu0 %v20241_v36  ;;  %v20301_v35 = vld [vmem:[#allocation2 + $0xeec] ss:$28 sps:$4 sm:$0xff]   ;;  %v649_v36 = vsub.s32 6, %v23166_v31 }
 0x281   :  { %5933 = vmatpush1.bf16.msra.mxu1 %v20236_v38  ;;  %6046 = vmatpush1.bf16.msra.mxu0 %v20239_v39  ;;  %v20299_v38 = vld [vmem:[#allocation2 + $0xee8] ss:$28 sps:$4 sm:$0xff]  }
 0x282   :  { %5934 = vmatprep.subr.bf16.mxu1 %v20244_v40  ;;  %6047 = vmatprep.subr.bf16.mxu0 %v20247_v42  ;;  %v621_v39 = vld [vmem:[#allocation4] sm:$0xff]  ;;  %v20304_v40 = vld [vmem:[#allocation2 + $0x145c] ss:$28 sps:$4 sm:$0xff]  }
 0x283   :  { %v20307_v42 = vld [vmem:[#allocation2 + $0xf24] ss:$28 sps:$4 sm:$0xff]  }
 0x285   :  { %5935 = vmatpush1.bf16.msra.mxu1 %v20242_v43  ;;  %6048 = vmatpush1.bf16.msra.mxu0 %v20245_v44  ;;  %v23169_v43 = vrot.slane %v621_v39, %v649_v36  ;;  %v20302_v44 = vld [vmem:[#allocation2 + $0x1458] ss:$28 sps:$4 sm:$0xff]   ;;  %v20356_v39 = vld [vmem:[#allocation2 + $0x1650] ss:$28 sps:$4 sm:$0xff]  }
 0x286   :  { %5936 = vmatprep.subr.bf16.mxu1 %v20250_v45  ;;  %6049 = vmatprep.subr.bf16.mxu0 %v20253_v46  ;;  %v20305_v45 = vld [vmem:[#allocation2 + $0xf20] ss:$28 sps:$4 sm:$0xff]   ;;  %v20310_v46 = vld [vmem:[#allocation2 + $0x1494] ss:$28 sps:$4 sm:$0xff]  }
 0x287   :  { %v20358_v36 = vld [vmem:[#allocation2 + $0x1654] ss:$28 sps:$4 sm:$0xff]  }
 0x289   :  { %5937 = vmatpush1.bf16.msra.mxu1 %v20248_v47  ;;  %6050 = vmatpush1.bf16.msra.mxu0 %v20251_v48  ;;  %v20313_v47 = vld [vmem:[#allocation2 + $0xf5c] ss:$28 sps:$4 sm:$0xff]  }
 0x28a   :  { %5938 = vmatprep.subr.bf16.mxu1 %v20256_v49  ;;  %6051 = vmatprep.subr.bf16.mxu0 %v20259_v50 }
 0x28b   :  { %v18863_v41 = vpop.f32.mrb[4].mxu1 }
 0x28c   :  { %v18864_v53 = vpop.f32.mrb[5].mxu1 }
 0x28d   :  { %v23150_v60 = vadd.f32 %v18864_v53, %v18863_v41  ;;  %v18866_v61 = vpop.f32.mrb[6].mxu1  ;;  %5939 = vmatpush1.bf16.msra.mxu1 %v20254_v52  ;;  %6052 = vmatpush1.bf16.msra.mxu0 %v20257_v54  ;;  %v20316_v53 = vld [vmem:[#allocation2 + $0x14cc] ss:$28 sps:$4 sm:$0xff]  }
 0x28e   :  { %v18867_v51 = vpop.f32.mrb[7].mxu1  ;;  %5940 = vmatprep.subr.bf16.mxu1 %v20262_v56  ;;  %6053 = vmatprep.subr.bf16.mxu0 %v20265_v57  ;;  %v20308_v56 = vld [vmem:[#allocation2 + $0x1490] ss:$28 sps:$4 sm:$0xff]   ;;  %v20311_v57 = vld [vmem:[#allocation2 + $0xf58] ss:$28 sps:$4 sm:$0xff]  }
 0x28f   :  { %v23152_v1 = vadd.f32 %v18867_v51, %v18866_v61  ;;  %v3261_v50 = vadd.f32 %v23150_v60, %v23169_v43  ;;  %v20319_v61 = vld [vmem:[#allocation2 + $0xf94] ss:$28 sps:$4 sm:$0xff]   ;;  %v20314_v60 = vld [vmem:[#allocation2 + $0x14c8] ss:$28 sps:$4 sm:$0xff]  }
 0x291   :  { %5941 = vmatpush1.bf16.msra.mxu1 %v20260_v62  ;;  %6054 = vmatpush1.bf16.msra.mxu0 %v20263_v58  ;;  %v3264_v62 = vadd.f32 %v23152_v1, %v23169_v43  ;;  %v20328_v1 = vld [vmem:[#allocation2 + $0x153c] ss:$28 sps:$4 sm:$0xff]  }
 0x292   :  { %5942 = vmatprep.subr.bf16.mxu1 %v20268_v63  ;;  %6055 = vmatprep.subr.bf16.mxu0 %v20271_v0  ;;  %v20317_v0 = vld [vmem:[#allocation2 + $0xf90] ss:$28 sps:$4 sm:$0xff]  }
 0x295   :  { %5943 = vmatpush1.bf16.msra.mxu1 %v20266_v2  ;;  %6056 = vmatpush1.bf16.msra.mxu0 %v20269_v3  ;;  %v20322_v2 = vld [vmem:[#allocation2 + $0x1504] ss:$28 sps:$4 sm:$0xff]   ;;  %v20325_v3 = vld [vmem:[#allocation2 + $0xfcc] ss:$28 sps:$4 sm:$0xff]  }
 0x296   :  { %5955 = vmatprep.subr.bf16.mxu1 %v20274_v4  ;;  %6057 = vmatprep.subr.bf16.mxu0 %v20277_v5  ;;  %v20320_v4 = vld [vmem:[#allocation2 + $0x1500] ss:$28 sps:$4 sm:$0xff]   ;;  %v20323_v5 = vld [vmem:[#allocation2 + $0xfc8] ss:$28 sps:$4 sm:$0xff]  }
 0x298   :  { %5945 = vmatmul.mubr.bf16.vlgmr.msra.gmra.mrb[20].mxu1 %v23157_v13 }
 0x299   :  { %5956 = vmatpush1.bf16.msra.mxu1 %v20272_v6  ;;  %6058 = vmatpush1.bf16.msra.mxu0 %v20275_v7  ;;  %v20331_v6 = vld [vmem:[#allocation2 + $0x1004] ss:$28 sps:$4 sm:$0xff]   ;;  %v20326_v7 = vld [vmem:[#allocation2 + $0x1538] ss:$28 sps:$4 sm:$0xff]  }
 0x29a   :  { %5957 = vmatprep.subr.bf16.mxu1 %v20280_v8  ;;  %6059 = vmatprep.subr.bf16.mxu0 %v20283_v10  ;;  %v20329_v8 = vld [vmem:[#allocation2 + $0x1000] ss:$28 sps:$4 sm:$0xff]   ;;  %v20334_v10 = vld [vmem:[#allocation2 + $0x1574] ss:$28 sps:$4 sm:$0xff]  }
 0x29b   :  { %5987 = vmatprep.mubr.bf16.mxu1 %v23163_v26 }
 0x29d   :  { %5958 = vmatpush1.bf16.msra.mxu1 %v20278_v14  ;;  %6060 = vmatpush1.bf16.msra.mxu0 %v20281_v23  ;;  %v20337_v14 = vld [vmem:[#allocation2 + $0x103c] ss:$28 sps:$4 sm:$0xff]   ;;  %v20332_v23 = vld [vmem:[#allocation2 + $0x1570] ss:$28 sps:$4 sm:$0xff]  }
 0x29e   :  { %5959 = vmatprep.subr.bf16.mxu1 %v20286_v24  ;;  %6061 = vmatprep.subr.bf16.mxu0 %v20289_v25  ;;  %v20335_v24 = vld [vmem:[#allocation2 + $0x1038] ss:$28 sps:$4 sm:$0xff]   ;;  %v20340_v25 = vld [vmem:[#allocation2 + $0x15ac] ss:$28 sps:$4 sm:$0xff]  }
 0x2a1   :  { %5960 = vmatpush1.bf16.msra.mxu1 %v20284_v28  ;;  %6062 = vmatpush1.bf16.msra.mxu0 %v20287_v9  ;;  %v20341_v28 = vld [vmem:[#allocation2 + $0x1070] ss:$28 sps:$4 sm:$0xff]   ;;  %v20346_v9 = vld [vmem:[#allocation2 + $0x15e4] ss:$28 sps:$4 sm:$0xff]  }
 0x2a2   :  { %5961 = vmatprep.subr.bf16.mxu1 %v20292_v29  ;;  %6063 = vmatprep.subr.bf16.mxu0 %v20295_v30  ;;  %v20349_v29 = vld [vmem:[#allocation2 + $0x10ac] ss:$28 sps:$4 sm:$0xff]   ;;  %v20344_v30 = vld [vmem:[#allocation2 + $0x15e0] ss:$28 sps:$4 sm:$0xff]  }
 0x2a5   :  { %5962 = vmatpush1.bf16.msra.mxu1 %v20290_v32  ;;  %6064 = vmatpush1.bf16.msra.mxu0 %v20293_v33  ;;  %v20352_v32 = vld [vmem:[#allocation2 + $0x161c] ss:$28 sps:$4 sm:$0xff]   ;;  %v20355_v33 = vld [vmem:[#allocation2 + $0x10e4] ss:$28 sps:$4 sm:$0xff]  }
 0x2a6   :  { %5963 = vmatprep.subr.bf16.mxu1 %v20298_v34  ;;  %6065 = vmatprep.subr.bf16.mxu0 %v20301_v35  ;;  %v20350_v34 = vld [vmem:[#allocation2 + $0x1618] ss:$28 sps:$4 sm:$0xff]   ;;  %v20353_v35 = vld [vmem:[#allocation2 + $0x10e0] ss:$28 sps:$4 sm:$0xff]  }
 0x2a9   :  { %5964 = vmatpush1.bf16.msra.mxu1 %v20296_v37  ;;  %6066 = vmatpush1.bf16.msra.mxu0 %v20299_v38  ;;  %v20361_v37 = vld [vmem:[#allocation2 + $0x111c] ss:$28 sps:$4 sm:$0xff]  }
 0x2aa   :  { %5965 = vmatprep.subr.bf16.mxu1 %v20304_v40  ;;  %6067 = vmatprep.subr.bf16.mxu0 %v20307_v42  ;;  %v20359_v40 = vld [vmem:[#allocation2 + $0x1118] ss:$28 sps:$4 sm:$0xff]  }
 0x2ab   :  { %v18885_v48 = vpop.f32.mrb[8].mxu1 }
 0x2ac   :  { %v18886_v49 = vpop.f32.mrb[9].mxu1 }
 0x2ad   :  { %v18887_v52 = vadd.f32 %v18886_v49, %v18885_v48  ;;  %v18888_v54 = vpop.f32.mrb[10].mxu1  ;;  %5966 = vmatpush1.bf16.msra.mxu1 %v20302_v44  ;;  %6068 = vmatpush1.bf16.msra.mxu0 %v20305_v45  ;;  %v20367_v48 = vld [vmem:[#allocation2 + $0x1154] ss:$28 sps:$4 sm:$0xff]  }
 0x2ae   :  { %v18889_v41 = vpop.f32.mrb[11].mxu1  ;;  %5967 = vmatprep.subr.bf16.mxu1 %v20310_v46  ;;  %6069 = vmatprep.subr.bf16.mxu0 %v20313_v47  ;;  %v20364_v47 = vld [vmem:[#allocation2 + $0x168c] ss:$28 sps:$4 sm:$0xff]  }
 0x2af   :  { %v23175_v58 = vadd.f32 %v18887_v52, %v3261_v50  ;;  %v18890_v51 = vadd.f32 %v18889_v41, %v18888_v54  ;;  %v20362_v52 = vld [vmem:[#allocation2 + $0x1688] ss:$28 sps:$4 sm:$0xff]   ;;  %v20365_v54 = vld [vmem:[#allocation2 + $0x1150] ss:$28 sps:$4 sm:$0xff]  }
 0x2b0   :  { %v20373_v41 = vld [vmem:[#allocation2 + $0x118c] ss:$28 sps:$4 sm:$0xff]  }
 0x2b1   :  { %v23177_v63 = vadd.f32 %v18890_v51, %v3264_v62  ;;  %5968 = vmatpush1.bf16.msra.mxu1 %v20308_v56  ;;  %6070 = vmatpush1.bf16.msra.mxu0 %v20311_v57  ;;  %v20370_v57 = vld [vmem:[#allocation2 + $0x16c4] ss:$28 sps:$4 sm:$0xff]   ;;  %v20376_v62 = vld [vmem:[#allocation2 + $0x16fc] ss:$28 sps:$4 sm:$0xff]  }
 0x2b2   :  { %5969 = vmatprep.subr.bf16.mxu1 %v20316_v53  ;;  %6071 = vmatprep.subr.bf16.mxu0 %v20319_v61  ;;  %v20368_v53 = vld [vmem:[#allocation2 + $0x16c0] ss:$28 sps:$4 sm:$0xff]   ;;  %v20371_v61 = vld [vmem:[#allocation2 + $0x1188] ss:$28 sps:$4 sm:$0xff]   ;;  %v20374_v51 = vld [vmem:[#allocation2 + $0x16f8] ss:$28 sps:$4 sm:$0xff]  }
 0x2b5   :  { %5970 = vmatpush1.bf16.msra.mxu1 %v20314_v60  ;;  %6072 = vmatpush1.bf16.msra.mxu0 %v20317_v0  ;;  %v23190_v60 = vld [vmem:[%s23775_s0 + $0x10] ss:$28 sps:$4 sm:$0xff]  }
 0x2b6   :  { %5971 = vmatprep.subr.bf16.mxu1 %v20322_v2  ;;  %6084 = vmatprep.subr.bf16.mxu0 %v20325_v3  ;;  %v20382_v0 = vld [vmem:[#allocation2 + $0x1734] ss:$28 sps:$4 sm:$0xff]   ;;  %v20385_v2 = vld [vmem:[#allocation2 + $0x11fc] ss:$28 sps:$4 sm:$0xff]  }
 0x2b7   :  { %v20380_v3 = vld [vmem:[#allocation2 + $0x1730] ss:$28 sps:$4 sm:$0xff]  }
 0x2b8   :  { %6074 = vmatmul.mubr.bf16.vlgmr.msra.gmra.mrb[8].mxu0 %v23118_v55  ;;  %v20338_v55 = vld [vmem:[#allocation2 + $0x15a8] ss:$28 sps:$4 sm:$0xff]  }
 0x2b9   :  { %5972 = vmatpush1.bf16.msra.mxu1 %v20320_v4  ;;  %6085 = vmatpush1.bf16.msra.mxu0 %v20323_v5  ;;  %v20383_v4 = vld [vmem:[#allocation2 + $0x11f8] ss:$28 sps:$4 sm:$0xff]   ;;  %v20388_v5 = vld [vmem:[#allocation2 + $0x176c] ss:$28 sps:$4 sm:$0xff]  }
 0x2ba   :  { %5973 = vmatprep.subr.bf16.mxu1 %v20328_v1  ;;  %6086 = vmatprep.subr.bf16.mxu0 %v20331_v6  ;;  %v20391_v1 = vld [vmem:[#allocation2 + $0x1234] ss:$28 sps:$4 sm:$0xff]   ;;  %v20386_v6 = vld [vmem:[#allocation2 + $0x1768] ss:$28 sps:$4 sm:$0xff]  }
 0x2bb   :  { %6116 = vmatprep.mubr.bf16.mxu0 %v23125_v59  ;;  %v20347_v59 = vld [vmem:[#allocation2 + $0x10a8] ss:$28 sps:$4 sm:$0xff]  }
 0x2bd   :  { %5974 = vmatpush1.bf16.msra.mxu1 %v20326_v7  ;;  %6087 = vmatpush1.bf16.msra.mxu0 %v20329_v8  ;;  %v20389_v7 = vld [vmem:[#allocation2 + $0x1230] ss:$28 sps:$4 sm:$0xff]   ;;  %v20394_v8 = vld [vmem:[#allocation2 + $0x17a4] ss:$28 sps:$4 sm:$0xff]  }
 0x2be   :  { %5975 = vmatprep.subr.bf16.mxu1 %v20334_v10  ;;  %6088 = vmatprep.subr.bf16.mxu0 %v20337_v14  ;;  %v20397_v10 = vld [vmem:[#allocation2 + $0x126c] ss:$28 sps:$4 sm:$0xff]   ;;  %v20392_v14 = vld [vmem:[#allocation2 + $0x17a0] ss:$28 sps:$4 sm:$0xff]  }
 0x2c1   :  { %5976 = vmatpush1.bf16.msra.mxu1 %v20332_v23  ;;  %6089 = vmatpush1.bf16.msra.mxu0 %v20335_v24  ;;  %v20395_v23 = vld [vmem:[#allocation2 + $0x1268] ss:$28 sps:$4 sm:$0xff]   ;;  %v20400_v24 = vld [vmem:[#allocation2 + $0x17dc] ss:$28 sps:$4 sm:$0xff]  }
 0x2c2   :  { %5977 = vmatprep.subr.bf16.mxu1 %v20340_v25  ;;  %6090 = vmatprep.subr.bf16.mxu0 %v20343_v27  ;;  %v20403_v25 = vld [vmem:[#allocation2 + $0x12a4] ss:$28 sps:$4 sm:$0xff]   ;;  %v20398_v27 = vld [vmem:[#allocation2 + $0x17d8] ss:$28 sps:$4 sm:$0xff]  }
 0x2c5   :  { %5978 = vmatpush1.bf16.msra.mxu1 %v20338_v55  ;;  %6091 = vmatpush1.bf16.msra.mxu0 %v20341_v28  ;;  %v20401_v55 = vld [vmem:[#allocation2 + $0x12a0] ss:$28 sps:$4 sm:$0xff]   ;;  %v20406_v28 = vld [vmem:[#allocation2 + $0x1814] ss:$28 sps:$4 sm:$0xff]  }
 0x2c6   :  { %5979 = vmatprep.subr.bf16.mxu1 %v20346_v9  ;;  %6092 = vmatprep.subr.bf16.mxu0 %v20349_v29  ;;  %v20409_v9 = vld [vmem:[#allocation2 + $0x12dc] ss:$28 sps:$4 sm:$0xff]  }
 0x2c9   :  { %5980 = vmatpush1.bf16.msra.mxu1 %v20344_v30  ;;  %6093 = vmatpush1.bf16.msra.mxu0 %v20347_v59  ;;  %v20404_v30 = vld [vmem:[#allocation2 + $0x1810] ss:$28 sps:$4 sm:$0xff]  }
 0x2ca   :  { %5981 = vmatprep.subr.bf16.mxu1 %v20352_v32  ;;  %6094 = vmatprep.subr.bf16.mxu0 %v20355_v33 }
 0x2cb   :  { %v18907_v38 = vpop.f32.mrb[12].mxu1 }
 0x2cc   :  { %v18908_v42 = vpop.f32.mrb[13].mxu1 }
 0x2cd   :  { %v18909_v44 = vadd.f32 %v18908_v42, %v18907_v38  ;;  %v18910_v45 = vpop.f32.mrb[14].mxu1  ;;  %5982 = vmatpush1.bf16.msra.mxu1 %v20350_v34  ;;  %6095 = vmatpush1.bf16.msra.mxu0 %v20353_v35  ;;  %v20407_v34 = vld [vmem:[#allocation2 + $0x12d8] ss:$28 sps:$4 sm:$0xff]   ;;  %v20412_v35 = vld [vmem:[#allocation2 + $0x184c] ss:$28 sps:$4 sm:$0xff]  }
 0x2ce   :  { %v18911_v46 = vpop.f32.mrb[15].mxu1  ;;  %5983 = vmatprep.subr.bf16.mxu1 %v20358_v36  ;;  %6096 = vmatprep.subr.bf16.mxu0 %v20361_v37  ;;  %v20415_v38 = vld [vmem:[#allocation2 + $0x1314] ss:$28 sps:$4 sm:$0xff]   ;;  %v20418_v42 = vld [vmem:[#allocation2 + $0x134c] ss:$28 sps:$4 sm:$0xff]  }
 0x2cf   :  { %v18912_v49 = vadd.f32 %v18911_v46, %v18910_v45  ;;  %v23182_v50 = vadd.f32 %v18909_v44, %v23175_v58  ;;  %v20379_v58 = vld [vmem:[#allocation2 + $0x11c4] ss:$28 sps:$4 sm:$0xff]   ;;  %v20421_v44 = vld [vmem:[#allocation2 + $0xc54] ss:$28 sps:$4 sm:$0xff]  }
 0x2d0   :  { %v20416_v45 = vld [vmem:[#allocation2 + $0x1348] ss:$28 sps:$4 sm:$0xff]   ;;  %v20419_v46 = vld [vmem:[#allocation2 + $0xc50] ss:$28 sps:$4 sm:$0xff]  }
 0x2d1   :  { %5984 = vmatpush1.bf16.msra.mxu1 %v20356_v39  ;;  %6097 = vmatpush1.bf16.msra.mxu0 %v20359_v40  ;;  %v23185_v56 = vadd.f32 %v18912_v49, %v23177_v63  ;;  %v20377_v63 = vld [vmem:[#allocation2 + $0x11c0] ss:$28 sps:$4 sm:$0xff]   ;;  %v20410_v39 = vld [vmem:[#allocation2 + $0x1848] ss:$28 sps:$4 sm:$0xff]   ;;  %v20413_v40 = vld [vmem:[#allocation2 + $0x1310] ss:$28 sps:$4 sm:$0xff]  }
 0x2d2   :  { %5985 = vmatprep.subr.bf16.mxu1 %v20364_v47  ;;  %6098 = vmatprep.subr.bf16.mxu0 %v20367_v48  ;;  %v20424_v47 = vld [vmem:[#allocation2 + $0x1384] ss:$28 sps:$4 sm:$0xff]   ;;  %v20427_v48 = vld [vmem:[#allocation2 + $0xc8c] ss:$28 sps:$4 sm:$0xff]  }
 0x2d3   :  { %v20422_v49 = vld [vmem:[#allocation2 + $0x1380] ss:$28 sps:$4 sm:$0xff]  }
 0x2d5   :  { %5986 = vmatpush1.bf16.msra.mxu1 %v20362_v52  ;;  %6099 = vmatpush1.bf16.msra.mxu0 %v20365_v54  ;;  %v20425_v52 = vld [vmem:[#allocation2 + $0xc88] ss:$28 sps:$4 sm:$0xff]   ;;  %v20430_v54 = vld [vmem:[#allocation2 + $0x13bc] ss:$28 sps:$4 sm:$0xff]  }
 0x2d6   :  { %5998 = vmatprep.subr.bf16.mxu1 %v20370_v57  ;;  %6100 = vmatprep.subr.bf16.mxu0 %v20373_v41  ;;  %v20428_v57 = vld [vmem:[#allocation2 + $0x13b8] ss:$28 sps:$4 sm:$0xff]   ;;  %v23211_v41 = vld [vmem:[%s23775_s0 + $0x4] ss:$28 sps:$4 sm:$0xff]  }
 0x2d8   :  { %5988 = vmatmul.mubr.bf16.vlgmr.msra.gmra.mrb[20].mxu1 %v23190_v60 }
 0x2d9   :  { %5999 = vmatpush1.bf16.msra.mxu1 %v20368_v53  ;;  %6101 = vmatpush1.bf16.msra.mxu0 %v20371_v61  ;;  %v20436_v53 = vld [vmem:[#allocation2 + $0x13f4] ss:$28 sps:$4 sm:$0xff]   ;;  %v20439_v61 = vld [vmem:[#allocation2 + $0xcfc] ss:$28 sps:$4 sm:$0xff]  }
 0x2da   :  { %6000 = vmatprep.subr.bf16.mxu1 %v20376_v62  ;;  %6102 = vmatprep.subr.bf16.mxu0 %v20379_v58  ;;  %v20434_v62 = vld [vmem:[#allocation2 + $0x13f0] ss:$28 sps:$4 sm:$0xff]   ;;  %v20437_v58 = vld [vmem:[#allocation2 + $0xcf8] ss:$28 sps:$4 sm:$0xff]  }
 0x2db   :  { %6030 = vmatprep.mubr.bf16.mxu1 %v22841_v17 }
 0x2dd   :  { %6001 = vmatpush1.bf16.msra.mxu1 %v20374_v51  ;;  %6103 = vmatpush1.bf16.msra.mxu0 %v20377_v63  ;;  %v20442_v51 = vld [vmem:[#allocation2 + $0x142c] ss:$28 sps:$4 sm:$0xff]  }
 0x2de   :  { %6002 = vmatprep.subr.bf16.mxu1 %v20382_v0  ;;  %6104 = vmatprep.subr.bf16.mxu0 %v20385_v2  ;;  %v20440_v63 = vld [vmem:[#allocation2 + $0x1428] ss:$28 sps:$4 sm:$0xff]   ;;  %v20443_v0 = vld [vmem:[#allocation2 + $0xd30] ss:$28 sps:$4 sm:$0xff]  }
 0x2df   :  { %v20448_v2 = vld [vmem:[#allocation2 + $0x1464] ss:$28 sps:$4 sm:$0xff]  }
 0x2e1   :  { %6003 = vmatpush1.bf16.msra.mxu1 %v20380_v3  ;;  %6105 = vmatpush1.bf16.msra.mxu0 %v20383_v4  ;;  %v20451_v3 = vld [vmem:[#allocation2 + $0xd6c] ss:$28 sps:$4 sm:$0xff]   ;;  %v20446_v4 = vld [vmem:[#allocation2 + $0x1460] ss:$28 sps:$4 sm:$0xff]  }
 0x2e2   :  { %6004 = vmatprep.subr.bf16.mxu1 %v20388_v5  ;;  %6106 = vmatprep.subr.bf16.mxu0 %v20391_v1  ;;  %v20449_v5 = vld [vmem:[#allocation2 + $0xd68] ss:$28 sps:$4 sm:$0xff]   ;;  %v20454_v1 = vld [vmem:[#allocation2 + $0x149c] ss:$28 sps:$4 sm:$0xff]  }
 0x2e5   :  { %6005 = vmatpush1.bf16.msra.mxu1 %v20386_v6  ;;  %6107 = vmatpush1.bf16.msra.mxu0 %v20389_v7  ;;  %v20457_v6 = vld [vmem:[#allocation2 + $0xda4] ss:$28 sps:$4 sm:$0xff]   ;;  %v20452_v7 = vld [vmem:[#allocation2 + $0x1498] ss:$28 sps:$4 sm:$0xff]  }
 0x2e6   :  { %6006 = vmatprep.subr.bf16.mxu1 %v20394_v8  ;;  %6108 = vmatprep.subr.bf16.mxu0 %v20397_v10  ;;  %v20455_v8 = vld [vmem:[#allocation2 + $0xda0] ss:$28 sps:$4 sm:$0xff]   ;;  %v20460_v10 = vld [vmem:[#allocation2 + $0x14d4] ss:$28 sps:$4 sm:$0xff]  }
 0x2e9   :  { %6007 = vmatpush1.bf16.msra.mxu1 %v20392_v14  ;;  %6109 = vmatpush1.bf16.msra.mxu0 %v20395_v23  ;;  %v20463_v14 = vld [vmem:[#allocation2 + $0xddc] ss:$28 sps:$4 sm:$0xff]   ;;  %v20458_v23 = vld [vmem:[#allocation2 + $0x14d0] ss:$28 sps:$4 sm:$0xff]  }
 0x2ea   :  { %6008 = vmatprep.subr.bf16.mxu1 %v20400_v24  ;;  %6110 = vmatprep.subr.bf16.mxu0 %v20403_v25  ;;  %v20461_v24 = vld [vmem:[#allocation2 + $0xdd8] ss:$28 sps:$4 sm:$0xff]   ;;  %v20466_v25 = vld [vmem:[#allocation2 + $0x150c] ss:$28 sps:$4 sm:$0xff]  }
 0x2eb   :  { %v3383_v29 = vpop.f32.mrb[16].mxu1 }
 0x2ec   :  { %v23195_v59 = vadd.f32 %v3383_v29, %v23182_v50  ;;  %v19205_v32 = vpop.f32.mrb[17].mxu1  ;;  %v23203_v50 = vld [vmem:[%s23775_s0 + $0x18] ss:$28 sps:$4 sm:$0xff]   ;;  %v20475_v29 = vld [vmem:[#allocation2 + $0xe4c] ss:$28 sps:$4 sm:$0xff]  }
 0x2ed   :  { %v3386_v33 = vpop.f32.mrb[18].mxu1  ;;  %6009 = vmatpush1.bf16.msra.mxu1 %v20398_v27  ;;  %6111 = vmatpush1.bf16.msra.mxu0 %v20401_v55  ;;  %v20469_v27 = vld [vmem:[#allocation2 + $0xe14] ss:$28 sps:$4 sm:$0xff]   ;;  %v20464_v55 = vld [vmem:[#allocation2 + $0x1508] ss:$28 sps:$4 sm:$0xff]  }
 0x2ee   :  { %v23198_v36 = vadd.f32 %v3386_v33, %v23185_v56  ;;  %v19206_v37 = vpop.f32.mrb[19].mxu1  ;;  %6010 = vmatprep.subr.bf16.mxu1 %v20406_v28  ;;  %6112 = vmatprep.subr.bf16.mxu0 %v20409_v9  ;;  %v20433_v56 = vld [vmem:[#allocation2 + $0xcc4] ss:$28 sps:$4 sm:$0xff]   ;;  %v20467_v28 = vld [vmem:[#allocation2 + $0xe10] ss:$28 sps:$4 sm:$0xff]  }
 0x2ef   :  { %v20472_v9 = vld [vmem:[#allocation2 + $0x1544] ss:$28 sps:$4 sm:$0xff]   ;;  %v20478_v33 = vld [vmem:[#allocation2 + $0x157c] ss:$28 sps:$4 sm:$0xff]  }
 0x2f0   :  { %v20473_v32 = vld [vmem:[#allocation2 + $0xe48] ss:$28 sps:$4 sm:$0xff]   ;;  %v20479_v37 = vld [vmem:[#allocation2 + $0xe80] ss:$28 sps:$4 sm:$0xff]  }
 0x2f1   :  { %6011 = vmatpush1.bf16.msra.mxu1 %v20404_v30  ;;  %6113 = vmatpush1.bf16.msra.mxu0 %v20407_v34  ;;  %v20470_v30 = vld [vmem:[#allocation2 + $0x1540] ss:$28 sps:$4 sm:$0xff]  }
 0x2f2   :  { %6012 = vmatprep.subr.bf16.mxu1 %v20412_v35  ;;  %6114 = vmatprep.subr.bf16.mxu0 %v20415_v38  ;;  %v20481_v34 = vld [vmem:[#allocation2 + $0xe84] ss:$28 sps:$4 sm:$0xff]   ;;  %v20476_v35 = vld [vmem:[#allocation2 + $0x1578] ss:$28 sps:$4 sm:$0xff]  }
 0x2f3   :  { %v20484_v38 = vld [vmem:[#allocation2 + $0x15b4] ss:$28 sps:$4 sm:$0xff]  }
 0x2f5   :  { %6013 = vmatpush1.bf16.msra.mxu1 %v20410_v39  ;;  %6115 = vmatpush1.bf16.msra.mxu0 %v20413_v40  ;;  %v20487_v39 = vld [vmem:[#allocation2 + $0xebc] ss:$28 sps:$4 sm:$0xff]   ;;  %v20482_v40 = vld [vmem:[#allocation2 + $0x15b0] ss:$28 sps:$4 sm:$0xff]  }
 0x2f6   :  { %6127 = vmatprep.subr.bf16.mxu0 %v20418_v42  ;;  %6213 = vmatprep.subr.bf16.mxu1 %v20421_v44  ;;  %v20485_v42 = vld [vmem:[#allocation2 + $0xeb8] ss:$28 sps:$4 sm:$0xff]   ;;  %v20490_v44 = vld [vmem:[#allocation2 + $0x15ec] ss:$28 sps:$4 sm:$0xff]  }
 0x2f8   :  { %6031 = vmatmul.mubr.bf16.vlgmr.msra.gmra.mrb[20].mxu1 %v23203_v50  ;;  %6117 = vmatmul.mubr.bf16.vlgmr.msra.gmra.mrb[8].mxu0 %v23157_v13  ;;  %v20431_v13 = vld [vmem:[#allocation2 + $0xcc0] ss:$28 sps:$4 sm:$0xff]  }
 0x2f9   :  { %6128 = vmatpush1.bf16.msra.mxu0 %v20416_v45  ;;  %6214 = vmatpush1.bf16.msra.mxu1 %v20419_v46  ;;  %v20493_v45 = vld [vmem:[#allocation2 + $0xef4] ss:$28 sps:$4 sm:$0xff]   ;;  %v20488_v46 = vld [vmem:[#allocation2 + $0x15e8] ss:$28 sps:$4 sm:$0xff]  }
 0x2fa   :  { %6129 = vmatprep.subr.bf16.mxu0 %v20424_v47  ;;  %6215 = vmatprep.subr.bf16.mxu1 %v20427_v48  ;;  %v20491_v47 = vld [vmem:[#allocation2 + $0xef0] ss:$28 sps:$4 sm:$0xff]   ;;  %v20496_v48 = vld [vmem:[#allocation2 + $0x1624] ss:$28 sps:$4 sm:$0xff]  }
 0x2fb   :  { %6159 = vmatprep.mubr.bf16.mxu0 %v23163_v26  ;;  %6245 = vmatprep.mubr.bf16.mxu1 %v23211_v41  ;;  %v20445_v26 = vld [vmem:[#allocation2 + $0xd34] ss:$28 sps:$4 sm:$0xff]  }
 0x2fd   :  { %6130 = vmatpush1.bf16.msra.mxu0 %v20422_v49  ;;  %6216 = vmatpush1.bf16.msra.mxu1 %v20425_v52  ;;  %v20499_v49 = vld [vmem:[#allocation2 + $0xf2c] ss:$28 sps:$4 sm:$0xff]   ;;  %v20494_v52 = vld [vmem:[#allocation2 + $0x1620] ss:$28 sps:$4 sm:$0xff]  }
 0x2fe   :  { %6131 = vmatprep.subr.bf16.mxu0 %v20430_v54  ;;  %6217 = vmatprep.subr.bf16.mxu1 %v20433_v56  ;;  %v20497_v54 = vld [vmem:[#allocation2 + $0xf28] ss:$28 sps:$4 sm:$0xff]   ;;  %v20502_v56 = vld [vmem:[#allocation2 + $0x165c] ss:$28 sps:$4 sm:$0xff]  }
 0x301   :  { %6132 = vmatpush1.bf16.msra.mxu0 %v20428_v57  ;;  %6218 = vmatpush1.bf16.msra.mxu1 %v20431_v13  ;;  %v20505_v57 = vld [vmem:[#allocation2 + $0xf64] ss:$28 sps:$4 sm:$0xff]   ;;  %v20500_v13 = vld [vmem:[#allocation2 + $0x1658] ss:$28 sps:$4 sm:$0xff]  }
 0x302   :  { %6133 = vmatprep.subr.bf16.mxu0 %v20436_v53  ;;  %6219 = vmatprep.subr.bf16.mxu1 %v20439_v61  ;;  %v20503_v53 = vld [vmem:[#allocation2 + $0xf60] ss:$28 sps:$4 sm:$0xff]   ;;  %v20508_v61 = vld [vmem:[#allocation2 + $0x1694] ss:$28 sps:$4 sm:$0xff]  }
 0x305   :  { %6134 = vmatpush1.bf16.msra.mxu0 %v20434_v62  ;;  %6220 = vmatpush1.bf16.msra.mxu1 %v20437_v58  ;;  %v20511_v62 = vld [vmem:[#allocation2 + $0xf9c] ss:$28 sps:$4 sm:$0xff]   ;;  %v20506_v58 = vld [vmem:[#allocation2 + $0x1690] ss:$28 sps:$4 sm:$0xff]  }
 0x306   :  { %6135 = vmatprep.subr.bf16.mxu0 %v20442_v51  ;;  %6221 = vmatprep.subr.bf16.mxu1 %v20445_v26  ;;  %v20509_v51 = vld [vmem:[#allocation2 + $0xf98] ss:$28 sps:$4 sm:$0xff]   ;;  %v20514_v26 = vld [vmem:[#allocation2 + $0x16cc] ss:$28 sps:$4 sm:$0xff]  }
 0x309   :  { %6136 = vmatpush1.bf16.msra.mxu0 %v20440_v63  ;;  %6222 = vmatpush1.bf16.msra.mxu1 %v20443_v0  ;;  %v20517_v63 = vld [vmem:[#allocation2 + $0xfd4] ss:$28 sps:$4 sm:$0xff]   ;;  %v20512_v0 = vld [vmem:[#allocation2 + $0x16c8] ss:$28 sps:$4 sm:$0xff]  }
 0x30a   :  { %6137 = vmatprep.subr.bf16.mxu0 %v20448_v2  ;;  %6223 = vmatprep.subr.bf16.mxu1 %v20451_v3  ;;  %v20515_v2 = vld [vmem:[#allocation2 + $0xfd0] ss:$28 sps:$4 sm:$0xff]   ;;  %v20520_v3 = vld [vmem:[#allocation2 + $0x1704] ss:$28 sps:$4 sm:$0xff]  }
 0x30d   :  { %6138 = vmatpush1.bf16.msra.mxu0 %v20446_v4  ;;  %6224 = vmatpush1.bf16.msra.mxu1 %v20449_v5  ;;  %v20523_v4 = vld [vmem:[#allocation2 + $0x100c] ss:$28 sps:$4 sm:$0xff]   ;;  %v20518_v5 = vld [vmem:[#allocation2 + $0x1700] ss:$28 sps:$4 sm:$0xff]  }
 0x30e   :  { %6139 = vmatprep.subr.bf16.mxu0 %v20454_v1  ;;  %6225 = vmatprep.subr.bf16.mxu1 %v20457_v6  ;;  %v20521_v1 = vld [vmem:[#allocation2 + $0x1008] ss:$28 sps:$4 sm:$0xff]   ;;  %v23218_v6 = vld [vmem:[%s23775_s0] ss:$28 sps:$4 sm:$0xff]  }
 0x311   :  { %6140 = vmatpush1.bf16.msra.mxu0 %v20452_v7  ;;  %6226 = vmatpush1.bf16.msra.mxu1 %v20455_v8  ;;  %v20526_v7 = vld [vmem:[#allocation2 + $0x173c] ss:$28 sps:$4 sm:$0xff]   ;;  %v20529_v8 = vld [vmem:[#allocation2 + $0x1044] ss:$28 sps:$4 sm:$0xff]  }
 0x312   :  { %6141 = vmatprep.subr.bf16.mxu0 %v20460_v10  ;;  %6227 = vmatprep.subr.bf16.mxu1 %v20463_v14  ;;  %v20524_v10 = vld [vmem:[#allocation2 + $0x1738] ss:$28 sps:$4 sm:$0xff]   ;;  %v20527_v14 = vld [vmem:[#allocation2 + $0x1040] ss:$28 sps:$4 sm:$0xff]  }
 0x315   :  { %6142 = vmatpush1.bf16.msra.mxu0 %v20458_v23  ;;  %6228 = vmatpush1.bf16.msra.mxu1 %v20461_v24  ;;  %v20532_v23 = vld [vmem:[#allocation2 + $0x1774] ss:$28 sps:$4 sm:$0xff]   ;;  %v20535_v24 = vld [vmem:[#allocation2 + $0x107c] ss:$28 sps:$4 sm:$0xff]  }
 0x316   :  { %6143 = vmatprep.subr.bf16.mxu0 %v20466_v25  ;;  %6229 = vmatprep.subr.bf16.mxu1 %v20469_v27  ;;  %v20530_v25 = vld [vmem:[#allocation2 + $0x1770] ss:$28 sps:$4 sm:$0xff]   ;;  %v20533_v27 = vld [vmem:[#allocation2 + $0x1078] ss:$28 sps:$4 sm:$0xff]  }
 0x319   :  { %6144 = vmatpush1.bf16.msra.mxu0 %v20464_v55  ;;  %6230 = vmatpush1.bf16.msra.mxu1 %v20467_v28  ;;  %v20538_v55 = vld [vmem:[#allocation2 + $0x17ac] ss:$28 sps:$4 sm:$0xff]   ;;  %v20541_v28 = vld [vmem:[#allocation2 + $0x10b4] ss:$28 sps:$4 sm:$0xff]  }
 0x31a   :  { %6145 = vmatprep.subr.bf16.mxu0 %v20472_v9  ;;  %6231 = vmatprep.subr.bf16.mxu1 %v20475_v29  ;;  %v20536_v9 = vld [vmem:[#allocation2 + $0x17a8] ss:$28 sps:$4 sm:$0xff]   ;;  %v20539_v29 = vld [vmem:[#allocation2 + $0x10b0] ss:$28 sps:$4 sm:$0xff]  }
 0x31d   :  { %6146 = vmatpush1.bf16.msra.mxu0 %v20470_v30  ;;  %6232 = vmatpush1.bf16.msra.mxu1 %v20473_v32  ;;  %v20544_v30 = vld [vmem:[#allocation2 + $0x17e4] ss:$28 sps:$4 sm:$0xff]   ;;  %v20547_v32 = vld [vmem:[#allocation2 + $0x10ec] ss:$28 sps:$4 sm:$0xff]  }
 0x31e   :  { %6147 = vmatprep.subr.bf16.mxu0 %v20478_v33  ;;  %6233 = vmatprep.subr.bf16.mxu1 %v20481_v34  ;;  %v20542_v33 = vld [vmem:[#allocation2 + $0x17e0] ss:$28 sps:$4 sm:$0xff]   ;;  %v20545_v34 = vld [vmem:[#allocation2 + $0x10e8] ss:$28 sps:$4 sm:$0xff]  }
 0x321   :  { %6148 = vmatpush1.bf16.msra.mxu0 %v20476_v35  ;;  %6234 = vmatpush1.bf16.msra.mxu1 %v20479_v37  ;;  %v20550_v35 = vld [vmem:[#allocation2 + $0x181c] ss:$28 sps:$4 sm:$0xff]   ;;  %v20553_v37 = vld [vmem:[#allocation2 + $0x1124] ss:$28 sps:$4 sm:$0xff]  }
 0x322   :  { %6149 = vmatprep.subr.bf16.mxu0 %v20484_v38  ;;  %6235 = vmatprep.subr.bf16.mxu1 %v20487_v39  ;;  %v20548_v39 = vld [vmem:[#allocation2 + $0x1818] ss:$28 sps:$4 sm:$0xff]  }
 0x325   :  { %6150 = vmatpush1.bf16.msra.mxu0 %v20482_v40  ;;  %6236 = vmatpush1.bf16.msra.mxu1 %v20485_v42  ;;  %v20551_v40 = vld [vmem:[#allocation2 + $0x1120] ss:$28 sps:$4 sm:$0xff]  }
 0x326   :  { %6151 = vmatprep.subr.bf16.mxu0 %v20490_v44  ;;  %6237 = vmatprep.subr.bf16.mxu1 %v20493_v45  ;;  %v20556_v44 = vld [vmem:[#allocation2 + $0x1854] ss:$28 sps:$4 sm:$0xff]  }
 0x329   :  { %6152 = vmatpush1.bf16.msra.mxu0 %v20488_v46  ;;  %6238 = vmatpush1.bf16.msra.mxu1 %v20491_v47  ;;  %v20559_v47 = vld [vmem:[#allocation2 + $0x115c] ss:$28 sps:$4 sm:$0xff]  }
 0x32a   :  { %6153 = vmatprep.subr.bf16.mxu0 %v20496_v48  ;;  %6239 = vmatprep.subr.bf16.mxu1 %v20499_v49  ;;  %v20554_v48 = vld [vmem:[#allocation2 + $0x1850] ss:$28 sps:$4 sm:$0xff]   ;;  %v20557_v49 = vld [vmem:[#allocation2 + $0x1158] ss:$28 sps:$4 sm:$0xff]  }
 0x32d   :  { %6154 = vmatpush1.bf16.msra.mxu0 %v20494_v52  ;;  %6240 = vmatpush1.bf16.msra.mxu1 %v20497_v54  ;;  %v20562_v52 = vld [vmem:[#allocation2 + $0x1194] ss:$28 sps:$4 sm:$0xff]  }
 0x32e   :  { %6155 = vmatprep.subr.bf16.mxu0 %v20502_v56  ;;  %6241 = vmatprep.subr.bf16.mxu1 %v20505_v57  ;;  %v20563_v54 = vld [vmem:[#allocation2 + $0xe18] ss:$28 sps:$4 sm:$0xff]   ;;  %v20560_v56 = vld [vmem:[#allocation2 + $0x1190] ss:$28 sps:$4 sm:$0xff]  }
 0x32f   :  { %v20564_v57 = vld [vmem:[#allocation2 + $0xc58] ss:$28 sps:$4 sm:$0xff]  }
 0x331   :  { %6156 = vmatpush1.bf16.msra.mxu0 %v20500_v13  ;;  %6242 = vmatpush1.bf16.msra.mxu1 %v20503_v53  ;;  %v20567_v13 = vld [vmem:[#allocation2 + $0x11cc] ss:$28 sps:$4 sm:$0xff]  }
 0x332   :  { %6157 = vmatprep.subr.bf16.mxu0 %v20508_v61  ;;  %6243 = vmatprep.subr.bf16.mxu1 %v20511_v62  ;;  %v20568_v53 = vld [vmem:[#allocation2 + $0xe50] ss:$28 sps:$4 sm:$0xff]   ;;  %v20565_v61 = vld [vmem:[#allocation2 + $0x11c8] ss:$28 sps:$4 sm:$0xff]  }
 0x333   :  { %v20569_v62 = vld [vmem:[#allocation2 + $0xc90] ss:$28 sps:$4 sm:$0xff]  }
 0x335   :  { %6158 = vmatpush1.bf16.msra.mxu0 %v20506_v58  ;;  %6244 = vmatpush1.bf16.msra.mxu1 %v20509_v51  ;;  %v20572_v58 = vld [vmem:[#allocation2 + $0x1204] ss:$28 sps:$4 sm:$0xff]  }
 0x336   :  { %6170 = vmatprep.subr.bf16.mxu0 %v20514_v26  ;;  %6256 = vmatprep.subr.bf16.mxu1 %v20517_v63  ;;  %v20573_v51 = vld [vmem:[#allocation2 + $0xe88] ss:$28 sps:$4 sm:$0xff]   ;;  %v20570_v26 = vld [vmem:[#allocation2 + $0x1200] ss:$28 sps:$4 sm:$0xff]  }
 0x337   :  { %v20574_v63 = vld [vmem:[#allocation2 + $0xcc8] ss:$28 sps:$4 sm:$0xff]  }
 0x338   :  { %6160 = vmatmul.mubr.bf16.vlgmr.msra.gmra.mrb[8].mxu0 %v23190_v60  ;;  %6246 = vmatmul.mubr.bf16.vlgmr.msra.gmra.mrb[24].mxu1 %v23218_v6  ;;  %v23225_v60 = vld [vmem:[%s23775_s0 + $0xc] ss:$28 sps:$4 sm:$0xff]  }
 0x339   :  { %6171 = vmatpush1.bf16.msra.mxu0 %v20512_v0  ;;  %6257 = vmatpush1.bf16.msra.mxu1 %v20515_v2  ;;  %v20577_v0 = vld [vmem:[#allocation2 + $0x123c] ss:$28 sps:$4 sm:$0xff]  }
 0x33a   :  { %6172 = vmatprep.subr.bf16.mxu0 %v20520_v3  ;;  %6258 = vmatprep.subr.bf16.mxu1 %v20523_v4  ;;  %v20578_v2 = vld [vmem:[#allocation2 + $0xec0] ss:$28 sps:$4 sm:$0xff]   ;;  %v20582_v4 = vld [vmem:[#allocation2 + $0x1274] ss:$28 sps:$4 sm:$0xff]  }
 0x33b   :  { %6202 = vmatprep.mubr.bf16.mxu0 %v22841_v17  ;;  %6288 = vmatprep.mubr.bf16.mxu1 %v23225_v60  ;;  %v20579_v3 = vld [vmem:[#allocation2 + $0xd00] ss:$28 sps:$4 sm:$0xff]  }
 0x33d   :  { %6173 = vmatpush1.bf16.msra.mxu0 %v20518_v5  ;;  %6259 = vmatpush1.bf16.msra.mxu1 %v20521_v1  ;;  %v20583_v5 = vld [vmem:[#allocation2 + $0xef8] ss:$28 sps:$4 sm:$0xff]   ;;  %v20580_v1 = vld [vmem:[#allocation2 + $0x1270] ss:$28 sps:$4 sm:$0xff]  }
 0x33e   :  { %6174 = vmatprep.subr.bf16.mxu0 %v20526_v7  ;;  %6260 = vmatprep.subr.bf16.mxu1 %v20529_v8  ;;  %v20587_v7 = vld [vmem:[#allocation2 + $0x12ac] ss:$28 sps:$4 sm:$0xff]  }
 0x33f   :  { %v20588_v8 = vld [vmem:[#allocation2 + $0xf30] ss:$28 sps:$4 sm:$0xff]  }
 0x341   :  { %6175 = vmatpush1.bf16.msra.mxu0 %v20524_v10  ;;  %6261 = vmatpush1.bf16.msra.mxu1 %v20527_v14  ;;  %v20585_v10 = vld [vmem:[#allocation2 + $0x12a8] ss:$28 sps:$4 sm:$0xff]   ;;  %v20589_v14 = vld [vmem:[#allocation2 + $0xd70] ss:$28 sps:$4 sm:$0xff]  }
 0x342   :  { %6176 = vmatprep.subr.bf16.mxu0 %v20532_v23  ;;  %6262 = vmatprep.subr.bf16.mxu1 %v20535_v24  ;;  %v20592_v23 = vld [vmem:[#allocation2 + $0x12e4] ss:$28 sps:$4 sm:$0xff]  }
 0x343   :  { %v20593_v24 = vld [vmem:[#allocation2 + $0xf68] ss:$28 sps:$4 sm:$0xff]  }
 0x345   :  { %6177 = vmatpush1.bf16.msra.mxu0 %v20530_v25  ;;  %6263 = vmatpush1.bf16.msra.mxu1 %v20533_v27  ;;  %v20590_v25 = vld [vmem:[#allocation2 + $0x12e0] ss:$28 sps:$4 sm:$0xff]   ;;  %v20594_v27 = vld [vmem:[#allocation2 + $0xda8] ss:$28 sps:$4 sm:$0xff]  }
 0x346   :  { %6178 = vmatprep.subr.bf16.mxu0 %v20538_v55  ;;  %6264 = vmatprep.subr.bf16.mxu1 %v20541_v28  ;;  %v20597_v55 = vld [vmem:[#allocation2 + $0x131c] ss:$28 sps:$4 sm:$0xff]  }
 0x347   :  { %v20598_v28 = vld [vmem:[#allocation2 + $0xfa0] ss:$28 sps:$4 sm:$0xff]  }
 0x349   :  { %6179 = vmatpush1.bf16.msra.mxu0 %v20536_v9  ;;  %6265 = vmatpush1.bf16.msra.mxu1 %v20539_v29  ;;  %v20595_v9 = vld [vmem:[#allocation2 + $0x1318] ss:$28 sps:$4 sm:$0xff]   ;;  %v20599_v29 = vld [vmem:[#allocation2 + $0xde0] ss:$28 sps:$4 sm:$0xff]  }
 0x34a   :  { %6180 = vmatprep.subr.bf16.mxu0 %v20544_v30  ;;  %6266 = vmatprep.subr.bf16.mxu1 %v20547_v32  ;;  %v20602_v30 = vld [vmem:[#allocation2 + $0x1354] ss:$28 sps:$4 sm:$0xff]  }
 0x34b   :  { %v23228_v38 = vpop.f32.mrb[4].mxu0  ;;  %v20603_v32 = vld [vmem:[#allocation2 + $0x1198] ss:$28 sps:$4 sm:$0xff]  }
 0x34c   :  { %v23230_v42 = vpop.f32.mrb[5].mxu0 }
 0x34d   :  { %v23232_v45 = vpop.f32.mrb[6].mxu0  ;;  %6181 = vmatpush1.bf16.msra.mxu0 %v20542_v33  ;;  %6267 = vmatpush1.bf16.msra.mxu1 %v20545_v34  ;;  %v20600_v33 = vld [vmem:[#allocation2 + $0x1350] ss:$28 sps:$4 sm:$0xff]   ;;  %v20604_v34 = vld [vmem:[#allocation2 + $0xfd8] ss:$28 sps:$4 sm:$0xff]  }
 0x34e   :  { %v23234_v46 = vpop.f32.mrb[7].mxu0  ;;  %6182 = vmatprep.subr.bf16.mxu0 %v20550_v35  ;;  %6268 = vmatprep.subr.bf16.mxu1 %v20553_v37  ;;  %v20607_v35 = vld [vmem:[#allocation2 + $0x138c] ss:$28 sps:$4 sm:$0xff]  }
 0x34f   :  { %v20608_v37 = vld [vmem:[#allocation2 + $0x11d0] ss:$28 sps:$4 sm:$0xff]  }
 0x351   :  { %6183 = vmatpush1.bf16.msra.mxu0 %v20548_v39  ;;  %6269 = vmatpush1.bf16.msra.mxu1 %v20551_v40  ;;  %v23241_v39 = vld [vmem:[%s23775_s0 + $0x8] ss:$28 sps:$4 sm:$0xff]  }
 0x352   :  { %6184 = vmatprep.subr.bf16.mxu0 %v20556_v44  ;;  %6270 = vmatprep.subr.bf16.mxu1 %v20559_v47  ;;  %v20605_v40 = vld [vmem:[#allocation2 + $0x1388] ss:$28 sps:$4 sm:$0xff]   ;;  %v20609_v44 = vld [vmem:[#allocation2 + $0x1010] ss:$28 sps:$4 sm:$0xff]  }
 0x353   :  { %v20612_v47 = vld [vmem:[#allocation2 + $0x13c4] ss:$28 sps:$4 sm:$0xff]  }
 0x355   :  { %6185 = vmatpush1.bf16.msra.mxu0 %v20554_v48  ;;  %6271 = vmatpush1.bf16.msra.mxu1 %v20557_v49  ;;  %v20613_v48 = vld [vmem:[#allocation2 + $0x1208] ss:$28 sps:$4 sm:$0xff]   ;;  %v23249_v49 = vld [vmem:[%s23775_s0 + $0x14] ss:$28 sps:$4 sm:$0xff]  }
 0x356   :  { %6272 = vmatprep.subr.bf16.mxu1 %v20562_v52  ;;  %18922 = vmatprep.subr.bf16.mxu0 %v20563_v54  ;;  %v20614_v52 = vld [vmem:[#allocation2 + $0x1048] ss:$28 sps:$4 sm:$0xff]   ;;  %v20617_v54 = vld [vmem:[#allocation2 + $0x13fc] ss:$28 sps:$4 sm:$0xff]  }
 0x358   :  { %6203 = vmatmul.mubr.bf16.vlgmr.msra.gmra.mrb[8].mxu0 %v23203_v50  ;;  %v20575_v50 = vld [vmem:[#allocation2 + $0x1238] ss:$28 sps:$4 sm:$0xff]  }
 0x359   :  { %6273 = vmatpush1.bf16.msra.mxu1 %v20560_v56  ;;  %18923 = vmatpush3.bf16.msra.mxu0 %v20564_v57  ;;  %v20618_v56 = vld [vmem:[#allocation2 + $0x1240] ss:$28 sps:$4 sm:$0xff]   ;;  %v20615_v57 = vld [vmem:[#allocation2 + $0x13f8] ss:$28 sps:$4 sm:$0xff]  }
 0x35a   :  { %6274 = vmatprep.subr.bf16.mxu1 %v20567_v13  ;;  %18924 = vmatprep.subr.bf16.mxu0 %v20568_v53  ;;  %v20619_v13 = vld [vmem:[#allocation2 + $0x1080] ss:$28 sps:$4 sm:$0xff]   ;;  %v20623_v53 = vld [vmem:[#allocation2 + $0x1278] ss:$28 sps:$4 sm:$0xff]  }
 0x35b   :  { %6417 = vmatprep.mubr.bf16.mxu0 %v23211_v41  ;;  %v20584_v41 = vld [vmem:[#allocation2 + $0xd38] ss:$28 sps:$4 sm:$0xff]  }
 0x35d   :  { %6275 = vmatpush1.bf16.msra.mxu1 %v20565_v61  ;;  %18925 = vmatpush3.bf16.msra.mxu0 %v20569_v62  ;;  %v20620_v61 = vld [vmem:[#allocation2 + $0x1430] ss:$28 sps:$4 sm:$0xff]   ;;  %v20624_v62 = vld [vmem:[#allocation2 + $0x10b8] ss:$28 sps:$4 sm:$0xff]  }
 0x35e   :  { %6276 = vmatprep.subr.bf16.mxu1 %v20572_v58  ;;  %18926 = vmatprep.subr.bf16.mxu0 %v20573_v51  ;;  %v20627_v58 = vld [vmem:[#allocation2 + $0x146c] ss:$28 sps:$4 sm:$0xff]  }
 0x35f   :  { %v20628_v51 = vld [vmem:[#allocation2 + $0x12b0] ss:$28 sps:$4 sm:$0xff]  }
 0x361   :  { %6277 = vmatpush1.bf16.msra.mxu1 %v20570_v26  ;;  %18927 = vmatpush3.bf16.msra.mxu0 %v20574_v63  ;;  %v20625_v26 = vld [vmem:[#allocation2 + $0x1468] ss:$28 sps:$4 sm:$0xff]   ;;  %v20629_v63 = vld [vmem:[#allocation2 + $0x10f0] ss:$28 sps:$4 sm:$0xff]  }
 0x362   :  { %6278 = vmatprep.subr.bf16.mxu1 %v20577_v0  ;;  %18928 = vmatprep.subr.bf16.mxu0 %v20578_v2  ;;  %v20632_v0 = vld [vmem:[#allocation2 + $0x14a4] ss:$28 sps:$4 sm:$0xff]  }
 0x363   :  { %v20633_v2 = vld [vmem:[#allocation2 + $0x12e8] ss:$28 sps:$4 sm:$0xff]  }
 0x365   :  { %6279 = vmatpush1.bf16.msra.mxu1 %v20575_v50  ;;  %18929 = vmatpush3.bf16.msra.mxu0 %v20579_v3  ;;  %v20630_v50 = vld [vmem:[#allocation2 + $0x14a0] ss:$28 sps:$4 sm:$0xff]   ;;  %v20634_v3 = vld [vmem:[#allocation2 + $0x1128] ss:$28 sps:$4 sm:$0xff]  }
 0x366   :  { %6280 = vmatprep.subr.bf16.mxu1 %v20582_v4  ;;  %18930 = vmatprep.subr.bf16.mxu0 %v20583_v5  ;;  %v20637_v4 = vld [vmem:[#allocation2 + $0x14dc] ss:$28 sps:$4 sm:$0xff]  }
 0x367   :  { %v20638_v5 = vld [vmem:[#allocation2 + $0x1320] ss:$28 sps:$4 sm:$0xff]  }
 0x369   :  { %6281 = vmatpush1.bf16.msra.mxu1 %v20580_v1  ;;  %18931 = vmatpush3.bf16.msra.mxu0 %v20584_v41  ;;  %v20635_v1 = vld [vmem:[#allocation2 + $0x14d8] ss:$28 sps:$4 sm:$0xff]   ;;  %v20639_v41 = vld [vmem:[#allocation2 + $0x1160] ss:$28 sps:$4 sm:$0xff]  }
 0x36a   :  { %6282 = vmatprep.subr.bf16.mxu1 %v20587_v7  ;;  %18932 = vmatprep.subr.bf16.mxu0 %v20588_v8  ;;  %v20642_v7 = vld [vmem:[#allocation2 + $0x1514] ss:$28 sps:$4 sm:$0xff]  }
 0x36b   :  { %v20643_v8 = vld [vmem:[#allocation2 + $0x1518] ss:$28 sps:$4 sm:$0xff]  }
 0x36d   :  { %6283 = vmatpush1.bf16.msra.mxu1 %v20585_v10  ;;  %18933 = vmatpush3.bf16.msra.mxu0 %v20589_v14  ;;  %v20640_v10 = vld [vmem:[#allocation2 + $0x1510] ss:$28 sps:$4 sm:$0xff]   ;;  %v20644_v14 = vld [vmem:[#allocation2 + $0x1358] ss:$28 sps:$4 sm:$0xff]  }
 0x36e   :  { %6284 = vmatprep.subr.bf16.mxu1 %v20592_v23  ;;  %18934 = vmatprep.subr.bf16.mxu0 %v20593_v24  ;;  %v20647_v23 = vld [vmem:[#allocation2 + $0x154c] ss:$28 sps:$4 sm:$0xff]  }
 0x36f   :  { %v20648_v24 = vld [vmem:[#allocation2 + $0x1550] ss:$28 sps:$4 sm:$0xff]  }
 0x371   :  { %6285 = vmatpush1.bf16.msra.mxu1 %v20590_v25  ;;  %18935 = vmatpush3.bf16.msra.mxu0 %v20594_v27  ;;  %v20645_v25 = vld [vmem:[#allocation2 + $0x1548] ss:$28 sps:$4 sm:$0xff]   ;;  %v20649_v27 = vld [vmem:[#allocation2 + $0x1390] ss:$28 sps:$4 sm:$0xff]  }
 0x372   :  { %6286 = vmatprep.subr.bf16.mxu1 %v20597_v55  ;;  %18936 = vmatprep.subr.bf16.mxu0 %v20598_v28  ;;  %v20652_v55 = vld [vmem:[#allocation2 + $0x1584] ss:$28 sps:$4 sm:$0xff]  }
 0x373   :  { %v20653_v28 = vld [vmem:[#allocation2 + $0x1588] ss:$28 sps:$4 sm:$0xff]  }
 0x375   :  { %6287 = vmatpush1.bf16.msra.mxu1 %v20595_v9  ;;  %18937 = vmatpush3.bf16.msra.mxu0 %v20599_v29  ;;  %v20650_v9 = vld [vmem:[#allocation2 + $0x1580] ss:$28 sps:$4 sm:$0xff]   ;;  %v20654_v29 = vld [vmem:[#allocation2 + $0x13c8] ss:$28 sps:$4 sm:$0xff]  }
 0x376   :  { %6299 = vmatprep.subr.bf16.mxu1 %v20602_v30  ;;  %18944 = vmatprep.subr.bf16.mxu0 %v20603_v32  ;;  %v20657_v30 = vld [vmem:[#allocation2 + $0x15bc] ss:$28 sps:$4 sm:$0xff]  }
 0x377   :  { %v20658_v32 = vld [vmem:[#allocation2 + $0x15c0] ss:$28 sps:$4 sm:$0xff]  }
 0x378   :  { %6289 = vmatmul.mubr.bf16.vlgmr.msra.gmra.mrb[24].mxu1 %v23241_v39  ;;  %6418 = vmatmul.mubr.bf16.vlgmr.msra.gmra.mrb[12].mxu0 %v23218_v6  ;;  %v20610_v6 = vld [vmem:[#allocation2 + $0x13c0] ss:$28 sps:$4 sm:$0xff]  }
 0x379   :  { %6300 = vmatpush1.bf16.msra.mxu1 %v20600_v33  ;;  %18945 = vmatpush3.bf16.msra.mxu0 %v20604_v34  ;;  %v20655_v33 = vld [vmem:[#allocation2 + $0x15b8] ss:$28 sps:$4 sm:$0xff]   ;;  %v20659_v34 = vld [vmem:[#allocation2 + $0x1400] ss:$28 sps:$4 sm:$0xff]  }
 0x37a   :  { %6301 = vmatprep.subr.bf16.mxu1 %v20607_v35  ;;  %18946 = vmatprep.subr.bf16.mxu0 %v20608_v37  ;;  %v20662_v35 = vld [vmem:[#allocation2 + $0x15f4] ss:$28 sps:$4 sm:$0xff]  }
 0x37b   :  { %6458 = vmatprep.mubr.bf16.mxu0 %v23225_v60  ;;  %6331 = vmatprep.mubr.bf16.mxu1 %v23249_v49  ;;  %v20622_v60 = vld [vmem:[#allocation2 + $0x1434] ss:$28 sps:$4 sm:$0xff]  }
 0x37c   :  { %v20663_v37 = vld [vmem:[#allocation2 + $0x15f8] ss:$28 sps:$4 sm:$0xff]  }
 0x37d   :  { %6302 = vmatpush1.bf16.msra.mxu1 %v20605_v40  ;;  %18947 = vmatpush3.bf16.msra.mxu0 %v20609_v44  ;;  %v20664_v40 = vld [vmem:[#allocation2 + $0x1438] ss:$28 sps:$4 sm:$0xff]   ;;  %v20667_v44 = vld [vmem:[#allocation2 + $0x162c] ss:$28 sps:$4 sm:$0xff]  }
 0x37e   :  { %6303 = vmatprep.subr.bf16.mxu1 %v20612_v47  ;;  %18948 = vmatprep.subr.bf16.mxu0 %v20613_v48  ;;  %v20668_v47 = vld [vmem:[#allocation2 + $0x1630] ss:$28 sps:$4 sm:$0xff]   ;;  %v20665_v48 = vld [vmem:[#allocation2 + $0x1628] ss:$28 sps:$4 sm:$0xff]  }
 0x381   :  { %6304 = vmatpush1.bf16.msra.mxu1 %v20610_v6  ;;  %18949 = vmatpush3.bf16.msra.mxu0 %v20614_v52  ;;  %v20672_v6 = vld [vmem:[#allocation2 + $0x1664] ss:$28 sps:$4 sm:$0xff]  }
 0x382   :  { %6305 = vmatprep.subr.bf16.mxu1 %v20617_v54  ;;  %18950 = vmatprep.subr.bf16.mxu0 %v20618_v56  ;;  %v20673_v52 = vld [vmem:[#allocation2 + $0x1668] ss:$28 sps:$4 sm:$0xff]   ;;  %v20670_v54 = vld [vmem:[#allocation2 + $0x1660] ss:$28 sps:$4 sm:$0xff]  }
 0x383   :  { %v20674_v56 = vld [vmem:[#allocation2 + $0x14a8] ss:$28 sps:$4 sm:$0xff]  }
 0x385   :  { %6306 = vmatpush1.bf16.msra.mxu1 %v20615_v57  ;;  %18951 = vmatpush3.bf16.msra.mxu0 %v20619_v13  ;;  %v20677_v57 = vld [vmem:[#allocation2 + $0x169c] ss:$28 sps:$4 sm:$0xff]  }
 0x386   :  { %6307 = vmatprep.subr.bf16.mxu1 %v20622_v60  ;;  %18952 = vmatprep.subr.bf16.mxu0 %v20623_v53  ;;  %v20678_v13 = vld [vmem:[#allocation2 + $0x16a0] ss:$28 sps:$4 sm:$0xff]   ;;  %v20675_v60 = vld [vmem:[#allocation2 + $0x1698] ss:$28 sps:$4 sm:$0xff]  }
 0x387   :  { %v20679_v53 = vld [vmem:[#allocation2 + $0x14e0] ss:$28 sps:$4 sm:$0xff]  }
 0x389   :  { %6308 = vmatpush1.bf16.msra.mxu1 %v20620_v61  ;;  %18953 = vmatpush3.bf16.msra.mxu0 %v20624_v62  ;;  %v20682_v61 = vld [vmem:[#allocation2 + $0x16d4] ss:$28 sps:$4 sm:$0xff]  }
 0x38a   :  { %6309 = vmatprep.subr.bf16.mxu1 %v20627_v58  ;;  %18954 = vmatprep.subr.bf16.mxu0 %v20628_v51  ;;  %v20680_v62 = vld [vmem:[#allocation2 + $0x16d0] ss:$28 sps:$4 sm:$0xff]   ;;  %v20683_v58 = vld [vmem:[#allocation2 + $0x16d8] ss:$28 sps:$4 sm:$0xff]  }
 0x38b   :  { %v20686_v51 = vld [vmem:[#allocation2 + $0x170c] ss:$28 sps:$4 sm:$0xff]  }
 0x38d   :  { %6310 = vmatpush1.bf16.msra.mxu1 %v20625_v26  ;;  %18955 = vmatpush3.bf16.msra.mxu0 %v20629_v63  ;;  %v22563_v26 = vld [vmem:[%s23775_s0 + $0x10] ss:$28 sps:$4 sm:$0xff]   ;;  %v20684_v63 = vld [vmem:[#allocation2 + $0x1708] ss:$28 sps:$4 sm:$0xff]  }
 0x38e   :  { %6311 = vmatprep.subr.bf16.mxu1 %v20632_v0  ;;  %18956 = vmatprep.subr.bf16.mxu0 %v20633_v2  ;;  %v20687_v0 = vld [vmem:[#allocation2 + $0x1710] ss:$28 sps:$4 sm:$0xff]   ;;  %v20690_v2 = vld [vmem:[#allocation2 + $0x1744] ss:$28 sps:$4 sm:$0xff]  }
 0x391   :  { %6312 = vmatpush1.bf16.msra.mxu1 %v20630_v50  ;;  %18957 = vmatpush3.bf16.msra.mxu0 %v20634_v3  ;;  %v20688_v50 = vld [vmem:[#allocation2 + $0x1740] ss:$28 sps:$4 sm:$0xff]   ;;  %v20691_v3 = vld [vmem:[#allocation2 + $0x1748] ss:$28 sps:$4 sm:$0xff]  }
 0x392   :  { %6313 = vmatprep.subr.bf16.mxu1 %v20637_v4  ;;  %18958 = vmatprep.subr.bf16.mxu0 %v20638_v5  ;;  %v20694_v4 = vld [vmem:[#allocation2 + $0x177c] ss:$28 sps:$4 sm:$0xff]  }
 0x393   :  { %v20692_v5 = vld [vmem:[#allocation2 + $0x1778] ss:$28 sps:$4 sm:$0xff]  }
 0x395   :  { %6314 = vmatpush1.bf16.msra.mxu1 %v20635_v1  ;;  %18959 = vmatpush3.bf16.msra.mxu0 %v20639_v41  ;;  %v20695_v1 = vld [vmem:[#allocation2 + $0x1780] ss:$28 sps:$4 sm:$0xff]   ;;  %v625_v41 = vsub.s32 0, %v23166_v31 }
 0x396   :  { %6315 = vmatprep.subr.bf16.mxu1 %v20642_v7  ;;  %18966 = vmatprep.subr.bf16.mxu0 %v20643_v8  ;;  %v20698_v7 = vld [vmem:[#allocation2 + $0x17b4] ss:$28 sps:$4 sm:$0xff]   ;;  %v629_v8 = vsub.s32 1, %v23166_v31 }
 0x398   :  { %6459 = vmatmul.mubr.bf16.vlgmr.msra.gmra.mrb[16].mxu0 %v23241_v39  ;;  %v20660_v39 = vld [vmem:[#allocation2 + $0x15f0] ss:$28 sps:$4 sm:$0xff]  }
 0x399   :  { %6316 = vmatpush1.bf16.msra.mxu1 %v20640_v10  ;;  %18967 = vmatpush3.bf16.msra.mxu0 %v20644_v14  ;;  %v20696_v10 = vld [vmem:[#allocation2 + $0x17b0] ss:$28 sps:$4 sm:$0xff]   ;;  %v20699_v14 = vld [vmem:[#allocation2 + $0x17b8] ss:$28 sps:$4 sm:$0xff]  }
 0x39a   :  { %6317 = vmatprep.subr.bf16.mxu1 %v20647_v23  ;;  %18968 = vmatprep.subr.bf16.mxu0 %v20648_v24  ;;  %v23266_v23 = vld [vmem:[#allocation4] sm:$0xff] }
 0x39b   :  { %6499 = vmatprep.mubr.bf16.mxu0 %v23249_v49  ;;  %v20669_v49 = vld [vmem:[#allocation2 + $0x1470] ss:$28 sps:$4 sm:$0xff]   ;;  %v23271_v24 = vrot.slane %v23266_v23, %v625_v41 }
 0x39d   :  { %6318 = vmatpush1.bf16.msra.mxu1 %v20645_v25  ;;  %18969 = vmatpush3.bf16.msra.mxu0 %v20649_v27  ;;  %v20702_v25 = vld [vmem:[#allocation2 + $0x17ec] ss:$28 sps:$4 sm:$0xff]   ;;  %v23277_v27 = vrot.slane %v23266_v23, %v629_v8 }
 0x39e   :  { %6319 = vmatprep.subr.bf16.mxu1 %v20652_v55  ;;  %18970 = vmatprep.subr.bf16.mxu0 %v20653_v28  ;;  %v20700_v55 = vld [vmem:[#allocation2 + $0x17e8] ss:$28 sps:$4 sm:$0xff]   ;;  %v20703_v28 = vld [vmem:[#allocation2 + $0x17f0] ss:$28 sps:$4 sm:$0xff]  }
 0x3a1   :  { %6320 = vmatpush1.bf16.msra.mxu1 %v20650_v9  ;;  %18971 = vmatpush3.bf16.msra.mxu0 %v20654_v29  ;;  %v19307_v9 = vadd.f32 %v23128_v11, %v23271_v24  ;;  %v20706_v29 = vld [vmem:[#allocation2 + $0x1824] ss:$28 sps:$4 sm:$0xff]  }
 0x3a2   :  { %6321 = vmatprep.subr.bf16.mxu1 %v20657_v30  ;;  %18972 = vmatprep.subr.bf16.mxu0 %v20658_v32  ;;  %v19308_v30 = vadd.f32 %v23132_v15, %v23277_v27 }
 0x3a5   :  { %6322 = vmatpush1.bf16.msra.mxu1 %v20655_v33  ;;  %18973 = vmatpush3.bf16.msra.mxu0 %v20659_v34  ;;  %v19309_v33 = vadd.f32 %v23136_v18, %v23271_v24  ;;  %v19310_v34 = vadd.f32 %v23140_v20, %v23277_v27  ;;  %v20710_v18 = vld [vmem:[#allocation2 + $0x185c] ss:$28 sps:$4 sm:$0xff]   ;;  %v3391_v20 = vmax.f32 %v19308_v30, 0.0  ;;  %v20733_v30 = vld [vmem:[#allocation2 + $0x1930] ss:$28 sps:$4 sm:$0xff]  }
 0x3a6   :  { %6323 = vmatprep.subr.bf16.mxu1 %v20662_v35  ;;  %18974 = vmatprep.subr.bf16.mxu0 %v20663_v37 }
 0x3a9   :  { %6324 = vmatpush1.bf16.msra.mxu1 %v20660_v39  ;;  %18975 = vmatpush3.bf16.msra.mxu0 %v20664_v40  ;;  %v20704_v40 = vld [vmem:[#allocation2 + $0x1820] ss:$28 sps:$4 sm:$0xff]  }
 0x3aa   :  { %6325 = vmatprep.subr.bf16.mxu1 %v20667_v44  ;;  %18976 = vmatprep.subr.bf16.mxu0 %v20668_v47  ;;  %v20707_v44 = vld [vmem:[#allocation2 + $0x1828] ss:$28 sps:$4 sm:$0xff]   ;;  %v3390_v47 = vmax.f32 %v19307_v9, 0.0  ;;  %v20735_v9 = vld [vmem:[#allocation2 + $0x1934] ss:$28 sps:$4 sm:$0xff]  }
 0x3ad   :  { %6326 = vmatpush1.bf16.msra.mxu1 %v20665_v48  ;;  %18977 = vmatpush3.bf16.msra.mxu0 %v20669_v49 }
 0x3ae   :  { %6327 = vmatprep.subr.bf16.mxu1 %v20672_v6  ;;  %18978 = vmatprep.subr.bf16.mxu0 %v20673_v52 }
 0x3b1   :  { %6328 = vmatpush1.bf16.msra.mxu1 %v20670_v54  ;;  %18979 = vmatpush3.bf16.msra.mxu0 %v20674_v56  ;;  %v3397_v54 = vmax.f32 %v19309_v33, 0.0  ;;  %v3398_v56 = vmax.f32 %v19310_v34, 0.0  ;;  %v20741_v33 = vld [vmem:[#allocation2 + $0x196c] ss:$28 sps:$4 sm:$0xff]   ;;  %v20736_v34 = vld [vmem:[#allocation2 + $0x1960] ss:$28 sps:$4 sm:$0xff]  }
 0x3b2   :  { %6329 = vmatprep.subr.bf16.mxu1 %v20677_v57  ;;  %18980 = vmatprep.subr.bf16.mxu0 %v20678_v13 }
 0x3b5   :  { %6330 = vmatpush1.bf16.msra.mxu1 %v20675_v60  ;;  %18981 = vmatpush3.bf16.msra.mxu0 %v20679_v53 }
 0x3b6   :  { %6342 = vmatprep.subr.bf16.mxu1 %v20682_v61  ;;  %19207 = vmatprep.subr.bf16.mxu0 %v22842_v22  ;;  %v20708_v61 = vld [vmem:[#allocation2 + $0x1858] ss:$28 sps:$4 sm:$0xff]  }
 0x3b8   :  { %6500 = vmatmul.mubr.bf16.vlgmr.msra.gmra.mrb[20].mxu0 %v22563_v26  ;;  %6332 = vmatmul.mubr.bf16.vlgmr.msra.gmra.mrb[24].mxu1 %v22563_v26  ;;  %v20717_v26 = vld [vmem:[#allocation2 + $0x188c] ss:$28 sps:$4 sm:$0xff]  }
 0x3b9   :  { %6343 = vmatpush1.bf16.msra.mxu1 %v20680_v62  ;;  %19208 = vmatpush3.bf16.msra.mxu0 %v20683_v58  ;;  %v20711_v62 = vld [vmem:[#allocation2 + $0x1860] ss:$28 sps:$4 sm:$0xff]  }
 0x3ba   :  { %6344 = vmatprep.subr.bf16.mxu1 %v20686_v51  ;;  %19209 = vmatprep.subr.bf16.mxu0 %v22842_v22  ;;  %v20714_v51 = vld [vmem:[#allocation2 + $0x1884] ss:$28 sps:$4 sm:$0xff]  }
 0x3bb   :  { %6374 = vmatprep.mubr.bf16.mxu1 %v22841_v17  ;;  %19223 = vmatprep.mubr.msk.bf16.mxu0 %vm22843_vm0, %v22842_v22 }
 0x3bd   :  { %6345 = vmatpush1.bf16.msra.mxu1 %v20684_v63  ;;  %19210 = vmatpush3.bf16.msra.mxu0 %v20687_v0  ;;  %v20712_v0 = vld [vmem:[#allocation2 + $0x1880] ss:$28 sps:$4 sm:$0xff]  }
 0x3be   :  { %6346 = vmatprep.subr.bf16.mxu1 %v20690_v2  ;;  %19211 = vmatprep.subr.bf16.mxu0 %v22842_v22  ;;  %v20715_v2 = vld [vmem:[#allocation2 + $0x1888] ss:$28 sps:$4 sm:$0xff]  }
 0x3c1   :  { %6347 = vmatpush1.bf16.msra.mxu1 %v20688_v50  ;;  %19212 = vmatpush3.bf16.msra.mxu0 %v20691_v3  ;;  %v20720_v50 = vld [vmem:[#allocation2 + $0x18bc] ss:$28 sps:$4 sm:$0xff]   ;;  %v20723_v3 = vld [vmem:[#allocation2 + $0x18c4] ss:$28 sps:$4 sm:$0xff]  }
 0x3c2   :  { %6348 = vmatprep.subr.bf16.mxu1 %v20694_v4  ;;  %19213 = vmatprep.subr.bf16.mxu0 %v22842_v22  ;;  %v22565_v4 = vld [vmem:[%s23775_s0 + $0x18] ss:$28 sps:$4 sm:$0xff]  }
 0x3c5   :  { %6349 = vmatpush1.bf16.msra.mxu1 %v20692_v5  ;;  %19214 = vmatpush3.bf16.msra.mxu0 %v20695_v1  ;;  %v20718_v5 = vld [vmem:[#allocation2 + $0x18b8] ss:$28 sps:$4 sm:$0xff]   ;;  %v20721_v1 = vld [vmem:[#allocation2 + $0x18c0] ss:$28 sps:$4 sm:$0xff]  }
 0x3c6   :  { %6350 = vmatprep.subr.bf16.mxu1 %v20698_v7  ;;  %19215 = vmatprep.subr.bf16.mxu0 %v22842_v22  ;;  %v20726_v7 = vld [vmem:[#allocation2 + $0x18f4] ss:$28 sps:$4 sm:$0xff]  }
 0x3c9   :  { %6351 = vmatpush1.bf16.msra.mxu1 %v20696_v10  ;;  %19216 = vmatpush3.bf16.msra.mxu0 %v20699_v14  ;;  %v20729_v10 = vld [vmem:[#allocation2 + $0x18fc] ss:$28 sps:$4 sm:$0xff]   ;;  %v22566_v14 = vld [vmem:[%s23775_s0 + $0x4] ss:$28 sps:$4 sm:$0xff]  }
 0x3ca   :  { %6352 = vmatprep.subr.bf16.mxu1 %v20702_v25  ;;  %19217 = vmatprep.subr.bf16.mxu0 %v22842_v22  ;;  %v20724_v25 = vld [vmem:[#allocation2 + $0x18f0] ss:$28 sps:$4 sm:$0xff]  }
 0x3cb   :  { %v6032_v32 = vpop.f32.mrb[20].mxu1 }
 0x3cc   :  { %v19319_v35 = vadd.f32 %v6032_v32, %v23271_v24  ;;  %v6034_v37 = vpop.f32.mrb[21].mxu1  ;;  %v20738_v32 = vld [vmem:[#allocation2 + $0x1964] ss:$28 sps:$4 sm:$0xff]  }
 0x3cd   :  { %v19320_v39 = vadd.f32 %v6034_v37, %v23277_v27  ;;  %v6036_v11 = vpop.f32.mrb[22].mxu1  ;;  %6353 = vmatpush1.bf16.msra.mxu1 %v20700_v55  ;;  %19218 = vmatpush3.bf16.msra.mxu0 %v20703_v28  ;;  %v20727_v55 = vld [vmem:[#allocation2 + $0x18f8] ss:$28 sps:$4 sm:$0xff]   ;;  %v20732_v28 = vld [vmem:[#allocation2 + $0x192c] ss:$28 sps:$4 sm:$0xff]  }
 0x3ce   :  { %v6549_v48 = vmax.f32 %v19319_v35, 0.0  ;;  %v19321_v15 = vadd.f32 %v6036_v11, %v23271_v24  ;;  %v6038_v49 = vpop.f32.mrb[23].mxu1  ;;  %6354 = vmatprep.subr.bf16.mxu1 %v20706_v29  ;;  %19219 = vmatprep.subr.bf16.mxu0 %v22842_v22  ;;  %v20730_v29 = vld [vmem:[#allocation2 + $0x1928] ss:$28 sps:$4 sm:$0xff]   ;;  %v20744_v37 = vld [vmem:[#allocation2 + $0x199c] ss:$28 sps:$4 sm:$0xff]  }
 0x3cf   :  { %v6550_v6 = vmax.f32 %v19320_v39, 0.0  ;;  %v19322_v52 = vadd.f32 %v6038_v49, %v23277_v27  ;;  %v20739_v35 = vld [vmem:[#allocation2 + $0x1968] ss:$28 sps:$4 sm:$0xff]   ;;  %v20742_v11 = vld [vmem:[#allocation2 + $0x1998] ss:$28 sps:$4 sm:$0xff]  }
 0x3d0   :  { %v23293_v57 = vmax.f32 %v3390_v47, %v6549_v48  ;;  %v6556_v13 = vmax.f32 %v19321_v15, 0.0  ;;  %v20747_v39 = vld [vmem:[#allocation2 + $0x19a4] ss:$28 sps:$4 sm:$0xff]   ;;  %v20753_v47 = vld [vmem:[#allocation2 + $0x19dc] ss:$28 sps:$4 sm:$0xff]  }
 0x3d1   :  { %v23295_v60 = vmax.f32 %v3391_v20, %v6550_v6  ;;  %v6557_v53 = vmax.f32 %v19322_v52, 0.0  ;;  %6355 = vmatpush1.bf16.msra.mxu1 %v20704_v40  ;;  %19220 = vmatpush3.bf16.msra.mxu0 %v20707_v44  ;;  %v20745_v40 = vld [vmem:[#allocation2 + $0x19a0] ss:$28 sps:$4 sm:$0xff]   ;;  %v20750_v44 = vld [vmem:[#allocation2 + $0x19d4] ss:$28 sps:$4 sm:$0xff]  }
 0x3d2   :  { %v23297_v58 = vmax.f32 %v3397_v54, %v6556_v13  ;;  %6356 = vmatprep.subr.bf16.mxu1 %v20710_v18  ;;  %19221 = vmatprep.subr.bf16.mxu0 %v22842_v22  ;;  %v20748_v48 = vld [vmem:[#allocation2 + $0x19d0] ss:$28 sps:$4 sm:$0xff]   ;;  %v20751_v15 = vld [vmem:[#allocation2 + $0x19d8] ss:$28 sps:$4 sm:$0xff]   ;;  %v20754_v20 = vld [vmem:[#allocation2 + $0x1a08] ss:$28 sps:$4 sm:$0xff]  }
 0x3d3   :  { %v23300_v63 = vmax.f32 %v3398_v56, %v6557_v53  ;;  %v20756_v49 = vld [vmem:[#allocation2 + $0x1a0c] ss:$28 sps:$4 sm:$0xff]   ;;  %v20759_v18 = vld [vmem:[#allocation2 + $0x1a14] ss:$28 sps:$4 sm:$0xff]   ;;  %v20762_v52 = vld [vmem:[#allocation2 + $0x1a44] ss:$28 sps:$4 sm:$0xff]  }
 0x3d4   :  { %v20757_v6 = vld [vmem:[#allocation2 + $0x1a10] ss:$28 sps:$4 sm:$0xff]   ;;  %v20760_v56 = vld [vmem:[#allocation2 + $0x1a40] ss:$28 sps:$4 sm:$0xff]   ;;  %v20763_v13 = vld [vmem:[#allocation2 + $0x1a48] ss:$28 sps:$4 sm:$0xff]  }
 0x3d5   :  { %6357 = vmatpush1.bf16.msra.mxu1 %v20708_v61  ;;  %19222 = vmatpush3.bf16.msra.mxu0 %v20711_v62  ;;  %v20765_v54 = vld [vmem:[#allocation2 + $0x1a4c] ss:$28 sps:$4 sm:$0xff]   ;;  %v20768_v53 = vld [vmem:[#allocation2 + $0x1a7c] ss:$28 sps:$4 sm:$0xff]   ;;  %v20771_v61 = vld [vmem:[#allocation2 + $0x1a84] ss:$28 sps:$4 sm:$0xff]  }
 0x3d6   :  { %9042 = vmatprep.subr.bf16.mxu0 %v20714_v51  ;;  %9214 = vmatprep.subr.bf16.mxu1 %v20717_v26  ;;  %v20766_v62 = vld [vmem:[#allocation2 + $0x1a78] ss:$28 sps:$4 sm:$0xff]   ;;  %v20769_v51 = vld [vmem:[#allocation2 + $0x1a80] ss:$28 sps:$4 sm:$0xff]  }
 0x3d7   :  { %v20774_v26 = vld [vmem:[#allocation2 + $0x1ab4] ss:$28 sps:$4 sm:$0xff]  }
 0x3d8   :  { %6375 = vmatmul.mubr.bf16.vlgmr.msra.gmra.mrb[24].mxu1 %v22565_v4  ;;  %19224 = vmatmul.mubr.bf16.vlgmr.msra.gmra.mrb[24].mxu0 %v22565_v4  ;;  %v20783_v4 = vld [vmem:[#allocation2 + $0x1af4] ss:$28 sps:$4 sm:$0xff]  }
 0x3d9   :  { %9043 = vmatpush1.bf16.msra.mxu0 %v20712_v0  ;;  %9215 = vmatpush1.bf16.msra.mxu1 %v20715_v2  ;;  %v20777_v0 = vld [vmem:[#allocation2 + $0x1abc] ss:$28 sps:$4 sm:$0xff]   ;;  %v20772_v2 = vld [vmem:[#allocation2 + $0x1ab0] ss:$28 sps:$4 sm:$0xff]  }
 0x3da   :  { %9044 = vmatprep.subr.bf16.mxu0 %v20720_v50  ;;  %9216 = vmatprep.subr.bf16.mxu1 %v20723_v3  ;;  %v20775_v50 = vld [vmem:[#allocation2 + $0x1ab8] ss:$28 sps:$4 sm:$0xff]   ;;  %v20780_v3 = vld [vmem:[#allocation2 + $0x1aec] ss:$28 sps:$4 sm:$0xff]  }
 0x3db   :  { %9074 = vmatprep.mubr.bf16.mxu0 %v22566_v14  ;;  %9246 = vmatprep.mubr.bf16.mxu1 %v22566_v14  ;;  %v20784_v14 = vld [vmem:[#allocation2 + $0x1b20] ss:$28 sps:$4 sm:$0xff]  }
 0x3dd   :  { %9045 = vmatpush1.bf16.msra.mxu0 %v20718_v5  ;;  %9217 = vmatpush1.bf16.msra.mxu1 %v20721_v1  ;;  %v20778_v5 = vld [vmem:[#allocation2 + $0x1ae8] ss:$28 sps:$4 sm:$0xff]   ;;  %v20781_v1 = vld [vmem:[#allocation2 + $0x1af0] ss:$28 sps:$4 sm:$0xff]  }
 0x3de   :  { %9046 = vmatprep.subr.bf16.mxu0 %v20726_v7  ;;  %9218 = vmatprep.subr.bf16.mxu1 %v20729_v10  ;;  %v20786_v7 = vld [vmem:[#allocation2 + $0x1b24] ss:$28 sps:$4 sm:$0xff]   ;;  %v20789_v10 = vld [vmem:[#allocation2 + $0x1b2c] ss:$28 sps:$4 sm:$0xff]  }
 0x3e1   :  { %9047 = vmatpush1.bf16.msra.mxu0 %v20724_v25  ;;  %9219 = vmatpush1.bf16.msra.mxu1 %v20727_v55  ;;  %v20787_v25 = vld [vmem:[#allocation2 + $0x1b28] ss:$28 sps:$4 sm:$0xff]   ;;  %v20792_v55 = vld [vmem:[#allocation2 + $0x1b5c] ss:$28 sps:$4 sm:$0xff]  }
 0x3e2   :  { %9048 = vmatprep.subr.bf16.mxu0 %v20732_v28  ;;  %9220 = vmatprep.subr.bf16.mxu1 %v20735_v9  ;;  %v20795_v28 = vld [vmem:[#allocation2 + $0x1b64] ss:$28 sps:$4 sm:$0xff]   ;;  %v20790_v9 = vld [vmem:[#allocation2 + $0x1b58] ss:$28 sps:$4 sm:$0xff]  }
 0x3e5   :  { %9049 = vmatpush1.bf16.msra.mxu0 %v20730_v29  ;;  %9221 = vmatpush1.bf16.msra.mxu1 %v20733_v30  ;;  %v20793_v29 = vld [vmem:[#allocation2 + $0x1b60] ss:$28 sps:$4 sm:$0xff]   ;;  %v20798_v30 = vld [vmem:[#allocation2 + $0x1b94] ss:$28 sps:$4 sm:$0xff]  }
 0x3e6   :  { %9050 = vmatprep.subr.bf16.mxu0 %v20738_v32  ;;  %9222 = vmatprep.subr.bf16.mxu1 %v20741_v33  ;;  %v20801_v32 = vld [vmem:[#allocation2 + $0x1b9c] ss:$28 sps:$4 sm:$0xff]   ;;  %v20796_v33 = vld [vmem:[#allocation2 + $0x1b90] ss:$28 sps:$4 sm:$0xff]  }
 0x3e9   :  { %9051 = vmatpush1.bf16.msra.mxu0 %v20736_v34  ;;  %9223 = vmatpush1.bf16.msra.mxu1 %v20739_v35  ;;  %v20799_v34 = vld [vmem:[#allocation2 + $0x1b98] ss:$28 sps:$4 sm:$0xff]   ;;  %v20804_v35 = vld [vmem:[#allocation2 + $0x1bcc] ss:$28 sps:$4 sm:$0xff]  }
 0x3ea   :  { %9052 = vmatprep.subr.bf16.mxu0 %v20744_v37  ;;  %9224 = vmatprep.subr.bf16.mxu1 %v20747_v39  ;;  %v20807_v37 = vld [vmem:[#allocation2 + $0x1bd4] ss:$28 sps:$4 sm:$0xff]   ;;  %v20802_v39 = vld [vmem:[#allocation2 + $0x1bc8] ss:$28 sps:$4 sm:$0xff]  }
 0x3ed   :  { %9053 = vmatpush1.bf16.msra.mxu0 %v20742_v11  ;;  %9225 = vmatpush1.bf16.msra.mxu1 %v20745_v40  ;;  %v20805_v11 = vld [vmem:[#allocation2 + $0x1bd0] ss:$28 sps:$4 sm:$0xff]   ;;  %v20810_v40 = vld [vmem:[#allocation2 + $0x1c04] ss:$28 sps:$4 sm:$0xff]  }
 0x3ee   :  { %9054 = vmatprep.subr.bf16.mxu0 %v20750_v44  ;;  %9226 = vmatprep.subr.bf16.mxu1 %v20753_v47  ;;  %v20813_v44 = vld [vmem:[#allocation2 + $0x1c0c] ss:$28 sps:$4 sm:$0xff]   ;;  %v20808_v47 = vld [vmem:[#allocation2 + $0x1c00] ss:$28 sps:$4 sm:$0xff]  }
 0x3f1   :  { %9055 = vmatpush1.bf16.msra.mxu0 %v20748_v48  ;;  %9227 = vmatpush1.bf16.msra.mxu1 %v20751_v15  ;;  %v20811_v48 = vld [vmem:[#allocation2 + $0x1c08] ss:$28 sps:$4 sm:$0xff]   ;;  %v20816_v15 = vld [vmem:[#allocation2 + $0x1c3c] ss:$28 sps:$4 sm:$0xff]  }
 0x3f2   :  { %9056 = vmatprep.subr.bf16.mxu0 %v20756_v49  ;;  %9228 = vmatprep.subr.bf16.mxu1 %v20759_v18  ;;  %v20819_v49 = vld [vmem:[#allocation2 + $0x1c44] ss:$28 sps:$4 sm:$0xff]  }
 0x3f3   :  { %v22567_v18 = vld [vmem:[%s23775_s0] ss:$28 sps:$4 sm:$0xff]  }
 0x3f5   :  { %9057 = vmatpush1.bf16.msra.mxu0 %v20754_v20  ;;  %9229 = vmatpush1.bf16.msra.mxu1 %v20757_v6  ;;  %v633_v20 = vsub.s32 2, %v23166_v31  ;;  %v20814_v6 = vld [vmem:[#allocation2 + $0x1c38] ss:$28 sps:$4 sm:$0xff]  }
 0x3f6   :  { %9058 = vmatprep.subr.bf16.mxu0 %v20762_v52  ;;  %9230 = vmatprep.subr.bf16.mxu1 %v20765_v54  ;;  %v20817_v52 = vld [vmem:[#allocation2 + $0x1c40] ss:$28 sps:$4 sm:$0xff]   ;;  %v20822_v54 = vld [vmem:[#allocation2 + $0x1c74] ss:$28 sps:$4 sm:$0xff]  }
 0x3f9   :  { %9059 = vmatpush1.bf16.msra.mxu0 %v20760_v56  ;;  %9231 = vmatpush1.bf16.msra.mxu1 %v20763_v13  ;;  %v20825_v56 = vld [vmem:[#allocation2 + $0x1c7c] ss:$28 sps:$4 sm:$0xff]   ;;  %v22568_v13 = vld [vmem:[%s23775_s0 + $0xc] ss:$28 sps:$4 sm:$0xff]  }
 0x3fa   :  { %9060 = vmatprep.subr.bf16.mxu0 %v20768_v53  ;;  %9232 = vmatprep.subr.bf16.mxu1 %v20771_v61  ;;  %v637_v53 = vsub.s32 3, %v23166_v31  ;;  %v23317_v61 = vrot.slane %v23266_v23, %v633_v20 }
 0x3fd   :  { %9061 = vmatpush1.bf16.msra.mxu0 %v20766_v62  ;;  %9233 = vmatpush1.bf16.msra.mxu1 %v20769_v51  ;;  %v20820_v62 = vld [vmem:[#allocation2 + $0x1c70] ss:$28 sps:$4 sm:$0xff]   ;;  %v20823_v51 = vld [vmem:[#allocation2 + $0x1c78] ss:$28 sps:$4 sm:$0xff]  }
 0x3fe   :  { %9062 = vmatprep.subr.bf16.mxu0 %v20774_v26  ;;  %9234 = vmatprep.subr.bf16.mxu1 %v20777_v0  ;;  %v20828_v26 = vld [vmem:[#allocation2 + $0x1cac] ss:$28 sps:$4 sm:$0xff]   ;;  %v20831_v0 = vld [vmem:[#allocation2 + $0x1cb4] ss:$28 sps:$4 sm:$0xff]  }
 0x401   :  { %9063 = vmatpush1.bf16.msra.mxu0 %v20772_v2  ;;  %9235 = vmatpush1.bf16.msra.mxu1 %v20775_v50  ;;  %v23320_v2 = vrot.slane %v23266_v23, %v637_v53  ;;  %v19311_v50 = vadd.f32 %v23130_v12, %v23317_v61  ;;  %v20832_v23 = vld [vmem:[#allocation2 + $0x1ce0] ss:$28 sps:$4 sm:$0xff]  }
 0x402   :  { %9064 = vmatprep.subr.bf16.mxu0 %v20780_v3  ;;  %9236 = vmatprep.subr.bf16.mxu1 %v20783_v4  ;;  %v20826_v3 = vld [vmem:[#allocation2 + $0x1ca8] ss:$28 sps:$4 sm:$0xff]   ;;  %v20829_v4 = vld [vmem:[#allocation2 + $0x1cb0] ss:$28 sps:$4 sm:$0xff]  }
 0x403   :  { %v19314_v12 = vadd.f32 %v23142_v21, %v23320_v2 }
 0x405   :  { %9065 = vmatpush1.bf16.msra.mxu0 %v20778_v5  ;;  %9237 = vmatpush1.bf16.msra.mxu1 %v20781_v1  ;;  %v20834_v5 = vld [vmem:[#allocation2 + $0x1ce4] ss:$28 sps:$4 sm:$0xff]   ;;  %v20837_v1 = vld [vmem:[#allocation2 + $0x1cec] ss:$28 sps:$4 sm:$0xff]  }
 0x406   :  { %9066 = vmatprep.subr.bf16.mxu0 %v20786_v7  ;;  %9238 = vmatprep.subr.bf16.mxu1 %v20789_v10  ;;  %v19312_v7 = vadd.f32 %v23134_v16, %v23320_v2  ;;  %v19313_v10 = vadd.f32 %v23138_v19, %v23317_v61  ;;  %v3400_v16 = vmax.f32 %v19314_v12, 0.0  ;;  %v20846_v19 = vld [vmem:[#allocation2 + $0x1d54] ss:$28 sps:$4 sm:$0xff]   ;;  %v20876_v12 = vld [vmem:[#allocation2 + $0x1e6c] ss:$28 sps:$4 sm:$0xff]  }
 0x409   :  { %9067 = vmatpush1.bf16.msra.mxu0 %v20784_v14  ;;  %9239 = vmatpush1.bf16.msra.mxu1 %v20787_v25  ;;  %v3392_v14 = vmax.f32 %v19311_v50, 0.0  ;;  %v20835_v25 = vld [vmem:[#allocation2 + $0x1ce8] ss:$28 sps:$4 sm:$0xff]   ;;  %v20856_v50 = vld [vmem:[#allocation2 + $0x1dc0] ss:$28 sps:$4 sm:$0xff]  }
 0x40a   :  { %9068 = vmatprep.subr.bf16.mxu0 %v20792_v55  ;;  %9240 = vmatprep.subr.bf16.mxu1 %v20795_v28  ;;  %v20840_v55 = vld [vmem:[#allocation2 + $0x1d1c] ss:$28 sps:$4 sm:$0xff]   ;;  %v20843_v28 = vld [vmem:[#allocation2 + $0x1d24] ss:$28 sps:$4 sm:$0xff]  }
 0x40d   :  { %9069 = vmatpush1.bf16.msra.mxu0 %v20790_v9  ;;  %9241 = vmatpush1.bf16.msra.mxu1 %v20793_v29  ;;  %v20838_v9 = vld [vmem:[#allocation2 + $0x1d18] ss:$28 sps:$4 sm:$0xff]   ;;  %v20841_v29 = vld [vmem:[#allocation2 + $0x1d20] ss:$28 sps:$4 sm:$0xff]  }
 0x40e   :  { %9070 = vmatprep.subr.bf16.mxu0 %v20798_v30  ;;  %9242 = vmatprep.subr.bf16.mxu1 %v20801_v32  ;;  %v3393_v30 = vmax.f32 %v19312_v7, 0.0  ;;  %v3399_v32 = vmax.f32 %v19313_v10, 0.0  ;;  %v20865_v7 = vld [vmem:[#allocation2 + $0x1e00] ss:$28 sps:$4 sm:$0xff]   ;;  %v20870_v10 = vld [vmem:[#allocation2 + $0x1e34] ss:$28 sps:$4 sm:$0xff]  }
 0x411   :  { %9071 = vmatpush1.bf16.msra.mxu0 %v20796_v33  ;;  %9243 = vmatpush1.bf16.msra.mxu1 %v20799_v34  ;;  %v20849_v33 = vld [vmem:[#allocation2 + $0x1d5c] ss:$28 sps:$4 sm:$0xff]  }
 0x412   :  { %9072 = vmatprep.subr.bf16.mxu0 %v20804_v35  ;;  %9244 = vmatprep.subr.bf16.mxu1 %v20807_v37  ;;  %v20844_v35 = vld [vmem:[#allocation2 + $0x1d50] ss:$28 sps:$4 sm:$0xff]   ;;  %v20847_v37 = vld [vmem:[#allocation2 + $0x1d58] ss:$28 sps:$4 sm:$0xff]  }
 0x415   :  { %9073 = vmatpush1.bf16.msra.mxu0 %v20802_v39  ;;  %9245 = vmatpush1.bf16.msra.mxu1 %v20805_v11 }
 0x416   :  { %9085 = vmatprep.subr.bf16.mxu0 %v20810_v40  ;;  %9257 = vmatprep.subr.bf16.mxu1 %v20813_v44 }
 0x418   :  { %9075 = vmatmul.mubr.bf16.vlgmr.msra.gmra.mrb[28].mxu0 %v22567_v18  ;;  %9247 = vmatmul.mubr.bf16.vlgmr.msra.gmra.mrb[28].mxu1 %v22567_v18 }
 0x419   :  { %9086 = vmatpush1.bf16.msra.mxu0 %v20808_v47  ;;  %9258 = vmatpush1.bf16.msra.mxu1 %v20811_v48 }
 0x41a   :  { %9087 = vmatprep.subr.bf16.mxu0 %v20816_v15  ;;  %9259 = vmatprep.subr.bf16.mxu1 %v20819_v49  ;;  %v20852_v15 = vld [vmem:[#allocation2 + $0x1d8c] ss:$28 sps:$4 sm:$0xff]   ;;  %v20855_v49 = vld [vmem:[#allocation2 + $0x1d94] ss:$28 sps:$4 sm:$0xff]  }
 0x41b   :  { %9117 = vmatprep.mubr.bf16.mxu0 %v22568_v13  ;;  %9289 = vmatprep.mubr.bf16.mxu1 %v22568_v13 }
 0x41d   :  { %9088 = vmatpush1.bf16.msra.mxu0 %v20814_v6  ;;  %9260 = vmatpush1.bf16.msra.mxu1 %v20817_v52  ;;  %v20850_v6 = vld [vmem:[#allocation2 + $0x1d88] ss:$28 sps:$4 sm:$0xff]   ;;  %v20853_v52 = vld [vmem:[#allocation2 + $0x1d90] ss:$28 sps:$4 sm:$0xff]  }
 0x41e   :  { %9089 = vmatprep.subr.bf16.mxu0 %v20822_v54  ;;  %9261 = vmatprep.subr.bf16.mxu1 %v20825_v56 }
 0x421   :  { %9090 = vmatpush1.bf16.msra.mxu0 %v20820_v62  ;;  %9262 = vmatpush1.bf16.msra.mxu1 %v20823_v51  ;;  %v20858_v51 = vld [vmem:[#allocation2 + $0x1dc4] ss:$28 sps:$4 sm:$0xff]  }
 0x422   :  { %9091 = vmatprep.subr.bf16.mxu0 %v20828_v26  ;;  %9263 = vmatprep.subr.bf16.mxu1 %v20831_v0  ;;  %v20861_v26 = vld [vmem:[#allocation2 + $0x1dcc] ss:$28 sps:$4 sm:$0xff]  }
 0x425   :  { %9092 = vmatpush1.bf16.msra.mxu0 %v20826_v3  ;;  %9264 = vmatpush1.bf16.msra.mxu1 %v20829_v4  ;;  %v20859_v3 = vld [vmem:[#allocation2 + $0x1dc8] ss:$28 sps:$4 sm:$0xff]   ;;  %v20864_v4 = vld [vmem:[#allocation2 + $0x1dfc] ss:$28 sps:$4 sm:$0xff]  }
 0x426   :  { %9093 = vmatprep.subr.bf16.mxu0 %v20834_v5  ;;  %9265 = vmatprep.subr.bf16.mxu1 %v20837_v1  ;;  %v20867_v5 = vld [vmem:[#allocation2 + $0x1e04] ss:$28 sps:$4 sm:$0xff]   ;;  %v20862_v1 = vld [vmem:[#allocation2 + $0x1df8] ss:$28 sps:$4 sm:$0xff]  }
 0x429   :  { %9094 = vmatpush1.bf16.msra.mxu0 %v20832_v23  ;;  %9266 = vmatpush1.bf16.msra.mxu1 %v20835_v25  ;;  %v20868_v23 = vld [vmem:[#allocation2 + $0x1e30] ss:$28 sps:$4 sm:$0xff]   ;;  %v20871_v25 = vld [vmem:[#allocation2 + $0x1e38] ss:$28 sps:$4 sm:$0xff]  }
 0x42a   :  { %9095 = vmatprep.subr.bf16.mxu0 %v20840_v55  ;;  %9267 = vmatprep.subr.bf16.mxu1 %v20843_v28  ;;  %v20879_v55 = vld [vmem:[#allocation2 + $0x1e74] ss:$28 sps:$4 sm:$0xff]   ;;  %v20874_v28 = vld [vmem:[#allocation2 + $0x1e68] ss:$28 sps:$4 sm:$0xff]  }
 0x42b   :  { %v6204_v34 = vpop.f32.mrb[8].mxu0 }
 0x42c   :  { %v19323_v21 = vadd.f32 %v6204_v34, %v23317_v61  ;;  %v6206_v39 = vpop.f32.mrb[9].mxu0  ;;  %v20886_v34 = vld [vmem:[#allocation2 + $0x1ed8] ss:$28 sps:$4 sm:$0xff]  }
 0x42d   :  { %v19324_v11 = vadd.f32 %v6206_v39, %v23320_v2  ;;  %v6208_v40 = vpop.f32.mrb[10].mxu0  ;;  %9096 = vmatpush1.bf16.msra.mxu0 %v20838_v9  ;;  %9268 = vmatpush1.bf16.msra.mxu1 %v20841_v29  ;;  %v20877_v9 = vld [vmem:[#allocation2 + $0x1e70] ss:$28 sps:$4 sm:$0xff]   ;;  %v20882_v29 = vld [vmem:[#allocation2 + $0x1ea4] ss:$28 sps:$4 sm:$0xff]  }
 0x42e   :  { %v6551_v44 = vmax.f32 %v19323_v21, 0.0  ;;  %v19325_v47 = vadd.f32 %v6208_v40, %v23317_v61  ;;  %v6210_v48 = vpop.f32.mrb[11].mxu0  ;;  %9097 = vmatprep.subr.bf16.mxu0 %v20846_v19  ;;  %9269 = vmatprep.subr.bf16.mxu1 %v20849_v33  ;;  %v20888_v19 = vld [vmem:[#allocation2 + $0x1edc] ss:$28 sps:$4 sm:$0xff]   ;;  %v20891_v33 = vld [vmem:[#allocation2 + $0x1ee4] ss:$28 sps:$4 sm:$0xff]  }
 0x42f   :  { %v6552_v18 = vmax.f32 %v19324_v11, 0.0  ;;  %v19326_v20 = vadd.f32 %v6210_v48, %v23320_v2  ;;  %v20897_v21 = vld [vmem:[#allocation2 + $0x1f1c] ss:$28 sps:$4 sm:$0xff]   ;;  %v20892_v39 = vld [vmem:[#allocation2 + $0x1f10] ss:$28 sps:$4 sm:$0xff]  }
 0x430   :  { %v23334_v54 = vmax.f32 %v3392_v14, %v6551_v44  ;;  %v6558_v56 = vmax.f32 %v19325_v47, 0.0  ;;  %v20873_v14 = vld [vmem:[#allocation2 + $0x1e3c] ss:$28 sps:$4 sm:$0xff]   ;;  %v20900_v47 = vld [vmem:[#allocation2 + $0x1f4c] ss:$28 sps:$4 sm:$0xff]  }
 0x431   :  { %v23336_v13 = vmax.f32 %v3393_v30, %v6552_v18  ;;  %v6559_v53 = vmax.f32 %v19326_v20, 0.0  ;;  %9098 = vmatpush1.bf16.msra.mxu0 %v20844_v35  ;;  %9270 = vmatpush1.bf16.msra.mxu1 %v20847_v37  ;;  %v20885_v30 = vld [vmem:[#allocation2 + $0x1eac] ss:$28 sps:$4 sm:$0xff]   ;;  %v20889_v35 = vld [vmem:[#allocation2 + $0x1ee0] ss:$28 sps:$4 sm:$0xff]  }
 0x432   :  { %v23338_v62 = vmax.f32 %v3399_v32, %v6558_v56  ;;  %9099 = vmatprep.subr.bf16.mxu0 %v20852_v15  ;;  %9271 = vmatprep.subr.bf16.mxu1 %v20855_v49  ;;  %v20880_v32 = vld [vmem:[#allocation2 + $0x1ea0] ss:$28 sps:$4 sm:$0xff]   ;;  %v20894_v37 = vld [vmem:[#allocation2 + $0x1f14] ss:$28 sps:$4 sm:$0xff]   ;;  %v20898_v20 = vld [vmem:[#allocation2 + $0x1f48] ss:$28 sps:$4 sm:$0xff]  }
 0x433   :  { %v23340_v0 = vmax.f32 %v3400_v16, %v6559_v53  ;;  %v20883_v16 = vld [vmem:[#allocation2 + $0x1ea8] ss:$28 sps:$4 sm:$0xff]   ;;  %v20895_v44 = vld [vmem:[#allocation2 + $0x1f18] ss:$28 sps:$4 sm:$0xff]  }
 0x434   :  { %v20903_v49 = vld [vmem:[#allocation2 + $0x1f54] ss:$28 sps:$4 sm:$0xff]   ;;  %v20906_v56 = vld [vmem:[#allocation2 + $0x1f84] ss:$28 sps:$4 sm:$0xff]   ;;  %v20909_v53 = vld [vmem:[#allocation2 + $0x1f8c] ss:$28 sps:$4 sm:$0xff]  }
 0x435   :  { %9100 = vmatpush1.bf16.msra.mxu0 %v20850_v6  ;;  %9272 = vmatpush1.bf16.msra.mxu1 %v20853_v52  ;;  %v20901_v52 = vld [vmem:[#allocation2 + $0x1f50] ss:$28 sps:$4 sm:$0xff]  }
 0x436   :  { %9101 = vmatprep.subr.bf16.mxu0 %v20858_v51  ;;  %9273 = vmatprep.subr.bf16.mxu1 %v20861_v26  ;;  %v20904_v51 = vld [vmem:[#allocation2 + $0x1f80] ss:$28 sps:$4 sm:$0xff]   ;;  %v20907_v26 = vld [vmem:[#allocation2 + $0x1f88] ss:$28 sps:$4 sm:$0xff]  }
 0x439   :  { %9102 = vmatpush1.bf16.msra.mxu0 %v20856_v50  ;;  %9274 = vmatpush1.bf16.msra.mxu1 %v20859_v3  ;;  %v20912_v50 = vld [vmem:[#allocation2 + $0x1fbc] ss:$28 sps:$4 sm:$0xff]   ;;  %v20915_v3 = vld [vmem:[#allocation2 + $0x1fc4] ss:$28 sps:$4 sm:$0xff]  }
 0x43a   :  { %9103 = vmatprep.subr.bf16.mxu0 %v20864_v4  ;;  %9275 = vmatprep.subr.bf16.mxu1 %v20867_v5  ;;  %v20910_v4 = vld [vmem:[#allocation2 + $0x1fb8] ss:$28 sps:$4 sm:$0xff]   ;;  %v22569_v5 = vld [vmem:[%s23775_s0 + $0x8] ss:$28 sps:$4 sm:$0xff]  }
 0x43d   :  { %9104 = vmatpush1.bf16.msra.mxu0 %v20862_v1  ;;  %9276 = vmatpush1.bf16.msra.mxu1 %v20865_v7  ;;  %v20913_v1 = vld [vmem:[#allocation2 + $0x1fc0] ss:$28 sps:$4 sm:$0xff]   ;;  %v20918_v7 = vld [vmem:[#allocation2 + $0x1ff4] ss:$28 sps:$4 sm:$0xff]  }
 0x43e   :  { %9105 = vmatprep.subr.bf16.mxu0 %v20870_v10  ;;  %9277 = vmatprep.subr.bf16.mxu1 %v20873_v14  ;;  %v20921_v10 = vld [vmem:[#allocation2 + $0x1ffc] ss:$28 sps:$4 sm:$0xff]   ;;  %v20916_v14 = vld [vmem:[#allocation2 + $0x1ff0] ss:$28 sps:$4 sm:$0xff]  }
 0x441   :  { %9106 = vmatpush1.bf16.msra.mxu0 %v20868_v23  ;;  %9278 = vmatpush1.bf16.msra.mxu1 %v20871_v25  ;;  %v22570_v23 = vld [vmem:[%s23775_s0 + $0x14] ss:$28 sps:$4 sm:$0xff]  }
 0x442   :  { %9107 = vmatprep.subr.bf16.mxu0 %v20876_v12  ;;  %9279 = vmatprep.subr.bf16.mxu1 %v20879_v55  ;;  %v20919_v25 = vld [vmem:[#allocation2 + $0x1ff8] ss:$28 sps:$4 sm:$0xff]   ;;  %v20924_v12 = vld [vmem:[#allocation2 + $0x202c] ss:$28 sps:$4 sm:$0xff]  }
 0x443   :  { %v20927_v55 = vld [vmem:[#allocation2 + $0x2034] ss:$28 sps:$4 sm:$0xff]  }
 0x445   :  { %9108 = vmatpush1.bf16.msra.mxu0 %v20874_v28  ;;  %9280 = vmatpush1.bf16.msra.mxu1 %v20877_v9  ;;  %v20922_v28 = vld [vmem:[#allocation2 + $0x2028] ss:$28 sps:$4 sm:$0xff]   ;;  %v20925_v9 = vld [vmem:[#allocation2 + $0x2030] ss:$28 sps:$4 sm:$0xff]  }
 0x446   :  { %9109 = vmatprep.subr.bf16.mxu0 %v20882_v29  ;;  %9281 = vmatprep.subr.bf16.mxu1 %v20885_v30  ;;  %v20930_v29 = vld [vmem:[#allocation2 + $0x2064] ss:$28 sps:$4 sm:$0xff]   ;;  %v20933_v30 = vld [vmem:[#allocation2 + $0x206c] ss:$28 sps:$4 sm:$0xff]  }
 0x449   :  { %9110 = vmatpush1.bf16.msra.mxu0 %v20880_v32  ;;  %9282 = vmatpush1.bf16.msra.mxu1 %v20883_v16  ;;  %v20928_v32 = vld [vmem:[#allocation2 + $0x2060] ss:$28 sps:$4 sm:$0xff]   ;;  %v20931_v16 = vld [vmem:[#allocation2 + $0x2068] ss:$28 sps:$4 sm:$0xff]  }
 0x44a   :  { %9111 = vmatprep.subr.bf16.mxu0 %v20888_v19  ;;  %9283 = vmatprep.subr.bf16.mxu1 %v20891_v33  ;;  %v20936_v19 = vld [vmem:[#allocation2 + $0x209c] ss:$28 sps:$4 sm:$0xff]   ;;  %v20939_v33 = vld [vmem:[#allocation2 + $0x20a4] ss:$28 sps:$4 sm:$0xff]  }
 0x44b   :  { %v18938_v11 = vpop.f32.mrb[12].mxu0 }
 0x44c   :  { %v18939_v40 = vpop.f32.mrb[13].mxu0 }
 0x44d   :  { %9112 = vmatpush1.bf16.msra.mxu0 %v20886_v34  ;;  %9284 = vmatpush1.bf16.msra.mxu1 %v20889_v35  ;;  %v23342_v48 = vadd.f32 %v18939_v40, %v18938_v11  ;;  %v18941_v15 = vpop.f32.mrb[14].mxu0  ;;  %v20934_v34 = vld [vmem:[#allocation2 + $0x2098] ss:$28 sps:$4 sm:$0xff]   ;;  %v20937_v35 = vld [vmem:[#allocation2 + $0x20a0] ss:$28 sps:$4 sm:$0xff]  }
 0x44e   :  { %9113 = vmatprep.subr.bf16.mxu0 %v20894_v37  ;;  %9285 = vmatprep.subr.bf16.mxu1 %v20897_v21  ;;  %v18942_v18 = vpop.f32.mrb[15].mxu0  ;;  %v20942_v37 = vld [vmem:[#allocation2 + $0x20d4] ss:$28 sps:$4 sm:$0xff]   ;;  %v20945_v21 = vld [vmem:[#allocation2 + $0x20dc] ss:$28 sps:$4 sm:$0xff]  }
 0x44f   :  { %v23344_v6 = vadd.f32 %v18942_v18, %v18941_v15  ;;  %v20940_v40 = vld [vmem:[#allocation2 + $0x20d0] ss:$28 sps:$4 sm:$0xff]   ;;  %v20943_v18 = vld [vmem:[#allocation2 + $0x20d8] ss:$28 sps:$4 sm:$0xff]  }
 0x451   :  { %9114 = vmatpush1.bf16.msra.mxu0 %v20892_v39  ;;  %9286 = vmatpush1.bf16.msra.mxu1 %v20895_v44  ;;  %v6420_v39 = vadd.f32 %v23342_v48, %v23169_v43  ;;  %v20946_v48 = vld [vmem:[#allocation2 + $0x2108] ss:$28 sps:$4 sm:$0xff]  }
 0x452   :  { %9115 = vmatprep.subr.bf16.mxu0 %v20900_v47  ;;  %9287 = vmatprep.subr.bf16.mxu1 %v20903_v49  ;;  %v6423_v47 = vadd.f32 %v23344_v6, %v23169_v43  ;;  %v20954_v6 = vld [vmem:[#allocation2 + $0x2144] ss:$28 sps:$4 sm:$0xff]  }
 0x455   :  { %9116 = vmatpush1.bf16.msra.mxu0 %v20898_v20  ;;  %9288 = vmatpush1.bf16.msra.mxu1 %v20901_v52  ;;  %v20948_v20 = vld [vmem:[#allocation2 + $0x210c] ss:$28 sps:$4 sm:$0xff]  }
 0x456   :  { %9128 = vmatprep.subr.bf16.mxu0 %v20906_v56  ;;  %9300 = vmatprep.subr.bf16.mxu1 %v20909_v53  ;;  %v20951_v56 = vld [vmem:[#allocation2 + $0x2114] ss:$28 sps:$4 sm:$0xff]  }
 0x458   :  { %9118 = vmatmul.mubr.bf16.vlgmr.msra.gmra.mrb[28].mxu0 %v22569_v5  ;;  %9290 = vmatmul.mubr.bf16.vlgmr.msra.gmra.mrb[28].mxu1 %v22569_v5  ;;  %v20955_v5 = vld [vmem:[#allocation2 + $0x2148] ss:$28 sps:$4 sm:$0xff]  }
 0x459   :  { %9129 = vmatpush1.bf16.msra.mxu0 %v20904_v51  ;;  %9301 = vmatpush1.bf16.msra.mxu1 %v20907_v26 }
 0x45a   :  { %9130 = vmatprep.subr.bf16.mxu0 %v20912_v50  ;;  %9302 = vmatprep.subr.bf16.mxu1 %v20915_v3  ;;  %v20949_v50 = vld [vmem:[#allocation2 + $0x2110] ss:$28 sps:$4 sm:$0xff]  }
 0x45b   :  { %9160 = vmatprep.mubr.bf16.mxu0 %v22570_v23  ;;  %9332 = vmatprep.mubr.bf16.mxu1 %v22570_v23  ;;  %v20957_v3 = vld [vmem:[#allocation2 + $0x214c] ss:$28 sps:$4 sm:$0xff]   ;;  %v20966_v23 = vld [vmem:[#allocation2 + $0x21b4] ss:$28 sps:$4 sm:$0xff]  }
 0x45d   :  { %9131 = vmatpush1.bf16.msra.mxu0 %v20910_v4  ;;  %9303 = vmatpush1.bf16.msra.mxu1 %v20913_v1  ;;  %v20952_v4 = vld [vmem:[#allocation2 + $0x2140] ss:$28 sps:$4 sm:$0xff]  }
 0x45e   :  { %9132 = vmatprep.subr.bf16.mxu0 %v20918_v7  ;;  %9304 = vmatprep.subr.bf16.mxu1 %v20921_v10  ;;  %v20960_v1 = vld [vmem:[#allocation2 + $0x217c] ss:$28 sps:$4 sm:$0xff]   ;;  %v20963_v7 = vld [vmem:[#allocation2 + $0x2184] ss:$28 sps:$4 sm:$0xff]  }
 0x45f   :  { %v20958_v10 = vld [vmem:[#allocation2 + $0x2178] ss:$28 sps:$4 sm:$0xff]  }
 0x461   :  { %9133 = vmatpush1.bf16.msra.mxu0 %v20916_v14  ;;  %9305 = vmatpush1.bf16.msra.mxu1 %v20919_v25  ;;  %v20961_v14 = vld [vmem:[#allocation2 + $0x2180] ss:$28 sps:$4 sm:$0xff]  }
 0x462   :  { %9134 = vmatprep.subr.bf16.mxu0 %v20924_v12  ;;  %9306 = vmatprep.subr.bf16.mxu1 %v20927_v55  ;;  %v20969_v25 = vld [vmem:[#allocation2 + $0x21bc] ss:$28 sps:$4 sm:$0xff]   ;;  %v20964_v12 = vld [vmem:[#allocation2 + $0x21b0] ss:$28 sps:$4 sm:$0xff]  }
 0x463   :  { %v20967_v55 = vld [vmem:[#allocation2 + $0x21b8] ss:$28 sps:$4 sm:$0xff]  }
 0x465   :  { %9135 = vmatpush1.bf16.msra.mxu0 %v20922_v28  ;;  %9307 = vmatpush1.bf16.msra.mxu1 %v20925_v9  ;;  %v20972_v28 = vld [vmem:[#allocation2 + $0x21ec] ss:$28 sps:$4 sm:$0xff]   ;;  %v20975_v9 = vld [vmem:[#allocation2 + $0x21f4] ss:$28 sps:$4 sm:$0xff]  }
 0x466   :  { %9136 = vmatprep.subr.bf16.mxu0 %v20930_v29  ;;  %9308 = vmatprep.subr.bf16.mxu1 %v20933_v30  ;;  %v20970_v29 = vld [vmem:[#allocation2 + $0x21e8] ss:$28 sps:$4 sm:$0xff]   ;;  %v20973_v30 = vld [vmem:[#allocation2 + $0x21f0] ss:$28 sps:$4 sm:$0xff]  }
 0x469   :  { %9137 = vmatpush1.bf16.msra.mxu0 %v20928_v32  ;;  %9309 = vmatpush1.bf16.msra.mxu1 %v20931_v16  ;;  %v20978_v32 = vld [vmem:[#allocation2 + $0x2224] ss:$28 sps:$4 sm:$0xff]   ;;  %v20981_v16 = vld [vmem:[#allocation2 + $0x222c] ss:$28 sps:$4 sm:$0xff]  }
 0x46a   :  { %9138 = vmatprep.subr.bf16.mxu0 %v20936_v19  ;;  %9310 = vmatprep.subr.bf16.mxu1 %v20939_v33  ;;  %v20976_v19 = vld [vmem:[#allocation2 + $0x2220] ss:$28 sps:$4 sm:$0xff]   ;;  %v20979_v33 = vld [vmem:[#allocation2 + $0x2228] ss:$28 sps:$4 sm:$0xff]  }
 0x46b   :  { %v18960_v11 = vpop.f32.mrb[16].mxu0 }
 0x46c   :  { %v18961_v44 = vpop.f32.mrb[17].mxu0 }
 0x46d   :  { %v18962_v15 = vadd.f32 %v18961_v44, %v18960_v11  ;;  %v18963_v49 = vpop.f32.mrb[18].mxu0  ;;  %9139 = vmatpush1.bf16.msra.mxu0 %v20934_v34  ;;  %9311 = vmatpush1.bf16.msra.mxu1 %v20937_v35  ;;  %v20984_v34 = vld [vmem:[#allocation2 + $0x225c] ss:$28 sps:$4 sm:$0xff]   ;;  %v20987_v35 = vld [vmem:[#allocation2 + $0x2264] ss:$28 sps:$4 sm:$0xff]  }
 0x46e   :  { %v18964_v52 = vpop.f32.mrb[19].mxu0  ;;  %9140 = vmatprep.subr.bf16.mxu0 %v20942_v37  ;;  %9312 = vmatprep.subr.bf16.mxu1 %v20945_v21  ;;  %v20982_v37 = vld [vmem:[#allocation2 + $0x2258] ss:$28 sps:$4 sm:$0xff]   ;;  %v20985_v21 = vld [vmem:[#allocation2 + $0x2260] ss:$28 sps:$4 sm:$0xff]  }
 0x46f   :  { %v23356_v53 = vadd.f32 %v18962_v15, %v6420_v39  ;;  %v18965_v51 = vadd.f32 %v18964_v52, %v18963_v49  ;;  %v20990_v39 = vld [vmem:[#allocation2 + $0x2294] ss:$28 sps:$4 sm:$0xff]   ;;  %v20993_v11 = vld [vmem:[#allocation2 + $0x229c] ss:$28 sps:$4 sm:$0xff]  }
 0x470   :  { %v20988_v44 = vld [vmem:[#allocation2 + $0x2290] ss:$28 sps:$4 sm:$0xff]  }
 0x471   :  { %v23358_v26 = vadd.f32 %v18965_v51, %v6423_v47  ;;  %9141 = vmatpush1.bf16.msra.mxu0 %v20940_v40  ;;  %9313 = vmatpush1.bf16.msra.mxu1 %v20943_v18  ;;  %v20991_v18 = vld [vmem:[#allocation2 + $0x2298] ss:$28 sps:$4 sm:$0xff]  }
 0x472   :  { %9142 = vmatprep.subr.bf16.mxu0 %v20948_v20  ;;  %9314 = vmatprep.subr.bf16.mxu1 %v20951_v56  ;;  %v20996_v20 = vld [vmem:[#allocation2 + $0x22cc] ss:$28 sps:$4 sm:$0xff]   ;;  %v20999_v56 = vld [vmem:[#allocation2 + $0x22d4] ss:$28 sps:$4 sm:$0xff]  }
 0x475   :  { %9143 = vmatpush1.bf16.msra.mxu0 %v20946_v48  ;;  %9315 = vmatpush1.bf16.msra.mxu1 %v20949_v50  ;;  %v20994_v48 = vld [vmem:[#allocation2 + $0x22c8] ss:$28 sps:$4 sm:$0xff]  }
 0x476   :  { %9144 = vmatprep.subr.bf16.mxu0 %v20954_v6  ;;  %9316 = vmatprep.subr.bf16.mxu1 %v20957_v3  ;;  %v20997_v6 = vld [vmem:[#allocation2 + $0x22d0] ss:$28 sps:$4 sm:$0xff]   ;;  %v21002_v3 = vld [vmem:[#allocation2 + $0x2304] ss:$28 sps:$4 sm:$0xff]  }
 0x479   :  { %9145 = vmatpush1.bf16.msra.mxu0 %v20952_v4  ;;  %9317 = vmatpush1.bf16.msra.mxu1 %v20955_v5  ;;  %v21005_v5 = vld [vmem:[#allocation2 + $0x230c] ss:$28 sps:$4 sm:$0xff]  }
 0x47a   :  { %9146 = vmatprep.subr.bf16.mxu0 %v20960_v1  ;;  %9318 = vmatprep.subr.bf16.mxu1 %v20963_v7  ;;  %v21000_v1 = vld [vmem:[#allocation2 + $0x2300] ss:$28 sps:$4 sm:$0xff]   ;;  %v21003_v7 = vld [vmem:[#allocation2 + $0x2308] ss:$28 sps:$4 sm:$0xff]  }
 0x47d   :  { %9147 = vmatpush1.bf16.msra.mxu0 %v20958_v10  ;;  %9319 = vmatpush1.bf16.msra.mxu1 %v20961_v14  ;;  %v21008_v10 = vld [vmem:[#allocation2 + $0x233c] ss:$28 sps:$4 sm:$0xff]   ;;  %v21011_v14 = vld [vmem:[#allocation2 + $0x2344] ss:$28 sps:$4 sm:$0xff]  }
 0x47e   :  { %9148 = vmatprep.subr.bf16.mxu0 %v20966_v23  ;;  %9320 = vmatprep.subr.bf16.mxu1 %v20969_v25  ;;  %v21009_v23 = vld [vmem:[#allocation2 + $0x2340] ss:$28 sps:$4 sm:$0xff]   ;;  %v22571_v25 = vld [vmem:[%s23775_s0 + $0x10] ss:$28 sps:$4 sm:$0xff]  }
 0x481   :  { %9149 = vmatpush1.bf16.msra.mxu0 %v20964_v12  ;;  %9321 = vmatpush1.bf16.msra.mxu1 %v20967_v55  ;;  %v21017_v12 = vld [vmem:[#allocation2 + $0x237c] ss:$28 sps:$4 sm:$0xff]   ;;  %v21012_v55 = vld [vmem:[#allocation2 + $0x2370] ss:$28 sps:$4 sm:$0xff]  }
 0x482   :  { %9150 = vmatprep.subr.bf16.mxu0 %v20972_v28  ;;  %9322 = vmatprep.subr.bf16.mxu1 %v20975_v9  ;;  %v21015_v28 = vld [vmem:[#allocation2 + $0x2378] ss:$28 sps:$4 sm:$0xff]   ;;  %v21020_v9 = vld [vmem:[#allocation2 + $0x23ac] ss:$28 sps:$4 sm:$0xff]  }
 0x485   :  { %9151 = vmatpush1.bf16.msra.mxu0 %v20970_v29  ;;  %9323 = vmatpush1.bf16.msra.mxu1 %v20973_v30  ;;  %v21023_v29 = vld [vmem:[#allocation2 + $0x23b4] ss:$28 sps:$4 sm:$0xff]   ;;  %v641_v30 = vsub.s32 4, %v23166_v31 }
 0x486   :  { %9152 = vmatprep.subr.bf16.mxu0 %v20978_v32  ;;  %9324 = vmatprep.subr.bf16.mxu1 %v20981_v16  ;;  %v645_v32 = vsub.s32 5, %v23166_v31  ;;  %v21018_v16 = vld [vmem:[#allocation2 + $0x23a8] ss:$28 sps:$4 sm:$0xff]  }
 0x489   :  { %9153 = vmatpush1.bf16.msra.mxu0 %v20976_v19  ;;  %9325 = vmatpush1.bf16.msra.mxu1 %v20979_v33  ;;  %v21021_v19 = vld [vmem:[#allocation2 + $0x23b0] ss:$28 sps:$4 sm:$0xff]   ;;  %v21026_v33 = vld [vmem:[#allocation2 + $0x23e4] ss:$28 sps:$4 sm:$0xff]  }
 0x48a   :  { %9154 = vmatprep.subr.bf16.mxu0 %v20984_v34  ;;  %9326 = vmatprep.subr.bf16.mxu1 %v20987_v35  ;;  %v21029_v34 = vld [vmem:[#allocation2 + $0x23ec] ss:$28 sps:$4 sm:$0xff]   ;;  %v22572_v35 = vld [vmem:[#allocation4] sm:$0xff] }
 0x48b   :  { %v18982_v40 = vpop.f32.mrb[20].mxu0 }
 0x48c   :  { %v18983_v47 = vpop.f32.mrb[21].mxu0 }
 0x48d   :  { %v18984_v15 = vadd.f32 %v18983_v47, %v18982_v40  ;;  %v18985_v49 = vpop.f32.mrb[22].mxu0  ;;  %9155 = vmatpush1.bf16.msra.mxu0 %v20982_v37  ;;  %9327 = vmatpush1.bf16.msra.mxu1 %v20985_v21  ;;  %v23373_v37 = vrot.slane %v22572_v35, %v641_v30  ;;  %v23375_v21 = vrot.slane %v22572_v35, %v645_v32  ;;  %v21032_v40 = vld [vmem:[#allocation2 + $0x241c] ss:$28 sps:$4 sm:$0xff]  }
 0x48e   :  { %v18986_v52 = vpop.f32.mrb[23].mxu0  ;;  %9156 = vmatprep.subr.bf16.mxu0 %v20990_v39  ;;  %9328 = vmatprep.subr.bf16.mxu1 %v20993_v11  ;;  %v21024_v39 = vld [vmem:[#allocation2 + $0x23e0] ss:$28 sps:$4 sm:$0xff]   ;;  %v21027_v11 = vld [vmem:[#allocation2 + $0x23e8] ss:$28 sps:$4 sm:$0xff]  }
 0x48f   :  { %v18987_v51 = vadd.f32 %v18986_v52, %v18985_v49  ;;  %v23361_v50 = vadd.f32 %v18984_v15, %v23356_v53  ;;  %v21006_v53 = vld [vmem:[#allocation2 + $0x2338] ss:$28 sps:$4 sm:$0xff]   ;;  %v19315_v47 = vadd.f32 %v23228_v38, %v23373_v37  ;;  %v19316_v15 = vadd.f32 %v23230_v42, %v23375_v21 }
 0x490   :  { %v21030_v49 = vld [vmem:[#allocation2 + $0x2418] ss:$28 sps:$4 sm:$0xff]   ;;  %v3396_v52 = vmax.f32 %v23195_v59, 0.0  ;;  %v19318_v42 = vadd.f32 %v23234_v46, %v23375_v21 }
 0x491   :  { %9157 = vmatpush1.bf16.msra.mxu0 %v20988_v44  ;;  %9329 = vmatpush1.bf16.msra.mxu1 %v20991_v18  ;;  %v23364_v4 = vadd.f32 %v18987_v51, %v23358_v26  ;;  %v21014_v26 = vld [vmem:[#allocation2 + $0x2374] ss:$28 sps:$4 sm:$0xff]   ;;  %v21035_v44 = vld [vmem:[#allocation2 + $0x2424] ss:$28 sps:$4 sm:$0xff]   ;;  %v21041_v51 = vld [vmem:[#allocation2 + $0x245c] ss:$28 sps:$4 sm:$0xff]  }
 0x492   :  { %9158 = vmatprep.subr.bf16.mxu0 %v20996_v20  ;;  %9330 = vmatprep.subr.bf16.mxu1 %v20999_v56  ;;  %v21033_v18 = vld [vmem:[#allocation2 + $0x2420] ss:$28 sps:$4 sm:$0xff]   ;;  %v19317_v20 = vadd.f32 %v23232_v45, %v23373_v37  ;;  %v21038_v56 = vld [vmem:[#allocation2 + $0x2454] ss:$28 sps:$4 sm:$0xff]   ;;  %v3395_v38 = vmax.f32 %v19316_v15, 0.0  ;;  %v3402_v30 = vmax.f32 %v19318_v42, 0.0 }
 0x493   :  { %v21060_v42 = vld [vmem:[#allocation2 + $0x1904] ss:$28 sps:$4 sm:$0xff]  }
 0x494   :  { %v3401_v45 = vmax.f32 %v19317_v20, 0.0  ;;  %v21048_v20 = vld [vmem:[#allocation2 + $0x1890] ss:$28 sps:$4 sm:$0xff]  }
 0x495   :  { %9159 = vmatpush1.bf16.msra.mxu0 %v20994_v48  ;;  %9331 = vmatpush1.bf16.msra.mxu1 %v20997_v6  ;;  %v3403_v48 = vmax.f32 %v23198_v36, 0.0  ;;  %v3394_v6 = vmax.f32 %v19315_v47, 0.0  ;;  %v21051_v47 = vld [vmem:[#allocation2 + $0x1a58] ss:$28 sps:$4 sm:$0xff]  }
 0x496   :  { %9171 = vmatprep.subr.bf16.mxu0 %v21002_v3  ;;  %9343 = vmatprep.subr.bf16.mxu1 %v21005_v5 }
 0x498   :  { %9161 = vmatmul.mubr.bf16.vlgmr.msra.gmra.mrb[28].mxu0 %v22571_v25  ;;  %9333 = vmatmul.mubr.bf16.vlgmr.msra.gmra.mrb[28].mxu1 %v22571_v25 }
 0x499   :  { %9172 = vmatpush1.bf16.msra.mxu0 %v21000_v1  ;;  %9344 = vmatpush1.bf16.msra.mxu1 %v21003_v7  ;;  %v21036_v1 = vld [vmem:[#allocation2 + $0x2450] ss:$28 sps:$4 sm:$0xff]   ;;  %v21039_v7 = vld [vmem:[#allocation2 + $0x2458] ss:$28 sps:$4 sm:$0xff]  }
 0x49a   :  { %9173 = vmatprep.subr.bf16.mxu0 %v21008_v10  ;;  %9345 = vmatprep.subr.bf16.mxu1 %v21011_v14 }
 0x49b   :  { %9203 = vmatprep.mubr.bf16.mxu0 %v22841_v17  ;;  %9375 = vmatprep.mubr.bf16.mxu1 %v22841_v17 }
 0x49d   :  { %9174 = vmatpush1.bf16.msra.mxu0 %v21006_v53  ;;  %9346 = vmatpush1.bf16.msra.mxu1 %v21009_v23 }
 0x49e   :  { %9175 = vmatprep.subr.bf16.mxu0 %v21014_v26  ;;  %9347 = vmatprep.subr.bf16.mxu1 %v21017_v12  ;;  %v21044_v26 = vld [vmem:[#allocation2 + $0x248c] ss:$28 sps:$4 sm:$0xff]   ;;  %v21047_v12 = vld [vmem:[#allocation2 + $0x2494] ss:$28 sps:$4 sm:$0xff]  }
 0x4a1   :  { %9176 = vmatpush1.bf16.msra.mxu0 %v21012_v55  ;;  %9348 = vmatpush1.bf16.msra.mxu1 %v21015_v28 }
 0x4a2   :  { %9177 = vmatprep.subr.bf16.mxu0 %v21020_v9  ;;  %9349 = vmatprep.subr.bf16.mxu1 %v21023_v29 }
 0x4a5   :  { %9178 = vmatpush1.bf16.msra.mxu0 %v21018_v16  ;;  %9350 = vmatpush1.bf16.msra.mxu1 %v21021_v19  ;;  %v21042_v19 = vld [vmem:[#allocation2 + $0x2488] ss:$28 sps:$4 sm:$0xff]  }
 0x4a6   :  { %9179 = vmatprep.subr.bf16.mxu0 %v21026_v33  ;;  %9351 = vmatprep.subr.bf16.mxu1 %v21029_v34  ;;  %v21045_v33 = vld [vmem:[#allocation2 + $0x2490] ss:$28 sps:$4 sm:$0xff]  }
 0x4a9   :  { %9180 = vmatpush1.bf16.msra.mxu0 %v21024_v39  ;;  %9352 = vmatpush1.bf16.msra.mxu1 %v21027_v11 }
 0x4aa   :  { %9181 = vmatprep.subr.bf16.mxu0 %v21032_v40  ;;  %9353 = vmatprep.subr.bf16.mxu1 %v21035_v44 }
 0x4ab   :  { %v6376_v3 = vpop.f32.mrb[24].mxu1  ;;  %v6542_v5 = vpop.f32.mrb[24].mxu0 }
 0x4ac   :  { %v19327_v59 = vadd.f32 %v6376_v3, %v23373_v37  ;;  %v6543_v10 = vadd.f32 %v6542_v5, %v23361_v50  ;;  %v6378_v14 = vpop.f32.mrb[25].mxu1  ;;  %v19225_v53 = vpop.f32.mrb[25].mxu0  ;;  %v21061_v3 = vld [vmem:[#allocation2 + $0x1ac8] ss:$28 sps:$4 sm:$0xff]  }
 0x4ad   :  { %v19328_v36 = vadd.f32 %v6378_v14, %v23375_v21  ;;  %v6380_v23 = vpop.f32.mrb[26].mxu1  ;;  %v6545_v25 = vpop.f32.mrb[26].mxu0  ;;  %9182 = vmatpush1.bf16.msra.mxu0 %v21030_v49  ;;  %9354 = vmatpush1.bf16.msra.mxu1 %v21033_v18  ;;  %v22574_v5 = vld [vmem:[%s23775_s0 + $0x4] ss:$28 sps:$4 sm:$0xff]   ;;  %v21070_v53 = vld [vmem:[#allocation2 + $0x1974] ss:$28 sps:$4 sm:$0xff]  }
 0x4ae   :  { %v6553_v46 = vmax.f32 %v19327_v59, 0.0  ;;  %v6555_v55 = vmax.f32 %v6543_v10, 0.0  ;;  %v19329_v28 = vadd.f32 %v6380_v23, %v23373_v37  ;;  %v6546_v9 = vadd.f32 %v6545_v25, %v23364_v4  ;;  %v6382_v29 = vpop.f32.mrb[27].mxu1  ;;  %9183 = vmatprep.subr.bf16.mxu0 %v21038_v56  ;;  %9355 = vmatprep.subr.bf16.mxu1 %v21041_v51  ;;  %v19226_v50 = vpop.f32.mrb[27].mxu0  ;;  %v21050_v4 = vld [vmem:[#allocation2 + $0x1894] ss:$28 sps:$4 sm:$0xff]  }
 0x4af   :  { %v6554_v32 = vmax.f32 %v19328_v36, 0.0  ;;  %v19330_v16 = vadd.f32 %v6382_v29, %v23375_v21  ;;  %v21055_v56 = vld [vmem:[#allocation2 + $0x18cc] ss:$28 sps:$4 sm:$0xff]   ;;  %v21066_v59 = vld [vmem:[#allocation2 + $0x1b00] ss:$28 sps:$4 sm:$0xff]  }
 0x4b0   :  { %v23393_v34 = vmax.f32 %v3394_v6, %v6553_v46  ;;  %v23395_v35 = vmax.f32 %v3396_v52, %v6555_v55  ;;  %v6560_v39 = vmax.f32 %v19329_v28, 0.0  ;;  %v6562_v11 = vmax.f32 %v6546_v9, 0.0  ;;  %v21052_v52 = vld [vmem:[#allocation2 + $0x1898] ss:$28 sps:$4 sm:$0xff]   ;;  %v21056_v51 = vld [vmem:[#allocation2 + $0x1a90] ss:$28 sps:$4 sm:$0xff]  }
 0x4b1   :  { %v23397_v40 = vmax.f32 %v3395_v38, %v6554_v32  ;;  %v6561_v44 = vmax.f32 %v19330_v16, 0.0  ;;  %9184 = vmatpush1.bf16.msra.mxu0 %v21036_v1  ;;  %9356 = vmatpush1.bf16.msra.mxu1 %v21039_v7  ;;  %v22573_v6 = vld [vmem:[%s23775_s0 + $0x18] ss:$28 sps:$4 sm:$0xff]   ;;  %v21057_v38 = vld [vmem:[#allocation2 + $0x18d0] ss:$28 sps:$4 sm:$0xff]  }
 0x4b2   :  { %v23399_v15 = vmax.f32 %v3401_v45, %v6560_v39  ;;  %v23401_v49 = vmax.f32 %v3403_v48, %v6562_v11  ;;  %9185 = vmatprep.subr.bf16.mxu0 %v21044_v26  ;;  %9357 = vmatprep.subr.bf16.mxu1 %v21047_v12  ;;  %v21053_v48 = vld [vmem:[#allocation2 + $0x18c8] ss:$28 sps:$4 sm:$0xff]   ;;  %v21058_v1 = vld [vmem:[#allocation2 + $0x1900] ss:$28 sps:$4 sm:$0xff]   ;;  %v21063_v10 = vld [vmem:[#allocation2 + $0x1938] ss:$28 sps:$4 sm:$0xff]  }
 0x4b3   :  { %v23403_v18 = vmax.f32 %v3402_v30, %v6561_v44  ;;  %v21062_v7 = vld [vmem:[#allocation2 + $0x1908] ss:$28 sps:$4 sm:$0xff]   ;;  %v21065_v45 = vld [vmem:[#allocation2 + $0x193c] ss:$28 sps:$4 sm:$0xff]   ;;  %v21068_v23 = vld [vmem:[#allocation2 + $0x1970] ss:$28 sps:$4 sm:$0xff]  }
 0x4b4   :  { %v21067_v14 = vld [vmem:[#allocation2 + $0x1940] ss:$28 sps:$4 sm:$0xff]   ;;  %v21071_v36 = vld [vmem:[#allocation2 + $0x1b38] ss:$28 sps:$4 sm:$0xff]   ;;  %v21075_v26 = vld [vmem:[#allocation2 + $0x19ac] ss:$28 sps:$4 sm:$0xff]  }
 0x4b5   :  { %9186 = vmatpush1.bf16.msra.mxu0 %v21042_v19  ;;  %9358 = vmatpush1.bf16.msra.mxu1 %v21045_v33  ;;  %v21072_v25 = vld [vmem:[#allocation2 + $0x1978] ss:$28 sps:$4 sm:$0xff]   ;;  %v21076_v12 = vld [vmem:[#allocation2 + $0x1b70] ss:$28 sps:$4 sm:$0xff]   ;;  %v21073_v46 = vld [vmem:[#allocation2 + $0x19a8] ss:$28 sps:$4 sm:$0xff]  }
 0x4b6   :  { %9386 = vmatprep.subr.bf16.mxu0 %v21050_v4  ;;  %18997 = vmatprep.subr.bf16.mxu1 %v21051_v47  ;;  %v21077_v55 = vld [vmem:[#allocation2 + $0x19b0] ss:$28 sps:$4 sm:$0xff]   ;;  %v21080_v28 = vld [vmem:[#allocation2 + $0x19e4] ss:$28 sps:$4 sm:$0xff]   ;;  %v21085_v30 = vld [vmem:[#allocation2 + $0x1a1c] ss:$28 sps:$4 sm:$0xff]  }
 0x4b7   :  { %v21081_v9 = vld [vmem:[#allocation2 + $0x1ba8] ss:$28 sps:$4 sm:$0xff]   ;;  %v21078_v29 = vld [vmem:[#allocation2 + $0x19e0] ss:$28 sps:$4 sm:$0xff]   ;;  %v21083_v16 = vld [vmem:[#allocation2 + $0x1a18] ss:$28 sps:$4 sm:$0xff]  }
 0x4b8   :  { %9204 = vmatmul.mubr.bf16.vlgmr.msra.gmra.mrb[28].mxu0 %v22573_v6  ;;  %9376 = vmatmul.mubr.bf16.vlgmr.msra.gmra.mrb[28].mxu1 %v22573_v6  ;;  %v21082_v50 = vld [vmem:[#allocation2 + $0x19e8] ss:$28 sps:$4 sm:$0xff]   ;;  %v21086_v32 = vld [vmem:[#allocation2 + $0x1be0] ss:$28 sps:$4 sm:$0xff]   ;;  %v21090_v33 = vld [vmem:[#allocation2 + $0x1a54] ss:$28 sps:$4 sm:$0xff]  }
 0x4b9   :  { %9387 = vmatpush1.bf16.msra.mxu0 %v21048_v20  ;;  %18998 = vmatpush3.bf16.msra.mxu1 %v21052_v52  ;;  %v21087_v19 = vld [vmem:[#allocation2 + $0x1a20] ss:$28 sps:$4 sm:$0xff]   ;;  %v21091_v39 = vld [vmem:[#allocation2 + $0x1dd8] ss:$28 sps:$4 sm:$0xff]   ;;  %v21088_v11 = vld [vmem:[#allocation2 + $0x1a50] ss:$28 sps:$4 sm:$0xff]  }
 0x4ba   :  { %9388 = vmatprep.subr.bf16.mxu0 %v21055_v56  ;;  %18999 = vmatprep.subr.bf16.mxu1 %v21056_v51  ;;  %v21092_v44 = vld [vmem:[#allocation2 + $0x1c18] ss:$28 sps:$4 sm:$0xff]   ;;  %v21095_v4 = vld [vmem:[#allocation2 + $0x1a8c] ss:$28 sps:$4 sm:$0xff]   ;;  %v23414_v20 = vld [vmem:[%s23775_s0] ss:$28 sps:$4 sm:$0xff]  }
 0x4bb   :  { %9590 = vmatprep.mubr.bf16.mxu1 %v22574_v5  ;;  %9418 = vmatprep.mubr.bf16.mxu0 %v22574_v5  ;;  %v21096_v47 = vld [vmem:[#allocation2 + $0x1e10] ss:$28 sps:$4 sm:$0xff]   ;;  %v21093_v52 = vld [vmem:[#allocation2 + $0x1a88] ss:$28 sps:$4 sm:$0xff]   ;;  %v21106_v5 = vld [vmem:[#allocation2 + $0x1e80] ss:$28 sps:$4 sm:$0xff]  }
 0x4bc   :  { %v21097_v56 = vld [vmem:[#allocation2 + $0x1c50] ss:$28 sps:$4 sm:$0xff]   ;;  %v21100_v51 = vld [vmem:[#allocation2 + $0x1ac4] ss:$28 sps:$4 sm:$0xff]  }
 0x4bd   :  { %9389 = vmatpush1.bf16.msra.mxu0 %v21053_v48  ;;  %19000 = vmatpush3.bf16.msra.mxu1 %v21057_v38  ;;  %v21101_v6 = vld [vmem:[#allocation2 + $0x1e48] ss:$28 sps:$4 sm:$0xff]   ;;  %v21098_v38 = vld [vmem:[#allocation2 + $0x1ac0] ss:$28 sps:$4 sm:$0xff]  }
 0x4be   :  { %9390 = vmatprep.subr.bf16.mxu0 %v21060_v42  ;;  %19001 = vmatprep.subr.bf16.mxu1 %v21061_v3  ;;  %v23420_v48 = vld [vmem:[%s23775_s0 + $0xc] ss:$28 sps:$4 sm:$0xff]   ;;  %v21105_v3 = vld [vmem:[#allocation2 + $0x1afc] ss:$28 sps:$4 sm:$0xff]  }
 0x4bf   :  { %v21102_v42 = vld [vmem:[#allocation2 + $0x1c88] ss:$28 sps:$4 sm:$0xff]  }
 0x4c1   :  { %9391 = vmatpush1.bf16.msra.mxu0 %v21058_v1  ;;  %19002 = vmatpush3.bf16.msra.mxu1 %v21062_v7  ;;  %v21103_v1 = vld [vmem:[#allocation2 + $0x1af8] ss:$28 sps:$4 sm:$0xff]   ;;  %v21107_v7 = vld [vmem:[#allocation2 + $0x1cc0] ss:$28 sps:$4 sm:$0xff]  }
 0x4c2   :  { %9392 = vmatprep.subr.bf16.mxu0 %v21065_v45  ;;  %19003 = vmatprep.subr.bf16.mxu1 %v21066_v59  ;;  %v21110_v45 = vld [vmem:[#allocation2 + $0x1b34] ss:$28 sps:$4 sm:$0xff]  }
 0x4c3   :  { %v21111_v59 = vld [vmem:[#allocation2 + $0x1eb8] ss:$28 sps:$4 sm:$0xff]  }
 0x4c5   :  { %9393 = vmatpush1.bf16.msra.mxu0 %v21063_v10  ;;  %19004 = vmatpush3.bf16.msra.mxu1 %v21067_v14  ;;  %v21108_v10 = vld [vmem:[#allocation2 + $0x1b30] ss:$28 sps:$4 sm:$0xff]   ;;  %v21112_v14 = vld [vmem:[#allocation2 + $0x1cf8] ss:$28 sps:$4 sm:$0xff]  }
 0x4c6   :  { %9394 = vmatprep.subr.bf16.mxu0 %v21070_v53  ;;  %19005 = vmatprep.subr.bf16.mxu1 %v21071_v36  ;;  %v21115_v53 = vld [vmem:[#allocation2 + $0x1b6c] ss:$28 sps:$4 sm:$0xff]  }
 0x4c7   :  { %v21116_v36 = vld [vmem:[#allocation2 + $0x1ef0] ss:$28 sps:$4 sm:$0xff]  }
 0x4c9   :  { %9395 = vmatpush1.bf16.msra.mxu0 %v21068_v23  ;;  %19006 = vmatpush3.bf16.msra.mxu1 %v21072_v25  ;;  %v21113_v23 = vld [vmem:[#allocation2 + $0x1b68] ss:$28 sps:$4 sm:$0xff]   ;;  %v21117_v25 = vld [vmem:[#allocation2 + $0x1d30] ss:$28 sps:$4 sm:$0xff]  }
 0x4ca   :  { %9396 = vmatprep.subr.bf16.mxu0 %v21075_v26  ;;  %19007 = vmatprep.subr.bf16.mxu1 %v21076_v12  ;;  %v21120_v26 = vld [vmem:[#allocation2 + $0x1ba4] ss:$28 sps:$4 sm:$0xff]  }
 0x4cb   :  { %v21121_v12 = vld [vmem:[#allocation2 + $0x1f28] ss:$28 sps:$4 sm:$0xff]  }
 0x4cd   :  { %9397 = vmatpush1.bf16.msra.mxu0 %v21073_v46  ;;  %19008 = vmatpush3.bf16.msra.mxu1 %v21077_v55  ;;  %v21118_v46 = vld [vmem:[#allocation2 + $0x1ba0] ss:$28 sps:$4 sm:$0xff]   ;;  %v21122_v55 = vld [vmem:[#allocation2 + $0x1d68] ss:$28 sps:$4 sm:$0xff]  }
 0x4ce   :  { %9398 = vmatprep.subr.bf16.mxu0 %v21080_v28  ;;  %19009 = vmatprep.subr.bf16.mxu1 %v21081_v9  ;;  %v21125_v28 = vld [vmem:[#allocation2 + $0x1bdc] ss:$28 sps:$4 sm:$0xff]  }
 0x4cf   :  { %v21126_v9 = vld [vmem:[#allocation2 + $0x1f60] ss:$28 sps:$4 sm:$0xff]  }
 0x4d1   :  { %9399 = vmatpush1.bf16.msra.mxu0 %v21078_v29  ;;  %19010 = vmatpush3.bf16.msra.mxu1 %v21082_v50  ;;  %v21123_v29 = vld [vmem:[#allocation2 + $0x1bd8] ss:$28 sps:$4 sm:$0xff]   ;;  %v21127_v50 = vld [vmem:[#allocation2 + $0x1da0] ss:$28 sps:$4 sm:$0xff]  }
 0x4d2   :  { %9400 = vmatprep.subr.bf16.mxu0 %v21085_v30  ;;  %19011 = vmatprep.subr.bf16.mxu1 %v21086_v32  ;;  %v21130_v30 = vld [vmem:[#allocation2 + $0x1c14] ss:$28 sps:$4 sm:$0xff]  }
 0x4d3   :  { %v21131_v32 = vld [vmem:[#allocation2 + $0x2158] ss:$28 sps:$4 sm:$0xff]  }
 0x4d5   :  { %9401 = vmatpush1.bf16.msra.mxu0 %v21083_v16  ;;  %19012 = vmatpush3.bf16.msra.mxu1 %v21087_v19  ;;  %v21128_v16 = vld [vmem:[#allocation2 + $0x1c10] ss:$28 sps:$4 sm:$0xff]   ;;  %v21132_v19 = vld [vmem:[#allocation2 + $0x1f98] ss:$28 sps:$4 sm:$0xff]  }
 0x4d6   :  { %9402 = vmatprep.subr.bf16.mxu0 %v21090_v33  ;;  %19019 = vmatprep.subr.bf16.mxu1 %v21091_v39  ;;  %v21135_v33 = vld [vmem:[#allocation2 + $0x1c4c] ss:$28 sps:$4 sm:$0xff]  }
 0x4d7   :  { %v21136_v39 = vld [vmem:[#allocation2 + $0x2190] ss:$28 sps:$4 sm:$0xff]  }
 0x4d8   :  { %9591 = vmatmul.mubr.bf16.vlgmr.msra.gmra.mrb[32].mxu1 %v23414_v20 }
 0x4d9   :  { %9403 = vmatpush1.bf16.msra.mxu0 %v21088_v11  ;;  %19020 = vmatpush3.bf16.msra.mxu1 %v21092_v44  ;;  %v23426_v11 = vld [vmem:[%s23775_s0 + $0x8] ss:$28 sps:$4 sm:$0xff]  }
 0x4da   :  { %9404 = vmatprep.subr.bf16.mxu0 %v21095_v4  ;;  %19021 = vmatprep.subr.bf16.mxu1 %v21096_v47  ;;  %v21133_v44 = vld [vmem:[#allocation2 + $0x1c48] ss:$28 sps:$4 sm:$0xff]   ;;  %v21137_v4 = vld [vmem:[#allocation2 + $0x1fd0] ss:$28 sps:$4 sm:$0xff]  }
 0x4db   :  { %9631 = vmatprep.mubr.bf16.mxu1 %v23420_v48  ;;  %v21140_v47 = vld [vmem:[#allocation2 + $0x1c84] ss:$28 sps:$4 sm:$0xff]  }
 0x4dd   :  { %9405 = vmatpush1.bf16.msra.mxu0 %v21093_v52  ;;  %19022 = vmatpush3.bf16.msra.mxu1 %v21097_v56  ;;  %v21141_v52 = vld [vmem:[#allocation2 + $0x21c8] ss:$28 sps:$4 sm:$0xff]   ;;  %v23433_v56 = vld [vmem:[%s23775_s0 + $0x14] ss:$28 sps:$4 sm:$0xff]  }
 0x4de   :  { %9406 = vmatprep.subr.bf16.mxu0 %v21100_v51  ;;  %19023 = vmatprep.subr.bf16.mxu1 %v21101_v6  ;;  %v21142_v51 = vld [vmem:[#allocation2 + $0x2008] ss:$28 sps:$4 sm:$0xff]   ;;  %v21145_v6 = vld [vmem:[#allocation2 + $0x1cbc] ss:$28 sps:$4 sm:$0xff]  }
 0x4e1   :  { %9407 = vmatpush1.bf16.msra.mxu0 %v21098_v38  ;;  %19024 = vmatpush3.bf16.msra.mxu1 %v21102_v42  ;;  %v21146_v38 = vld [vmem:[#allocation2 + $0x2200] ss:$28 sps:$4 sm:$0xff]   ;;  %v21143_v42 = vld [vmem:[#allocation2 + $0x1cb8] ss:$28 sps:$4 sm:$0xff]  }
 0x4e2   :  { %9408 = vmatprep.subr.bf16.mxu0 %v21105_v3  ;;  %19025 = vmatprep.subr.bf16.mxu1 %v21106_v5  ;;  %v21147_v3 = vld [vmem:[#allocation2 + $0x2040] ss:$28 sps:$4 sm:$0xff]   ;;  %v21150_v5 = vld [vmem:[#allocation2 + $0x1cf4] ss:$28 sps:$4 sm:$0xff]  }
 0x4e5   :  { %9409 = vmatpush1.bf16.msra.mxu0 %v21103_v1  ;;  %19026 = vmatpush3.bf16.msra.mxu1 %v21107_v7  ;;  %v21151_v1 = vld [vmem:[#allocation2 + $0x2238] ss:$28 sps:$4 sm:$0xff]   ;;  %v21148_v7 = vld [vmem:[#allocation2 + $0x1cf0] ss:$28 sps:$4 sm:$0xff]  }
 0x4e6   :  { %9410 = vmatprep.subr.bf16.mxu0 %v21110_v45  ;;  %19027 = vmatprep.subr.bf16.mxu1 %v21111_v59  ;;  %v21155_v45 = vld [vmem:[#allocation2 + $0x1d2c] ss:$28 sps:$4 sm:$0xff]  }
 0x4e7   :  { %v21156_v59 = vld [vmem:[#allocation2 + $0x2270] ss:$28 sps:$4 sm:$0xff]  }
 0x4e9   :  { %9411 = vmatpush1.bf16.msra.mxu0 %v21108_v10  ;;  %19028 = vmatpush3.bf16.msra.mxu1 %v21112_v14  ;;  %v21153_v10 = vld [vmem:[#allocation2 + $0x1d28] ss:$28 sps:$4 sm:$0xff]   ;;  %v21157_v14 = vld [vmem:[#allocation2 + $0x20b0] ss:$28 sps:$4 sm:$0xff]  }
 0x4ea   :  { %9412 = vmatprep.subr.bf16.mxu0 %v21115_v53  ;;  %19029 = vmatprep.subr.bf16.mxu1 %v21116_v36  ;;  %v21160_v53 = vld [vmem:[#allocation2 + $0x1d64] ss:$28 sps:$4 sm:$0xff]  }
 0x4eb   :  { %v21161_v36 = vld [vmem:[#allocation2 + $0x22a8] ss:$28 sps:$4 sm:$0xff]  }
 0x4ed   :  { %9413 = vmatpush1.bf16.msra.mxu0 %v21113_v23  ;;  %19030 = vmatpush3.bf16.msra.mxu1 %v21117_v25  ;;  %v21158_v23 = vld [vmem:[#allocation2 + $0x1d60] ss:$28 sps:$4 sm:$0xff]   ;;  %v21162_v25 = vld [vmem:[#allocation2 + $0x20e8] ss:$28 sps:$4 sm:$0xff]  }
 0x4ee   :  { %9414 = vmatprep.subr.bf16.mxu0 %v21120_v26  ;;  %19031 = vmatprep.subr.bf16.mxu1 %v21121_v12  ;;  %v21165_v26 = vld [vmem:[#allocation2 + $0x1d9c] ss:$28 sps:$4 sm:$0xff]  }
 0x4ef   :  { %v21166_v12 = vld [vmem:[#allocation2 + $0x22e0] ss:$28 sps:$4 sm:$0xff]  }
 0x4f1   :  { %9415 = vmatpush1.bf16.msra.mxu0 %v21118_v46  ;;  %19032 = vmatpush3.bf16.msra.mxu1 %v21122_v55  ;;  %v21163_v46 = vld [vmem:[#allocation2 + $0x1d98] ss:$28 sps:$4 sm:$0xff]   ;;  %v21167_v55 = vld [vmem:[#allocation2 + $0x2120] ss:$28 sps:$4 sm:$0xff]  }
 0x4f2   :  { %9416 = vmatprep.subr.bf16.mxu0 %v21125_v28  ;;  %19033 = vmatprep.subr.bf16.mxu1 %v21126_v9  ;;  %v21170_v28 = vld [vmem:[#allocation2 + $0x1dd4] ss:$28 sps:$4 sm:$0xff]  }
 0x4f3   :  { %v21168_v9 = vld [vmem:[#allocation2 + $0x1dd0] ss:$28 sps:$4 sm:$0xff]  }
 0x4f5   :  { %9417 = vmatpush1.bf16.msra.mxu0 %v21123_v29  ;;  %19034 = vmatpush3.bf16.msra.mxu1 %v21127_v50  ;;  %v21171_v29 = vld [vmem:[#allocation2 + $0x2318] ss:$28 sps:$4 sm:$0xff]   ;;  %v21174_v50 = vld [vmem:[#allocation2 + $0x1e0c] ss:$28 sps:$4 sm:$0xff]  }
 0x4f6   :  { %9429 = vmatprep.subr.bf16.mxu0 %v21130_v30  ;;  %19041 = vmatprep.subr.bf16.mxu1 %v21131_v32  ;;  %v23441_v30 = vld [vmem:[%s23775_s0 + $0x10] ss:$28 sps:$4 sm:$0xff]   ;;  %v21172_v32 = vld [vmem:[#allocation2 + $0x1e08] ss:$28 sps:$4 sm:$0xff]  }
 0x4f8   :  { %9632 = vmatmul.mubr.bf16.vlgmr.msra.gmra.mrb[36].mxu1 %v23426_v11  ;;  %9419 = vmatmul.mubr.bf16.vlgmr.msra.gmra.mrb[32].mxu0 %v23414_v20  ;;  %v21138_v20 = vld [vmem:[#allocation2 + $0x1c80] ss:$28 sps:$4 sm:$0xff]  }
 0x4f9   :  { %9430 = vmatpush1.bf16.msra.mxu0 %v21128_v16  ;;  %19042 = vmatpush3.bf16.msra.mxu1 %v21132_v19  ;;  %v21175_v16 = vld [vmem:[#allocation2 + $0x2350] ss:$28 sps:$4 sm:$0xff]   ;;  %v21178_v19 = vld [vmem:[#allocation2 + $0x1e44] ss:$28 sps:$4 sm:$0xff]  }
 0x4fa   :  { %9431 = vmatprep.subr.bf16.mxu0 %v21135_v33  ;;  %19043 = vmatprep.subr.bf16.mxu1 %v21136_v39  ;;  %v21176_v33 = vld [vmem:[#allocation2 + $0x1e40] ss:$28 sps:$4 sm:$0xff]   ;;  %v21179_v39 = vld [vmem:[#allocation2 + $0x2388] ss:$28 sps:$4 sm:$0xff]  }
 0x4fb   :  { %9672 = vmatprep.mubr.bf16.mxu1 %v23433_v56  ;;  %9461 = vmatprep.mubr.bf16.mxu0 %v23420_v48  ;;  %v21152_v48 = vld [vmem:[#allocation2 + $0x2078] ss:$28 sps:$4 sm:$0xff]  }
 0x4fd   :  { %9432 = vmatpush1.bf16.msra.mxu0 %v21133_v44  ;;  %19044 = vmatpush3.bf16.msra.mxu1 %v21137_v4  ;;  %v21182_v44 = vld [vmem:[#allocation2 + $0x1e7c] ss:$28 sps:$4 sm:$0xff]  }
 0x4fe   :  { %9433 = vmatprep.subr.bf16.mxu0 %v21140_v47  ;;  %19045 = vmatprep.subr.bf16.mxu1 %v21141_v52  ;;  %v21180_v4 = vld [vmem:[#allocation2 + $0x1e78] ss:$28 sps:$4 sm:$0xff]   ;;  %v21183_v47 = vld [vmem:[#allocation2 + $0x23c0] ss:$28 sps:$4 sm:$0xff]  }
 0x4ff   :  { %v21186_v52 = vld [vmem:[#allocation2 + $0x1eb4] ss:$28 sps:$4 sm:$0xff]  }
 0x501   :  { %9434 = vmatpush1.bf16.msra.mxu0 %v21138_v20  ;;  %19046 = vmatpush3.bf16.msra.mxu1 %v21142_v51  ;;  %v21184_v20 = vld [vmem:[#allocation2 + $0x1eb0] ss:$28 sps:$4 sm:$0xff]   ;;  %v21187_v51 = vld [vmem:[#allocation2 + $0x23f8] ss:$28 sps:$4 sm:$0xff]  }
 0x502   :  { %9435 = vmatprep.subr.bf16.mxu0 %v21145_v6  ;;  %19047 = vmatprep.subr.bf16.mxu1 %v21146_v38  ;;  %v21190_v6 = vld [vmem:[#allocation2 + $0x1eec] ss:$28 sps:$4 sm:$0xff]  }
 0x503   :  { %v21188_v38 = vld [vmem:[#allocation2 + $0x1ee8] ss:$28 sps:$4 sm:$0xff]  }
 0x505   :  { %9436 = vmatpush1.bf16.msra.mxu0 %v21143_v42  ;;  %19048 = vmatpush3.bf16.msra.mxu1 %v21147_v3  ;;  %v21191_v42 = vld [vmem:[#allocation2 + $0x2430] ss:$28 sps:$4 sm:$0xff]   ;;  %v21194_v3 = vld [vmem:[#allocation2 + $0x1f24] ss:$28 sps:$4 sm:$0xff]  }
 0x506   :  { %9437 = vmatprep.subr.bf16.mxu0 %v21150_v5  ;;  %19049 = vmatprep.subr.bf16.mxu1 %v21151_v1  ;;  %v21192_v5 = vld [vmem:[#allocation2 + $0x1f20] ss:$28 sps:$4 sm:$0xff]   ;;  %v21195_v1 = vld [vmem:[#allocation2 + $0x2468] ss:$28 sps:$4 sm:$0xff]  }
 0x509   :  { %9438 = vmatpush1.bf16.msra.mxu0 %v21148_v7  ;;  %19050 = vmatpush3.bf16.msra.mxu1 %v21152_v48  ;;  %v21198_v7 = vld [vmem:[#allocation2 + $0x1f5c] ss:$28 sps:$4 sm:$0xff]  }
 0x50a   :  { %9439 = vmatprep.subr.bf16.mxu0 %v21155_v45  ;;  %19051 = vmatprep.subr.bf16.mxu1 %v21156_v59  ;;  %v21196_v48 = vld [vmem:[#allocation2 + $0x1f58] ss:$28 sps:$4 sm:$0xff]   ;;  %v21199_v45 = vld [vmem:[#allocation2 + $0x24a0] ss:$28 sps:$4 sm:$0xff]  }
 0x50b   :  { %v21202_v59 = vld [vmem:[#allocation2 + $0x1f94] ss:$28 sps:$4 sm:$0xff]  }
 0x50d   :  { %9440 = vmatpush1.bf16.msra.mxu0 %v21153_v10  ;;  %19052 = vmatpush3.bf16.msra.mxu1 %v21157_v14  ;;  %v21205_v10 = vld [vmem:[#allocation2 + $0x24c4] ss:$28 sps:$4 sm:$0xff]   ;;  %v21200_v14 = vld [vmem:[#allocation2 + $0x1f90] ss:$28 sps:$4 sm:$0xff]  }
 0x50e   :  { %9441 = vmatprep.subr.bf16.mxu0 %v21160_v53  ;;  %19053 = vmatprep.subr.bf16.mxu1 %v21161_v36  ;;  %v21203_v53 = vld [vmem:[#allocation2 + $0x24c0] ss:$28 sps:$4 sm:$0xff]   ;;  %v21208_v36 = vld [vmem:[#allocation2 + $0x1fcc] ss:$28 sps:$4 sm:$0xff]  }
 0x511   :  { %9442 = vmatpush1.bf16.msra.mxu0 %v21158_v23  ;;  %19054 = vmatpush3.bf16.msra.mxu1 %v21162_v25  ;;  %v21211_v23 = vld [vmem:[#allocation2 + $0x24fc] ss:$28 sps:$4 sm:$0xff]  }
 0x512   :  { %9443 = vmatprep.subr.bf16.mxu0 %v21165_v26  ;;  %19055 = vmatprep.subr.bf16.mxu1 %v21166_v12  ;;  %v23456_v25 = vld [vmem:[%s23775_s0 + $0x18] ss:$28 sps:$4 sm:$0xff]   ;;  %v21206_v26 = vld [vmem:[#allocation2 + $0x1fc8] ss:$28 sps:$4 sm:$0xff]  }
 0x513   :  { %v21209_v12 = vld [vmem:[#allocation2 + $0x24f8] ss:$28 sps:$4 sm:$0xff]  }
 0x515   :  { %9444 = vmatpush1.bf16.msra.mxu0 %v21163_v46  ;;  %19056 = vmatpush3.bf16.msra.mxu1 %v21167_v55  ;;  %v21214_v46 = vld [vmem:[#allocation2 + $0x2004] ss:$28 sps:$4 sm:$0xff]   ;;  %v21217_v55 = vld [vmem:[#allocation2 + $0x2534] ss:$28 sps:$4 sm:$0xff]  }
 0x516   :  { %9445 = vmatprep.subr.bf16.mxu0 %v21170_v28  ;;  %19227 = vmatprep.subr.bf16.mxu1 %v22842_v22  ;;  %v23464_v28 = vld [vmem:[%s23775_s0 + $0x4] ss:$28 sps:$4 sm:$0xff]  }
 0x518   :  { %9673 = vmatmul.mubr.bf16.vlgmr.msra.gmra.mrb[40].mxu1 %v23441_v30 }
 0x519   :  { %9446 = vmatpush1.bf16.msra.mxu0 %v21168_v9  ;;  %19228 = vmatpush3.bf16.msra.mxu1 %v21171_v29  ;;  %v21215_v9 = vld [vmem:[#allocation2 + $0x2530] ss:$28 sps:$4 sm:$0xff]   ;;  %v21220_v29 = vld [vmem:[#allocation2 + $0x203c] ss:$28 sps:$4 sm:$0xff]  }
 0x51a   :  { %9447 = vmatprep.subr.bf16.mxu0 %v21174_v50  ;;  %19229 = vmatprep.subr.bf16.mxu1 %v22842_v22  ;;  %v21223_v50 = vld [vmem:[#allocation2 + $0x256c] ss:$28 sps:$4 sm:$0xff]  }
 0x51b   :  { %19243 = vmatprep.mubr.msk.bf16.mxu1 %vm22843_vm0, %v22842_v22 }
 0x51d   :  { %9448 = vmatpush1.bf16.msra.mxu0 %v21172_v32  ;;  %19230 = vmatpush3.bf16.msra.mxu1 %v21175_v16  ;;  %v21218_v32 = vld [vmem:[#allocation2 + $0x2038] ss:$28 sps:$4 sm:$0xff]   ;;  %v21221_v16 = vld [vmem:[#allocation2 + $0x2568] ss:$28 sps:$4 sm:$0xff]  }
 0x51e   :  { %9449 = vmatprep.subr.bf16.mxu0 %v21178_v19  ;;  %19231 = vmatprep.subr.bf16.mxu1 %v22842_v22  ;;  %v21229_v19 = vld [vmem:[#allocation2 + $0x25a4] ss:$28 sps:$4 sm:$0xff]  }
 0x521   :  { %9450 = vmatpush1.bf16.msra.mxu0 %v21176_v33  ;;  %19232 = vmatpush3.bf16.msra.mxu1 %v21179_v39  ;;  %v21224_v33 = vld [vmem:[#allocation2 + $0x2070] ss:$28 sps:$4 sm:$0xff]   ;;  %v21227_v39 = vld [vmem:[#allocation2 + $0x25a0] ss:$28 sps:$4 sm:$0xff]  }
 0x522   :  { %9451 = vmatprep.subr.bf16.mxu0 %v21182_v44  ;;  %19233 = vmatprep.subr.bf16.mxu1 %v22842_v22  ;;  %v21232_v44 = vld [vmem:[#allocation2 + $0x20ac] ss:$28 sps:$4 sm:$0xff]  }
 0x525   :  { %9452 = vmatpush1.bf16.msra.mxu0 %v21180_v4  ;;  %19234 = vmatpush3.bf16.msra.mxu1 %v21183_v47  ;;  %v21235_v4 = vld [vmem:[#allocation2 + $0x25dc] ss:$28 sps:$4 sm:$0xff]   ;;  %v21230_v47 = vld [vmem:[#allocation2 + $0x20a8] ss:$28 sps:$4 sm:$0xff]  }
 0x526   :  { %9453 = vmatprep.subr.bf16.mxu0 %v21186_v52  ;;  %19235 = vmatprep.subr.bf16.mxu1 %v22842_v22  ;;  %v21233_v52 = vld [vmem:[#allocation2 + $0x25d8] ss:$28 sps:$4 sm:$0xff]  }
 0x529   :  { %9454 = vmatpush1.bf16.msra.mxu0 %v21184_v20  ;;  %19236 = vmatpush3.bf16.msra.mxu1 %v21187_v51  ;;  %v21238_v20 = vld [vmem:[#allocation2 + $0x20e4] ss:$28 sps:$4 sm:$0xff]   ;;  %v21241_v51 = vld [vmem:[#allocation2 + $0x2614] ss:$28 sps:$4 sm:$0xff]  }
 0x52a   :  { %9455 = vmatprep.subr.bf16.mxu0 %v21190_v6  ;;  %19237 = vmatprep.subr.bf16.mxu1 %v22842_v22  ;;  %v21236_v6 = vld [vmem:[#allocation2 + $0x20e0] ss:$28 sps:$4 sm:$0xff]  }
 0x52d   :  { %9456 = vmatpush1.bf16.msra.mxu0 %v21188_v38  ;;  %19238 = vmatpush3.bf16.msra.mxu1 %v21191_v42  ;;  %v21239_v38 = vld [vmem:[#allocation2 + $0x2610] ss:$28 sps:$4 sm:$0xff]   ;;  %v21244_v42 = vld [vmem:[#allocation2 + $0x211c] ss:$28 sps:$4 sm:$0xff]  }
 0x52e   :  { %9457 = vmatprep.subr.bf16.mxu0 %v21194_v3  ;;  %19239 = vmatprep.subr.bf16.mxu1 %v22842_v22  ;;  %v21247_v3 = vld [vmem:[#allocation2 + $0x264c] ss:$28 sps:$4 sm:$0xff]  }
 0x531   :  { %9458 = vmatpush1.bf16.msra.mxu0 %v21192_v5  ;;  %19240 = vmatpush3.bf16.msra.mxu1 %v21195_v1  ;;  %v21242_v5 = vld [vmem:[#allocation2 + $0x2118] ss:$28 sps:$4 sm:$0xff]   ;;  %v21245_v1 = vld [vmem:[#allocation2 + $0x2648] ss:$28 sps:$4 sm:$0xff]  }
 0x532   :  { %9459 = vmatprep.subr.bf16.mxu0 %v21198_v7  ;;  %19241 = vmatprep.subr.bf16.mxu1 %v22842_v22  ;;  %v21250_v7 = vld [vmem:[#allocation2 + $0x2154] ss:$28 sps:$4 sm:$0xff]  }
 0x535   :  { %9460 = vmatpush1.bf16.msra.mxu0 %v21196_v48  ;;  %19242 = vmatpush3.bf16.msra.mxu1 %v21199_v45  ;;  %v21253_v48 = vld [vmem:[#allocation2 + $0x2684] ss:$28 sps:$4 sm:$0xff]   ;;  %v21248_v45 = vld [vmem:[#allocation2 + $0x2150] ss:$28 sps:$4 sm:$0xff]  }
 0x536   :  { %9472 = vmatprep.subr.bf16.mxu0 %v21202_v59  ;;  %12215 = vmatprep.subr.bf16.mxu1 %v21205_v10  ;;  %v21251_v59 = vld [vmem:[#allocation2 + $0x2680] ss:$28 sps:$4 sm:$0xff]   ;;  %v21256_v10 = vld [vmem:[#allocation2 + $0x218c] ss:$28 sps:$4 sm:$0xff]  }
 0x538   :  { %19244 = vmatmul.mubr.bf16.vlgmr.msra.gmra.mrb[44].mxu1 %v23456_v25  ;;  %9462 = vmatmul.mubr.bf16.vlgmr.msra.gmra.mrb[32].mxu0 %v23426_v11  ;;  %v21212_v11 = vld [vmem:[#allocation2 + $0x2000] ss:$28 sps:$4 sm:$0xff]  }
 0x539   :  { %9473 = vmatpush1.bf16.msra.mxu0 %v21200_v14  ;;  %12216 = vmatpush1.bf16.msra.mxu1 %v21203_v53  ;;  %v21259_v14 = vld [vmem:[#allocation2 + $0x26bc] ss:$28 sps:$4 sm:$0xff]   ;;  %v21254_v53 = vld [vmem:[#allocation2 + $0x2188] ss:$28 sps:$4 sm:$0xff]  }
 0x53a   :  { %9474 = vmatprep.subr.bf16.mxu0 %v21208_v36  ;;  %12217 = vmatprep.subr.bf16.mxu1 %v21211_v23  ;;  %v21257_v36 = vld [vmem:[#allocation2 + $0x26b8] ss:$28 sps:$4 sm:$0xff]   ;;  %v21262_v23 = vld [vmem:[#allocation2 + $0x21c4] ss:$28 sps:$4 sm:$0xff]  }
 0x53b   :  { %9504 = vmatprep.mubr.bf16.mxu0 %v23433_v56  ;;  %12247 = vmatprep.mubr.bf16.mxu1 %v23464_v28  ;;  %v21226_v56 = vld [vmem:[#allocation2 + $0x2074] ss:$28 sps:$4 sm:$0xff]  }
 0x53d   :  { %9475 = vmatpush1.bf16.msra.mxu0 %v21206_v26  ;;  %12218 = vmatpush1.bf16.msra.mxu1 %v21209_v12  ;;  %v21265_v26 = vld [vmem:[#allocation2 + $0x26f4] ss:$28 sps:$4 sm:$0xff]   ;;  %v21260_v12 = vld [vmem:[#allocation2 + $0x21c0] ss:$28 sps:$4 sm:$0xff]  }
 0x53e   :  { %9476 = vmatprep.subr.bf16.mxu0 %v21214_v46  ;;  %12219 = vmatprep.subr.bf16.mxu1 %v21217_v55  ;;  %v21263_v46 = vld [vmem:[#allocation2 + $0x26f0] ss:$28 sps:$4 sm:$0xff]   ;;  %v21268_v55 = vld [vmem:[#allocation2 + $0x21fc] ss:$28 sps:$4 sm:$0xff]  }
 0x541   :  { %9477 = vmatpush1.bf16.msra.mxu0 %v21212_v11  ;;  %12220 = vmatpush1.bf16.msra.mxu1 %v21215_v9  ;;  %v21271_v11 = vld [vmem:[#allocation2 + $0x272c] ss:$28 sps:$4 sm:$0xff]   ;;  %v21266_v9 = vld [vmem:[#allocation2 + $0x21f8] ss:$28 sps:$4 sm:$0xff]  }
 0x542   :  { %9478 = vmatprep.subr.bf16.mxu0 %v21220_v29  ;;  %12221 = vmatprep.subr.bf16.mxu1 %v21223_v50  ;;  %v21269_v29 = vld [vmem:[#allocation2 + $0x2728] ss:$28 sps:$4 sm:$0xff]   ;;  %v21274_v50 = vld [vmem:[#allocation2 + $0x2234] ss:$28 sps:$4 sm:$0xff]  }
 0x545   :  { %9479 = vmatpush1.bf16.msra.mxu0 %v21218_v32  ;;  %12222 = vmatpush1.bf16.msra.mxu1 %v21221_v16  ;;  %v21277_v32 = vld [vmem:[#allocation2 + $0x2764] ss:$28 sps:$4 sm:$0xff]   ;;  %v21272_v16 = vld [vmem:[#allocation2 + $0x2230] ss:$28 sps:$4 sm:$0xff]  }
 0x546   :  { %9480 = vmatprep.subr.bf16.mxu0 %v21226_v56  ;;  %12223 = vmatprep.subr.bf16.mxu1 %v21229_v19  ;;  %v21275_v56 = vld [vmem:[#allocation2 + $0x2760] ss:$28 sps:$4 sm:$0xff]   ;;  %v21280_v19 = vld [vmem:[#allocation2 + $0x226c] ss:$28 sps:$4 sm:$0xff]  }
 0x549   :  { %9481 = vmatpush1.bf16.msra.mxu0 %v21224_v33  ;;  %12224 = vmatpush1.bf16.msra.mxu1 %v21227_v39  ;;  %v21283_v33 = vld [vmem:[#allocation2 + $0x279c] ss:$28 sps:$4 sm:$0xff]   ;;  %v21278_v39 = vld [vmem:[#allocation2 + $0x2268] ss:$28 sps:$4 sm:$0xff]  }
 0x54a   :  { %9482 = vmatprep.subr.bf16.mxu0 %v21232_v44  ;;  %12225 = vmatprep.subr.bf16.mxu1 %v21235_v4  ;;  %v21281_v44 = vld [vmem:[#allocation2 + $0x2798] ss:$28 sps:$4 sm:$0xff]   ;;  %v21286_v4 = vld [vmem:[#allocation2 + $0x22a4] ss:$28 sps:$4 sm:$0xff]  }
 0x54d   :  { %9483 = vmatpush1.bf16.msra.mxu0 %v21230_v47  ;;  %12226 = vmatpush1.bf16.msra.mxu1 %v21233_v52  ;;  %v21289_v47 = vld [vmem:[#allocation2 + $0x27d4] ss:$28 sps:$4 sm:$0xff]   ;;  %v21284_v52 = vld [vmem:[#allocation2 + $0x22a0] ss:$28 sps:$4 sm:$0xff]  }
 0x54e   :  { %9484 = vmatprep.subr.bf16.mxu0 %v21238_v20  ;;  %12227 = vmatprep.subr.bf16.mxu1 %v21241_v51  ;;  %v21287_v20 = vld [vmem:[#allocation2 + $0x27d0] ss:$28 sps:$4 sm:$0xff]   ;;  %v21292_v51 = vld [vmem:[#allocation2 + $0x22dc] ss:$28 sps:$4 sm:$0xff]  }
 0x551   :  { %9485 = vmatpush1.bf16.msra.mxu0 %v21236_v6  ;;  %12228 = vmatpush1.bf16.msra.mxu1 %v21239_v38  ;;  %v21295_v6 = vld [vmem:[#allocation2 + $0x280c] ss:$28 sps:$4 sm:$0xff]   ;;  %v21290_v38 = vld [vmem:[#allocation2 + $0x22d8] ss:$28 sps:$4 sm:$0xff]  }
 0x552   :  { %9486 = vmatprep.subr.bf16.mxu0 %v21244_v42  ;;  %12229 = vmatprep.subr.bf16.mxu1 %v21247_v3  ;;  %v21293_v42 = vld [vmem:[#allocation2 + $0x2808] ss:$28 sps:$4 sm:$0xff]   ;;  %v21298_v3 = vld [vmem:[#allocation2 + $0x2314] ss:$28 sps:$4 sm:$0xff]  }
 0x555   :  { %9487 = vmatpush1.bf16.msra.mxu0 %v21242_v5  ;;  %12230 = vmatpush1.bf16.msra.mxu1 %v21245_v1  ;;  %v21301_v5 = vld [vmem:[#allocation2 + $0x2844] ss:$28 sps:$4 sm:$0xff]   ;;  %v21296_v1 = vld [vmem:[#allocation2 + $0x2310] ss:$28 sps:$4 sm:$0xff]  }
 0x556   :  { %9488 = vmatprep.subr.bf16.mxu0 %v21250_v7  ;;  %12231 = vmatprep.subr.bf16.mxu1 %v21253_v48  ;;  %v21299_v7 = vld [vmem:[#allocation2 + $0x2840] ss:$28 sps:$4 sm:$0xff]   ;;  %v21304_v48 = vld [vmem:[#allocation2 + $0x234c] ss:$28 sps:$4 sm:$0xff]  }
 0x559   :  { %9489 = vmatpush1.bf16.msra.mxu0 %v21248_v45  ;;  %12232 = vmatpush1.bf16.msra.mxu1 %v21251_v59  ;;  %v21307_v45 = vld [vmem:[#allocation2 + $0x287c] ss:$28 sps:$4 sm:$0xff]  }
 0x55a   :  { %9490 = vmatprep.subr.bf16.mxu0 %v21256_v10  ;;  %12233 = vmatprep.subr.bf16.mxu1 %v21259_v14  ;;  %v23471_v59 = vld [vmem:[%s23775_s0] ss:$28 sps:$4 sm:$0xff]   ;;  %v21302_v10 = vld [vmem:[#allocation2 + $0x2348] ss:$28 sps:$4 sm:$0xff]   ;;  %v21305_v14 = vld [vmem:[#allocation2 + $0x2878] ss:$28 sps:$4 sm:$0xff]  }
 0x55d   :  { %9491 = vmatpush1.bf16.msra.mxu0 %v21254_v53  ;;  %12234 = vmatpush1.bf16.msra.mxu1 %v21257_v36  ;;  %v21310_v53 = vld [vmem:[#allocation2 + $0x2384] ss:$28 sps:$4 sm:$0xff]   ;;  %v21313_v36 = vld [vmem:[#allocation2 + $0x28b4] ss:$28 sps:$4 sm:$0xff]  }
 0x55e   :  { %9492 = vmatprep.subr.bf16.mxu0 %v21262_v23  ;;  %12235 = vmatprep.subr.bf16.mxu1 %v21265_v26  ;;  %v21308_v23 = vld [vmem:[#allocation2 + $0x2380] ss:$28 sps:$4 sm:$0xff]   ;;  %v21311_v26 = vld [vmem:[#allocation2 + $0x28b0] ss:$28 sps:$4 sm:$0xff]  }
 0x561   :  { %9493 = vmatpush1.bf16.msra.mxu0 %v21260_v12  ;;  %12236 = vmatpush1.bf16.msra.mxu1 %v21263_v46  ;;  %v21316_v12 = vld [vmem:[#allocation2 + $0x23bc] ss:$28 sps:$4 sm:$0xff]   ;;  %v21319_v46 = vld [vmem:[#allocation2 + $0x28ec] ss:$28 sps:$4 sm:$0xff]  }
 0x562   :  { %9494 = vmatprep.subr.bf16.mxu0 %v21268_v55  ;;  %12237 = vmatprep.subr.bf16.mxu1 %v21271_v11  ;;  %v21314_v55 = vld [vmem:[#allocation2 + $0x23b8] ss:$28 sps:$4 sm:$0xff]   ;;  %v21317_v11 = vld [vmem:[#allocation2 + $0x28e8] ss:$28 sps:$4 sm:$0xff]  }
 0x565   :  { %9495 = vmatpush1.bf16.msra.mxu0 %v21266_v9  ;;  %12238 = vmatpush1.bf16.msra.mxu1 %v21269_v29  ;;  %v21322_v9 = vld [vmem:[#allocation2 + $0x23f4] ss:$28 sps:$4 sm:$0xff]   ;;  %v21325_v29 = vld [vmem:[#allocation2 + $0x2924] ss:$28 sps:$4 sm:$0xff]  }
 0x566   :  { %9496 = vmatprep.subr.bf16.mxu0 %v21274_v50  ;;  %12239 = vmatprep.subr.bf16.mxu1 %v21277_v32  ;;  %v21320_v50 = vld [vmem:[#allocation2 + $0x23f0] ss:$28 sps:$4 sm:$0xff]   ;;  %v21323_v32 = vld [vmem:[#allocation2 + $0x2920] ss:$28 sps:$4 sm:$0xff]  }
 0x569   :  { %9497 = vmatpush1.bf16.msra.mxu0 %v21272_v16  ;;  %12240 = vmatpush1.bf16.msra.mxu1 %v21275_v56  ;;  %v21328_v16 = vld [vmem:[#allocation2 + $0x242c] ss:$28 sps:$4 sm:$0xff]   ;;  %v21331_v56 = vld [vmem:[#allocation2 + $0x295c] ss:$28 sps:$4 sm:$0xff]  }
 0x56a   :  { %9498 = vmatprep.subr.bf16.mxu0 %v21280_v19  ;;  %12241 = vmatprep.subr.bf16.mxu1 %v21283_v33  ;;  %v21326_v19 = vld [vmem:[#allocation2 + $0x2428] ss:$28 sps:$4 sm:$0xff]   ;;  %v21329_v33 = vld [vmem:[#allocation2 + $0x2958] ss:$28 sps:$4 sm:$0xff]  }
 0x56d   :  { %9499 = vmatpush1.bf16.msra.mxu0 %v21278_v39  ;;  %12242 = vmatpush1.bf16.msra.mxu1 %v21281_v44  ;;  %v21334_v39 = vld [vmem:[#allocation2 + $0x2464] ss:$28 sps:$4 sm:$0xff]   ;;  %v21337_v44 = vld [vmem:[#allocation2 + $0x2994] ss:$28 sps:$4 sm:$0xff]  }
 0x56e   :  { %9500 = vmatprep.subr.bf16.mxu0 %v21286_v4  ;;  %12243 = vmatprep.subr.bf16.mxu1 %v21289_v47 }
 0x571   :  { %9501 = vmatpush1.bf16.msra.mxu0 %v21284_v52  ;;  %12244 = vmatpush1.bf16.msra.mxu1 %v21287_v20 }
 0x572   :  { %9502 = vmatprep.subr.bf16.mxu0 %v21292_v51  ;;  %12245 = vmatprep.subr.bf16.mxu1 %v21295_v6 }
 0x575   :  { %9503 = vmatpush1.bf16.msra.mxu0 %v21290_v38  ;;  %12246 = vmatpush1.bf16.msra.mxu1 %v21293_v42  ;;  %v21332_v38 = vld [vmem:[#allocation2 + $0x2460] ss:$28 sps:$4 sm:$0xff]  }
 0x576   :  { %9515 = vmatprep.subr.bf16.mxu0 %v21298_v3  ;;  %12258 = vmatprep.subr.bf16.mxu1 %v21301_v5 }
 0x578   :  { %9505 = vmatmul.mubr.bf16.vlgmr.msra.gmra.mrb[32].mxu0 %v23441_v30  ;;  %12248 = vmatmul.mubr.bf16.vlgmr.msra.gmra.mrb[48].mxu1 %v23471_v59  ;;  %v23478_v30 = vld [vmem:[%s23775_s0 + $0xc] ss:$28 sps:$4 sm:$0xff]  }
 0x579   :  { %9516 = vmatpush1.bf16.msra.mxu0 %v21296_v1  ;;  %12259 = vmatpush1.bf16.msra.mxu1 %v21299_v7  ;;  %v21335_v7 = vld [vmem:[#allocation2 + $0x2990] ss:$28 sps:$4 sm:$0xff]  }
 0x57a   :  { %9517 = vmatprep.subr.bf16.mxu0 %v21304_v48  ;;  %12260 = vmatprep.subr.bf16.mxu1 %v21307_v45  ;;  %v21340_v48 = vld [vmem:[#allocation2 + $0x249c] ss:$28 sps:$4 sm:$0xff]  }
 0x57b   :  { %9547 = vmatprep.mubr.bf16.mxu0 %v22841_v17  ;;  %12290 = vmatprep.mubr.bf16.mxu1 %v23478_v30 }
 0x57d   :  { %9518 = vmatpush1.bf16.msra.mxu0 %v21302_v10  ;;  %12261 = vmatpush1.bf16.msra.mxu1 %v21305_v14 }
 0x57e   :  { %9519 = vmatprep.subr.bf16.mxu0 %v21310_v53  ;;  %12262 = vmatprep.subr.bf16.mxu1 %v21313_v36 }
 0x581   :  { %9520 = vmatpush1.bf16.msra.mxu0 %v21308_v23  ;;  %12263 = vmatpush1.bf16.msra.mxu1 %v21311_v26  ;;  %v21343_v26 = vld [vmem:[#allocation2 + $0x29cc] ss:$28 sps:$4 sm:$0xff]  }
 0x582   :  { %9521 = vmatprep.subr.bf16.mxu0 %v21316_v12  ;;  %12264 = vmatprep.subr.bf16.mxu1 %v21319_v46 }
 0x585   :  { %9522 = vmatpush1.bf16.msra.mxu0 %v21314_v55  ;;  %12265 = vmatpush1.bf16.msra.mxu1 %v21317_v11 }
 0x586   :  { %9523 = vmatprep.subr.bf16.mxu0 %v21322_v9  ;;  %12266 = vmatprep.subr.bf16.mxu1 %v21325_v29 }
 0x589   :  { %9524 = vmatpush1.bf16.msra.mxu0 %v21320_v50  ;;  %12267 = vmatpush1.bf16.msra.mxu1 %v21323_v32 }
 0x58a   :  { %9525 = vmatprep.subr.bf16.mxu0 %v21328_v16  ;;  %12268 = vmatprep.subr.bf16.mxu1 %v21331_v56 }
 0x58b   :  { %v9205_v4 = vpop.f32.mrb[28].mxu0  ;;  %v9377_v47 = vpop.f32.mrb[28].mxu1 }
 0x58c   :  { %v19331_v52 = vadd.f32 %v9205_v4, %v23271_v24  ;;  %v19335_v20 = vadd.f32 %v9377_v47, %v23317_v61  ;;  %v9207_v51 = vpop.f32.mrb[29].mxu0  ;;  %v9379_v6 = vpop.f32.mrb[29].mxu1  ;;  %v21346_v4 = vld [vmem:[#allocation2 + $0x2a04] ss:$28 sps:$4 sm:$0xff]  }
 0x58d   :  { %v19332_v42 = vadd.f32 %v9207_v51, %v23277_v27  ;;  %v19336_v3 = vadd.f32 %v9379_v6, %v23320_v2  ;;  %v9209_v5 = vpop.f32.mrb[30].mxu0  ;;  %v9381_v1 = vpop.f32.mrb[30].mxu1  ;;  %9526 = vmatpush1.bf16.msra.mxu0 %v21326_v19  ;;  %12269 = vmatpush1.bf16.msra.mxu1 %v21329_v33  ;;  %v21355_v51 = vld [vmem:[#allocation2 + $0x2504] ss:$28 sps:$4 sm:$0xff]  }
 0x58e   :  { %v9722_v45 = vmax.f32 %v19331_v52, 0.0  ;;  %v9724_v10 = vmax.f32 %v19335_v20, 0.0  ;;  %v19333_v14 = vadd.f32 %v9209_v5, %v23271_v24  ;;  %v19337_v53 = vadd.f32 %v9381_v1, %v23317_v61  ;;  %v9211_v36 = vpop.f32.mrb[31].mxu0  ;;  %v9383_v23 = vpop.f32.mrb[31].mxu1  ;;  %9527 = vmatprep.subr.bf16.mxu0 %v21334_v39  ;;  %12270 = vmatprep.subr.bf16.mxu1 %v21337_v44  ;;  %v21338_v39 = vld [vmem:[#allocation2 + $0x2498] ss:$28 sps:$4 sm:$0xff]  }
 0x58f   :  { %v9723_v12 = vmax.f32 %v19332_v42, 0.0  ;;  %v9725_v46 = vmax.f32 %v19336_v3, 0.0  ;;  %v19334_v55 = vadd.f32 %v9211_v36, %v23277_v27  ;;  %v19338_v11 = vadd.f32 %v9383_v23, %v23320_v2  ;;  %v21341_v44 = vld [vmem:[#allocation2 + $0x29c8] ss:$28 sps:$4 sm:$0xff]   ;;  %v21344_v52 = vld [vmem:[#allocation2 + $0x2a00] ss:$28 sps:$4 sm:$0xff]  }
 0x590   :  { %v23490_v9 = vmax.f32 %v23293_v57, %v9722_v45  ;;  %v23493_v29 = vmax.f32 %v23334_v54, %v9724_v10  ;;  %v9729_v50 = vmax.f32 %v19333_v14, 0.0  ;;  %v9731_v32 = vmax.f32 %v19337_v53, 0.0  ;;  %v21347_v20 = vld [vmem:[#allocation2 + $0x24c8] ss:$28 sps:$4 sm:$0xff]   ;;  %v21353_v6 = vld [vmem:[#allocation2 + $0x2500] ss:$28 sps:$4 sm:$0xff]  }
 0x591   :  { %v23496_v16 = vmax.f32 %v23295_v60, %v9723_v12  ;;  %v23499_v56 = vmax.f32 %v23336_v13, %v9725_v46  ;;  %v9730_v19 = vmax.f32 %v19334_v55, 0.0  ;;  %v9732_v33 = vmax.f32 %v19338_v11, 0.0  ;;  %9528 = vmatpush1.bf16.msra.mxu0 %v21332_v38  ;;  %12271 = vmatpush1.bf16.msra.mxu1 %v21335_v7  ;;  %v21349_v60 = vld [vmem:[#allocation2 + $0x24cc] ss:$28 sps:$4 sm:$0xff]   ;;  %v21361_v38 = vld [vmem:[#allocation2 + $0x253c] ss:$28 sps:$4 sm:$0xff]  }
 0x592   :  { %v23502_v57 = vmax.f32 %v23297_v58, %v9729_v50  ;;  %v23505_v54 = vmax.f32 %v23338_v62, %v9731_v32  ;;  %9529 = vmatprep.subr.bf16.mxu0 %v21340_v48  ;;  %12272 = vmatprep.subr.bf16.mxu1 %v21343_v26  ;;  %v21352_v58 = vld [vmem:[#allocation2 + $0x2a3c] ss:$28 sps:$4 sm:$0xff]   ;;  %v21364_v3 = vld [vmem:[#allocation2 + $0x2aac] ss:$28 sps:$4 sm:$0xff]   ;;  %v21367_v5 = vld [vmem:[#allocation2 + $0x2574] ss:$28 sps:$4 sm:$0xff]  }
 0x593   :  { %v23508_v47 = vmax.f32 %v23300_v63, %v9730_v19  ;;  %v23511_v13 = vmax.f32 %v23340_v0, %v9732_v33  ;;  %v21350_v62 = vld [vmem:[#allocation2 + $0x2a38] ss:$28 sps:$4 sm:$0xff]   ;;  %v21356_v0 = vld [vmem:[#allocation2 + $0x2a70] ss:$28 sps:$4 sm:$0xff]   ;;  %v21370_v7 = vld [vmem:[#allocation2 + $0x2ae4] ss:$28 sps:$4 sm:$0xff]  }
 0x594   :  { %v21358_v63 = vld [vmem:[#allocation2 + $0x2a74] ss:$28 sps:$4 sm:$0xff]   ;;  %v21373_v48 = vld [vmem:[#allocation2 + $0x25ac] ss:$28 sps:$4 sm:$0xff]   ;;  %v21368_v45 = vld [vmem:[#allocation2 + $0x2ae0] ss:$28 sps:$4 sm:$0xff]  }
 0x595   :  { %9530 = vmatpush1.bf16.msra.mxu0 %v21338_v39  ;;  %12273 = vmatpush1.bf16.msra.mxu1 %v21341_v44  ;;  %v21359_v42 = vld [vmem:[#allocation2 + $0x2538] ss:$28 sps:$4 sm:$0xff]   ;;  %v21365_v1 = vld [vmem:[#allocation2 + $0x2570] ss:$28 sps:$4 sm:$0xff]   ;;  %v21379_v14 = vld [vmem:[#allocation2 + $0x25e4] ss:$28 sps:$4 sm:$0xff]  }
 0x596   :  { %12274 = vmatprep.subr.bf16.mxu1 %v21346_v4  ;;  %12387 = vmatprep.subr.bf16.mxu0 %v21349_v60  ;;  %v21376_v10 = vld [vmem:[#allocation2 + $0x2b1c] ss:$28 sps:$4 sm:$0xff]   ;;  %v21382_v23 = vld [vmem:[#allocation2 + $0x2b54] ss:$28 sps:$4 sm:$0xff]   ;;  %v21388_v33 = vld [vmem:[#allocation2 + $0x2b8c] ss:$28 sps:$4 sm:$0xff]  }
 0x597   :  { %v21374_v53 = vld [vmem:[#allocation2 + $0x2b18] ss:$28 sps:$4 sm:$0xff]   ;;  %v21377_v36 = vld [vmem:[#allocation2 + $0x25e0] ss:$28 sps:$4 sm:$0xff]   ;;  %v21380_v50 = vld [vmem:[#allocation2 + $0x2b50] ss:$28 sps:$4 sm:$0xff]  }
 0x598   :  { %9548 = vmatmul.mubr.bf16.vlgmr.msra.gmra.mrb[32].mxu0 %v23456_v25  ;;  %v21362_v25 = vld [vmem:[#allocation2 + $0x2aa8] ss:$28 sps:$4 sm:$0xff]   ;;  %v21385_v26 = vld [vmem:[#allocation2 + $0x261c] ss:$28 sps:$4 sm:$0xff]   ;;  %v21391_v39 = vld [vmem:[#allocation2 + $0x2654] ss:$28 sps:$4 sm:$0xff]  }
 0x599   :  { %12275 = vmatpush1.bf16.msra.mxu1 %v21344_v52  ;;  %12388 = vmatpush1.bf16.msra.mxu0 %v21347_v20  ;;  %v21383_v32 = vld [vmem:[#allocation2 + $0x2618] ss:$28 sps:$4 sm:$0xff]   ;;  %v21386_v4 = vld [vmem:[#allocation2 + $0x2b88] ss:$28 sps:$4 sm:$0xff]   ;;  %v21389_v60 = vld [vmem:[#allocation2 + $0x2650] ss:$28 sps:$4 sm:$0xff]  }
 0x59a   :  { %12276 = vmatprep.subr.bf16.mxu1 %v21352_v58  ;;  %12389 = vmatprep.subr.bf16.mxu0 %v21355_v51  ;;  %v21394_v52 = vld [vmem:[#allocation2 + $0x2bc4] ss:$28 sps:$4 sm:$0xff]   ;;  %v21397_v20 = vld [vmem:[#allocation2 + $0x268c] ss:$28 sps:$4 sm:$0xff]  }
 0x59b   :  { %12419 = vmatprep.mubr.bf16.mxu0 %v23464_v28  ;;  %v21371_v28 = vld [vmem:[#allocation2 + $0x25a8] ss:$28 sps:$4 sm:$0xff]   ;;  %v21392_v58 = vld [vmem:[#allocation2 + $0x2bc0] ss:$28 sps:$4 sm:$0xff]  }
 0x59c   :  { %v21395_v51 = vld [vmem:[#allocation2 + $0x2688] ss:$28 sps:$4 sm:$0xff]  }
 0x59d   :  { %12277 = vmatpush1.bf16.msra.mxu1 %v21350_v62  ;;  %12390 = vmatpush1.bf16.msra.mxu0 %v21353_v6  ;;  %v21400_v62 = vld [vmem:[#allocation2 + $0x2bfc] ss:$28 sps:$4 sm:$0xff]   ;;  %v21403_v6 = vld [vmem:[#allocation2 + $0x26c4] ss:$28 sps:$4 sm:$0xff]  }
 0x59e   :  { %12278 = vmatprep.subr.bf16.mxu1 %v21358_v63  ;;  %12391 = vmatprep.subr.bf16.mxu0 %v21361_v38  ;;  %v23522_v63 = vld [vmem:[%s23775_s0 + $0x8] ss:$28 sps:$4 sm:$0xff]   ;;  %v21398_v38 = vld [vmem:[#allocation2 + $0x2bf8] ss:$28 sps:$4 sm:$0xff]  }
 0x5a1   :  { %12279 = vmatpush1.bf16.msra.mxu1 %v21356_v0  ;;  %12392 = vmatpush1.bf16.msra.mxu0 %v21359_v42  ;;  %v21401_v0 = vld [vmem:[#allocation2 + $0x26c0] ss:$28 sps:$4 sm:$0xff]   ;;  %v21406_v42 = vld [vmem:[#allocation2 + $0x2c34] ss:$28 sps:$4 sm:$0xff]  }
 0x5a2   :  { %12280 = vmatprep.subr.bf16.mxu1 %v21364_v3  ;;  %12393 = vmatprep.subr.bf16.mxu0 %v21367_v5  ;;  %v21409_v3 = vld [vmem:[#allocation2 + $0x26fc] ss:$28 sps:$4 sm:$0xff]   ;;  %v23528_v5 = vld [vmem:[%s23775_s0 + $0x14] ss:$28 sps:$4 sm:$0xff]  }
 0x5a5   :  { %12281 = vmatpush1.bf16.msra.mxu1 %v21362_v25  ;;  %12394 = vmatpush1.bf16.msra.mxu0 %v21365_v1  ;;  %v21404_v25 = vld [vmem:[#allocation2 + $0x2c30] ss:$28 sps:$4 sm:$0xff]   ;;  %v21407_v1 = vld [vmem:[#allocation2 + $0x26f8] ss:$28 sps:$4 sm:$0xff]  }
 0x5a6   :  { %12282 = vmatprep.subr.bf16.mxu1 %v21370_v7  ;;  %12395 = vmatprep.subr.bf16.mxu0 %v21373_v48  ;;  %v21412_v7 = vld [vmem:[#allocation2 + $0x2c6c] ss:$28 sps:$4 sm:$0xff]   ;;  %v21415_v48 = vld [vmem:[#allocation2 + $0x2734] ss:$28 sps:$4 sm:$0xff]  }
 0x5a9   :  { %12283 = vmatpush1.bf16.msra.mxu1 %v21368_v45  ;;  %12396 = vmatpush1.bf16.msra.mxu0 %v21371_v28  ;;  %v21410_v45 = vld [vmem:[#allocation2 + $0x2c68] ss:$28 sps:$4 sm:$0xff]   ;;  %v21413_v28 = vld [vmem:[#allocation2 + $0x2730] ss:$28 sps:$4 sm:$0xff]  }
 0x5aa   :  { %12284 = vmatprep.subr.bf16.mxu1 %v21376_v10  ;;  %12397 = vmatprep.subr.bf16.mxu0 %v21379_v14  ;;  %v21418_v10 = vld [vmem:[#allocation2 + $0x2ca4] ss:$28 sps:$4 sm:$0xff]   ;;  %v21421_v14 = vld [vmem:[#allocation2 + $0x276c] ss:$28 sps:$4 sm:$0xff]  }
 0x5ab   :  { %v19013_v12 = vpop.f32.mrb[32].mxu1 }
 0x5ac   :  { %v19014_v46 = vpop.f32.mrb[33].mxu1 }
 0x5ad   :  { %v23515_v55 = vadd.f32 %v19014_v46, %v19013_v12  ;;  %v19016_v11 = vpop.f32.mrb[34].mxu1  ;;  %12285 = vmatpush1.bf16.msra.mxu1 %v21374_v53  ;;  %12398 = vmatpush1.bf16.msra.mxu0 %v21377_v36  ;;  %v21416_v53 = vld [vmem:[#allocation2 + $0x2ca0] ss:$28 sps:$4 sm:$0xff]   ;;  %v21419_v36 = vld [vmem:[#allocation2 + $0x2768] ss:$28 sps:$4 sm:$0xff]  }
 0x5ae   :  { %v19017_v19 = vpop.f32.mrb[35].mxu1  ;;  %12286 = vmatprep.subr.bf16.mxu1 %v21382_v23  ;;  %12399 = vmatprep.subr.bf16.mxu0 %v21385_v26  ;;  %v21424_v23 = vld [vmem:[#allocation2 + $0x2cdc] ss:$28 sps:$4 sm:$0xff]   ;;  %v21427_v26 = vld [vmem:[#allocation2 + $0x27a4] ss:$28 sps:$4 sm:$0xff]  }
 0x5af   :  { %v23517_v44 = vadd.f32 %v19017_v19, %v19016_v11  ;;  %v21422_v12 = vld [vmem:[#allocation2 + $0x2cd8] ss:$28 sps:$4 sm:$0xff]   ;;  %v21425_v46 = vld [vmem:[#allocation2 + $0x27a0] ss:$28 sps:$4 sm:$0xff]  }
 0x5b0   :  { %v21430_v11 = vld [vmem:[#allocation2 + $0x2d14] ss:$28 sps:$4 sm:$0xff]  }
 0x5b1   :  { %12287 = vmatpush1.bf16.msra.mxu1 %v21380_v50  ;;  %12400 = vmatpush1.bf16.msra.mxu0 %v21383_v32  ;;  %v21433_v50 = vld [vmem:[#allocation2 + $0x27dc] ss:$28 sps:$4 sm:$0xff]  }
 0x5b2   :  { %12288 = vmatprep.subr.bf16.mxu1 %v21388_v33  ;;  %12401 = vmatprep.subr.bf16.mxu0 %v21391_v39  ;;  %v9593_v33 = vadd.f32 %v23515_v55, %v23169_v43  ;;  %v21434_v55 = vld [vmem:[#allocation2 + $0x2d48] ss:$28 sps:$4 sm:$0xff]  }
 0x5b5   :  { %12289 = vmatpush1.bf16.msra.mxu1 %v21386_v4  ;;  %12402 = vmatpush1.bf16.msra.mxu0 %v21389_v60  ;;  %v21428_v60 = vld [vmem:[#allocation2 + $0x2d10] ss:$28 sps:$4 sm:$0xff]  }
 0x5b6   :  { %12301 = vmatprep.subr.bf16.mxu1 %v21394_v52  ;;  %12403 = vmatprep.subr.bf16.mxu0 %v21397_v20  ;;  %v21431_v52 = vld [vmem:[#allocation2 + $0x27d8] ss:$28 sps:$4 sm:$0xff]  }
 0x5b8   :  { %12291 = vmatmul.mubr.bf16.vlgmr.msra.gmra.mrb[48].mxu1 %v23522_v63 }
 0x5b9   :  { %12302 = vmatpush1.bf16.msra.mxu1 %v21392_v58  ;;  %12404 = vmatpush1.bf16.msra.mxu0 %v21395_v51  ;;  %v21436_v58 = vld [vmem:[#allocation2 + $0x2d4c] ss:$28 sps:$4 sm:$0xff]   ;;  %v21439_v51 = vld [vmem:[#allocation2 + $0x2814] ss:$28 sps:$4 sm:$0xff]  }
 0x5ba   :  { %12303 = vmatprep.subr.bf16.mxu1 %v21400_v62  ;;  %12405 = vmatprep.subr.bf16.mxu0 %v21403_v6  ;;  %v9596_v62 = vadd.f32 %v23517_v44, %v23169_v43  ;;  %v21448_v44 = vld [vmem:[#allocation2 + $0x2dbc] ss:$28 sps:$4 sm:$0xff]  }
 0x5bb   :  { %12333 = vmatprep.mubr.bf16.mxu1 %v23528_v5 }
 0x5bd   :  { %12304 = vmatpush1.bf16.msra.mxu1 %v21398_v38  ;;  %12406 = vmatpush1.bf16.msra.mxu0 %v21401_v0 }
 0x5be   :  { %12305 = vmatprep.subr.bf16.mxu1 %v21406_v42  ;;  %12407 = vmatprep.subr.bf16.mxu0 %v21409_v3  ;;  %v21437_v42 = vld [vmem:[#allocation2 + $0x2810] ss:$28 sps:$4 sm:$0xff]   ;;  %v21442_v3 = vld [vmem:[#allocation2 + $0x2d84] ss:$28 sps:$4 sm:$0xff]  }
 0x5c1   :  { %12306 = vmatpush1.bf16.msra.mxu1 %v21404_v25  ;;  %12408 = vmatpush1.bf16.msra.mxu0 %v21407_v1  ;;  %v21445_v25 = vld [vmem:[#allocation2 + $0x284c] ss:$28 sps:$4 sm:$0xff]   ;;  %v21440_v1 = vld [vmem:[#allocation2 + $0x2d80] ss:$28 sps:$4 sm:$0xff]  }
 0x5c2   :  { %12307 = vmatprep.subr.bf16.mxu1 %v21412_v7  ;;  %12409 = vmatprep.subr.bf16.mxu0 %v21415_v48  ;;  %v21443_v7 = vld [vmem:[#allocation2 + $0x2848] ss:$28 sps:$4 sm:$0xff]  }
 0x5c3   :  { %v21451_v48 = vld [vmem:[#allocation2 + $0x2884] ss:$28 sps:$4 sm:$0xff]  }
 0x5c5   :  { %12308 = vmatpush1.bf16.msra.mxu1 %v21410_v45  ;;  %12410 = vmatpush1.bf16.msra.mxu0 %v21413_v28  ;;  %v21446_v45 = vld [vmem:[#allocation2 + $0x2db8] ss:$28 sps:$4 sm:$0xff]   ;;  %v21449_v28 = vld [vmem:[#allocation2 + $0x2880] ss:$28 sps:$4 sm:$0xff]  }
 0x5c6   :  { %12309 = vmatprep.subr.bf16.mxu1 %v21418_v10  ;;  %12411 = vmatprep.subr.bf16.mxu0 %v21421_v14  ;;  %v21454_v10 = vld [vmem:[#allocation2 + $0x2df4] ss:$28 sps:$4 sm:$0xff]   ;;  %v21457_v14 = vld [vmem:[#allocation2 + $0x28bc] ss:$28 sps:$4 sm:$0xff]  }
 0x5c9   :  { %12310 = vmatpush1.bf16.msra.mxu1 %v21416_v53  ;;  %12412 = vmatpush1.bf16.msra.mxu0 %v21419_v36  ;;  %v21452_v53 = vld [vmem:[#allocation2 + $0x2df0] ss:$28 sps:$4 sm:$0xff]   ;;  %v21455_v36 = vld [vmem:[#allocation2 + $0x28b8] ss:$28 sps:$4 sm:$0xff]  }
 0x5ca   :  { %12311 = vmatprep.subr.bf16.mxu1 %v21424_v23  ;;  %12413 = vmatprep.subr.bf16.mxu0 %v21427_v26  ;;  %v21460_v23 = vld [vmem:[#allocation2 + $0x2e2c] ss:$28 sps:$4 sm:$0xff]   ;;  %v21463_v26 = vld [vmem:[#allocation2 + $0x28f4] ss:$28 sps:$4 sm:$0xff]  }
 0x5cb   :  { %v19035_v32 = vpop.f32.mrb[36].mxu1 }
 0x5cc   :  { %v19036_v19 = vpop.f32.mrb[37].mxu1 }
 0x5cd   :  { %v19037_v39 = vadd.f32 %v19036_v19, %v19035_v32  ;;  %v19038_v4 = vpop.f32.mrb[38].mxu1  ;;  %12312 = vmatpush1.bf16.msra.mxu1 %v21422_v12  ;;  %12414 = vmatpush1.bf16.msra.mxu0 %v21425_v46  ;;  %v21461_v12 = vld [vmem:[#allocation2 + $0x28f0] ss:$28 sps:$4 sm:$0xff]   ;;  %v21466_v46 = vld [vmem:[#allocation2 + $0x2e64] ss:$28 sps:$4 sm:$0xff]  }
 0x5ce   :  { %v19039_v20 = vpop.f32.mrb[39].mxu1  ;;  %12313 = vmatprep.subr.bf16.mxu1 %v21430_v11  ;;  %12415 = vmatprep.subr.bf16.mxu0 %v21433_v50  ;;  %v21469_v11 = vld [vmem:[#allocation2 + $0x292c] ss:$28 sps:$4 sm:$0xff]   ;;  %v21464_v50 = vld [vmem:[#allocation2 + $0x2e60] ss:$28 sps:$4 sm:$0xff]  }
 0x5cf   :  { %v23535_v6 = vadd.f32 %v19037_v39, %v9593_v33  ;;  %v19040_v38 = vadd.f32 %v19039_v20, %v19038_v4  ;;  %v21472_v32 = vld [vmem:[#allocation2 + $0x2e9c] ss:$28 sps:$4 sm:$0xff]   ;;  %v21475_v19 = vld [vmem:[#allocation2 + $0x2964] ss:$28 sps:$4 sm:$0xff]   ;;  %v21478_v4 = vld [vmem:[#allocation2 + $0x2ed4] ss:$28 sps:$4 sm:$0xff]  }
 0x5d0   :  { %v21470_v33 = vld [vmem:[#allocation2 + $0x2e98] ss:$28 sps:$4 sm:$0xff]   ;;  %v21473_v39 = vld [vmem:[#allocation2 + $0x2960] ss:$28 sps:$4 sm:$0xff]  }
 0x5d1   :  { %v23537_v0 = vadd.f32 %v19040_v38, %v9596_v62  ;;  %12314 = vmatpush1.bf16.msra.mxu1 %v21428_v60  ;;  %12416 = vmatpush1.bf16.msra.mxu0 %v21431_v52  ;;  %v21481_v60 = vld [vmem:[#allocation2 + $0x299c] ss:$28 sps:$4 sm:$0xff]   ;;  %v21476_v62 = vld [vmem:[#allocation2 + $0x2ed0] ss:$28 sps:$4 sm:$0xff]  }
 0x5d2   :  { %12315 = vmatprep.subr.bf16.mxu1 %v21436_v58  ;;  %12417 = vmatprep.subr.bf16.mxu0 %v21439_v51  ;;  %v21479_v38 = vld [vmem:[#allocation2 + $0x2998] ss:$28 sps:$4 sm:$0xff]  }
 0x5d5   :  { %12316 = vmatpush1.bf16.msra.mxu1 %v21434_v55  ;;  %12418 = vmatpush1.bf16.msra.mxu0 %v21437_v42  ;;  %v21484_v42 = vld [vmem:[#allocation2 + $0x2f0c] ss:$28 sps:$4 sm:$0xff]  }
 0x5d6   :  { %12317 = vmatprep.subr.bf16.mxu1 %v21442_v3  ;;  %12430 = vmatprep.subr.bf16.mxu0 %v21445_v25  ;;  %v21487_v3 = vld [vmem:[#allocation2 + $0x29d4] ss:$28 sps:$4 sm:$0xff]  }
 0x5d8   :  { %12420 = vmatmul.mubr.bf16.vlgmr.msra.gmra.mrb[36].mxu0 %v23471_v59  ;;  %v21458_v59 = vld [vmem:[#allocation2 + $0x2e28] ss:$28 sps:$4 sm:$0xff]  }
 0x5d9   :  { %12318 = vmatpush1.bf16.msra.mxu1 %v21440_v1  ;;  %12431 = vmatpush1.bf16.msra.mxu0 %v21443_v7  ;;  %v21482_v7 = vld [vmem:[#allocation2 + $0x2f08] ss:$28 sps:$4 sm:$0xff]  }
 0x5da   :  { %12319 = vmatprep.subr.bf16.mxu1 %v21448_v44  ;;  %12432 = vmatprep.subr.bf16.mxu0 %v21451_v48  ;;  %v21485_v44 = vld [vmem:[#allocation2 + $0x29d0] ss:$28 sps:$4 sm:$0xff]  }
 0x5db   :  { %12462 = vmatprep.mubr.bf16.mxu0 %v23478_v30  ;;  %v21467_v30 = vld [vmem:[#allocation2 + $0x2928] ss:$28 sps:$4 sm:$0xff]  }
 0x5dd   :  { %12320 = vmatpush1.bf16.msra.mxu1 %v21446_v45  ;;  %12433 = vmatpush1.bf16.msra.mxu0 %v21449_v28  ;;  %v21490_v45 = vld [vmem:[#allocation2 + $0x2f44] ss:$28 sps:$4 sm:$0xff]   ;;  %v21493_v28 = vld [vmem:[#allocation2 + $0x2a0c] ss:$28 sps:$4 sm:$0xff]  }
 0x5de   :  { %12321 = vmatprep.subr.bf16.mxu1 %v21454_v10  ;;  %12434 = vmatprep.subr.bf16.mxu0 %v21457_v14  ;;  %v21488_v10 = vld [vmem:[#allocation2 + $0x2f40] ss:$28 sps:$4 sm:$0xff]   ;;  %v21491_v14 = vld [vmem:[#allocation2 + $0x2a08] ss:$28 sps:$4 sm:$0xff]  }
 0x5e1   :  { %12322 = vmatpush1.bf16.msra.mxu1 %v21452_v53  ;;  %12435 = vmatpush1.bf16.msra.mxu0 %v21455_v36  ;;  %v21496_v53 = vld [vmem:[#allocation2 + $0x2f7c] ss:$28 sps:$4 sm:$0xff]   ;;  %v21499_v36 = vld [vmem:[#allocation2 + $0x2a44] ss:$28 sps:$4 sm:$0xff]  }
 0x5e2   :  { %12323 = vmatprep.subr.bf16.mxu1 %v21460_v23  ;;  %12436 = vmatprep.subr.bf16.mxu0 %v21463_v26  ;;  %v21497_v23 = vld [vmem:[#allocation2 + $0x2a40] ss:$28 sps:$4 sm:$0xff]   ;;  %v21502_v26 = vld [vmem:[#allocation2 + $0x2fb4] ss:$28 sps:$4 sm:$0xff]  }
 0x5e5   :  { %12324 = vmatpush1.bf16.msra.mxu1 %v21458_v59  ;;  %12437 = vmatpush1.bf16.msra.mxu0 %v21461_v12  ;;  %v21505_v59 = vld [vmem:[#allocation2 + $0x2a7c] ss:$28 sps:$4 sm:$0xff]   ;;  %v21500_v12 = vld [vmem:[#allocation2 + $0x2fb0] ss:$28 sps:$4 sm:$0xff]  }
 0x5e6   :  { %12325 = vmatprep.subr.bf16.mxu1 %v21466_v46  ;;  %12438 = vmatprep.subr.bf16.mxu0 %v21469_v11  ;;  %v21503_v46 = vld [vmem:[#allocation2 + $0x2a78] ss:$28 sps:$4 sm:$0xff]   ;;  %v21508_v11 = vld [vmem:[#allocation2 + $0x2fec] ss:$28 sps:$4 sm:$0xff]  }
 0x5e9   :  { %12326 = vmatpush1.bf16.msra.mxu1 %v21464_v50  ;;  %12439 = vmatpush1.bf16.msra.mxu0 %v21467_v30  ;;  %v21511_v50 = vld [vmem:[#allocation2 + $0x2ab4] ss:$28 sps:$4 sm:$0xff]   ;;  %v21506_v30 = vld [vmem:[#allocation2 + $0x2fe8] ss:$28 sps:$4 sm:$0xff]  }
 0x5ea   :  { %12327 = vmatprep.subr.bf16.mxu1 %v21472_v32  ;;  %12440 = vmatprep.subr.bf16.mxu0 %v21475_v19  ;;  %v21509_v32 = vld [vmem:[#allocation2 + $0x2ab0] ss:$28 sps:$4 sm:$0xff]   ;;  %v21514_v19 = vld [vmem:[#allocation2 + $0x3024] ss:$28 sps:$4 sm:$0xff]  }
 0x5eb   :  { %v19057_v52 = vpop.f32.mrb[40].mxu1 }
 0x5ec   :  { %v19058_v20 = vpop.f32.mrb[41].mxu1 }
 0x5ed   :  { %v19059_v58 = vadd.f32 %v19058_v20, %v19057_v52  ;;  %v19060_v51 = vpop.f32.mrb[42].mxu1  ;;  %12328 = vmatpush1.bf16.msra.mxu1 %v21470_v33  ;;  %12441 = vmatpush1.bf16.msra.mxu0 %v21473_v39  ;;  %v21517_v33 = vld [vmem:[#allocation2 + $0x2aec] ss:$28 sps:$4 sm:$0xff]   ;;  %v21512_v39 = vld [vmem:[#allocation2 + $0x3020] ss:$28 sps:$4 sm:$0xff]  }
 0x5ee   :  { %v19061_v55 = vpop.f32.mrb[43].mxu1  ;;  %12329 = vmatprep.subr.bf16.mxu1 %v21478_v4  ;;  %12442 = vmatprep.subr.bf16.mxu0 %v21481_v60  ;;  %v21515_v4 = vld [vmem:[#allocation2 + $0x2ae8] ss:$28 sps:$4 sm:$0xff]   ;;  %v21520_v60 = vld [vmem:[#allocation2 + $0x305c] ss:$28 sps:$4 sm:$0xff]  }
 0x5ef   :  { %v19062_v25 = vadd.f32 %v19061_v55, %v19060_v51  ;;  %v9675_v1 = vadd.f32 %v19059_v58, %v23535_v6  ;;  %v23548_v6 = vld [vmem:[%s23775_s0 + $0x10] ss:$28 sps:$4 sm:$0xff]   ;;  %v21523_v52 = vld [vmem:[#allocation2 + $0x2b24] ss:$28 sps:$4 sm:$0xff]   ;;  %v21518_v20 = vld [vmem:[#allocation2 + $0x3058] ss:$28 sps:$4 sm:$0xff]  }
 0x5f0   :  { %v21521_v58 = vld [vmem:[#allocation2 + $0x2b20] ss:$28 sps:$4 sm:$0xff]   ;;  %v21526_v51 = vld [vmem:[#allocation2 + $0x3094] ss:$28 sps:$4 sm:$0xff]  }
 0x5f1   :  { %12330 = vmatpush1.bf16.msra.mxu1 %v21476_v62  ;;  %12443 = vmatpush1.bf16.msra.mxu0 %v21479_v38  ;;  %v23543_v48 = vadd.f32 %v19062_v25, %v23537_v0  ;;  %v21494_v0 = vld [vmem:[#allocation2 + $0x2f78] ss:$28 sps:$4 sm:$0xff]   ;;  %v21524_v25 = vld [vmem:[#allocation2 + $0x3090] ss:$28 sps:$4 sm:$0xff]  }
 0x5f2   :  { %12331 = vmatprep.subr.bf16.mxu1 %v21484_v42  ;;  %12444 = vmatprep.subr.bf16.mxu0 %v21487_v3  ;;  %v21529_v62 = vld [vmem:[#allocation2 + $0x2b5c] ss:$28 sps:$4 sm:$0xff]  }
 0x5f5   :  { %12332 = vmatpush1.bf16.msra.mxu1 %v21482_v7  ;;  %12445 = vmatpush1.bf16.msra.mxu0 %v21485_v44  ;;  %v21527_v7 = vld [vmem:[#allocation2 + $0x2b58] ss:$28 sps:$4 sm:$0xff]  }
 0x5f6   :  { %12344 = vmatprep.subr.bf16.mxu1 %v21490_v45  ;;  %12446 = vmatprep.subr.bf16.mxu0 %v21493_v28 }
 0x5f8   :  { %12334 = vmatmul.mubr.bf16.vlgmr.msra.gmra.mrb[48].mxu1 %v23548_v6 }
 0x5f9   :  { %12345 = vmatpush1.bf16.msra.mxu1 %v21488_v10  ;;  %12447 = vmatpush1.bf16.msra.mxu0 %v21491_v14  ;;  %v21532_v10 = vld [vmem:[#allocation2 + $0x30cc] ss:$28 sps:$4 sm:$0xff]   ;;  %v21535_v14 = vld [vmem:[#allocation2 + $0x2b94] ss:$28 sps:$4 sm:$0xff]  }
 0x5fa   :  { %12346 = vmatprep.subr.bf16.mxu1 %v21496_v53  ;;  %12448 = vmatprep.subr.bf16.mxu0 %v21499_v36 }
 0x5fb   :  { %12376 = vmatprep.mubr.bf16.mxu1 %v22841_v17 }
 0x5fd   :  { %12347 = vmatpush1.bf16.msra.mxu1 %v21494_v0  ;;  %12449 = vmatpush1.bf16.msra.mxu0 %v21497_v23  ;;  %v21533_v0 = vld [vmem:[#allocation2 + $0x2b90] ss:$28 sps:$4 sm:$0xff]  }
 0x5fe   :  { %12348 = vmatprep.subr.bf16.mxu1 %v21502_v26  ;;  %12450 = vmatprep.subr.bf16.mxu0 %v21505_v59  ;;  %v21538_v26 = vld [vmem:[#allocation2 + $0x2bcc] ss:$28 sps:$4 sm:$0xff]  }
 0x5ff   :  { %v21536_v59 = vld [vmem:[#allocation2 + $0x2bc8] ss:$28 sps:$4 sm:$0xff]  }
 0x601   :  { %12349 = vmatpush1.bf16.msra.mxu1 %v21500_v12  ;;  %12451 = vmatpush1.bf16.msra.mxu0 %v21503_v46  ;;  %v21539_v12 = vld [vmem:[#allocation2 + $0x24d0] ss:$28 sps:$4 sm:$0xff]  }
 0x602   :  { %12350 = vmatprep.subr.bf16.mxu1 %v21508_v11  ;;  %12452 = vmatprep.subr.bf16.mxu0 %v21511_v50  ;;  %v21547_v46 = vld [vmem:[#allocation2 + $0x250c] ss:$28 sps:$4 sm:$0xff]   ;;  %v23562_v11 = vld [vmem:[%s23775_s0 + $0x18] ss:$28 sps:$4 sm:$0xff]  }
 0x603   :  { %v21545_v50 = vld [vmem:[#allocation2 + $0x2508] ss:$28 sps:$4 sm:$0xff]  }
 0x605   :  { %12351 = vmatpush1.bf16.msra.mxu1 %v21506_v30  ;;  %12453 = vmatpush1.bf16.msra.mxu0 %v21509_v32  ;;  %v21550_v30 = vld [vmem:[#allocation2 + $0x2c3c] ss:$28 sps:$4 sm:$0xff]   ;;  %v21553_v32 = vld [vmem:[#allocation2 + $0x2544] ss:$28 sps:$4 sm:$0xff]  }
 0x606   :  { %12352 = vmatprep.subr.bf16.mxu1 %v21514_v19  ;;  %12454 = vmatprep.subr.bf16.mxu0 %v21517_v33  ;;  %v23570_v19 = vld [vmem:[%s23775_s0 + $0x4] ss:$28 sps:$4 sm:$0xff]   ;;  %v21548_v33 = vld [vmem:[#allocation2 + $0x2c38] ss:$28 sps:$4 sm:$0xff]  }
 0x609   :  { %12353 = vmatpush1.bf16.msra.mxu1 %v21512_v39  ;;  %12455 = vmatpush1.bf16.msra.mxu0 %v21515_v4  ;;  %v21551_v39 = vld [vmem:[#allocation2 + $0x2540] ss:$28 sps:$4 sm:$0xff]   ;;  %v21556_v4 = vld [vmem:[#allocation2 + $0x2c74] ss:$28 sps:$4 sm:$0xff]  }
 0x60a   :  { %12354 = vmatprep.subr.bf16.mxu1 %v21520_v60  ;;  %12456 = vmatprep.subr.bf16.mxu0 %v21523_v52  ;;  %v21559_v60 = vld [vmem:[#allocation2 + $0x257c] ss:$28 sps:$4 sm:$0xff]   ;;  %v21554_v52 = vld [vmem:[#allocation2 + $0x2c70] ss:$28 sps:$4 sm:$0xff]  }
 0x60b   :  { %v9715_v38 = vpop.f32.mrb[44].mxu1 }
 0x60c   :  { %v9716_v55 = vadd.f32 %v9715_v38, %v9675_v1  ;;  %v19245_v42 = vpop.f32.mrb[45].mxu1  ;;  %v21530_v1 = vld [vmem:[#allocation2 + $0x30c8] ss:$28 sps:$4 sm:$0xff]   ;;  %v21563_v38 = vld [vmem:[#allocation2 + $0x25b0] ss:$28 sps:$4 sm:$0xff]  }
 0x60d   :  { %v9718_v3 = vpop.f32.mrb[46].mxu1  ;;  %12355 = vmatpush1.bf16.msra.mxu1 %v21518_v20  ;;  %12457 = vmatpush1.bf16.msra.mxu0 %v21521_v58  ;;  %v21557_v20 = vld [vmem:[#allocation2 + $0x2578] ss:$28 sps:$4 sm:$0xff]   ;;  %v21562_v58 = vld [vmem:[#allocation2 + $0x2cac] ss:$28 sps:$4 sm:$0xff]  }
 0x60e   :  { %v9728_v44 = vmax.f32 %v9716_v55, 0.0  ;;  %v9719_v45 = vadd.f32 %v9718_v3, %v23543_v48  ;;  %v19246_v28 = vpop.f32.mrb[47].mxu1  ;;  %12356 = vmatprep.subr.bf16.mxu1 %v21526_v51  ;;  %12458 = vmatprep.subr.bf16.mxu0 %v21529_v62  ;;  %v21541_v48 = vld [vmem:[#allocation2 + $0x24d4] ss:$28 sps:$4 sm:$0xff]   ;;  %v21560_v62 = vld [vmem:[#allocation2 + $0x2ca8] ss:$28 sps:$4 sm:$0xff]  }
 0x60f   :  { %v21565_v51 = vld [vmem:[#allocation2 + $0x25b4] ss:$28 sps:$4 sm:$0xff]   ;;  %v21568_v55 = vld [vmem:[#allocation2 + $0x2ce4] ss:$28 sps:$4 sm:$0xff]   ;;  %v21571_v42 = vld [vmem:[#allocation2 + $0x25ec] ss:$28 sps:$4 sm:$0xff]  }
 0x610   :  { %v23554_v53 = vmax.f32 %v23395_v35, %v9728_v44  ;;  %v9735_v36 = vmax.f32 %v9719_v45, 0.0  ;;  %v21544_v35 = vld [vmem:[#allocation2 + $0x2c04] ss:$28 sps:$4 sm:$0xff]   ;;  %v21572_v45 = vld [vmem:[#allocation2 + $0x2d18] ss:$28 sps:$4 sm:$0xff]  }
 0x611   :  { %12357 = vmatpush1.bf16.msra.mxu1 %v21524_v25  ;;  %12459 = vmatpush1.bf16.msra.mxu0 %v21527_v7  ;;  %v21566_v3 = vld [vmem:[#allocation2 + $0x2ce0] ss:$28 sps:$4 sm:$0xff]   ;;  %v21569_v25 = vld [vmem:[#allocation2 + $0x25e8] ss:$28 sps:$4 sm:$0xff]  }
 0x612   :  { %v23557_v23 = vmax.f32 %v23401_v49, %v9735_v36  ;;  %12358 = vmatprep.subr.bf16.mxu1 %v21532_v10  ;;  %12460 = vmatprep.subr.bf16.mxu0 %v21535_v14  ;;  %v21542_v49 = vld [vmem:[#allocation2 + $0x2c00] ss:$28 sps:$4 sm:$0xff]   ;;  %v21580_v10 = vld [vmem:[#allocation2 + $0x2d54] ss:$28 sps:$4 sm:$0xff]  }
 0x613   :  { %v21574_v7 = vld [vmem:[#allocation2 + $0x2d1c] ss:$28 sps:$4 sm:$0xff]   ;;  %v21577_v44 = vld [vmem:[#allocation2 + $0x2624] ss:$28 sps:$4 sm:$0xff]   ;;  %v21578_v36 = vld [vmem:[#allocation2 + $0x2d50] ss:$28 sps:$4 sm:$0xff]  }
 0x614   :  { %v21575_v28 = vld [vmem:[#allocation2 + $0x2620] ss:$28 sps:$4 sm:$0xff]  }
 0x615   :  { %12359 = vmatpush1.bf16.msra.mxu1 %v21530_v1  ;;  %12461 = vmatpush1.bf16.msra.mxu0 %v21533_v0  ;;  %v21583_v14 = vld [vmem:[#allocation2 + $0x265c] ss:$28 sps:$4 sm:$0xff]   ;;  %v21586_v0 = vld [vmem:[#allocation2 + $0x2d8c] ss:$28 sps:$4 sm:$0xff]  }
 0x616   :  { %12473 = vmatprep.subr.bf16.mxu0 %v21538_v26  ;;  %12559 = vmatprep.subr.bf16.mxu1 %v21541_v48  ;;  %v21581_v1 = vld [vmem:[#allocation2 + $0x2658] ss:$28 sps:$4 sm:$0xff]   ;;  %v21584_v48 = vld [vmem:[#allocation2 + $0x2d88] ss:$28 sps:$4 sm:$0xff]  }
 0x617   :  { %v21589_v26 = vld [vmem:[#allocation2 + $0x2694] ss:$28 sps:$4 sm:$0xff]  }
 0x618   :  { %12377 = vmatmul.mubr.bf16.vlgmr.msra.gmra.mrb[48].mxu1 %v23562_v11  ;;  %12463 = vmatmul.mubr.bf16.vlgmr.msra.gmra.mrb[36].mxu0 %v23522_v63 }
 0x619   :  { %12474 = vmatpush1.bf16.msra.mxu0 %v21536_v59  ;;  %12560 = vmatpush1.bf16.msra.mxu1 %v21539_v12  ;;  %v21587_v59 = vld [vmem:[#allocation2 + $0x2690] ss:$28 sps:$4 sm:$0xff]   ;;  %v21592_v12 = vld [vmem:[#allocation2 + $0x2dc4] ss:$28 sps:$4 sm:$0xff]  }
 0x61a   :  { %12475 = vmatprep.subr.bf16.mxu0 %v21544_v35  ;;  %12561 = vmatprep.subr.bf16.mxu1 %v21547_v46  ;;  %v21595_v35 = vld [vmem:[#allocation2 + $0x26cc] ss:$28 sps:$4 sm:$0xff]   ;;  %v21590_v46 = vld [vmem:[#allocation2 + $0x2dc0] ss:$28 sps:$4 sm:$0xff]  }
 0x61b   :  { %12505 = vmatprep.mubr.bf16.mxu0 %v23528_v5  ;;  %12591 = vmatprep.mubr.bf16.mxu1 %v23570_v19 }
 0x61d   :  { %12476 = vmatpush1.bf16.msra.mxu0 %v21542_v49  ;;  %12562 = vmatpush1.bf16.msra.mxu1 %v21545_v50  ;;  %v21593_v49 = vld [vmem:[#allocation2 + $0x26c8] ss:$28 sps:$4 sm:$0xff]   ;;  %v21598_v50 = vld [vmem:[#allocation2 + $0x2dfc] ss:$28 sps:$4 sm:$0xff]  }
 0x61e   :  { %12477 = vmatprep.subr.bf16.mxu0 %v21550_v30  ;;  %12563 = vmatprep.subr.bf16.mxu1 %v21553_v32  ;;  %v21601_v30 = vld [vmem:[#allocation2 + $0x2704] ss:$28 sps:$4 sm:$0xff]   ;;  %v21596_v32 = vld [vmem:[#allocation2 + $0x2df8] ss:$28 sps:$4 sm:$0xff]  }
 0x621   :  { %12478 = vmatpush1.bf16.msra.mxu0 %v21548_v33  ;;  %12564 = vmatpush1.bf16.msra.mxu1 %v21551_v39  ;;  %v21599_v33 = vld [vmem:[#allocation2 + $0x2700] ss:$28 sps:$4 sm:$0xff]   ;;  %v21604_v39 = vld [vmem:[#allocation2 + $0x2e34] ss:$28 sps:$4 sm:$0xff]  }
 0x622   :  { %12479 = vmatprep.subr.bf16.mxu0 %v21556_v4  ;;  %12565 = vmatprep.subr.bf16.mxu1 %v21559_v60  ;;  %v21607_v4 = vld [vmem:[#allocation2 + $0x273c] ss:$28 sps:$4 sm:$0xff]   ;;  %v21602_v60 = vld [vmem:[#allocation2 + $0x2e30] ss:$28 sps:$4 sm:$0xff]  }
 0x625   :  { %12480 = vmatpush1.bf16.msra.mxu0 %v21554_v52  ;;  %12566 = vmatpush1.bf16.msra.mxu1 %v21557_v20  ;;  %v21605_v52 = vld [vmem:[#allocation2 + $0x2738] ss:$28 sps:$4 sm:$0xff]   ;;  %v21610_v20 = vld [vmem:[#allocation2 + $0x2e6c] ss:$28 sps:$4 sm:$0xff]  }
 0x626   :  { %12481 = vmatprep.subr.bf16.mxu0 %v21562_v58  ;;  %12567 = vmatprep.subr.bf16.mxu1 %v21565_v51  ;;  %v21613_v58 = vld [vmem:[#allocation2 + $0x2774] ss:$28 sps:$4 sm:$0xff]   ;;  %v21608_v51 = vld [vmem:[#allocation2 + $0x2e68] ss:$28 sps:$4 sm:$0xff]  }
 0x629   :  { %12482 = vmatpush1.bf16.msra.mxu0 %v21560_v62  ;;  %12568 = vmatpush1.bf16.msra.mxu1 %v21563_v38  ;;  %v21611_v62 = vld [vmem:[#allocation2 + $0x2770] ss:$28 sps:$4 sm:$0xff]   ;;  %v21616_v38 = vld [vmem:[#allocation2 + $0x2ea4] ss:$28 sps:$4 sm:$0xff]  }
 0x62a   :  { %12483 = vmatprep.subr.bf16.mxu0 %v21568_v55  ;;  %12569 = vmatprep.subr.bf16.mxu1 %v21571_v42  ;;  %v21619_v55 = vld [vmem:[#allocation2 + $0x27ac] ss:$28 sps:$4 sm:$0xff]   ;;  %v21614_v42 = vld [vmem:[#allocation2 + $0x2ea0] ss:$28 sps:$4 sm:$0xff]  }
 0x62d   :  { %12484 = vmatpush1.bf16.msra.mxu0 %v21566_v3  ;;  %12570 = vmatpush1.bf16.msra.mxu1 %v21569_v25  ;;  %v21617_v3 = vld [vmem:[#allocation2 + $0x27a8] ss:$28 sps:$4 sm:$0xff]   ;;  %v21622_v25 = vld [vmem:[#allocation2 + $0x2edc] ss:$28 sps:$4 sm:$0xff]  }
 0x62e   :  { %12485 = vmatprep.subr.bf16.mxu0 %v21574_v7  ;;  %12571 = vmatprep.subr.bf16.mxu1 %v21577_v44  ;;  %v21625_v7 = vld [vmem:[#allocation2 + $0x27e4] ss:$28 sps:$4 sm:$0xff]   ;;  %v21620_v44 = vld [vmem:[#allocation2 + $0x2ed8] ss:$28 sps:$4 sm:$0xff]  }
 0x631   :  { %12486 = vmatpush1.bf16.msra.mxu0 %v21572_v45  ;;  %12572 = vmatpush1.bf16.msra.mxu1 %v21575_v28  ;;  %v21623_v45 = vld [vmem:[#allocation2 + $0x27e0] ss:$28 sps:$4 sm:$0xff]   ;;  %v21628_v28 = vld [vmem:[#allocation2 + $0x2f14] ss:$28 sps:$4 sm:$0xff]  }
 0x632   :  { %12487 = vmatprep.subr.bf16.mxu0 %v21580_v10  ;;  %12573 = vmatprep.subr.bf16.mxu1 %v21583_v14  ;;  %v21631_v10 = vld [vmem:[#allocation2 + $0x281c] ss:$28 sps:$4 sm:$0xff]   ;;  %v21626_v14 = vld [vmem:[#allocation2 + $0x2f10] ss:$28 sps:$4 sm:$0xff]  }
 0x635   :  { %12488 = vmatpush1.bf16.msra.mxu0 %v21578_v36  ;;  %12574 = vmatpush1.bf16.msra.mxu1 %v21581_v1  ;;  %v21629_v36 = vld [vmem:[#allocation2 + $0x2818] ss:$28 sps:$4 sm:$0xff]   ;;  %v21634_v1 = vld [vmem:[#allocation2 + $0x2f4c] ss:$28 sps:$4 sm:$0xff]  }
 0x636   :  { %12489 = vmatprep.subr.bf16.mxu0 %v21586_v0  ;;  %12575 = vmatprep.subr.bf16.mxu1 %v21589_v26  ;;  %v21637_v0 = vld [vmem:[#allocation2 + $0x2854] ss:$28 sps:$4 sm:$0xff]   ;;  %v21632_v26 = vld [vmem:[#allocation2 + $0x2f48] ss:$28 sps:$4 sm:$0xff]  }
 0x639   :  { %12490 = vmatpush1.bf16.msra.mxu0 %v21584_v48  ;;  %12576 = vmatpush1.bf16.msra.mxu1 %v21587_v59  ;;  %v21635_v48 = vld [vmem:[#allocation2 + $0x2850] ss:$28 sps:$4 sm:$0xff]   ;;  %v21640_v59 = vld [vmem:[#allocation2 + $0x2f84] ss:$28 sps:$4 sm:$0xff]  }
 0x63a   :  { %12491 = vmatprep.subr.bf16.mxu0 %v21592_v12  ;;  %12577 = vmatprep.subr.bf16.mxu1 %v21595_v35  ;;  %v21643_v12 = vld [vmem:[#allocation2 + $0x288c] ss:$28 sps:$4 sm:$0xff]   ;;  %v23577_v35 = vld [vmem:[%s23775_s0] ss:$28 sps:$4 sm:$0xff]  }
 0x63d   :  { %12492 = vmatpush1.bf16.msra.mxu0 %v21590_v46  ;;  %12578 = vmatpush1.bf16.msra.mxu1 %v21593_v49  ;;  %v21638_v46 = vld [vmem:[#allocation2 + $0x2f80] ss:$28 sps:$4 sm:$0xff]   ;;  %v21641_v49 = vld [vmem:[#allocation2 + $0x2888] ss:$28 sps:$4 sm:$0xff]  }
 0x63e   :  { %12493 = vmatprep.subr.bf16.mxu0 %v21598_v50  ;;  %12579 = vmatprep.subr.bf16.mxu1 %v21601_v30  ;;  %v21646_v50 = vld [vmem:[#allocation2 + $0x2fbc] ss:$28 sps:$4 sm:$0xff]   ;;  %v21649_v30 = vld [vmem:[#allocation2 + $0x28c4] ss:$28 sps:$4 sm:$0xff]  }
 0x641   :  { %12494 = vmatpush1.bf16.msra.mxu0 %v21596_v32  ;;  %12580 = vmatpush1.bf16.msra.mxu1 %v21599_v33  ;;  %v23584_v32 = vld [vmem:[%s23775_s0 + $0xc] ss:$28 sps:$4 sm:$0xff]   ;;  %v21644_v33 = vld [vmem:[#allocation2 + $0x2fb8] ss:$28 sps:$4 sm:$0xff]  }
 0x642   :  { %12495 = vmatprep.subr.bf16.mxu0 %v21604_v39  ;;  %12581 = vmatprep.subr.bf16.mxu1 %v21607_v4  ;;  %v21647_v39 = vld [vmem:[#allocation2 + $0x28c0] ss:$28 sps:$4 sm:$0xff]   ;;  %v21652_v4 = vld [vmem:[#allocation2 + $0x2ff4] ss:$28 sps:$4 sm:$0xff]  }
 0x645   :  { %12496 = vmatpush1.bf16.msra.mxu0 %v21602_v60  ;;  %12582 = vmatpush1.bf16.msra.mxu1 %v21605_v52  ;;  %v21655_v60 = vld [vmem:[#allocation2 + $0x28fc] ss:$28 sps:$4 sm:$0xff]   ;;  %v21650_v52 = vld [vmem:[#allocation2 + $0x2ff0] ss:$28 sps:$4 sm:$0xff]  }
 0x646   :  { %12497 = vmatprep.subr.bf16.mxu0 %v21610_v20  ;;  %12583 = vmatprep.subr.bf16.mxu1 %v21613_v58  ;;  %v21653_v20 = vld [vmem:[#allocation2 + $0x28f8] ss:$28 sps:$4 sm:$0xff]   ;;  %v21658_v58 = vld [vmem:[#allocation2 + $0x302c] ss:$28 sps:$4 sm:$0xff]  }
 0x649   :  { %12498 = vmatpush1.bf16.msra.mxu0 %v21608_v51  ;;  %12584 = vmatpush1.bf16.msra.mxu1 %v21611_v62  ;;  %v21661_v51 = vld [vmem:[#allocation2 + $0x2934] ss:$28 sps:$4 sm:$0xff]   ;;  %v21656_v62 = vld [vmem:[#allocation2 + $0x3028] ss:$28 sps:$4 sm:$0xff]  }
 0x64a   :  { %12499 = vmatprep.subr.bf16.mxu0 %v21616_v38  ;;  %12585 = vmatprep.subr.bf16.mxu1 %v21619_v55  ;;  %v21659_v38 = vld [vmem:[#allocation2 + $0x2930] ss:$28 sps:$4 sm:$0xff]   ;;  %v21664_v55 = vld [vmem:[#allocation2 + $0x3064] ss:$28 sps:$4 sm:$0xff]  }
 0x64d   :  { %12500 = vmatpush1.bf16.msra.mxu0 %v21614_v42  ;;  %12586 = vmatpush1.bf16.msra.mxu1 %v21617_v3  ;;  %v21667_v42 = vld [vmem:[#allocation2 + $0x296c] ss:$28 sps:$4 sm:$0xff]   ;;  %v21662_v3 = vld [vmem:[#allocation2 + $0x3060] ss:$28 sps:$4 sm:$0xff]  }
 0x64e   :  { %12501 = vmatprep.subr.bf16.mxu0 %v21622_v25  ;;  %12587 = vmatprep.subr.bf16.mxu1 %v21625_v7  ;;  %v21665_v25 = vld [vmem:[#allocation2 + $0x2968] ss:$28 sps:$4 sm:$0xff]   ;;  %v21670_v7 = vld [vmem:[#allocation2 + $0x309c] ss:$28 sps:$4 sm:$0xff]  }
 0x651   :  { %12502 = vmatpush1.bf16.msra.mxu0 %v21620_v44  ;;  %12588 = vmatpush1.bf16.msra.mxu1 %v21623_v45  ;;  %v21673_v44 = vld [vmem:[#allocation2 + $0x29a4] ss:$28 sps:$4 sm:$0xff]  }
 0x652   :  { %12503 = vmatprep.subr.bf16.mxu0 %v21628_v28  ;;  %12589 = vmatprep.subr.bf16.mxu1 %v21631_v10 }
 0x655   :  { %12504 = vmatpush1.bf16.msra.mxu0 %v21626_v14  ;;  %12590 = vmatpush1.bf16.msra.mxu1 %v21629_v36 }
 0x656   :  { %12516 = vmatprep.subr.bf16.mxu0 %v21634_v1  ;;  %12602 = vmatprep.subr.bf16.mxu1 %v21637_v0  ;;  %v21668_v1 = vld [vmem:[#allocation2 + $0x3098] ss:$28 sps:$4 sm:$0xff]   ;;  %v21671_v0 = vld [vmem:[#allocation2 + $0x29a0] ss:$28 sps:$4 sm:$0xff]  }
 0x658   :  { %12506 = vmatmul.mubr.bf16.vlgmr.msra.gmra.mrb[36].mxu0 %v23548_v6  ;;  %12592 = vmatmul.mubr.bf16.vlgmr.msra.gmra.mrb[52].mxu1 %v23577_v35 }
 0x659   :  { %12517 = vmatpush1.bf16.msra.mxu0 %v21632_v26  ;;  %12603 = vmatpush1.bf16.msra.mxu1 %v21635_v48 }
 0x65a   :  { %12518 = vmatprep.subr.bf16.mxu0 %v21640_v59  ;;  %12604 = vmatprep.subr.bf16.mxu1 %v21643_v12  ;;  %v21676_v12 = vld [vmem:[#allocation2 + $0x30d4] ss:$28 sps:$4 sm:$0xff]  }
 0x65b   :  { %12548 = vmatprep.mubr.bf16.mxu0 %v22841_v17  ;;  %12634 = vmatprep.mubr.bf16.mxu1 %v23584_v32 }
 0x65d   :  { %12519 = vmatpush1.bf16.msra.mxu0 %v21638_v46  ;;  %12605 = vmatpush1.bf16.msra.mxu1 %v21641_v49  ;;  %v21679_v46 = vld [vmem:[#allocation2 + $0x29dc] ss:$28 sps:$4 sm:$0xff]  }
 0x65e   :  { %12520 = vmatprep.subr.bf16.mxu0 %v21646_v50  ;;  %12606 = vmatprep.subr.bf16.mxu1 %v21649_v30 }
 0x661   :  { %12521 = vmatpush1.bf16.msra.mxu0 %v21644_v33  ;;  %12607 = vmatpush1.bf16.msra.mxu1 %v21647_v39 }
 0x662   :  { %12522 = vmatprep.subr.bf16.mxu0 %v21652_v4  ;;  %12608 = vmatprep.subr.bf16.mxu1 %v21655_v60  ;;  %v21674_v60 = vld [vmem:[#allocation2 + $0x30d0] ss:$28 sps:$4 sm:$0xff]  }
 0x665   :  { %12523 = vmatpush1.bf16.msra.mxu0 %v21650_v52  ;;  %12609 = vmatpush1.bf16.msra.mxu1 %v21653_v20  ;;  %v21677_v52 = vld [vmem:[#allocation2 + $0x29d8] ss:$28 sps:$4 sm:$0xff]  }
 0x666   :  { %12524 = vmatprep.subr.bf16.mxu0 %v21658_v58  ;;  %12610 = vmatprep.subr.bf16.mxu1 %v21661_v51  ;;  %v21682_v58 = vld [vmem:[#allocation2 + $0x2a14] ss:$28 sps:$4 sm:$0xff]  }
 0x667   :  { %v21683_v51 = vld [vmem:[#allocation2 + $0x2698] ss:$28 sps:$4 sm:$0xff]  }
 0x669   :  { %12525 = vmatpush1.bf16.msra.mxu0 %v21656_v62  ;;  %12611 = vmatpush1.bf16.msra.mxu1 %v21659_v38  ;;  %v21687_v38 = vld [vmem:[#allocation2 + $0x2a4c] ss:$28 sps:$4 sm:$0xff]  }
 0x66a   :  { %12526 = vmatprep.subr.bf16.mxu0 %v21664_v55  ;;  %12612 = vmatprep.subr.bf16.mxu1 %v21667_v42  ;;  %v21688_v55 = vld [vmem:[#allocation2 + $0x26d0] ss:$28 sps:$4 sm:$0xff]  }
 0x66b   :  { %v9549_v45 = vpop.f32.mrb[32].mxu0  ;;  %v21689_v42 = vld [vmem:[#allocation2 + $0x2510] ss:$28 sps:$4 sm:$0xff]  }
 0x66c   :  { %v19339_v28 = vadd.f32 %v9549_v45, %v23373_v37  ;;  %v9551_v10 = vpop.f32.mrb[33].mxu0  ;;  %v21698_v45 = vld [vmem:[#allocation2 + $0x2740] ss:$28 sps:$4 sm:$0xff]  }
 0x66d   :  { %v19340_v14 = vadd.f32 %v9551_v10, %v23375_v21  ;;  %v9553_v36 = vpop.f32.mrb[34].mxu0  ;;  %12527 = vmatpush1.bf16.msra.mxu0 %v21662_v3  ;;  %12613 = vmatpush1.bf16.msra.mxu1 %v21665_v25  ;;  %v21692_v3 = vld [vmem:[#allocation2 + $0x2a84] ss:$28 sps:$4 sm:$0xff]  }
 0x66e   :  { %v9726_v26 = vmax.f32 %v19339_v28, 0.0  ;;  %v19341_v48 = vadd.f32 %v9553_v36, %v23373_v37  ;;  %v9555_v59 = vpop.f32.mrb[35].mxu0  ;;  %12528 = vmatprep.subr.bf16.mxu0 %v21670_v7  ;;  %12614 = vmatprep.subr.bf16.mxu1 %v21673_v44  ;;  %v21693_v25 = vld [vmem:[#allocation2 + $0x2708] ss:$28 sps:$4 sm:$0xff]   ;;  %v21697_v44 = vld [vmem:[#allocation2 + $0x2abc] ss:$28 sps:$4 sm:$0xff]  }
 0x66f   :  { %v9727_v49 = vmax.f32 %v19340_v14, 0.0  ;;  %v19342_v50 = vadd.f32 %v9555_v59, %v23375_v21  ;;  %v21694_v7 = vld [vmem:[#allocation2 + $0x2548] ss:$28 sps:$4 sm:$0xff]   ;;  %v21695_v28 = vld [vmem:[#allocation2 + $0x2ab8] ss:$28 sps:$4 sm:$0xff]  }
 0x670   :  { %v23592_v30 = vmax.f32 %v23393_v34, %v9726_v26  ;;  %v9733_v33 = vmax.f32 %v19341_v48, 0.0  ;;  %v21680_v34 = vld [vmem:[#allocation2 + $0x2a10] ss:$28 sps:$4 sm:$0xff]   ;;  %v21699_v10 = vld [vmem:[#allocation2 + $0x2580] ss:$28 sps:$4 sm:$0xff]  }
 0x671   :  { %v23595_v39 = vmax.f32 %v23397_v40, %v9727_v49  ;;  %v9734_v4 = vmax.f32 %v19342_v50, 0.0  ;;  %12529 = vmatpush1.bf16.msra.mxu0 %v21668_v1  ;;  %12615 = vmatpush1.bf16.msra.mxu1 %v21671_v0  ;;  %v21684_v40 = vld [vmem:[#allocation2 + $0x24d8] ss:$28 sps:$4 sm:$0xff]   ;;  %v21700_v1 = vld [vmem:[#allocation2 + $0x2af0] ss:$28 sps:$4 sm:$0xff]  }
 0x672   :  { %v23598_v20 = vmax.f32 %v23399_v15, %v9733_v33  ;;  %12530 = vmatprep.subr.bf16.mxu0 %v21676_v12  ;;  %12616 = vmatprep.subr.bf16.mxu1 %v21679_v46  ;;  %v21685_v15 = vld [vmem:[#allocation2 + $0x2a48] ss:$28 sps:$4 sm:$0xff]   ;;  %v21702_v14 = vld [vmem:[#allocation2 + $0x2af4] ss:$28 sps:$4 sm:$0xff]   ;;  %v21710_v49 = vld [vmem:[#allocation2 + $0x2b60] ss:$28 sps:$4 sm:$0xff]  }
 0x673   :  { %v23601_v62 = vmax.f32 %v23403_v18, %v9734_v4  ;;  %v21690_v18 = vld [vmem:[#allocation2 + $0x2a80] ss:$28 sps:$4 sm:$0xff]   ;;  %v21703_v36 = vld [vmem:[#allocation2 + $0x2778] ss:$28 sps:$4 sm:$0xff]   ;;  %v21707_v0 = vld [vmem:[#allocation2 + $0x2b2c] ss:$28 sps:$4 sm:$0xff]  }
 0x674   :  { %v21708_v26 = vld [vmem:[#allocation2 + $0x27b0] ss:$28 sps:$4 sm:$0xff]   ;;  %v21705_v48 = vld [vmem:[#allocation2 + $0x2b28] ss:$28 sps:$4 sm:$0xff]   ;;  %v21717_v33 = vld [vmem:[#allocation2 + $0x2b9c] ss:$28 sps:$4 sm:$0xff]  }
 0x675   :  { %12531 = vmatpush1.bf16.msra.mxu0 %v21674_v60  ;;  %12617 = vmatpush1.bf16.msra.mxu1 %v21677_v52  ;;  %v21709_v59 = vld [vmem:[#allocation2 + $0x25f0] ss:$28 sps:$4 sm:$0xff]   ;;  %v21712_v12 = vld [vmem:[#allocation2 + $0x2b64] ss:$28 sps:$4 sm:$0xff]   ;;  %v21715_v60 = vld [vmem:[#allocation2 + $0x2b98] ss:$28 sps:$4 sm:$0xff]  }
 0x676   :  { %12618 = vmatprep.subr.bf16.mxu1 %v21682_v58  ;;  %19072 = vmatprep.subr.bf16.mxu0 %v21683_v51  ;;  %v21713_v46 = vld [vmem:[#allocation2 + $0x27e8] ss:$28 sps:$4 sm:$0xff]   ;;  %v21718_v4 = vld [vmem:[#allocation2 + $0x2820] ss:$28 sps:$4 sm:$0xff]   ;;  %v21722_v58 = vld [vmem:[#allocation2 + $0x2bd4] ss:$28 sps:$4 sm:$0xff]  }
 0x677   :  { %v21714_v50 = vld [vmem:[#allocation2 + $0x2628] ss:$28 sps:$4 sm:$0xff]   ;;  %v21719_v52 = vld [vmem:[#allocation2 + $0x2660] ss:$28 sps:$4 sm:$0xff]   ;;  %v21723_v51 = vld [vmem:[#allocation2 + $0x2a18] ss:$28 sps:$4 sm:$0xff]  }
 0x678   :  { %12549 = vmatmul.mubr.bf16.vlgmr.msra.gmra.mrb[36].mxu0 %v23562_v11 }
 0x679   :  { %12619 = vmatpush1.bf16.msra.mxu1 %v21680_v34  ;;  %19073 = vmatpush3.bf16.msra.mxu0 %v21684_v40  ;;  %v21720_v34 = vld [vmem:[#allocation2 + $0x2bd0] ss:$28 sps:$4 sm:$0xff]   ;;  %v21724_v40 = vld [vmem:[#allocation2 + $0x2858] ss:$28 sps:$4 sm:$0xff]  }
 0x67a   :  { %12620 = vmatprep.subr.bf16.mxu1 %v21687_v38  ;;  %19074 = vmatprep.subr.bf16.mxu0 %v21688_v55  ;;  %v21727_v38 = vld [vmem:[#allocation2 + $0x2c0c] ss:$28 sps:$4 sm:$0xff]  }
 0x67b   :  { %12763 = vmatprep.mubr.bf16.mxu0 %v23570_v19  ;;  %v21704_v19 = vld [vmem:[#allocation2 + $0x25b8] ss:$28 sps:$4 sm:$0xff]   ;;  %v21728_v55 = vld [vmem:[#allocation2 + $0x2a50] ss:$28 sps:$4 sm:$0xff]  }
 0x67d   :  { %12621 = vmatpush1.bf16.msra.mxu1 %v21685_v15  ;;  %19075 = vmatpush3.bf16.msra.mxu0 %v21689_v42  ;;  %v21725_v15 = vld [vmem:[#allocation2 + $0x2c08] ss:$28 sps:$4 sm:$0xff]   ;;  %v21729_v42 = vld [vmem:[#allocation2 + $0x2890] ss:$28 sps:$4 sm:$0xff]  }
 0x67e   :  { %12622 = vmatprep.subr.bf16.mxu1 %v21692_v3  ;;  %19076 = vmatprep.subr.bf16.mxu0 %v21693_v25  ;;  %v21732_v3 = vld [vmem:[#allocation2 + $0x2c44] ss:$28 sps:$4 sm:$0xff]  }
 0x67f   :  { %v21733_v25 = vld [vmem:[#allocation2 + $0x2a88] ss:$28 sps:$4 sm:$0xff]  }
 0x681   :  { %12623 = vmatpush1.bf16.msra.mxu1 %v21690_v18  ;;  %19077 = vmatpush3.bf16.msra.mxu0 %v21694_v7  ;;  %v21730_v18 = vld [vmem:[#allocation2 + $0x2c40] ss:$28 sps:$4 sm:$0xff]   ;;  %v21734_v7 = vld [vmem:[#allocation2 + $0x28c8] ss:$28 sps:$4 sm:$0xff]  }
 0x682   :  { %12624 = vmatprep.subr.bf16.mxu1 %v21697_v44  ;;  %19078 = vmatprep.subr.bf16.mxu0 %v21698_v45  ;;  %v21735_v44 = vld [vmem:[#allocation2 + $0x2c78] ss:$28 sps:$4 sm:$0xff]   ;;  %v21739_v45 = vld [vmem:[#allocation2 + $0x2900] ss:$28 sps:$4 sm:$0xff]  }
 0x685   :  { %12625 = vmatpush1.bf16.msra.mxu1 %v21695_v28  ;;  %19079 = vmatpush3.bf16.msra.mxu0 %v21699_v10  ;;  %v21742_v28 = vld [vmem:[#allocation2 + $0x2cb4] ss:$28 sps:$4 sm:$0xff]  }
 0x686   :  { %12626 = vmatprep.subr.bf16.mxu1 %v21702_v14  ;;  %19080 = vmatprep.subr.bf16.mxu0 %v21703_v36  ;;  %v21743_v10 = vld [vmem:[#allocation2 + $0x2af8] ss:$28 sps:$4 sm:$0xff]   ;;  %v21747_v14 = vld [vmem:[#allocation2 + $0x2cec] ss:$28 sps:$4 sm:$0xff]  }
 0x687   :  { %v21748_v36 = vld [vmem:[#allocation2 + $0x2b30] ss:$28 sps:$4 sm:$0xff]  }
 0x689   :  { %12627 = vmatpush1.bf16.msra.mxu1 %v21700_v1  ;;  %19081 = vmatpush3.bf16.msra.mxu0 %v21704_v19  ;;  %v21745_v1 = vld [vmem:[#allocation2 + $0x2ce8] ss:$28 sps:$4 sm:$0xff]   ;;  %v21749_v19 = vld [vmem:[#allocation2 + $0x2970] ss:$28 sps:$4 sm:$0xff]  }
 0x68a   :  { %12628 = vmatprep.subr.bf16.mxu1 %v21707_v0  ;;  %19082 = vmatprep.subr.bf16.mxu0 %v21708_v26  ;;  %v21752_v0 = vld [vmem:[#allocation2 + $0x2d24] ss:$28 sps:$4 sm:$0xff]  }
 0x68b   :  { %v21753_v26 = vld [vmem:[#allocation2 + $0x2b68] ss:$28 sps:$4 sm:$0xff]  }
 0x68d   :  { %12629 = vmatpush1.bf16.msra.mxu1 %v21705_v48  ;;  %19083 = vmatpush3.bf16.msra.mxu0 %v21709_v59  ;;  %v21750_v48 = vld [vmem:[#allocation2 + $0x2d20] ss:$28 sps:$4 sm:$0xff]   ;;  %v21754_v59 = vld [vmem:[#allocation2 + $0x29a8] ss:$28 sps:$4 sm:$0xff]  }
 0x68e   :  { %12630 = vmatprep.subr.bf16.mxu1 %v21712_v12  ;;  %19084 = vmatprep.subr.bf16.mxu0 %v21713_v46  ;;  %v21757_v12 = vld [vmem:[#allocation2 + $0x2d5c] ss:$28 sps:$4 sm:$0xff]  }
 0x68f   :  { %v21758_v46 = vld [vmem:[#allocation2 + $0x2ba0] ss:$28 sps:$4 sm:$0xff]  }
 0x691   :  { %12631 = vmatpush1.bf16.msra.mxu1 %v21710_v49  ;;  %19085 = vmatpush3.bf16.msra.mxu0 %v21714_v50  ;;  %v21755_v49 = vld [vmem:[#allocation2 + $0x2d58] ss:$28 sps:$4 sm:$0xff]   ;;  %v21759_v50 = vld [vmem:[#allocation2 + $0x29e0] ss:$28 sps:$4 sm:$0xff]  }
 0x692   :  { %12632 = vmatprep.subr.bf16.mxu1 %v21717_v33  ;;  %19086 = vmatprep.subr.bf16.mxu0 %v21718_v4  ;;  %v21762_v33 = vld [vmem:[#allocation2 + $0x2d94] ss:$28 sps:$4 sm:$0xff]  }
 0x693   :  { %v21763_v4 = vld [vmem:[#allocation2 + $0x2d98] ss:$28 sps:$4 sm:$0xff]  }
 0x695   :  { %12633 = vmatpush1.bf16.msra.mxu1 %v21715_v60  ;;  %19087 = vmatpush3.bf16.msra.mxu0 %v21719_v52  ;;  %v21760_v60 = vld [vmem:[#allocation2 + $0x2d90] ss:$28 sps:$4 sm:$0xff]   ;;  %v21764_v52 = vld [vmem:[#allocation2 + $0x2bd8] ss:$28 sps:$4 sm:$0xff]  }
 0x696   :  { %12645 = vmatprep.subr.bf16.mxu1 %v21722_v58  ;;  %19094 = vmatprep.subr.bf16.mxu0 %v21723_v51  ;;  %v21767_v58 = vld [vmem:[#allocation2 + $0x2dcc] ss:$28 sps:$4 sm:$0xff]  }
 0x697   :  { %v21768_v51 = vld [vmem:[#allocation2 + $0x2dd0] ss:$28 sps:$4 sm:$0xff]  }
 0x698   :  { %12635 = vmatmul.mubr.bf16.vlgmr.msra.gmra.mrb[52].mxu1 %v23522_v63  ;;  %12764 = vmatmul.mubr.bf16.vlgmr.msra.gmra.mrb[40].mxu0 %v23577_v35  ;;  %v21737_v63 = vld [vmem:[#allocation2 + $0x2c7c] ss:$28 sps:$4 sm:$0xff]  }
 0x699   :  { %12646 = vmatpush1.bf16.msra.mxu1 %v21720_v34  ;;  %19095 = vmatpush3.bf16.msra.mxu0 %v21724_v40  ;;  %v21738_v35 = vld [vmem:[#allocation2 + $0x2ac0] ss:$28 sps:$4 sm:$0xff]   ;;  %v22591_v34 = vld [vmem:[%s23775_s0 + $0x8] ss:$28 sps:$4 sm:$0xff]  }
 0x69a   :  { %12647 = vmatprep.subr.bf16.mxu1 %v21727_v38  ;;  %19096 = vmatprep.subr.bf16.mxu0 %v21728_v55  ;;  %v21765_v40 = vld [vmem:[#allocation2 + $0x2dc8] ss:$28 sps:$4 sm:$0xff]   ;;  %v21769_v38 = vld [vmem:[#allocation2 + $0x2c10] ss:$28 sps:$4 sm:$0xff]  }
 0x69b   :  { %12804 = vmatprep.mubr.bf16.mxu0 %v23584_v32  ;;  %12677 = vmatprep.mubr.bf16.mxu1 %v23528_v5  ;;  %v21740_v32 = vld [vmem:[#allocation2 + $0x2cb0] ss:$28 sps:$4 sm:$0xff]   ;;  %v21744_v5 = vld [vmem:[#allocation2 + $0x2938] ss:$28 sps:$4 sm:$0xff]   ;;  %v21772_v55 = vld [vmem:[#allocation2 + $0x2e04] ss:$28 sps:$4 sm:$0xff]  }
 0x69d   :  { %12648 = vmatpush1.bf16.msra.mxu1 %v21725_v15  ;;  %19097 = vmatpush3.bf16.msra.mxu0 %v21729_v42  ;;  %v21773_v15 = vld [vmem:[#allocation2 + $0x2e08] ss:$28 sps:$4 sm:$0xff]   ;;  %v22592_v42 = vld [vmem:[%s23775_s0 + $0x14] ss:$28 sps:$4 sm:$0xff]  }
 0x69e   :  { %12649 = vmatprep.subr.bf16.mxu1 %v21732_v3  ;;  %19098 = vmatprep.subr.bf16.mxu0 %v21733_v25  ;;  %v21770_v3 = vld [vmem:[#allocation2 + $0x2e00] ss:$28 sps:$4 sm:$0xff]   ;;  %v21774_v25 = vld [vmem:[#allocation2 + $0x2c48] ss:$28 sps:$4 sm:$0xff]  }
 0x6a1   :  { %12650 = vmatpush1.bf16.msra.mxu1 %v21730_v18  ;;  %19099 = vmatpush3.bf16.msra.mxu0 %v21734_v7  ;;  %v21777_v18 = vld [vmem:[#allocation2 + $0x2e3c] ss:$28 sps:$4 sm:$0xff]  }
 0x6a2   :  { %12651 = vmatprep.subr.bf16.mxu1 %v21737_v63  ;;  %19100 = vmatprep.subr.bf16.mxu0 %v21738_v35  ;;  %v21778_v7 = vld [vmem:[#allocation2 + $0x2e40] ss:$28 sps:$4 sm:$0xff]   ;;  %v21775_v63 = vld [vmem:[#allocation2 + $0x2e38] ss:$28 sps:$4 sm:$0xff]  }
 0x6a3   :  { %v21779_v35 = vld [vmem:[#allocation2 + $0x2c80] ss:$28 sps:$4 sm:$0xff]  }
 0x6a5   :  { %12652 = vmatpush1.bf16.msra.mxu1 %v21735_v44  ;;  %19101 = vmatpush3.bf16.msra.mxu0 %v21739_v45  ;;  %v21782_v44 = vld [vmem:[#allocation2 + $0x2e74] ss:$28 sps:$4 sm:$0xff]  }
 0x6a6   :  { %12653 = vmatprep.subr.bf16.mxu1 %v21742_v28  ;;  %19102 = vmatprep.subr.bf16.mxu0 %v21743_v10  ;;  %v21783_v45 = vld [vmem:[#allocation2 + $0x2e78] ss:$28 sps:$4 sm:$0xff]   ;;  %v21780_v28 = vld [vmem:[#allocation2 + $0x2e70] ss:$28 sps:$4 sm:$0xff]  }
 0x6a7   :  { %v21784_v10 = vld [vmem:[#allocation2 + $0x2cb8] ss:$28 sps:$4 sm:$0xff]  }
 0x6a9   :  { %12654 = vmatpush1.bf16.msra.mxu1 %v21740_v32  ;;  %19103 = vmatpush3.bf16.msra.mxu0 %v21744_v5  ;;  %v21787_v32 = vld [vmem:[#allocation2 + $0x2eac] ss:$28 sps:$4 sm:$0xff]  }
 0x6aa   :  { %12655 = vmatprep.subr.bf16.mxu1 %v21747_v14  ;;  %19104 = vmatprep.subr.bf16.mxu0 %v21748_v36  ;;  %v21788_v5 = vld [vmem:[#allocation2 + $0x2eb0] ss:$28 sps:$4 sm:$0xff]   ;;  %v21785_v14 = vld [vmem:[#allocation2 + $0x2ea8] ss:$28 sps:$4 sm:$0xff]  }
 0x6ab   :  { %v21789_v36 = vld [vmem:[#allocation2 + $0x2cf0] ss:$28 sps:$4 sm:$0xff]  }
 0x6ad   :  { %12656 = vmatpush1.bf16.msra.mxu1 %v21745_v1  ;;  %19105 = vmatpush3.bf16.msra.mxu0 %v21749_v19  ;;  %v21792_v1 = vld [vmem:[#allocation2 + $0x2ee4] ss:$28 sps:$4 sm:$0xff]  }
 0x6ae   :  { %12657 = vmatprep.subr.bf16.mxu1 %v21752_v0  ;;  %19106 = vmatprep.subr.bf16.mxu0 %v21753_v26  ;;  %v21793_v19 = vld [vmem:[#allocation2 + $0x2ee8] ss:$28 sps:$4 sm:$0xff]   ;;  %v21790_v0 = vld [vmem:[#allocation2 + $0x2ee0] ss:$28 sps:$4 sm:$0xff]  }
 0x6af   :  { %v21794_v26 = vld [vmem:[#allocation2 + $0x2d28] ss:$28 sps:$4 sm:$0xff]  }
 0x6b1   :  { %12658 = vmatpush1.bf16.msra.mxu1 %v21750_v48  ;;  %19107 = vmatpush3.bf16.msra.mxu0 %v21754_v59  ;;  %v21797_v48 = vld [vmem:[#allocation2 + $0x2f1c] ss:$28 sps:$4 sm:$0xff]  }
 0x6b2   :  { %12659 = vmatprep.subr.bf16.mxu1 %v21757_v12  ;;  %19108 = vmatprep.subr.bf16.mxu0 %v21758_v46  ;;  %v21798_v59 = vld [vmem:[#allocation2 + $0x2f20] ss:$28 sps:$4 sm:$0xff]   ;;  %v21795_v12 = vld [vmem:[#allocation2 + $0x2f18] ss:$28 sps:$4 sm:$0xff]  }
 0x6b3   :  { %v21799_v46 = vld [vmem:[#allocation2 + $0x2d60] ss:$28 sps:$4 sm:$0xff]  }
 0x6b5   :  { %12660 = vmatpush1.bf16.msra.mxu1 %v21755_v49  ;;  %19109 = vmatpush3.bf16.msra.mxu0 %v21759_v50  ;;  %v21802_v49 = vld [vmem:[#allocation2 + $0x2f54] ss:$28 sps:$4 sm:$0xff]  }
 0x6b6   :  { %12661 = vmatprep.subr.bf16.mxu1 %v21762_v33  ;;  %19116 = vmatprep.subr.bf16.mxu0 %v21763_v4  ;;  %v21800_v50 = vld [vmem:[#allocation2 + $0x2f50] ss:$28 sps:$4 sm:$0xff]   ;;  %v21803_v33 = vld [vmem:[#allocation2 + $0x2f58] ss:$28 sps:$4 sm:$0xff]  }
 0x6b7   :  { %v21806_v4 = vld [vmem:[#allocation2 + $0x2f8c] ss:$28 sps:$4 sm:$0xff]  }
 0x6b8   :  { %12805 = vmatmul.mubr.bf16.vlgmr.msra.gmra.mrb[44].mxu0 %v22591_v34  ;;  %v21811_v34 = vld [vmem:[#allocation2 + $0x2fc8] ss:$28 sps:$4 sm:$0xff]  }
 0x6b9   :  { %12662 = vmatpush1.bf16.msra.mxu1 %v21760_v60  ;;  %19117 = vmatpush3.bf16.msra.mxu0 %v21764_v52  ;;  %v21804_v60 = vld [vmem:[#allocation2 + $0x2f88] ss:$28 sps:$4 sm:$0xff]   ;;  %v21807_v52 = vld [vmem:[#allocation2 + $0x2f90] ss:$28 sps:$4 sm:$0xff]  }
 0x6ba   :  { %12663 = vmatprep.subr.bf16.mxu1 %v21767_v58  ;;  %19118 = vmatprep.subr.bf16.mxu0 %v21768_v51  ;;  %v21810_v58 = vld [vmem:[#allocation2 + $0x2fc4] ss:$28 sps:$4 sm:$0xff]  }
 0x6bb   :  { %12845 = vmatprep.mubr.bf16.mxu0 %v22592_v42  ;;  %v21808_v51 = vld [vmem:[#allocation2 + $0x2fc0] ss:$28 sps:$4 sm:$0xff]   ;;  %v21819_v42 = vld [vmem:[#allocation2 + $0x3038] ss:$28 sps:$4 sm:$0xff]  }
 0x6bd   :  { %12664 = vmatpush1.bf16.msra.mxu1 %v21765_v40  ;;  %19119 = vmatpush3.bf16.msra.mxu0 %v21769_v38  ;;  %v21812_v40 = vld [vmem:[#allocation2 + $0x2ff8] ss:$28 sps:$4 sm:$0xff]   ;;  %v21815_v38 = vld [vmem:[#allocation2 + $0x3000] ss:$28 sps:$4 sm:$0xff]  }
 0x6be   :  { %12665 = vmatprep.subr.bf16.mxu1 %v21772_v55  ;;  %19120 = vmatprep.subr.bf16.mxu0 %v21773_v15  ;;  %v21818_v55 = vld [vmem:[#allocation2 + $0x3034] ss:$28 sps:$4 sm:$0xff]  }
 0x6bf   :  { %v21816_v15 = vld [vmem:[#allocation2 + $0x3030] ss:$28 sps:$4 sm:$0xff]  }
 0x6c1   :  { %12666 = vmatpush1.bf16.msra.mxu1 %v21770_v3  ;;  %19121 = vmatpush3.bf16.msra.mxu0 %v21774_v25  ;;  %v21822_v3 = vld [vmem:[#allocation2 + $0x306c] ss:$28 sps:$4 sm:$0xff]  }
 0x6c2   :  { %12667 = vmatprep.subr.bf16.mxu1 %v21777_v18  ;;  %19122 = vmatprep.subr.bf16.mxu0 %v21778_v7  ;;  %v21820_v25 = vld [vmem:[#allocation2 + $0x3068] ss:$28 sps:$4 sm:$0xff]   ;;  %v21823_v18 = vld [vmem:[#allocation2 + $0x3070] ss:$28 sps:$4 sm:$0xff]  }
 0x6c3   :  { %v21826_v7 = vld [vmem:[#allocation2 + $0x30a4] ss:$28 sps:$4 sm:$0xff]  }
 0x6c5   :  { %12668 = vmatpush1.bf16.msra.mxu1 %v21775_v63  ;;  %19123 = vmatpush3.bf16.msra.mxu0 %v21779_v35 }
 0x6c6   :  { %12669 = vmatprep.subr.bf16.mxu1 %v21782_v44  ;;  %19124 = vmatprep.subr.bf16.mxu0 %v21783_v45 }
 0x6c9   :  { %12670 = vmatpush1.bf16.msra.mxu1 %v21780_v28  ;;  %19125 = vmatpush3.bf16.msra.mxu0 %v21784_v10  ;;  %v21824_v10 = vld [vmem:[#allocation2 + $0x30a0] ss:$28 sps:$4 sm:$0xff]  }
 0x6ca   :  { %12671 = vmatprep.subr.bf16.mxu1 %v21787_v32  ;;  %19126 = vmatprep.subr.bf16.mxu0 %v21788_v5  ;;  %v21827_v32 = vld [vmem:[#allocation2 + $0x30a8] ss:$28 sps:$4 sm:$0xff]  }
 0x6cd   :  { %12672 = vmatpush1.bf16.msra.mxu1 %v21785_v14  ;;  %19127 = vmatpush3.bf16.msra.mxu0 %v21789_v36 }
 0x6ce   :  { %12673 = vmatprep.subr.bf16.mxu1 %v21792_v1  ;;  %19128 = vmatprep.subr.bf16.mxu0 %v21793_v19  ;;  %v21830_v1 = vld [vmem:[#allocation2 + $0x30dc] ss:$28 sps:$4 sm:$0xff]  }
 0x6d1   :  { %12674 = vmatpush1.bf16.msra.mxu1 %v21790_v0  ;;  %19129 = vmatpush3.bf16.msra.mxu0 %v21794_v26 }
 0x6d2   :  { %12675 = vmatprep.subr.bf16.mxu1 %v21797_v48  ;;  %19130 = vmatprep.subr.bf16.mxu0 %v21798_v59 }
 0x6d5   :  { %12676 = vmatpush1.bf16.msra.mxu1 %v21795_v12  ;;  %19131 = vmatpush3.bf16.msra.mxu0 %v21799_v46  ;;  %v21828_v46 = vld [vmem:[#allocation2 + $0x30d8] ss:$28 sps:$4 sm:$0xff]  }
 0x6d6   :  { %12688 = vmatprep.subr.bf16.mxu1 %v21802_v49  ;;  %19247 = vmatprep.subr.bf16.mxu0 %v22842_v22  ;;  %v21831_v49 = vld [vmem:[#allocation2 + $0x30e0] ss:$28 sps:$4 sm:$0xff]  }
 0x6d8   :  { %12846 = vmatmul.mubr.bf16.vlgmr.msra.gmra.mrb[48].mxu0 %v23548_v6  ;;  %12678 = vmatmul.mubr.bf16.vlgmr.msra.gmra.mrb[52].mxu1 %v23548_v6  ;;  %v21814_v6 = vld [vmem:[#allocation2 + $0x2ffc] ss:$28 sps:$4 sm:$0xff]  }
 0x6d9   :  { %12689 = vmatpush1.bf16.msra.mxu1 %v21800_v50  ;;  %19248 = vmatpush3.bf16.msra.mxu0 %v21803_v33  ;;  %v21834_v50 = vld [vmem:[#allocation6 + $0x4] ss:$8 sps:$4 sm:$0xff]  }
 0x6da   :  { %12690 = vmatprep.subr.bf16.mxu1 %v21806_v4  ;;  %19249 = vmatprep.subr.bf16.mxu0 %v22842_v22  ;;  %v21837_v33 = vld [vmem:[#allocation6 + $0x384] ss:$8 sps:$4 sm:$0xff]  }
 0x6db   :  { %12720 = vmatprep.mubr.bf16.mxu1 %v22841_v17  ;;  %19263 = vmatprep.mubr.msk.bf16.mxu0 %vm22843_vm0, %v22842_v22 }
 0x6dd   :  { %12691 = vmatpush1.bf16.msra.mxu1 %v21804_v60  ;;  %19250 = vmatpush3.bf16.msra.mxu0 %v21807_v52  ;;  %v21835_v60 = vld [vmem:[#allocation6 + $0x380] ss:$8 sps:$4 sm:$0xff]   ;;  %v21840_v52 = vld [vmem:[#allocation6 + $0x14] ss:$8 sps:$4 sm:$0xff]  }
 0x6de   :  { %12692 = vmatprep.subr.bf16.mxu1 %v21810_v58  ;;  %19251 = vmatprep.subr.bf16.mxu0 %v22842_v22  ;;  %v21843_v58 = vld [vmem:[#allocation6 + $0x394] ss:$8 sps:$4 sm:$0xff]  }
 0x6e1   :  { %12693 = vmatpush1.bf16.msra.mxu1 %v21808_v51  ;;  %19252 = vmatpush3.bf16.msra.mxu0 %v21811_v34  ;;  %v21846_v51 = vld [vmem:[#allocation6 + $0x24] ss:$8 sps:$4 sm:$0xff]  }
 0x6e2   :  { %12694 = vmatprep.subr.bf16.mxu1 %v21814_v6  ;;  %19253 = vmatprep.subr.bf16.mxu0 %v22842_v22  ;;  %v21849_v34 = vld [vmem:[#allocation6 + $0x3a4] ss:$8 sps:$4 sm:$0xff]   ;;  %v21844_v6 = vld [vmem:[#allocation6 + $0x20] ss:$8 sps:$4 sm:$0xff]  }
 0x6e5   :  { %12695 = vmatpush1.bf16.msra.mxu1 %v21812_v40  ;;  %19254 = vmatpush3.bf16.msra.mxu0 %v21815_v38  ;;  %v21847_v40 = vld [vmem:[#allocation6 + $0x3a0] ss:$8 sps:$4 sm:$0xff]   ;;  %v21852_v38 = vld [vmem:[#allocation6 + $0x34] ss:$8 sps:$4 sm:$0xff]  }
 0x6e6   :  { %12696 = vmatprep.subr.bf16.mxu1 %v21818_v55  ;;  %19255 = vmatprep.subr.bf16.mxu0 %v22842_v22  ;;  %v21850_v55 = vld [vmem:[#allocation6 + $0x30] ss:$8 sps:$4 sm:$0xff]  }
 0x6e9   :  { %12697 = vmatpush1.bf16.msra.mxu1 %v21816_v15  ;;  %19256 = vmatpush3.bf16.msra.mxu0 %v21819_v42  ;;  %v21853_v15 = vld [vmem:[#allocation6 + $0x3b0] ss:$8 sps:$4 sm:$0xff]   ;;  %v21858_v42 = vld [vmem:[#allocation6 + $0x44] ss:$8 sps:$4 sm:$0xff]  }
 0x6ea   :  { %12698 = vmatprep.subr.bf16.mxu1 %v21822_v3  ;;  %19257 = vmatprep.subr.bf16.mxu0 %v22842_v22  ;;  %v21861_v3 = vld [vmem:[#allocation6 + $0x3c4] ss:$8 sps:$4 sm:$0xff]  }
 0x6eb   :  { %v12378_v63 = vpop.f32.mrb[48].mxu1 }
 0x6ec   :  { %v19343_v35 = vadd.f32 %v12378_v63, %v23271_v24  ;;  %v12380_v44 = vpop.f32.mrb[49].mxu1  ;;  %v21867_v63 = vld [vmem:[#allocation6 + $0x3d4] ss:$8 sps:$4 sm:$0xff]  }
 0x6ed   :  { %v19344_v45 = vadd.f32 %v12380_v44, %v23277_v27  ;;  %v12382_v28 = vpop.f32.mrb[50].mxu1  ;;  %12699 = vmatpush1.bf16.msra.mxu1 %v21820_v25  ;;  %19258 = vmatpush3.bf16.msra.mxu0 %v21823_v18  ;;  %v21856_v25 = vld [vmem:[#allocation6 + $0x40] ss:$8 sps:$4 sm:$0xff]   ;;  %v21865_v44 = vld [vmem:[#allocation6 + $0x3d0] ss:$8 sps:$4 sm:$0xff]  }
 0x6ee   :  { %v12895_v5 = vmax.f32 %v19343_v35, 0.0  ;;  %v19345_v14 = vadd.f32 %v12382_v28, %v23271_v24  ;;  %v12384_v36 = vpop.f32.mrb[51].mxu1  ;;  %12700 = vmatprep.subr.bf16.mxu1 %v21826_v7  ;;  %19259 = vmatprep.subr.bf16.mxu0 %v22842_v22  ;;  %v21859_v18 = vld [vmem:[#allocation6 + $0x3c0] ss:$8 sps:$4 sm:$0xff]   ;;  %v21864_v7 = vld [vmem:[#allocation6 + $0x54] ss:$8 sps:$4 sm:$0xff]  }
 0x6ef   :  { %v12896_v19 = vmax.f32 %v19344_v45, 0.0  ;;  %v19346_v0 = vadd.f32 %v12384_v36, %v23277_v27  ;;  %v21862_v35 = vld [vmem:[#allocation6 + $0x50] ss:$8 sps:$4 sm:$0xff]   ;;  %v21870_v45 = vld [vmem:[#allocation6 + $0x64] ss:$8 sps:$4 sm:$0xff]  }
 0x6f0   :  { %v12909_v26 = vmax.f32 %v23490_v9, %v12895_v5  ;;  %v12902_v48 = vmax.f32 %v19345_v14, 0.0  ;;  %v21873_v28 = vld [vmem:[#allocation6 + $0x3e4] ss:$8 sps:$4 sm:$0xff]   ;;  %v21876_v5 = vld [vmem:[#allocation6 + $0x74] ss:$8 sps:$4 sm:$0xff]  }
 0x6f1   :  { %v12910_v59 = vmax.f32 %v23496_v16, %v12896_v19  ;;  %v12903_v12 = vmax.f32 %v19346_v0, 0.0  ;;  %12701 = vmatpush1.bf16.msra.mxu1 %v21824_v10  ;;  %19260 = vmatpush3.bf16.msra.mxu0 %v21827_v32  ;;  %v21832_v16 = vld [vmem:[#allocation6] ss:$8 sps:$4 sm:$0xff]   ;;  %v21879_v14 = vld [vmem:[#allocation6 + $0x3f4] ss:$8 sps:$4 sm:$0xff]  }
 0x6f2   :  { %v12916_v24 = vmax.f32 %v23502_v57, %v12902_v48  ;;  %12702 = vmatprep.subr.bf16.mxu1 %v21830_v1  ;;  %19261 = vmatprep.subr.bf16.mxu0 %v22842_v22  ;;  %v21838_v57 = vld [vmem:[#allocation6 + $0x10] ss:$8 sps:$4 sm:$0xff]   ;;  %v21868_v10 = vld [vmem:[#allocation6 + $0x60] ss:$8 sps:$4 sm:$0xff]   ;;  %v21882_v19 = vld [vmem:[#allocation6 + $0x84] ss:$8 sps:$4 sm:$0xff]  }
 0x6f3   :  { %v12917_v4 = vmax.f32 %v23508_v47, %v12903_v12  ;;  %v21841_v47 = vld [vmem:[#allocation6 + $0x390] ss:$8 sps:$4 sm:$0xff]   ;;  %v21871_v32 = vld [vmem:[#allocation6 + $0x3e0] ss:$8 sps:$4 sm:$0xff]   ;;  %v21885_v0 = vld [vmem:[#allocation6 + $0x404] ss:$8 sps:$4 sm:$0xff]  }
 0x6f4   :  { %v23636_v27 = vpack.c.bf16 %v12916_v24, %v12909_v26  ;;  %v21874_v36 = vld [vmem:[#allocation6 + $0x70] ss:$8 sps:$4 sm:$0xff]   ;;  %v21880_v26 = vld [vmem:[#allocation6 + $0x80] ss:$8 sps:$4 sm:$0xff]   ;;  %v21891_v12 = vld [vmem:[#allocation6 + $0x414] ss:$8 sps:$4 sm:$0xff]  }
 0x6f5   :  { %v23638_v9 = vpack.c.bf16 %v12917_v4, %v12910_v59  ;;  %12703 = vmatpush1.bf16.msra.mxu1 %v21828_v46  ;;  %19262 = vmatpush3.bf16.msra.mxu0 %v21831_v49  ;;  %v21877_v1 = vld [vmem:[#allocation6 + $0x3f0] ss:$8 sps:$4 sm:$0xff]   ;;  %v21883_v48 = vld [vmem:[#allocation6 + $0x400] ss:$8 sps:$4 sm:$0xff]   ;;  %v21888_v59 = vld [vmem:[#allocation6 + $0x94] ss:$8 sps:$4 sm:$0xff]  }
 0x6f6   :  { %13614 = vmatprep.subr.bf16.mxu0 %v21834_v50  ;;  %14463 = vmatprep.subr.bf16.mxu1 %v21837_v33  ;;  %v21886_v46 = vld [vmem:[#allocation6 + $0x90] ss:$8 sps:$4 sm:$0xff]   ;;  %v21894_v24 = vld [vmem:[#allocation6 + $0xa4] ss:$8 sps:$4 sm:$0xff]   ;;  %v21892_v33 = vld [vmem:[#allocation6 + $0xa0] ss:$8 sps:$4 sm:$0xff]  }
 0x6f7   :  { %v21889_v49 = vld [vmem:[#allocation6 + $0x410] ss:$8 sps:$4 sm:$0xff]   ;;  %v21897_v50 = vld [vmem:[#allocation6 + $0x424] ss:$8 sps:$4 sm:$0xff]   ;;  %v21895_v4 = vld [vmem:[#allocation6 + $0x420] ss:$8 sps:$4 sm:$0xff]  }
 0x6f8   :  { %12721 = vmatmul.mubr.bf16.vlgmr.msra.gmra.mrb[52].mxu1 %v23562_v11  ;;  %19264 = vmatmul.mubr.bf16.vlgmr.msra.gmra.mrb[52].mxu0 %v23562_v11  ;;  %v21855_v11 = vld [vmem:[#allocation6 + $0x3b4] ss:$8 sps:$4 sm:$0xff]  }
 0x6f9   :  { %13615 = vmatpush1.bf16.msra.mxu0 %v21832_v16  ;;  %13646 = vmatprep.mubr.bf16.mxu0 %v23638_v9  ;;  %v21900_v16 = vld [vmem:[#allocation6 + $0xb4] ss:$8 sps:$4 sm:$0xff]  }
 0x6fa   :  { %14464 = vmatpush1.bf16.msra.mxu1 %v21835_v60  ;;  %14495 = vmatprep.mubr.bf16.mxu1 %v23638_v9  ;;  %v21903_v60 = vld [vmem:[#allocation6 + $0x434] ss:$8 sps:$4 sm:$0xff]  }
 0x6fb   :  { %13616 = vmatprep.subr.bf16.mxu0 %v21840_v52  ;;  %14465 = vmatprep.subr.bf16.mxu1 %v21843_v58  ;;  %v21898_v52 = vld [vmem:[#allocation6 + $0xb0] ss:$8 sps:$4 sm:$0xff]  }
 0x6fc   :  { %v21901_v58 = vld [vmem:[#allocation6 + $0x430] ss:$8 sps:$4 sm:$0xff]  }
 0x6fd   :  { %13617 = vmatpush1.bf16.msra.mxu0 %v21838_v57  ;;  %v21906_v57 = vld [vmem:[#allocation6 + $0xc4] ss:$8 sps:$4 sm:$0xff]  }
 0x6fe   :  { %14466 = vmatpush1.bf16.msra.mxu1 %v21841_v47  ;;  %13618 = vmatprep.subr.bf16.mxu0 %v21846_v51  ;;  %v21909_v47 = vld [vmem:[#allocation6 + $0x444] ss:$8 sps:$4 sm:$0xff]   ;;  %v21904_v51 = vld [vmem:[#allocation6 + $0xc0] ss:$8 sps:$4 sm:$0xff]  }
 0x6ff   :  { %14467 = vmatprep.subr.bf16.mxu1 %v21849_v34  ;;  %v21907_v34 = vld [vmem:[#allocation6 + $0x440] ss:$8 sps:$4 sm:$0xff]  }
 0x701   :  { %13619 = vmatpush1.bf16.msra.mxu0 %v21844_v6  ;;  %v21912_v6 = vld [vmem:[#allocation6 + $0xd4] ss:$8 sps:$4 sm:$0xff]  }
 0x702   :  { %14468 = vmatpush1.bf16.msra.mxu1 %v21847_v40  ;;  %13620 = vmatprep.subr.bf16.mxu0 %v21852_v38  ;;  %v21915_v40 = vld [vmem:[#allocation6 + $0x454] ss:$8 sps:$4 sm:$0xff]   ;;  %v21910_v38 = vld [vmem:[#allocation6 + $0xd0] ss:$8 sps:$4 sm:$0xff]  }
 0x703   :  { %14469 = vmatprep.subr.bf16.mxu1 %v21855_v11  ;;  %v21913_v11 = vld [vmem:[#allocation6 + $0x450] ss:$8 sps:$4 sm:$0xff]  }
 0x705   :  { %13621 = vmatpush1.bf16.msra.mxu0 %v21850_v55  ;;  %v21918_v55 = vld [vmem:[#allocation6 + $0xe4] ss:$8 sps:$4 sm:$0xff]  }
 0x706   :  { %14470 = vmatpush1.bf16.msra.mxu1 %v21853_v15  ;;  %13622 = vmatprep.subr.bf16.mxu0 %v21858_v42  ;;  %v21921_v15 = vld [vmem:[#allocation6 + $0x464] ss:$8 sps:$4 sm:$0xff]   ;;  %v21916_v42 = vld [vmem:[#allocation6 + $0xe0] ss:$8 sps:$4 sm:$0xff]  }
 0x707   :  { %14471 = vmatprep.subr.bf16.mxu1 %v21861_v3  ;;  %v21919_v3 = vld [vmem:[#allocation6 + $0x460] ss:$8 sps:$4 sm:$0xff]  }
 0x709   :  { %13623 = vmatpush1.bf16.msra.mxu0 %v21856_v25  ;;  %v21924_v25 = vld [vmem:[#allocation6 + $0xf4] ss:$8 sps:$4 sm:$0xff]  }
 0x70a   :  { %14472 = vmatpush1.bf16.msra.mxu1 %v21859_v18  ;;  %13624 = vmatprep.subr.bf16.mxu0 %v21864_v7  ;;  %v21927_v18 = vld [vmem:[#allocation6 + $0x474] ss:$8 sps:$4 sm:$0xff]   ;;  %v21922_v7 = vld [vmem:[#allocation6 + $0xf0] ss:$8 sps:$4 sm:$0xff]  }
 0x70b   :  { %14473 = vmatprep.subr.bf16.mxu1 %v21867_v63  ;;  %v21925_v63 = vld [vmem:[#allocation6 + $0x470] ss:$8 sps:$4 sm:$0xff]  }
 0x70d   :  { %13625 = vmatpush1.bf16.msra.mxu0 %v21862_v35  ;;  %v21930_v35 = vld [vmem:[#allocation6 + $0x104] ss:$8 sps:$4 sm:$0xff]  }
 0x70e   :  { %14474 = vmatpush1.bf16.msra.mxu1 %v21865_v44  ;;  %13626 = vmatprep.subr.bf16.mxu0 %v21870_v45  ;;  %v21933_v44 = vld [vmem:[#allocation6 + $0x484] ss:$8 sps:$4 sm:$0xff]   ;;  %v21928_v45 = vld [vmem:[#allocation6 + $0x100] ss:$8 sps:$4 sm:$0xff]  }
 0x70f   :  { %14475 = vmatprep.subr.bf16.mxu1 %v21873_v28  ;;  %v21931_v28 = vld [vmem:[#allocation6 + $0x480] ss:$8 sps:$4 sm:$0xff]  }
 0x711   :  { %13627 = vmatpush1.bf16.msra.mxu0 %v21868_v10  ;;  %v21936_v10 = vld [vmem:[#allocation6 + $0x114] ss:$8 sps:$4 sm:$0xff]  }
 0x712   :  { %14476 = vmatpush1.bf16.msra.mxu1 %v21871_v32  ;;  %13628 = vmatprep.subr.bf16.mxu0 %v21876_v5  ;;  %v21939_v32 = vld [vmem:[#allocation6 + $0x494] ss:$8 sps:$4 sm:$0xff]   ;;  %v21934_v5 = vld [vmem:[#allocation6 + $0x110] ss:$8 sps:$4 sm:$0xff]  }
 0x713   :  { %14477 = vmatprep.subr.bf16.mxu1 %v21879_v14  ;;  %v21937_v14 = vld [vmem:[#allocation6 + $0x490] ss:$8 sps:$4 sm:$0xff]  }
 0x715   :  { %13629 = vmatpush1.bf16.msra.mxu0 %v21874_v36  ;;  %v21942_v36 = vld [vmem:[#allocation6 + $0x124] ss:$8 sps:$4 sm:$0xff]  }
 0x716   :  { %14478 = vmatpush1.bf16.msra.mxu1 %v21877_v1  ;;  %13630 = vmatprep.subr.bf16.mxu0 %v21882_v19  ;;  %v21945_v1 = vld [vmem:[#allocation6 + $0x4a4] ss:$8 sps:$4 sm:$0xff]   ;;  %v21940_v19 = vld [vmem:[#allocation6 + $0x120] ss:$8 sps:$4 sm:$0xff]  }
 0x717   :  { %14479 = vmatprep.subr.bf16.mxu1 %v21885_v0  ;;  %v21943_v0 = vld [vmem:[#allocation6 + $0x4a0] ss:$8 sps:$4 sm:$0xff]  }
 0x719   :  { %13631 = vmatpush1.bf16.msra.mxu0 %v21880_v26  ;;  %v21948_v26 = vld [vmem:[#allocation6 + $0x134] ss:$8 sps:$4 sm:$0xff]  }
 0x71a   :  { %14480 = vmatpush1.bf16.msra.mxu1 %v21883_v48  ;;  %13632 = vmatprep.subr.bf16.mxu0 %v21888_v59  ;;  %v21951_v48 = vld [vmem:[#allocation6 + $0x4b4] ss:$8 sps:$4 sm:$0xff]   ;;  %v21946_v59 = vld [vmem:[#allocation6 + $0x130] ss:$8 sps:$4 sm:$0xff]  }
 0x71b   :  { %14481 = vmatprep.subr.bf16.mxu1 %v21891_v12  ;;  %v21949_v12 = vld [vmem:[#allocation6 + $0x4b0] ss:$8 sps:$4 sm:$0xff]  }
 0x71d   :  { %13633 = vmatpush1.bf16.msra.mxu0 %v21886_v46  ;;  %v21954_v46 = vld [vmem:[#allocation6 + $0x144] ss:$8 sps:$4 sm:$0xff]  }
 0x71e   :  { %14482 = vmatpush1.bf16.msra.mxu1 %v21889_v49  ;;  %13634 = vmatprep.subr.bf16.mxu0 %v21894_v24  ;;  %v21957_v49 = vld [vmem:[#allocation6 + $0x4c4] ss:$8 sps:$4 sm:$0xff]   ;;  %v21952_v24 = vld [vmem:[#allocation6 + $0x140] ss:$8 sps:$4 sm:$0xff]  }
 0x71f   :  { %14483 = vmatprep.subr.bf16.mxu1 %v21897_v50  ;;  %v21955_v50 = vld [vmem:[#allocation6 + $0x4c0] ss:$8 sps:$4 sm:$0xff]  }
 0x721   :  { %13635 = vmatpush1.bf16.msra.mxu0 %v21892_v33  ;;  %v21960_v33 = vld [vmem:[#allocation6 + $0x154] ss:$8 sps:$4 sm:$0xff]  }
 0x722   :  { %14484 = vmatpush1.bf16.msra.mxu1 %v21895_v4  ;;  %13636 = vmatprep.subr.bf16.mxu0 %v21900_v16  ;;  %v21963_v4 = vld [vmem:[#allocation6 + $0x4d4] ss:$8 sps:$4 sm:$0xff]   ;;  %v21958_v16 = vld [vmem:[#allocation6 + $0x150] ss:$8 sps:$4 sm:$0xff]  }
 0x723   :  { %14485 = vmatprep.subr.bf16.mxu1 %v21903_v60  ;;  %v21961_v60 = vld [vmem:[#allocation6 + $0x4d0] ss:$8 sps:$4 sm:$0xff]  }
 0x725   :  { %13637 = vmatpush1.bf16.msra.mxu0 %v21898_v52  ;;  %v21966_v52 = vld [vmem:[#allocation6 + $0x164] ss:$8 sps:$4 sm:$0xff]  }
 0x726   :  { %14486 = vmatpush1.bf16.msra.mxu1 %v21901_v58  ;;  %13638 = vmatprep.subr.bf16.mxu0 %v21906_v57  ;;  %v21969_v57 = vld [vmem:[#allocation6 + $0x4e4] ss:$8 sps:$4 sm:$0xff]  }
 0x727   :  { %14487 = vmatprep.subr.bf16.mxu1 %v21909_v47 }
 0x729   :  { %13639 = vmatpush1.bf16.msra.mxu0 %v21904_v51 }
 0x72a   :  { %14488 = vmatpush1.bf16.msra.mxu1 %v21907_v34  ;;  %13640 = vmatprep.subr.bf16.mxu0 %v21912_v6 }
 0x72b   :  { %14489 = vmatprep.subr.bf16.mxu1 %v21915_v40  ;;  %v21964_v40 = vld [vmem:[#allocation6 + $0x160] ss:$8 sps:$4 sm:$0xff]  }
 0x72d   :  { %13641 = vmatpush1.bf16.msra.mxu0 %v21910_v38 }
 0x72e   :  { %14490 = vmatpush1.bf16.msra.mxu1 %v21913_v11  ;;  %13642 = vmatprep.subr.bf16.mxu0 %v21918_v55 }
 0x72f   :  { %14491 = vmatprep.subr.bf16.mxu1 %v21921_v15  ;;  %v21967_v15 = vld [vmem:[#allocation6 + $0x4e0] ss:$8 sps:$4 sm:$0xff]  }
 0x731   :  { %13643 = vmatpush1.bf16.msra.mxu0 %v21916_v42  ;;  %v21972_v42 = vld [vmem:[#allocation6 + $0x174] ss:$8 sps:$4 sm:$0xff]  }
 0x732   :  { %14492 = vmatpush1.bf16.msra.mxu1 %v21919_v3  ;;  %13644 = vmatprep.subr.bf16.mxu0 %v21924_v25 }
 0x733   :  { %14493 = vmatprep.subr.bf16.mxu1 %v21927_v18  ;;  %v21975_v18 = vld [vmem:[#allocation6 + $0x4f4] ss:$8 sps:$4 sm:$0xff]  }
 0x735   :  { %13645 = vmatpush1.bf16.msra.mxu0 %v21922_v7 }
 0x736   :  { %14494 = vmatpush1.bf16.msra.mxu1 %v21925_v63  ;;  %13657 = vmatprep.subr.bf16.mxu0 %v21930_v35 }
 0x737   :  { %14506 = vmatprep.subr.bf16.mxu1 %v21933_v44 }
 0x738   :  { %13647 = vmatmul.mubr.bf16.vlgmr.msra.gmra.mrb[56].mxu0 %v23636_v27 }
 0x739   :  { %14496 = vmatmul.mubr.bf16.vlgmr.msra.gmra.mrb[56].mxu1 %v23636_v27  ;;  %13658 = vmatpush1.bf16.msra.mxu0 %v21928_v45  ;;  %v21970_v45 = vld [vmem:[#allocation6 + $0x170] ss:$8 sps:$4 sm:$0xff]  }
 0x73a   :  { %14507 = vmatpush1.bf16.msra.mxu1 %v21931_v28  ;;  %13659 = vmatprep.subr.bf16.mxu0 %v21936_v10  ;;  %v21973_v28 = vld [vmem:[#allocation6 + $0x4f0] ss:$8 sps:$4 sm:$0xff]   ;;  %v21978_v10 = vld [vmem:[#allocation6 + $0x184] ss:$8 sps:$4 sm:$0xff]  }
 0x73b   :  { %14508 = vmatprep.subr.bf16.mxu1 %v21939_v32 }
 0x73d   :  { %13660 = vmatpush1.bf16.msra.mxu0 %v21934_v5  ;;  %v21981_v5 = vld [vmem:[#allocation6 + $0x504] ss:$8 sps:$4 sm:$0xff]  }
 0x73e   :  { %14509 = vmatpush1.bf16.msra.mxu1 %v21937_v14  ;;  %13661 = vmatprep.subr.bf16.mxu0 %v21942_v36  ;;  %v21984_v36 = vld [vmem:[#allocation6 + $0x194] ss:$8 sps:$4 sm:$0xff]  }
 0x73f   :  { %14510 = vmatprep.subr.bf16.mxu1 %v21945_v1  ;;  %v21985_v1 = vld [vmem:[#allocation6 + $0x510] ss:$8 sps:$4 sm:$0xff]  }
 0x741   :  { %13662 = vmatpush1.bf16.msra.mxu0 %v21940_v19  ;;  %v21990_v19 = vld [vmem:[#allocation6 + $0x1a4] ss:$8 sps:$4 sm:$0xff]  }
 0x742   :  { %14511 = vmatpush1.bf16.msra.mxu1 %v21943_v0  ;;  %13663 = vmatprep.subr.bf16.mxu0 %v21948_v26  ;;  %v21993_v0 = vld [vmem:[#allocation6 + $0x524] ss:$8 sps:$4 sm:$0xff]   ;;  %v21988_v26 = vld [vmem:[#allocation6 + $0x1a0] ss:$8 sps:$4 sm:$0xff]  }
 0x743   :  { %14512 = vmatprep.subr.bf16.mxu1 %v21951_v48  ;;  %v21991_v48 = vld [vmem:[#allocation6 + $0x520] ss:$8 sps:$4 sm:$0xff]  }
 0x745   :  { %13664 = vmatpush1.bf16.msra.mxu0 %v21946_v59  ;;  %v21996_v59 = vld [vmem:[#allocation6 + $0x1b4] ss:$8 sps:$4 sm:$0xff]  }
 0x746   :  { %14513 = vmatpush1.bf16.msra.mxu1 %v21949_v12  ;;  %13665 = vmatprep.subr.bf16.mxu0 %v21954_v46  ;;  %v21999_v12 = vld [vmem:[#allocation6 + $0x534] ss:$8 sps:$4 sm:$0xff]   ;;  %v21994_v46 = vld [vmem:[#allocation6 + $0x1b0] ss:$8 sps:$4 sm:$0xff]  }
 0x747   :  { %14514 = vmatprep.subr.bf16.mxu1 %v21957_v49  ;;  %v21997_v49 = vld [vmem:[#allocation6 + $0x530] ss:$8 sps:$4 sm:$0xff]  }
 0x749   :  { %13666 = vmatpush1.bf16.msra.mxu0 %v21952_v24  ;;  %v22002_v24 = vld [vmem:[#allocation6 + $0x1c4] ss:$8 sps:$4 sm:$0xff]  }
 0x74a   :  { %14515 = vmatpush1.bf16.msra.mxu1 %v21955_v50  ;;  %13667 = vmatprep.subr.bf16.mxu0 %v21960_v33  ;;  %v22005_v50 = vld [vmem:[#allocation6 + $0x544] ss:$8 sps:$4 sm:$0xff]   ;;  %v22000_v33 = vld [vmem:[#allocation6 + $0x1c0] ss:$8 sps:$4 sm:$0xff]  }
 0x74b   :  { %v12550_v58 = vpop.f32.mrb[36].mxu0  ;;  %14516 = vmatprep.subr.bf16.mxu1 %v21963_v4  ;;  %v22003_v4 = vld [vmem:[#allocation6 + $0x540] ss:$8 sps:$4 sm:$0xff]  }
 0x74c   :  { %v19347_v47 = vadd.f32 %v12550_v58, %v23317_v61  ;;  %v12552_v51 = vpop.f32.mrb[37].mxu0  ;;  %v22009_v58 = vld [vmem:[#allocation6 + $0x550] ss:$8 sps:$4 sm:$0xff]  }
 0x74d   :  { %v19348_v34 = vadd.f32 %v12552_v51, %v23320_v2  ;;  %v12554_v6 = vpop.f32.mrb[38].mxu0  ;;  %13668 = vmatpush1.bf16.msra.mxu0 %v21958_v16  ;;  %v22008_v16 = vld [vmem:[#allocation6 + $0x1d4] ss:$8 sps:$4 sm:$0xff]  }
 0x74e   :  { %v12897_v38 = vmax.f32 %v19347_v47, 0.0  ;;  %v19349_v11 = vadd.f32 %v12554_v6, %v23317_v61  ;;  %14517 = vmatpush1.bf16.msra.mxu1 %v21961_v60  ;;  %v12556_v55 = vpop.f32.mrb[39].mxu0  ;;  %13669 = vmatprep.subr.bf16.mxu0 %v21966_v52  ;;  %v22011_v60 = vld [vmem:[#allocation6 + $0x554] ss:$8 sps:$4 sm:$0xff]   ;;  %v22006_v52 = vld [vmem:[#allocation6 + $0x1d0] ss:$8 sps:$4 sm:$0xff]  }
 0x74f   :  { %v12898_v3 = vmax.f32 %v19348_v34, 0.0  ;;  %v19350_v25 = vadd.f32 %v12556_v55, %v23320_v2  ;;  %14518 = vmatprep.subr.bf16.mxu1 %v21969_v57  ;;  %v22014_v57 = vld [vmem:[#allocation6 + $0x1e4] ss:$8 sps:$4 sm:$0xff]   ;;  %v22012_v6 = vld [vmem:[#allocation6 + $0x1e0] ss:$8 sps:$4 sm:$0xff]  }
 0x750   :  { %v12911_v7 = vmax.f32 %v23493_v29, %v12897_v38  ;;  %v12904_v63 = vmax.f32 %v19349_v11, 0.0  ;;  %v21976_v29 = vld [vmem:[#allocation6 + $0x180] ss:$8 sps:$4 sm:$0xff]   ;;  %v22017_v47 = vld [vmem:[#allocation6 + $0x564] ss:$8 sps:$4 sm:$0xff]  }
 0x751   :  { %v12912_v35 = vmax.f32 %v23499_v56, %v12898_v3  ;;  %v12905_v44 = vmax.f32 %v19350_v25, 0.0  ;;  %13670 = vmatpush1.bf16.msra.mxu0 %v21964_v40  ;;  %v21979_v56 = vld [vmem:[#allocation6 + $0x500] ss:$8 sps:$4 sm:$0xff]   ;;  %v22020_v55 = vld [vmem:[#allocation6 + $0x1f4] ss:$8 sps:$4 sm:$0xff]  }
 0x752   :  { %v12918_v61 = vmax.f32 %v23505_v54, %v12904_v63  ;;  %14519 = vmatpush1.bf16.msra.mxu1 %v21967_v15  ;;  %13671 = vmatprep.subr.bf16.mxu0 %v21972_v42  ;;  %v21987_v54 = vld [vmem:[#allocation6 + $0x514] ss:$8 sps:$4 sm:$0xff]   ;;  %v22015_v11 = vld [vmem:[#allocation6 + $0x560] ss:$8 sps:$4 sm:$0xff]   ;;  %v22018_v25 = vld [vmem:[#allocation6 + $0x1f0] ss:$8 sps:$4 sm:$0xff]  }
 0x753   :  { %v12919_v32 = vmax.f32 %v23511_v13, %v12905_v44  ;;  %14520 = vmatprep.subr.bf16.mxu1 %v21975_v18  ;;  %v21982_v13 = vld [vmem:[#allocation6 + $0x190] ss:$8 sps:$4 sm:$0xff]   ;;  %v22023_v42 = vld [vmem:[#allocation6 + $0x574] ss:$8 sps:$4 sm:$0xff]   ;;  %v22029_v63 = vld [vmem:[#allocation6 + $0x584] ss:$8 sps:$4 sm:$0xff]  }
 0x754   :  { %v23654_v2 = vpack.c.bf16 %v12918_v61, %v12911_v7  ;;  %v22021_v18 = vld [vmem:[#allocation6 + $0x570] ss:$8 sps:$4 sm:$0xff]   ;;  %v22026_v7 = vld [vmem:[#allocation6 + $0x204] ss:$8 sps:$4 sm:$0xff]   ;;  %v22027_v44 = vld [vmem:[#allocation6 + $0x580] ss:$8 sps:$4 sm:$0xff]  }
 0x755   :  { %v23656_v14 = vpack.c.bf16 %v12919_v32, %v12912_v35  ;;  %13672 = vmatpush1.bf16.msra.mxu0 %v21970_v45  ;;  %v22024_v35 = vld [vmem:[#allocation6 + $0x200] ss:$8 sps:$4 sm:$0xff]   ;;  %v22032_v45 = vld [vmem:[#allocation6 + $0x214] ss:$8 sps:$4 sm:$0xff]   ;;  %v22038_v32 = vld [vmem:[#allocation6 + $0x224] ss:$8 sps:$4 sm:$0xff]  }
 0x756   :  { %14521 = vmatpush1.bf16.msra.mxu1 %v21973_v28  ;;  %13673 = vmatprep.subr.bf16.mxu0 %v21978_v10  ;;  %v22035_v61 = vld [vmem:[#allocation6 + $0x594] ss:$8 sps:$4 sm:$0xff]   ;;  %v22030_v28 = vld [vmem:[#allocation6 + $0x210] ss:$8 sps:$4 sm:$0xff]  }
 0x757   :  { %13689 = vmatprep.mubr.bf16.mxu0 %v23656_v14  ;;  %14538 = vmatprep.mubr.bf16.mxu1 %v23656_v14  ;;  %v22033_v10 = vld [vmem:[#allocation6 + $0x590] ss:$8 sps:$4 sm:$0xff]  }
 0x758   :  { %14522 = vmatprep.subr.bf16.mxu1 %v21981_v5  ;;  %v22041_v5 = vld [vmem:[#allocation6 + $0x5a4] ss:$8 sps:$4 sm:$0xff]  }
 0x759   :  { %13674 = vmatpush1.bf16.msra.mxu0 %v21976_v29  ;;  %v22036_v29 = vld [vmem:[#allocation6 + $0x220] ss:$8 sps:$4 sm:$0xff]  }
 0x75a   :  { %14523 = vmatpush1.bf16.msra.mxu1 %v21979_v56  ;;  %13675 = vmatprep.subr.bf16.mxu0 %v21984_v36  ;;  %v22039_v56 = vld [vmem:[#allocation6 + $0x5a0] ss:$8 sps:$4 sm:$0xff]   ;;  %v22044_v36 = vld [vmem:[#allocation6 + $0x234] ss:$8 sps:$4 sm:$0xff]  }
 0x75b   :  { %14524 = vmatprep.subr.bf16.mxu1 %v21987_v54  ;;  %v22047_v54 = vld [vmem:[#allocation6 + $0x5b4] ss:$8 sps:$4 sm:$0xff]  }
 0x75d   :  { %13676 = vmatpush1.bf16.msra.mxu0 %v21982_v13  ;;  %v22042_v13 = vld [vmem:[#allocation6 + $0x230] ss:$8 sps:$4 sm:$0xff]  }
 0x75e   :  { %14525 = vmatpush1.bf16.msra.mxu1 %v21985_v1  ;;  %13677 = vmatprep.subr.bf16.mxu0 %v21990_v19  ;;  %v22045_v1 = vld [vmem:[#allocation6 + $0x5b0] ss:$8 sps:$4 sm:$0xff]   ;;  %v22050_v19 = vld [vmem:[#allocation6 + $0x244] ss:$8 sps:$4 sm:$0xff]  }
 0x75f   :  { %14526 = vmatprep.subr.bf16.mxu1 %v21993_v0  ;;  %v22053_v0 = vld [vmem:[#allocation6 + $0x5c4] ss:$8 sps:$4 sm:$0xff]  }
 0x761   :  { %13678 = vmatpush1.bf16.msra.mxu0 %v21988_v26  ;;  %v22048_v26 = vld [vmem:[#allocation6 + $0x240] ss:$8 sps:$4 sm:$0xff]  }
 0x762   :  { %14527 = vmatpush1.bf16.msra.mxu1 %v21991_v48  ;;  %13679 = vmatprep.subr.bf16.mxu0 %v21996_v59  ;;  %v22051_v48 = vld [vmem:[#allocation6 + $0x5c0] ss:$8 sps:$4 sm:$0xff]   ;;  %v22056_v59 = vld [vmem:[#allocation6 + $0x254] ss:$8 sps:$4 sm:$0xff]  }
 0x763   :  { %14528 = vmatprep.subr.bf16.mxu1 %v21999_v12  ;;  %v22059_v12 = vld [vmem:[#allocation6 + $0x5d4] ss:$8 sps:$4 sm:$0xff]  }
 0x765   :  { %13680 = vmatpush1.bf16.msra.mxu0 %v21994_v46  ;;  %v22054_v46 = vld [vmem:[#allocation6 + $0x250] ss:$8 sps:$4 sm:$0xff]  }
 0x766   :  { %14529 = vmatpush1.bf16.msra.mxu1 %v21997_v49  ;;  %13681 = vmatprep.subr.bf16.mxu0 %v22002_v24  ;;  %v22057_v49 = vld [vmem:[#allocation6 + $0x5d0] ss:$8 sps:$4 sm:$0xff]   ;;  %v22062_v24 = vld [vmem:[#allocation6 + $0x264] ss:$8 sps:$4 sm:$0xff]  }
 0x767   :  { %14530 = vmatprep.subr.bf16.mxu1 %v22005_v50 }
 0x769   :  { %13682 = vmatpush1.bf16.msra.mxu0 %v22000_v33 }
 0x76a   :  { %14531 = vmatpush1.bf16.msra.mxu1 %v22003_v4  ;;  %13683 = vmatprep.subr.bf16.mxu0 %v22008_v16  ;;  %v22065_v4 = vld [vmem:[#allocation6 + $0x5e4] ss:$8 sps:$4 sm:$0xff]  }
 0x76b   :  { %14532 = vmatprep.subr.bf16.mxu1 %v22011_v60  ;;  %v19088_v51 = vpop.f32.mrb[40].mxu0 }
 0x76c   :  { %v19089_v34 = vpop.f32.mrb[41].mxu0 }
 0x76d   :  { %13684 = vmatpush1.bf16.msra.mxu0 %v22006_v52  ;;  %v23660_v40 = vadd.f32 %v19089_v34, %v19088_v51  ;;  %v19091_v38 = vpop.f32.mrb[42].mxu0  ;;  %v22063_v51 = vld [vmem:[#allocation6 + $0x5e0] ss:$8 sps:$4 sm:$0xff]   ;;  %v22068_v34 = vld [vmem:[#allocation6 + $0x274] ss:$8 sps:$4 sm:$0xff]  }
 0x76e   :  { %14533 = vmatpush1.bf16.msra.mxu1 %v22009_v58  ;;  %13685 = vmatprep.subr.bf16.mxu0 %v22014_v57  ;;  %v19092_v15 = vpop.f32.mrb[43].mxu0  ;;  %v22060_v57 = vld [vmem:[#allocation6 + $0x260] ss:$8 sps:$4 sm:$0xff]  }
 0x76f   :  { %14534 = vmatprep.subr.bf16.mxu1 %v22017_v47  ;;  %v19093_v3 = vadd.f32 %v19092_v15, %v19091_v38  ;;  %v12766_v50 = vadd.f32 %v23660_v40, %v23169_v43  ;;  %v22071_v40 = vld [vmem:[#allocation6 + $0x5f4] ss:$8 sps:$4 sm:$0xff]   ;;  %v22074_v15 = vld [vmem:[#allocation6 + $0x284] ss:$8 sps:$4 sm:$0xff]  }
 0x771   :  { %13686 = vmatpush1.bf16.msra.mxu0 %v22012_v6  ;;  %v12769_v60 = vadd.f32 %v19093_v3, %v23169_v43  ;;  %v22069_v43 = vld [vmem:[#allocation6 + $0x5f0] ss:$8 sps:$4 sm:$0xff]   ;;  %v22072_v3 = vld [vmem:[#allocation6 + $0x280] ss:$8 sps:$4 sm:$0xff]  }
 0x772   :  { %14535 = vmatpush1.bf16.msra.mxu1 %v22015_v11  ;;  %13687 = vmatprep.subr.bf16.mxu0 %v22020_v55  ;;  %v22066_v55 = vld [vmem:[#allocation6 + $0x270] ss:$8 sps:$4 sm:$0xff]  }
 0x773   :  { %14536 = vmatprep.subr.bf16.mxu1 %v22023_v42  ;;  %v22077_v42 = vld [vmem:[#allocation6 + $0x604] ss:$8 sps:$4 sm:$0xff]  }
 0x775   :  { %13688 = vmatpush1.bf16.msra.mxu0 %v22018_v25  ;;  %v22075_v25 = vld [vmem:[#allocation6 + $0x600] ss:$8 sps:$4 sm:$0xff]  }
 0x776   :  { %14537 = vmatpush1.bf16.msra.mxu1 %v22021_v18  ;;  %13700 = vmatprep.subr.bf16.mxu0 %v22026_v7  ;;  %v22080_v18 = vld [vmem:[#allocation6 + $0x294] ss:$8 sps:$4 sm:$0xff]  }
 0x777   :  { %14549 = vmatprep.subr.bf16.mxu1 %v22029_v63  ;;  %v22083_v7 = vld [vmem:[#allocation6 + $0x614] ss:$8 sps:$4 sm:$0xff]   ;;  %v22078_v63 = vld [vmem:[#allocation6 + $0x290] ss:$8 sps:$4 sm:$0xff]  }
 0x778   :  { %13690 = vmatmul.mubr.bf16.vlgmr.msra.gmra.mrb[56].mxu0 %v23654_v2 }
 0x779   :  { %14539 = vmatmul.mubr.bf16.vlgmr.msra.gmra.mrb[56].mxu1 %v23654_v2  ;;  %13701 = vmatpush1.bf16.msra.mxu0 %v22024_v35  ;;  %v22081_v35 = vld [vmem:[#allocation6 + $0x610] ss:$8 sps:$4 sm:$0xff]  }
 0x77a   :  { %14550 = vmatpush1.bf16.msra.mxu1 %v22027_v44  ;;  %13702 = vmatprep.subr.bf16.mxu0 %v22032_v45  ;;  %v22086_v44 = vld [vmem:[#allocation6 + $0x2a4] ss:$8 sps:$4 sm:$0xff]  }
 0x77b   :  { %14551 = vmatprep.subr.bf16.mxu1 %v22035_v61  ;;  %v22089_v45 = vld [vmem:[#allocation6 + $0x624] ss:$8 sps:$4 sm:$0xff]   ;;  %v22084_v61 = vld [vmem:[#allocation6 + $0x2a0] ss:$8 sps:$4 sm:$0xff]  }
 0x77d   :  { %13703 = vmatpush1.bf16.msra.mxu0 %v22030_v28  ;;  %v22087_v28 = vld [vmem:[#allocation6 + $0x620] ss:$8 sps:$4 sm:$0xff]  }
 0x77e   :  { %14552 = vmatpush1.bf16.msra.mxu1 %v22033_v10  ;;  %13704 = vmatprep.subr.bf16.mxu0 %v22038_v32  ;;  %v22092_v10 = vld [vmem:[#allocation6 + $0x2b4] ss:$8 sps:$4 sm:$0xff]  }
 0x77f   :  { %14553 = vmatprep.subr.bf16.mxu1 %v22041_v5  ;;  %v22095_v32 = vld [vmem:[#allocation6 + $0x634] ss:$8 sps:$4 sm:$0xff]   ;;  %v22090_v5 = vld [vmem:[#allocation6 + $0x2b0] ss:$8 sps:$4 sm:$0xff]  }
 0x781   :  { %13705 = vmatpush1.bf16.msra.mxu0 %v22036_v29  ;;  %v22093_v29 = vld [vmem:[#allocation6 + $0x630] ss:$8 sps:$4 sm:$0xff]  }
 0x782   :  { %14554 = vmatpush1.bf16.msra.mxu1 %v22039_v56  ;;  %13706 = vmatprep.subr.bf16.mxu0 %v22044_v36  ;;  %v22098_v56 = vld [vmem:[#allocation6 + $0x2c4] ss:$8 sps:$4 sm:$0xff]  }
 0x783   :  { %14555 = vmatprep.subr.bf16.mxu1 %v22047_v54  ;;  %v22101_v36 = vld [vmem:[#allocation6 + $0x644] ss:$8 sps:$4 sm:$0xff]   ;;  %v22096_v54 = vld [vmem:[#allocation6 + $0x2c0] ss:$8 sps:$4 sm:$0xff]  }
 0x785   :  { %13707 = vmatpush1.bf16.msra.mxu0 %v22042_v13  ;;  %v22099_v13 = vld [vmem:[#allocation6 + $0x640] ss:$8 sps:$4 sm:$0xff]  }
 0x786   :  { %14556 = vmatpush1.bf16.msra.mxu1 %v22045_v1  ;;  %13708 = vmatprep.subr.bf16.mxu0 %v22050_v19  ;;  %v22104_v1 = vld [vmem:[#allocation6 + $0x2d4] ss:$8 sps:$4 sm:$0xff]  }
 0x787   :  { %14557 = vmatprep.subr.bf16.mxu1 %v22053_v0  ;;  %v22107_v19 = vld [vmem:[#allocation6 + $0x654] ss:$8 sps:$4 sm:$0xff]   ;;  %v22102_v0 = vld [vmem:[#allocation6 + $0x2d0] ss:$8 sps:$4 sm:$0xff]  }
 0x789   :  { %13709 = vmatpush1.bf16.msra.mxu0 %v22048_v26  ;;  %v22105_v26 = vld [vmem:[#allocation6 + $0x650] ss:$8 sps:$4 sm:$0xff]  }
 0x78a   :  { %14558 = vmatpush1.bf16.msra.mxu1 %v22051_v48  ;;  %13710 = vmatprep.subr.bf16.mxu0 %v22056_v59  ;;  %v22110_v48 = vld [vmem:[#allocation6 + $0x2e4] ss:$8 sps:$4 sm:$0xff]  }
 0x78b   :  { %v19110_v33 = vpop.f32.mrb[44].mxu0  ;;  %14559 = vmatprep.subr.bf16.mxu1 %v22059_v12  ;;  %v22113_v12 = vld [vmem:[#allocation6 + $0x664] ss:$8 sps:$4 sm:$0xff]  }
 0x78c   :  { %v19111_v16 = vpop.f32.mrb[45].mxu0 }
 0x78d   :  { %v19112_v52 = vadd.f32 %v19111_v16, %v19110_v33  ;;  %v19113_v58 = vpop.f32.mrb[46].mxu0  ;;  %13711 = vmatpush1.bf16.msra.mxu0 %v22054_v46  ;;  %v22116_v16 = vld [vmem:[#allocation6 + $0x2f4] ss:$8 sps:$4 sm:$0xff]  }
 0x78e   :  { %v19114_v47 = vpop.f32.mrb[47].mxu0  ;;  %14560 = vmatpush1.bf16.msra.mxu1 %v22057_v49  ;;  %13712 = vmatprep.subr.bf16.mxu0 %v22062_v24 }
 0x78f   :  { %v23667_v6 = vadd.f32 %v19112_v52, %v12766_v50  ;;  %v19115_v38 = vadd.f32 %v19114_v47, %v19113_v58  ;;  %14561 = vmatprep.subr.bf16.mxu1 %v22065_v4  ;;  %v22108_v50 = vld [vmem:[#allocation6 + $0x2e0] ss:$8 sps:$4 sm:$0xff]   ;;  %v22119_v58 = vld [vmem:[#allocation6 + $0x674] ss:$8 sps:$4 sm:$0xff]   ;;  %v22114_v47 = vld [vmem:[#allocation6 + $0x2f0] ss:$8 sps:$4 sm:$0xff]  }
 0x790   :  { %v22111_v4 = vld [vmem:[#allocation6 + $0x660] ss:$8 sps:$4 sm:$0xff]  }
 0x791   :  { %v23669_v11 = vadd.f32 %v19115_v38, %v12769_v60  ;;  %13713 = vmatpush1.bf16.msra.mxu0 %v22060_v57  ;;  %v22125_v38 = vld [vmem:[#allocation6 + $0x684] ss:$8 sps:$4 sm:$0xff]  }
 0x792   :  { %14562 = vmatpush1.bf16.msra.mxu1 %v22063_v51  ;;  %13714 = vmatprep.subr.bf16.mxu0 %v22068_v34  ;;  %v22117_v51 = vld [vmem:[#allocation6 + $0x670] ss:$8 sps:$4 sm:$0xff]   ;;  %v22122_v34 = vld [vmem:[#allocation6 + $0x304] ss:$8 sps:$4 sm:$0xff]  }
 0x793   :  { %14563 = vmatprep.subr.bf16.mxu1 %v22071_v40 }
 0x795   :  { %13715 = vmatpush1.bf16.msra.mxu0 %v22066_v55 }
 0x796   :  { %14564 = vmatpush1.bf16.msra.mxu1 %v22069_v43  ;;  %13716 = vmatprep.subr.bf16.mxu0 %v22074_v15 }
 0x797   :  { %14565 = vmatprep.subr.bf16.mxu1 %v22077_v42 }
 0x799   :  { %13717 = vmatpush1.bf16.msra.mxu0 %v22072_v3 }
 0x79a   :  { %14566 = vmatpush1.bf16.msra.mxu1 %v22075_v25  ;;  %13718 = vmatprep.subr.bf16.mxu0 %v22080_v18 }
 0x79b   :  { %14567 = vmatprep.subr.bf16.mxu1 %v22083_v7 }
 0x79d   :  { %13719 = vmatpush1.bf16.msra.mxu0 %v22078_v63 }
 0x79e   :  { %14568 = vmatpush1.bf16.msra.mxu1 %v22081_v35  ;;  %13720 = vmatprep.subr.bf16.mxu0 %v22086_v44 }
 0x79f   :  { %14569 = vmatprep.subr.bf16.mxu1 %v22089_v45 }
 0x7a1   :  { %13721 = vmatpush1.bf16.msra.mxu0 %v22084_v61 }
 0x7a2   :  { %14570 = vmatpush1.bf16.msra.mxu1 %v22087_v28  ;;  %13722 = vmatprep.subr.bf16.mxu0 %v22092_v10 }
 0x7a3   :  { %14571 = vmatprep.subr.bf16.mxu1 %v22095_v32 }
 0x7a5   :  { %13723 = vmatpush1.bf16.msra.mxu0 %v22090_v5 }
 0x7a6   :  { %14572 = vmatpush1.bf16.msra.mxu1 %v22093_v29  ;;  %13724 = vmatprep.subr.bf16.mxu0 %v22098_v56 }
 0x7a7   :  { %14573 = vmatprep.subr.bf16.mxu1 %v22101_v36 }
 0x7a9   :  { %13725 = vmatpush1.bf16.msra.mxu0 %v22096_v54 }
 0x7aa   :  { %14574 = vmatpush1.bf16.msra.mxu1 %v22099_v13  ;;  %13726 = vmatprep.subr.bf16.mxu0 %v22104_v1 }
 0x7ab   :  { %v19132_v59 = vpop.f32.mrb[48].mxu0  ;;  %14575 = vmatprep.subr.bf16.mxu1 %v22107_v19 }
 0x7ac   :  { %v19133_v46 = vpop.f32.mrb[49].mxu0 }
 0x7ad   :  { %v19134_v49 = vadd.f32 %v19133_v46, %v19132_v59  ;;  %v19135_v24 = vpop.f32.mrb[50].mxu0  ;;  %13727 = vmatpush1.bf16.msra.mxu0 %v22102_v0  ;;  %v22123_v0 = vld [vmem:[#allocation6 + $0x680] ss:$8 sps:$4 sm:$0xff]   ;;  %v22143_v46 = vld [vmem:[#allocation6 + $0x6b4] ss:$8 sps:$4 sm:$0xff]  }
 0x7ae   :  { %v19136_v33 = vpop.f32.mrb[51].mxu0  ;;  %14576 = vmatpush1.bf16.msra.mxu1 %v22105_v26  ;;  %13728 = vmatprep.subr.bf16.mxu0 %v22110_v48  ;;  %v22131_v26 = vld [vmem:[#allocation6 + $0x694] ss:$8 sps:$4 sm:$0xff]   ;;  %v22132_v48 = vld [vmem:[#allocation6 + $0x320] ss:$8 sps:$4 sm:$0xff]  }
 0x7af   :  { %v19137_v60 = vadd.f32 %v19136_v33, %v19135_v24  ;;  %v12848_v52 = vadd.f32 %v19134_v49, %v23667_v6  ;;  %14577 = vmatprep.subr.bf16.mxu1 %v22113_v12  ;;  %v22135_v59 = vld [vmem:[#allocation6 + $0x6a0] ss:$8 sps:$4 sm:$0xff]   ;;  %v22140_v12 = vld [vmem:[#allocation6 + $0x334] ss:$8 sps:$4 sm:$0xff]   ;;  %v22138_v49 = vld [vmem:[#allocation6 + $0x330] ss:$8 sps:$4 sm:$0xff]  }
 0x7b0   :  { %v22141_v24 = vld [vmem:[#allocation6 + $0x6b0] ss:$8 sps:$4 sm:$0xff]   ;;  %v22149_v33 = vld [vmem:[#allocation6 + $0x6c4] ss:$8 sps:$4 sm:$0xff]  }
 0x7b1   :  { %v12851_v57 = vadd.f32 %v19137_v60, %v23669_v11  ;;  %13729 = vmatpush1.bf16.msra.mxu0 %v22108_v50  ;;  %v22146_v50 = vld [vmem:[#allocation6 + $0x344] ss:$8 sps:$4 sm:$0xff]   ;;  %v22152_v60 = vld [vmem:[#allocation6 + $0x354] ss:$8 sps:$4 sm:$0xff]  }
 0x7b2   :  { %14578 = vmatpush1.bf16.msra.mxu1 %v22111_v4  ;;  %13730 = vmatprep.subr.bf16.mxu0 %v22116_v16  ;;  %v22144_v4 = vld [vmem:[#allocation6 + $0x340] ss:$8 sps:$4 sm:$0xff]  }
 0x7b3   :  { %14579 = vmatprep.subr.bf16.mxu1 %v22119_v58  ;;  %v22147_v16 = vld [vmem:[#allocation6 + $0x6c0] ss:$8 sps:$4 sm:$0xff]   ;;  %v22150_v58 = vld [vmem:[#allocation6 + $0x350] ss:$8 sps:$4 sm:$0xff]  }
 0x7b5   :  { %13731 = vmatpush1.bf16.msra.mxu0 %v22114_v47  ;;  %v22158_v47 = vld [vmem:[#allocation6 + $0x364] ss:$8 sps:$4 sm:$0xff]  }
 0x7b6   :  { %14580 = vmatpush1.bf16.msra.mxu1 %v22117_v51  ;;  %13743 = vmatprep.subr.bf16.mxu0 %v22122_v34  ;;  %v22161_v51 = vld [vmem:[#allocation6 + $0x6e4] ss:$8 sps:$4 sm:$0xff]   ;;  %v22156_v34 = vld [vmem:[#allocation6 + $0x360] ss:$8 sps:$4 sm:$0xff]  }
 0x7b7   :  { %14592 = vmatprep.subr.bf16.mxu1 %v22125_v38  ;;  %v22159_v38 = vld [vmem:[#allocation6 + $0x6e0] ss:$8 sps:$4 sm:$0xff]  }
 0x7cb   :  { %v12722_v40 = vpop.f32.mrb[52].mxu1  ;;  %v12888_v55 = vpop.f32.mrb[52].mxu0 }
 0x7cc   :  { %v19351_v6 = vadd.f32 %v12722_v40, %v23373_v37  ;;  %v12889_v43 = vadd.f32 %v12888_v55, %v12848_v52  ;;  %v12724_v15 = vpop.f32.mrb[53].mxu1  ;;  %v19265_v42 = vpop.f32.mrb[53].mxu0  ;;  %v22155_v52 = vld [vmem:[#allocation6 + $0x6d4] ss:$8 sps:$4 sm:$0xff]  }
 0x7cd   :  { %v19352_v11 = vadd.f32 %v12724_v15, %v23375_v21  ;;  %v12726_v3 = vpop.f32.mrb[54].mxu1  ;;  %v12891_v25 = vpop.f32.mrb[54].mxu0  ;;  %v22164_v40 = vld [vmem:[#allocation6 + $0x374] ss:$8 sps:$4 sm:$0xff]   ;;  %v22170_v15 = vld [vmem:[#allocation6 + $0x704] ss:$8 sps:$4 sm:$0xff]  }
 0x7ce   :  { %v12899_v18 = vmax.f32 %v19351_v6, 0.0  ;;  %v12901_v7 = vmax.f32 %v12889_v43, 0.0  ;;  %v19353_v63 = vadd.f32 %v12726_v3, %v23373_v37  ;;  %v12892_v35 = vadd.f32 %v12891_v25, %v12851_v57  ;;  %v12728_v44 = vpop.f32.mrb[55].mxu1  ;;  %v19266_v45 = vpop.f32.mrb[55].mxu0  ;;  %v22153_v57 = vld [vmem:[#allocation6 + $0x6d0] ss:$8 sps:$4 sm:$0xff]  }
 0x7cf   :  { %v12900_v61 = vmax.f32 %v19352_v11, 0.0  ;;  %v19354_v28 = vadd.f32 %v12728_v44, %v23375_v21  ;;  %v22167_v55 = vld [vmem:[#allocation6 + $0x6f4] ss:$8 sps:$4 sm:$0xff]   ;;  %v22162_v6 = vld [vmem:[#allocation6 + $0x370] ss:$8 sps:$4 sm:$0xff]  }
 0x7d0   :  { %v12913_v10 = vmax.f32 %v23592_v30, %v12899_v18  ;;  %v12915_v32 = vmax.f32 %v23554_v53, %v12901_v7  ;;  %v12906_v5 = vmax.f32 %v19353_v63, 0.0  ;;  %v12908_v29 = vmax.f32 %v12892_v35, 0.0  ;;  %v22120_v30 = vld [vmem:[#allocation6 + $0x300] ss:$8 sps:$4 sm:$0xff]   ;;  %v22128_v53 = vld [vmem:[#allocation6 + $0x314] ss:$8 sps:$4 sm:$0xff]  }
 0x7d1   :  { %v12914_v56 = vmax.f32 %v23595_v39, %v12900_v61  ;;  %v12907_v36 = vmax.f32 %v19354_v28, 0.0  ;;  %v22129_v39 = vld [vmem:[#allocation6 + $0x690] ss:$8 sps:$4 sm:$0xff]   ;;  %v22173_v42 = vld [vmem:[#allocation6 + $0xa84] ss:$8 sps:$4 sm:$0xff]  }
 0x7d2   :  { %v12920_v54 = vmax.f32 %v23598_v20, %v12906_v5  ;;  %v12922_v13 = vmax.f32 %v23557_v23, %v12908_v29  ;;  %v22126_v23 = vld [vmem:[#allocation6 + $0x310] ss:$8 sps:$4 sm:$0xff]   ;;  %v22134_v20 = vld [vmem:[#allocation6 + $0x324] ss:$8 sps:$4 sm:$0xff]   ;;  %v22168_v11 = vld [vmem:[#allocation6 + $0x700] ss:$8 sps:$4 sm:$0xff]  }
 0x7d3   :  { %v12921_v37 = vmax.f32 %v23601_v62, %v12907_v36  ;;  %v22137_v62 = vld [vmem:[#allocation6 + $0x6a4] ss:$8 sps:$4 sm:$0xff]   ;;  %v22165_v43 = vld [vmem:[#allocation6 + $0x6f0] ss:$8 sps:$4 sm:$0xff]   ;;  %v22171_v3 = vld [vmem:[#allocation6 + $0xa80] ss:$8 sps:$4 sm:$0xff]  }
 0x7d4   :  { %v23683_v1 = vpack.c.bf16 %v12920_v54, %v12913_v10  ;;  %v23685_v19 = vpack.c.bf16 %v12922_v13, %v12915_v32  ;;  %v22176_v25 = vld [vmem:[#allocation6 + $0x714] ss:$8 sps:$4 sm:$0xff]   ;;  %v22174_v7 = vld [vmem:[#allocation6 + $0x710] ss:$8 sps:$4 sm:$0xff]   ;;  %v22182_v35 = vld [vmem:[#allocation6 + $0x724] ss:$8 sps:$4 sm:$0xff]  }
 0x7d5   :  { %v23687_v21 = vpack.c.bf16 %v12921_v37, %v12914_v56  ;;  %v22179_v18 = vld [vmem:[#allocation6 + $0xa94] ss:$8 sps:$4 sm:$0xff]   ;;  %v22177_v63 = vld [vmem:[#allocation6 + $0xa90] ss:$8 sps:$4 sm:$0xff]   ;;  %v22185_v44 = vld [vmem:[#allocation6 + $0xaa4] ss:$8 sps:$4 sm:$0xff]  }
 0x7d6   :  { %v22180_v45 = vld [vmem:[#allocation6 + $0x720] ss:$8 sps:$4 sm:$0xff]   ;;  %v22188_v28 = vld [vmem:[#allocation6 + $0x734] ss:$8 sps:$4 sm:$0xff]   ;;  %v22186_v32 = vld [vmem:[#allocation6 + $0x730] ss:$8 sps:$4 sm:$0xff]  }
 0x7d7   :  { %13732 = vmatprep.mubr.bf16.mxu0 %v23687_v21  ;;  %14581 = vmatprep.mubr.bf16.mxu1 %v23687_v21  ;;  %v22183_v61 = vld [vmem:[#allocation6 + $0xaa0] ss:$8 sps:$4 sm:$0xff]   ;;  %v22191_v10 = vld [vmem:[#allocation6 + $0xab4] ss:$8 sps:$4 sm:$0xff]   ;;  %v22189_v5 = vld [vmem:[#allocation6 + $0xab0] ss:$8 sps:$4 sm:$0xff]  }
 0x7d8   :  { %13733 = vmatmul.mubr.bf16.vlgmr.msra.gmra.mrb[56].mxu0 %v23683_v1  ;;  %14582 = vmatmul.mubr.bf16.vlgmr.msra.gmra.mrb[56].mxu1 %v23683_v1  ;;  %v22194_v29 = vld [vmem:[#allocation6 + $0x744] ss:$8 sps:$4 sm:$0xff]   ;;  %v22192_v56 = vld [vmem:[#allocation6 + $0x740] ss:$8 sps:$4 sm:$0xff]   ;;  %v22200_v54 = vld [vmem:[#allocation6 + $0x754] ss:$8 sps:$4 sm:$0xff]  }
 0x7d9   :  { %13744 = vmatpush1.bf16.msra.mxu0 %v22120_v30  ;;  %14593 = vmatpush1.bf16.msra.mxu1 %v22123_v0  ;;  %v22195_v36 = vld [vmem:[#allocation6 + $0xac0] ss:$8 sps:$4 sm:$0xff]   ;;  %v22203_v13 = vld [vmem:[#allocation6 + $0xad4] ss:$8 sps:$4 sm:$0xff]   ;;  %v22198_v37 = vld [vmem:[#allocation6 + $0x750] ss:$8 sps:$4 sm:$0xff]  }
 0x7da   :  { %13745 = vmatprep.subr.bf16.mxu0 %v22128_v53  ;;  %14594 = vmatprep.subr.bf16.mxu1 %v22131_v26  ;;  %v22201_v30 = vld [vmem:[#allocation6 + $0xad0] ss:$8 sps:$4 sm:$0xff]   ;;  %v22206_v0 = vld [vmem:[#allocation6 + $0x764] ss:$8 sps:$4 sm:$0xff]   ;;  %v22204_v26 = vld [vmem:[#allocation6 + $0x760] ss:$8 sps:$4 sm:$0xff]  }
 0x7db   :  { %13775 = vmatprep.mubr.bf16.mxu0 %v22841_v17  ;;  %14624 = vmatprep.mubr.bf16.mxu1 %v22841_v17  ;;  %v22209_v53 = vld [vmem:[#allocation6 + $0xae4] ss:$8 sps:$4 sm:$0xff]  }
 0x7dd   :  { %13746 = vmatpush1.bf16.msra.mxu0 %v22126_v23  ;;  %14595 = vmatpush1.bf16.msra.mxu1 %v22129_v39  ;;  %v22207_v23 = vld [vmem:[#allocation6 + $0xae0] ss:$8 sps:$4 sm:$0xff]   ;;  %v22212_v39 = vld [vmem:[#allocation6 + $0x774] ss:$8 sps:$4 sm:$0xff]  }
 0x7de   :  { %13747 = vmatprep.subr.bf16.mxu0 %v22134_v20  ;;  %14596 = vmatprep.subr.bf16.mxu1 %v22137_v62  ;;  %v22215_v20 = vld [vmem:[#allocation6 + $0xaf4] ss:$8 sps:$4 sm:$0xff]   ;;  %v22210_v62 = vld [vmem:[#allocation6 + $0x770] ss:$8 sps:$4 sm:$0xff]  }
 0x7e1   :  { %13748 = vmatpush1.bf16.msra.mxu0 %v22132_v48  ;;  %14597 = vmatpush1.bf16.msra.mxu1 %v22135_v59  ;;  %v22213_v48 = vld [vmem:[#allocation6 + $0xaf0] ss:$8 sps:$4 sm:$0xff]   ;;  %v22218_v59 = vld [vmem:[#allocation6 + $0x784] ss:$8 sps:$4 sm:$0xff]  }
 0x7e2   :  { %13749 = vmatprep.subr.bf16.mxu0 %v22140_v12  ;;  %14598 = vmatprep.subr.bf16.mxu1 %v22143_v46  ;;  %v22221_v12 = vld [vmem:[#allocation6 + $0xb04] ss:$8 sps:$4 sm:$0xff]   ;;  %v22216_v46 = vld [vmem:[#allocation6 + $0x780] ss:$8 sps:$4 sm:$0xff]  }
 0x7e5   :  { %13750 = vmatpush1.bf16.msra.mxu0 %v22138_v49  ;;  %14599 = vmatpush1.bf16.msra.mxu1 %v22141_v24  ;;  %v22219_v49 = vld [vmem:[#allocation6 + $0xb00] ss:$8 sps:$4 sm:$0xff]   ;;  %v22224_v24 = vld [vmem:[#allocation6 + $0x794] ss:$8 sps:$4 sm:$0xff]  }
 0x7e6   :  { %13751 = vmatprep.subr.bf16.mxu0 %v22146_v50  ;;  %14600 = vmatprep.subr.bf16.mxu1 %v22149_v33  ;;  %v22227_v50 = vld [vmem:[#allocation6 + $0xb14] ss:$8 sps:$4 sm:$0xff]   ;;  %v22222_v33 = vld [vmem:[#allocation6 + $0x790] ss:$8 sps:$4 sm:$0xff]  }
 0x7e9   :  { %13752 = vmatpush1.bf16.msra.mxu0 %v22144_v4  ;;  %14601 = vmatpush1.bf16.msra.mxu1 %v22147_v16  ;;  %v22225_v4 = vld [vmem:[#allocation6 + $0xb10] ss:$8 sps:$4 sm:$0xff]   ;;  %v22230_v16 = vld [vmem:[#allocation6 + $0x7a4] ss:$8 sps:$4 sm:$0xff]  }
 0x7ea   :  { %13753 = vmatprep.subr.bf16.mxu0 %v22152_v60  ;;  %14602 = vmatprep.subr.bf16.mxu1 %v22155_v52  ;;  %v22233_v60 = vld [vmem:[#allocation6 + $0xb24] ss:$8 sps:$4 sm:$0xff]   ;;  %v22228_v52 = vld [vmem:[#allocation6 + $0x7a0] ss:$8 sps:$4 sm:$0xff]  }
 0x7ed   :  { %13754 = vmatpush1.bf16.msra.mxu0 %v22150_v58  ;;  %14603 = vmatpush1.bf16.msra.mxu1 %v22153_v57  ;;  %v22231_v58 = vld [vmem:[#allocation6 + $0xb20] ss:$8 sps:$4 sm:$0xff]   ;;  %v22236_v57 = vld [vmem:[#allocation6 + $0x7b4] ss:$8 sps:$4 sm:$0xff]  }
 0x7ee   :  { %13755 = vmatprep.subr.bf16.mxu0 %v22158_v47  ;;  %14604 = vmatprep.subr.bf16.mxu1 %v22161_v51  ;;  %v22239_v47 = vld [vmem:[#allocation6 + $0xb34] ss:$8 sps:$4 sm:$0xff]   ;;  %v22234_v51 = vld [vmem:[#allocation6 + $0x7b0] ss:$8 sps:$4 sm:$0xff]  }
 0x7f1   :  { %13756 = vmatpush1.bf16.msra.mxu0 %v22156_v34  ;;  %14605 = vmatpush1.bf16.msra.mxu1 %v22159_v38  ;;  %v22237_v34 = vld [vmem:[#allocation6 + $0xb30] ss:$8 sps:$4 sm:$0xff]   ;;  %v22242_v38 = vld [vmem:[#allocation6 + $0x7c4] ss:$8 sps:$4 sm:$0xff]  }
 0x7f2   :  { %13757 = vmatprep.subr.bf16.mxu0 %v22164_v40  ;;  %14606 = vmatprep.subr.bf16.mxu1 %v22167_v55  ;;  %v22245_v40 = vld [vmem:[#allocation6 + $0xb44] ss:$8 sps:$4 sm:$0xff]   ;;  %v22240_v55 = vld [vmem:[#allocation6 + $0x7c0] ss:$8 sps:$4 sm:$0xff]  }
 0x7f5   :  { %13758 = vmatpush1.bf16.msra.mxu0 %v22162_v6  ;;  %14607 = vmatpush1.bf16.msra.mxu1 %v22165_v43  ;;  %v22243_v6 = vld [vmem:[#allocation6 + $0xb40] ss:$8 sps:$4 sm:$0xff]   ;;  %v22248_v43 = vld [vmem:[#allocation6 + $0x7d4] ss:$8 sps:$4 sm:$0xff]  }
 0x7f6   :  { %15316 = vmatprep.subr.bf16.mxu0 %v22170_v15  ;;  %16169 = vmatprep.subr.bf16.mxu1 %v22173_v42  ;;  %v22251_v15 = vld [vmem:[#allocation6 + $0xb54] ss:$8 sps:$4 sm:$0xff]   ;;  %v22246_v42 = vld [vmem:[#allocation6 + $0x7d0] ss:$8 sps:$4 sm:$0xff]  }
 0x7f8   :  { %13776 = vmatmul.mubr.bf16.vlgmr.msra.gmra.mrb[56].mxu0 %v23685_v19  ;;  %14625 = vmatmul.mubr.bf16.vlgmr.msra.gmra.mrb[56].mxu1 %v23685_v19 }
 0x7f9   :  { %15317 = vmatpush1.bf16.msra.mxu0 %v22168_v11  ;;  %15348 = vmatprep.mubr.bf16.mxu0 %v23638_v9  ;;  %v22249_v11 = vld [vmem:[#allocation6 + $0xb50] ss:$8 sps:$4 sm:$0xff]  }
 0x7fa   :  { %16170 = vmatpush1.bf16.msra.mxu1 %v22171_v3  ;;  %16201 = vmatprep.mubr.bf16.mxu1 %v23638_v9  ;;  %v22197_v9 = vld [vmem:[#allocation6 + $0xac4] ss:$8 sps:$4 sm:$0xff]  }
 0x7fb   :  { %15318 = vmatprep.subr.bf16.mxu0 %v22176_v25  ;;  %16171 = vmatprep.subr.bf16.mxu1 %v22179_v18  ;;  %v22254_v3 = vld [vmem:[#allocation6 + $0x7e4] ss:$8 sps:$4 sm:$0xff]   ;;  %v22252_v18 = vld [vmem:[#allocation6 + $0x7e0] ss:$8 sps:$4 sm:$0xff]  }
 0x7fc   :  { %v22257_v25 = vld [vmem:[#allocation6 + $0xb64] ss:$8 sps:$4 sm:$0xff]  }
 0x7fd   :  { %15319 = vmatpush1.bf16.msra.mxu0 %v22174_v7  ;;  %v22255_v7 = vld [vmem:[#allocation6 + $0xb60] ss:$8 sps:$4 sm:$0xff]  }
 0x7fe   :  { %16172 = vmatpush1.bf16.msra.mxu1 %v22177_v63  ;;  %15320 = vmatprep.subr.bf16.mxu0 %v22182_v35  ;;  %v22260_v63 = vld [vmem:[#allocation6 + $0x7f4] ss:$8 sps:$4 sm:$0xff]  }
 0x7ff   :  { %16173 = vmatprep.subr.bf16.mxu1 %v22185_v44  ;;  %v22263_v35 = vld [vmem:[#allocation6 + $0xb74] ss:$8 sps:$4 sm:$0xff]   ;;  %v22258_v44 = vld [vmem:[#allocation6 + $0x7f0] ss:$8 sps:$4 sm:$0xff]  }
 0x801   :  { %15321 = vmatpush1.bf16.msra.mxu0 %v22180_v45  ;;  %v22261_v45 = vld [vmem:[#allocation6 + $0xb70] ss:$8 sps:$4 sm:$0xff]  }
 0x802   :  { %16174 = vmatpush1.bf16.msra.mxu1 %v22183_v61  ;;  %15322 = vmatprep.subr.bf16.mxu0 %v22188_v28  ;;  %v22266_v61 = vld [vmem:[#allocation6 + $0x804] ss:$8 sps:$4 sm:$0xff]  }
 0x803   :  { %16175 = vmatprep.subr.bf16.mxu1 %v22191_v10  ;;  %v22269_v28 = vld [vmem:[#allocation6 + $0xb84] ss:$8 sps:$4 sm:$0xff]   ;;  %v22264_v10 = vld [vmem:[#allocation6 + $0x800] ss:$8 sps:$4 sm:$0xff]  }
 0x805   :  { %15323 = vmatpush1.bf16.msra.mxu0 %v22186_v32  ;;  %v22267_v32 = vld [vmem:[#allocation6 + $0xb80] ss:$8 sps:$4 sm:$0xff]  }
 0x806   :  { %16176 = vmatpush1.bf16.msra.mxu1 %v22189_v5  ;;  %15324 = vmatprep.subr.bf16.mxu0 %v22194_v29  ;;  %v22272_v5 = vld [vmem:[#allocation6 + $0x814] ss:$8 sps:$4 sm:$0xff]  }
 0x807   :  { %16177 = vmatprep.subr.bf16.mxu1 %v22197_v9  ;;  %v22275_v29 = vld [vmem:[#allocation6 + $0xb94] ss:$8 sps:$4 sm:$0xff]   ;;  %v22270_v9 = vld [vmem:[#allocation6 + $0x810] ss:$8 sps:$4 sm:$0xff]  }
 0x809   :  { %15325 = vmatpush1.bf16.msra.mxu0 %v22192_v56  ;;  %v22273_v56 = vld [vmem:[#allocation6 + $0xb90] ss:$8 sps:$4 sm:$0xff]  }
 0x80a   :  { %16178 = vmatpush1.bf16.msra.mxu1 %v22195_v36  ;;  %15326 = vmatprep.subr.bf16.mxu0 %v22200_v54  ;;  %v22278_v36 = vld [vmem:[#allocation6 + $0x824] ss:$8 sps:$4 sm:$0xff]  }
 0x80b   :  { %16179 = vmatprep.subr.bf16.mxu1 %v22203_v13  ;;  %v22281_v54 = vld [vmem:[#allocation6 + $0xba4] ss:$8 sps:$4 sm:$0xff]   ;;  %v22276_v13 = vld [vmem:[#allocation6 + $0x820] ss:$8 sps:$4 sm:$0xff]  }
 0x80d   :  { %15327 = vmatpush1.bf16.msra.mxu0 %v22198_v37  ;;  %v22279_v37 = vld [vmem:[#allocation6 + $0xba0] ss:$8 sps:$4 sm:$0xff]  }
 0x80e   :  { %16180 = vmatpush1.bf16.msra.mxu1 %v22201_v30  ;;  %15328 = vmatprep.subr.bf16.mxu0 %v22206_v0  ;;  %v22284_v30 = vld [vmem:[#allocation6 + $0x834] ss:$8 sps:$4 sm:$0xff]   ;;  %v22282_v0 = vld [vmem:[#allocation6 + $0x830] ss:$8 sps:$4 sm:$0xff]  }
 0x80f   :  { %16181 = vmatprep.subr.bf16.mxu1 %v22209_v53  ;;  %v22285_v53 = vld [vmem:[#allocation6 + $0xbb0] ss:$8 sps:$4 sm:$0xff]  }
 0x811   :  { %15329 = vmatpush1.bf16.msra.mxu0 %v22204_v26  ;;  %v22290_v26 = vld [vmem:[#allocation6 + $0x844] ss:$8 sps:$4 sm:$0xff]  }
 0x812   :  { %16182 = vmatpush1.bf16.msra.mxu1 %v22207_v23  ;;  %15330 = vmatprep.subr.bf16.mxu0 %v22212_v39  ;;  %v22293_v23 = vld [vmem:[#allocation6 + $0xbc4] ss:$8 sps:$4 sm:$0xff]   ;;  %v22291_v39 = vld [vmem:[#allocation6 + $0xbc0] ss:$8 sps:$4 sm:$0xff]  }
 0x813   :  { %16183 = vmatprep.subr.bf16.mxu1 %v22215_v20  ;;  %v22296_v20 = vld [vmem:[#allocation6 + $0x854] ss:$8 sps:$4 sm:$0xff]  }
 0x815   :  { %15331 = vmatpush1.bf16.msra.mxu0 %v22210_v62  ;;  %v22299_v62 = vld [vmem:[#allocation6 + $0xbd4] ss:$8 sps:$4 sm:$0xff]  }
 0x816   :  { %16184 = vmatpush1.bf16.msra.mxu1 %v22213_v48  ;;  %15332 = vmatprep.subr.bf16.mxu0 %v22218_v59  ;;  %v22294_v48 = vld [vmem:[#allocation6 + $0x850] ss:$8 sps:$4 sm:$0xff]  }
 0x817   :  { %16185 = vmatprep.subr.bf16.mxu1 %v22221_v12  ;;  %v22297_v59 = vld [vmem:[#allocation6 + $0xbd0] ss:$8 sps:$4 sm:$0xff]   ;;  %v22302_v12 = vld [vmem:[#allocation6 + $0x864] ss:$8 sps:$4 sm:$0xff]  }
 0x819   :  { %15333 = vmatpush1.bf16.msra.mxu0 %v22216_v46  ;;  %v22305_v46 = vld [vmem:[#allocation6 + $0xbe4] ss:$8 sps:$4 sm:$0xff]  }
 0x81a   :  { %16186 = vmatpush1.bf16.msra.mxu1 %v22219_v49  ;;  %15334 = vmatprep.subr.bf16.mxu0 %v22224_v24  ;;  %v22300_v49 = vld [vmem:[#allocation6 + $0x860] ss:$8 sps:$4 sm:$0xff]  }
 0x81b   :  { %16187 = vmatprep.subr.bf16.mxu1 %v22227_v50  ;;  %v22303_v24 = vld [vmem:[#allocation6 + $0xbe0] ss:$8 sps:$4 sm:$0xff]   ;;  %v22308_v50 = vld [vmem:[#allocation6 + $0x874] ss:$8 sps:$4 sm:$0xff]  }
 0x81d   :  { %15335 = vmatpush1.bf16.msra.mxu0 %v22222_v33  ;;  %v22311_v33 = vld [vmem:[#allocation6 + $0xbf4] ss:$8 sps:$4 sm:$0xff]  }
 0x81e   :  { %16188 = vmatpush1.bf16.msra.mxu1 %v22225_v4  ;;  %15336 = vmatprep.subr.bf16.mxu0 %v22230_v16  ;;  %v22306_v4 = vld [vmem:[#allocation6 + $0x870] ss:$8 sps:$4 sm:$0xff]  }
 0x81f   :  { %16189 = vmatprep.subr.bf16.mxu1 %v22233_v60  ;;  %v22309_v16 = vld [vmem:[#allocation6 + $0xbf0] ss:$8 sps:$4 sm:$0xff]   ;;  %v22314_v60 = vld [vmem:[#allocation6 + $0x884] ss:$8 sps:$4 sm:$0xff]  }
 0x821   :  { %15337 = vmatpush1.bf16.msra.mxu0 %v22228_v52  ;;  %v22317_v52 = vld [vmem:[#allocation6 + $0xc04] ss:$8 sps:$4 sm:$0xff]  }
 0x822   :  { %16190 = vmatpush1.bf16.msra.mxu1 %v22231_v58  ;;  %15338 = vmatprep.subr.bf16.mxu0 %v22236_v57  ;;  %v22312_v58 = vld [vmem:[#allocation6 + $0x880] ss:$8 sps:$4 sm:$0xff]  }
 0x823   :  { %16191 = vmatprep.subr.bf16.mxu1 %v22239_v47  ;;  %v22315_v57 = vld [vmem:[#allocation6 + $0xc00] ss:$8 sps:$4 sm:$0xff]   ;;  %v22320_v47 = vld [vmem:[#allocation6 + $0x894] ss:$8 sps:$4 sm:$0xff]  }
 0x825   :  { %15339 = vmatpush1.bf16.msra.mxu0 %v22234_v51  ;;  %v22323_v51 = vld [vmem:[#allocation6 + $0xc14] ss:$8 sps:$4 sm:$0xff]  }
 0x826   :  { %16192 = vmatpush1.bf16.msra.mxu1 %v22237_v34  ;;  %15340 = vmatprep.subr.bf16.mxu0 %v22242_v38  ;;  %v22318_v34 = vld [vmem:[#allocation6 + $0x890] ss:$8 sps:$4 sm:$0xff]  }
 0x827   :  { %16193 = vmatprep.subr.bf16.mxu1 %v22245_v40  ;;  %v22321_v38 = vld [vmem:[#allocation6 + $0xc10] ss:$8 sps:$4 sm:$0xff]   ;;  %v22326_v40 = vld [vmem:[#allocation6 + $0x8a4] ss:$8 sps:$4 sm:$0xff]  }
 0x829   :  { %15341 = vmatpush1.bf16.msra.mxu0 %v22240_v55  ;;  %v22329_v55 = vld [vmem:[#allocation6 + $0xc24] ss:$8 sps:$4 sm:$0xff]  }
 0x82a   :  { %16194 = vmatpush1.bf16.msra.mxu1 %v22243_v6  ;;  %15342 = vmatprep.subr.bf16.mxu0 %v22248_v43  ;;  %v22324_v6 = vld [vmem:[#allocation6 + $0x8a0] ss:$8 sps:$4 sm:$0xff]  }
 0x82b   :  { %16195 = vmatprep.subr.bf16.mxu1 %v22251_v15  ;;  %v22327_v43 = vld [vmem:[#allocation6 + $0xc20] ss:$8 sps:$4 sm:$0xff]   ;;  %v22332_v15 = vld [vmem:[#allocation6 + $0x8b4] ss:$8 sps:$4 sm:$0xff]  }
 0x82d   :  { %15343 = vmatpush1.bf16.msra.mxu0 %v22246_v42  ;;  %v22335_v42 = vld [vmem:[#allocation6 + $0xc34] ss:$8 sps:$4 sm:$0xff]  }
 0x82e   :  { %16196 = vmatpush1.bf16.msra.mxu1 %v22249_v11  ;;  %15344 = vmatprep.subr.bf16.mxu0 %v22254_v3  ;;  %v22330_v11 = vld [vmem:[#allocation6 + $0x8b0] ss:$8 sps:$4 sm:$0xff]  }
 0x82f   :  { %16197 = vmatprep.subr.bf16.mxu1 %v22257_v25  ;;  %v22333_v3 = vld [vmem:[#allocation6 + $0xc30] ss:$8 sps:$4 sm:$0xff]   ;;  %v22338_v25 = vld [vmem:[#allocation6 + $0x8c4] ss:$8 sps:$4 sm:$0xff]  }
 0x831   :  { %15345 = vmatpush1.bf16.msra.mxu0 %v22252_v18  ;;  %v22341_v18 = vld [vmem:[#allocation6 + $0xc44] ss:$8 sps:$4 sm:$0xff]  }
 0x832   :  { %16198 = vmatpush1.bf16.msra.mxu1 %v22255_v7  ;;  %15346 = vmatprep.subr.bf16.mxu0 %v22260_v63  ;;  %v22336_v7 = vld [vmem:[#allocation6 + $0x8c0] ss:$8 sps:$4 sm:$0xff]  }
 0x833   :  { %16199 = vmatprep.subr.bf16.mxu1 %v22263_v35  ;;  %v22339_v63 = vld [vmem:[#allocation6 + $0xc40] ss:$8 sps:$4 sm:$0xff]   ;;  %v22344_v35 = vld [vmem:[#allocation6 + $0x8d4] ss:$8 sps:$4 sm:$0xff]  }
 0x835   :  { %15347 = vmatpush1.bf16.msra.mxu0 %v22258_v44  ;;  %v22347_v44 = vld [vmem:[#allocation6 + $0xc54] ss:$8 sps:$4 sm:$0xff]  }
 0x836   :  { %16200 = vmatpush1.bf16.msra.mxu1 %v22261_v45  ;;  %15359 = vmatprep.subr.bf16.mxu0 %v22266_v61  ;;  %v22342_v45 = vld [vmem:[#allocation6 + $0x8d0] ss:$8 sps:$4 sm:$0xff]  }
 0x837   :  { %16212 = vmatprep.subr.bf16.mxu1 %v22269_v28  ;;  %v22345_v61 = vld [vmem:[#allocation6 + $0xc50] ss:$8 sps:$4 sm:$0xff]   ;;  %v22350_v28 = vld [vmem:[#allocation6 + $0x8e4] ss:$8 sps:$4 sm:$0xff]  }
 0x838   :  { %15349 = vmatmul.mubr.bf16.vlgmr.msra.gmra.mrb[60].mxu0 %v23636_v27 }
 0x839   :  { %16202 = vmatmul.mubr.bf16.vlgmr.msra.gmra.mrb[60].mxu1 %v23636_v27  ;;  %15360 = vmatpush1.bf16.msra.mxu0 %v22264_v10  ;;  %v22287_v27 = vld [vmem:[#allocation6 + $0xbb4] ss:$8 sps:$4 sm:$0xff]   ;;  %v22353_v10 = vld [vmem:[#allocation6 + $0xc64] ss:$8 sps:$4 sm:$0xff]  }
 0x83a   :  { %15391 = vmatprep.mubr.bf16.mxu0 %v23656_v14  ;;  %16213 = vmatpush1.bf16.msra.mxu1 %v22267_v32  ;;  %v22348_v32 = vld [vmem:[#allocation6 + $0x8e0] ss:$8 sps:$4 sm:$0xff]  }
 0x83b   :  { %16244 = vmatprep.mubr.bf16.mxu1 %v23656_v14  ;;  %15361 = vmatprep.subr.bf16.mxu0 %v22272_v5  ;;  %v22288_v14 = vld [vmem:[#allocation6 + $0x840] ss:$8 sps:$4 sm:$0xff]  }
 0x83c   :  { %16214 = vmatprep.subr.bf16.mxu1 %v22275_v29  ;;  %v22351_v5 = vld [vmem:[#allocation6 + $0xc60] ss:$8 sps:$4 sm:$0xff]   ;;  %v22356_v29 = vld [vmem:[#allocation6 + $0x8f4] ss:$8 sps:$4 sm:$0xff]  }
 0x83d   :  { %15362 = vmatpush1.bf16.msra.mxu0 %v22270_v9  ;;  %v22359_v9 = vld [vmem:[#allocation6 + $0xc74] ss:$8 sps:$4 sm:$0xff]  }
 0x83e   :  { %16215 = vmatpush1.bf16.msra.mxu1 %v22273_v56  ;;  %15363 = vmatprep.subr.bf16.mxu0 %v22278_v36  ;;  %v22354_v56 = vld [vmem:[#allocation6 + $0x8f0] ss:$8 sps:$4 sm:$0xff]  }
 0x83f   :  { %16216 = vmatprep.subr.bf16.mxu1 %v22281_v54  ;;  %v22357_v36 = vld [vmem:[#allocation6 + $0xc70] ss:$8 sps:$4 sm:$0xff]   ;;  %v22362_v54 = vld [vmem:[#allocation6 + $0x904] ss:$8 sps:$4 sm:$0xff]  }
 0x841   :  { %15364 = vmatpush1.bf16.msra.mxu0 %v22276_v13  ;;  %v22365_v13 = vld [vmem:[#allocation6 + $0xc84] ss:$8 sps:$4 sm:$0xff]  }
 0x842   :  { %16217 = vmatpush1.bf16.msra.mxu1 %v22279_v37  ;;  %15365 = vmatprep.subr.bf16.mxu0 %v22284_v30  ;;  %v22360_v37 = vld [vmem:[#allocation6 + $0x900] ss:$8 sps:$4 sm:$0xff]  }
 0x843   :  { %16218 = vmatprep.subr.bf16.mxu1 %v22287_v27  ;;  %v22363_v30 = vld [vmem:[#allocation6 + $0xc80] ss:$8 sps:$4 sm:$0xff]   ;;  %v22368_v27 = vld [vmem:[#allocation6 + $0x914] ss:$8 sps:$4 sm:$0xff]  }
 0x845   :  { %15366 = vmatpush1.bf16.msra.mxu0 %v22282_v0  ;;  %v22371_v0 = vld [vmem:[#allocation6 + $0xc94] ss:$8 sps:$4 sm:$0xff]  }
 0x846   :  { %16219 = vmatpush1.bf16.msra.mxu1 %v22285_v53  ;;  %15367 = vmatprep.subr.bf16.mxu0 %v22290_v26  ;;  %v22366_v53 = vld [vmem:[#allocation6 + $0x910] ss:$8 sps:$4 sm:$0xff]  }
 0x847   :  { %16220 = vmatprep.subr.bf16.mxu1 %v22293_v23  ;;  %v22369_v26 = vld [vmem:[#allocation6 + $0xc90] ss:$8 sps:$4 sm:$0xff]   ;;  %v22374_v23 = vld [vmem:[#allocation6 + $0x924] ss:$8 sps:$4 sm:$0xff]  }
 0x849   :  { %15368 = vmatpush1.bf16.msra.mxu0 %v22288_v14  ;;  %v22377_v14 = vld [vmem:[#allocation6 + $0xca4] ss:$8 sps:$4 sm:$0xff]  }
 0x84a   :  { %16221 = vmatpush1.bf16.msra.mxu1 %v22291_v39  ;;  %15369 = vmatprep.subr.bf16.mxu0 %v22296_v20  ;;  %v22372_v39 = vld [vmem:[#allocation6 + $0x920] ss:$8 sps:$4 sm:$0xff]  }
 0x84b   :  { %16222 = vmatprep.subr.bf16.mxu1 %v22299_v62  ;;  %v22375_v20 = vld [vmem:[#allocation6 + $0xca0] ss:$8 sps:$4 sm:$0xff]   ;;  %v22380_v62 = vld [vmem:[#allocation6 + $0x934] ss:$8 sps:$4 sm:$0xff]  }
 0x84d   :  { %15370 = vmatpush1.bf16.msra.mxu0 %v22294_v48  ;;  %v22378_v48 = vld [vmem:[#allocation6 + $0x930] ss:$8 sps:$4 sm:$0xff]  }
 0x84e   :  { %16223 = vmatpush1.bf16.msra.mxu1 %v22297_v59  ;;  %15371 = vmatprep.subr.bf16.mxu0 %v22302_v12  ;;  %v22381_v59 = vld [vmem:[#allocation6 + $0xcb0] ss:$8 sps:$4 sm:$0xff]   ;;  %v22386_v12 = vld [vmem:[#allocation6 + $0x944] ss:$8 sps:$4 sm:$0xff]  }
 0x84f   :  { %16224 = vmatprep.subr.bf16.mxu1 %v22305_v46  ;;  %v22389_v46 = vld [vmem:[#allocation6 + $0xcc4] ss:$8 sps:$4 sm:$0xff]  }
 0x851   :  { %15372 = vmatpush1.bf16.msra.mxu0 %v22300_v49  ;;  %v22387_v49 = vld [vmem:[#allocation6 + $0xcc0] ss:$8 sps:$4 sm:$0xff]  }
 0x852   :  { %16225 = vmatpush1.bf16.msra.mxu1 %v22303_v24  ;;  %15373 = vmatprep.subr.bf16.mxu0 %v22308_v50  ;;  %v22392_v24 = vld [vmem:[#allocation6 + $0x954] ss:$8 sps:$4 sm:$0xff]  }
 0x853   :  { %16226 = vmatprep.subr.bf16.mxu1 %v22311_v33  ;;  %v22395_v50 = vld [vmem:[#allocation6 + $0xcd4] ss:$8 sps:$4 sm:$0xff]   ;;  %v22390_v33 = vld [vmem:[#allocation6 + $0x950] ss:$8 sps:$4 sm:$0xff]  }
 0x855   :  { %15374 = vmatpush1.bf16.msra.mxu0 %v22306_v4  ;;  %v22393_v4 = vld [vmem:[#allocation6 + $0xcd0] ss:$8 sps:$4 sm:$0xff]  }
 0x856   :  { %16227 = vmatpush1.bf16.msra.mxu1 %v22309_v16  ;;  %15375 = vmatprep.subr.bf16.mxu0 %v22314_v60  ;;  %v22398_v16 = vld [vmem:[#allocation6 + $0x964] ss:$8 sps:$4 sm:$0xff]  }
 0x857   :  { %16228 = vmatprep.subr.bf16.mxu1 %v22317_v52  ;;  %v22401_v60 = vld [vmem:[#allocation6 + $0xce4] ss:$8 sps:$4 sm:$0xff]   ;;  %v22396_v52 = vld [vmem:[#allocation6 + $0x960] ss:$8 sps:$4 sm:$0xff]  }
 0x859   :  { %15376 = vmatpush1.bf16.msra.mxu0 %v22312_v58  ;;  %v22399_v58 = vld [vmem:[#allocation6 + $0xce0] ss:$8 sps:$4 sm:$0xff]  }
 0x85a   :  { %16229 = vmatpush1.bf16.msra.mxu1 %v22315_v57  ;;  %15377 = vmatprep.subr.bf16.mxu0 %v22320_v47  ;;  %v22404_v57 = vld [vmem:[#allocation6 + $0x974] ss:$8 sps:$4 sm:$0xff]  }
 0x85b   :  { %16230 = vmatprep.subr.bf16.mxu1 %v22323_v51  ;;  %v22407_v47 = vld [vmem:[#allocation6 + $0xcf4] ss:$8 sps:$4 sm:$0xff]   ;;  %v22402_v51 = vld [vmem:[#allocation6 + $0x970] ss:$8 sps:$4 sm:$0xff]  }
 0x85d   :  { %15378 = vmatpush1.bf16.msra.mxu0 %v22318_v34  ;;  %v22405_v34 = vld [vmem:[#allocation6 + $0xcf0] ss:$8 sps:$4 sm:$0xff]  }
 0x85e   :  { %16231 = vmatpush1.bf16.msra.mxu1 %v22321_v38  ;;  %15379 = vmatprep.subr.bf16.mxu0 %v22326_v40  ;;  %v22410_v38 = vld [vmem:[#allocation6 + $0x984] ss:$8 sps:$4 sm:$0xff]  }
 0x85f   :  { %16232 = vmatprep.subr.bf16.mxu1 %v22329_v55  ;;  %v22413_v40 = vld [vmem:[#allocation6 + $0xd04] ss:$8 sps:$4 sm:$0xff]   ;;  %v22408_v55 = vld [vmem:[#allocation6 + $0x980] ss:$8 sps:$4 sm:$0xff]  }
 0x861   :  { %15380 = vmatpush1.bf16.msra.mxu0 %v22324_v6  ;;  %v22411_v6 = vld [vmem:[#allocation6 + $0xd00] ss:$8 sps:$4 sm:$0xff]  }
 0x862   :  { %16233 = vmatpush1.bf16.msra.mxu1 %v22327_v43  ;;  %15381 = vmatprep.subr.bf16.mxu0 %v22332_v15  ;;  %v22416_v43 = vld [vmem:[#allocation6 + $0x994] ss:$8 sps:$4 sm:$0xff]  }
 0x863   :  { %16234 = vmatprep.subr.bf16.mxu1 %v22335_v42  ;;  %v22419_v15 = vld [vmem:[#allocation6 + $0xd14] ss:$8 sps:$4 sm:$0xff]   ;;  %v22414_v42 = vld [vmem:[#allocation6 + $0x990] ss:$8 sps:$4 sm:$0xff]  }
 0x865   :  { %15382 = vmatpush1.bf16.msra.mxu0 %v22330_v11  ;;  %v22417_v11 = vld [vmem:[#allocation6 + $0xd10] ss:$8 sps:$4 sm:$0xff]  }
 0x866   :  { %16235 = vmatpush1.bf16.msra.mxu1 %v22333_v3  ;;  %15383 = vmatprep.subr.bf16.mxu0 %v22338_v25  ;;  %v22422_v3 = vld [vmem:[#allocation6 + $0x9a4] ss:$8 sps:$4 sm:$0xff]  }
 0x867   :  { %16236 = vmatprep.subr.bf16.mxu1 %v22341_v18  ;;  %v22425_v25 = vld [vmem:[#allocation6 + $0xd24] ss:$8 sps:$4 sm:$0xff]   ;;  %v22420_v18 = vld [vmem:[#allocation6 + $0x9a0] ss:$8 sps:$4 sm:$0xff]  }
 0x869   :  { %15384 = vmatpush1.bf16.msra.mxu0 %v22336_v7  ;;  %v22423_v7 = vld [vmem:[#allocation6 + $0xd20] ss:$8 sps:$4 sm:$0xff]  }
 0x86a   :  { %16237 = vmatpush1.bf16.msra.mxu1 %v22339_v63  ;;  %15385 = vmatprep.subr.bf16.mxu0 %v22344_v35  ;;  %v22428_v63 = vld [vmem:[#allocation6 + $0x9b4] ss:$8 sps:$4 sm:$0xff]  }
 0x86b   :  { %16238 = vmatprep.subr.bf16.mxu1 %v22347_v44  ;;  %v22431_v35 = vld [vmem:[#allocation6 + $0xd34] ss:$8 sps:$4 sm:$0xff]   ;;  %v22426_v44 = vld [vmem:[#allocation6 + $0x9b0] ss:$8 sps:$4 sm:$0xff]  }
 0x86d   :  { %15386 = vmatpush1.bf16.msra.mxu0 %v22342_v45  ;;  %v22429_v45 = vld [vmem:[#allocation6 + $0xd30] ss:$8 sps:$4 sm:$0xff]  }
 0x86e   :  { %16239 = vmatpush1.bf16.msra.mxu1 %v22345_v61  ;;  %15387 = vmatprep.subr.bf16.mxu0 %v22350_v28  ;;  %v22434_v61 = vld [vmem:[#allocation6 + $0x9c4] ss:$8 sps:$4 sm:$0xff]  }
 0x86f   :  { %16240 = vmatprep.subr.bf16.mxu1 %v22353_v10  ;;  %v22437_v28 = vld [vmem:[#allocation6 + $0xd44] ss:$8 sps:$4 sm:$0xff]   ;;  %v22432_v10 = vld [vmem:[#allocation6 + $0x9c0] ss:$8 sps:$4 sm:$0xff]  }
 0x871   :  { %15388 = vmatpush1.bf16.msra.mxu0 %v22348_v32  ;;  %v22435_v32 = vld [vmem:[#allocation6 + $0xd40] ss:$8 sps:$4 sm:$0xff]  }
 0x872   :  { %16241 = vmatpush1.bf16.msra.mxu1 %v22351_v5  ;;  %15389 = vmatprep.subr.bf16.mxu0 %v22356_v29  ;;  %v22440_v5 = vld [vmem:[#allocation6 + $0x9d4] ss:$8 sps:$4 sm:$0xff]  }
 0x873   :  { %16242 = vmatprep.subr.bf16.mxu1 %v22359_v9  ;;  %v22443_v29 = vld [vmem:[#allocation6 + $0xd54] ss:$8 sps:$4 sm:$0xff]   ;;  %v22438_v9 = vld [vmem:[#allocation6 + $0x9d0] ss:$8 sps:$4 sm:$0xff]  }
 0x875   :  { %15390 = vmatpush1.bf16.msra.mxu0 %v22354_v56  ;;  %v22441_v56 = vld [vmem:[#allocation6 + $0xd50] ss:$8 sps:$4 sm:$0xff]  }
 0x876   :  { %16243 = vmatpush1.bf16.msra.mxu1 %v22357_v36  ;;  %15402 = vmatprep.subr.bf16.mxu0 %v22362_v54  ;;  %v22446_v36 = vld [vmem:[#allocation6 + $0x9e4] ss:$8 sps:$4 sm:$0xff]  }
 0x877   :  { %16255 = vmatprep.subr.bf16.mxu1 %v22365_v13  ;;  %v22449_v54 = vld [vmem:[#allocation6 + $0xd64] ss:$8 sps:$4 sm:$0xff]   ;;  %v22444_v13 = vld [vmem:[#allocation6 + $0x9e0] ss:$8 sps:$4 sm:$0xff]  }
 0x878   :  { %15392 = vmatmul.mubr.bf16.vlgmr.msra.gmra.mrb[60].mxu0 %v23654_v2 }
 0x879   :  { %16245 = vmatmul.mubr.bf16.vlgmr.msra.gmra.mrb[60].mxu1 %v23654_v2  ;;  %15403 = vmatpush1.bf16.msra.mxu0 %v22360_v37  ;;  %v22383_v2 = vld [vmem:[#allocation6 + $0xcb4] ss:$8 sps:$4 sm:$0xff]   ;;  %v22447_v37 = vld [vmem:[#allocation6 + $0xd60] ss:$8 sps:$4 sm:$0xff]  }
 0x87a   :  { %15434 = vmatprep.mubr.bf16.mxu0 %v23687_v21  ;;  %16256 = vmatpush1.bf16.msra.mxu1 %v22363_v30  ;;  %v22452_v30 = vld [vmem:[#allocation6 + $0x9f4] ss:$8 sps:$4 sm:$0xff]  }
 0x87b   :  { %16287 = vmatprep.mubr.bf16.mxu1 %v23687_v21  ;;  %15404 = vmatprep.subr.bf16.mxu0 %v22368_v27  ;;  %v22384_v21 = vld [vmem:[#allocation6 + $0x940] ss:$8 sps:$4 sm:$0xff]   ;;  %v22455_v27 = vld [vmem:[#allocation6 + $0xd74] ss:$8 sps:$4 sm:$0xff]  }
 0x87c   :  { %16257 = vmatprep.subr.bf16.mxu1 %v22371_v0  ;;  %v22450_v0 = vld [vmem:[#allocation6 + $0x9f0] ss:$8 sps:$4 sm:$0xff]  }
 0x87d   :  { %15405 = vmatpush1.bf16.msra.mxu0 %v22366_v53  ;;  %v22453_v53 = vld [vmem:[#allocation6 + $0xd70] ss:$8 sps:$4 sm:$0xff]  }
 0x87e   :  { %16258 = vmatpush1.bf16.msra.mxu1 %v22369_v26  ;;  %15406 = vmatprep.subr.bf16.mxu0 %v22374_v23  ;;  %v22458_v26 = vld [vmem:[#allocation6 + $0xa04] ss:$8 sps:$4 sm:$0xff]  }
 0x87f   :  { %16259 = vmatprep.subr.bf16.mxu1 %v22377_v14  ;;  %v22461_v23 = vld [vmem:[#allocation6 + $0xd84] ss:$8 sps:$4 sm:$0xff]   ;;  %v22456_v14 = vld [vmem:[#allocation6 + $0xa00] ss:$8 sps:$4 sm:$0xff]  }
 0x881   :  { %15407 = vmatpush1.bf16.msra.mxu0 %v22372_v39  ;;  %v22459_v39 = vld [vmem:[#allocation6 + $0xd80] ss:$8 sps:$4 sm:$0xff]  }
 0x882   :  { %16260 = vmatpush1.bf16.msra.mxu1 %v22375_v20  ;;  %15408 = vmatprep.subr.bf16.mxu0 %v22380_v62  ;;  %v22464_v20 = vld [vmem:[#allocation6 + $0xa14] ss:$8 sps:$4 sm:$0xff]  }
 0x883   :  { %16261 = vmatprep.subr.bf16.mxu1 %v22383_v2  ;;  %v22467_v62 = vld [vmem:[#allocation6 + $0xd94] ss:$8 sps:$4 sm:$0xff]   ;;  %v22462_v2 = vld [vmem:[#allocation6 + $0xa10] ss:$8 sps:$4 sm:$0xff]  }
 0x885   :  { %15409 = vmatpush1.bf16.msra.mxu0 %v22378_v48  ;;  %v22465_v48 = vld [vmem:[#allocation6 + $0xd90] ss:$8 sps:$4 sm:$0xff]  }
 0x886   :  { %16262 = vmatpush1.bf16.msra.mxu1 %v22381_v59  ;;  %15410 = vmatprep.subr.bf16.mxu0 %v22386_v12  ;;  %v22470_v59 = vld [vmem:[#allocation6 + $0xa24] ss:$8 sps:$4 sm:$0xff]  }
 0x887   :  { %16263 = vmatprep.subr.bf16.mxu1 %v22389_v46  ;;  %v22473_v12 = vld [vmem:[#allocation6 + $0xda4] ss:$8 sps:$4 sm:$0xff]   ;;  %v22468_v46 = vld [vmem:[#allocation6 + $0xa20] ss:$8 sps:$4 sm:$0xff]  }
 0x889   :  { %15411 = vmatpush1.bf16.msra.mxu0 %v22384_v21  ;;  %v22471_v21 = vld [vmem:[#allocation6 + $0xda0] ss:$8 sps:$4 sm:$0xff]  }
 0x88a   :  { %16264 = vmatpush1.bf16.msra.mxu1 %v22387_v49  ;;  %15412 = vmatprep.subr.bf16.mxu0 %v22392_v24  ;;  %v22476_v49 = vld [vmem:[#allocation6 + $0xa34] ss:$8 sps:$4 sm:$0xff]   ;;  %v22474_v24 = vld [vmem:[#allocation6 + $0xa30] ss:$8 sps:$4 sm:$0xff]  }
 0x88b   :  { %16265 = vmatprep.subr.bf16.mxu1 %v22395_v50  ;;  %v22477_v50 = vld [vmem:[#allocation6 + $0xdb0] ss:$8 sps:$4 sm:$0xff]  }
 0x88d   :  { %15413 = vmatpush1.bf16.msra.mxu0 %v22390_v33  ;;  %v22482_v33 = vld [vmem:[#allocation6 + $0xa44] ss:$8 sps:$4 sm:$0xff]  }
 0x88e   :  { %16266 = vmatpush1.bf16.msra.mxu1 %v22393_v4  ;;  %15414 = vmatprep.subr.bf16.mxu0 %v22398_v16  ;;  %v22485_v4 = vld [vmem:[#allocation6 + $0xdc4] ss:$8 sps:$4 sm:$0xff]   ;;  %v22480_v16 = vld [vmem:[#allocation6 + $0xa40] ss:$8 sps:$4 sm:$0xff]  }
 0x88f   :  { %16267 = vmatprep.subr.bf16.mxu1 %v22401_v60  ;;  %v13042_v60 = vld [vmem:[#allocation7] sm:$0x3] }
 0x891   :  { %15415 = vmatpush1.bf16.msra.mxu0 %v22396_v52  ;;  %v22488_v52 = vld [vmem:[#allocation6 + $0xa54] ss:$8 sps:$4 sm:$0xff]  }
 0x892   :  { %16268 = vmatpush1.bf16.msra.mxu1 %v22399_v58  ;;  %15416 = vmatprep.subr.bf16.mxu0 %v22404_v57  ;;  %v22491_v58 = vld [vmem:[#allocation6 + $0xdd4] ss:$8 sps:$4 sm:$0xff]   ;;  %v23713_v57 = vrot.slane %v13042_v60, %v625_v41 }
 0x893   :  { %16269 = vmatprep.subr.bf16.mxu1 %v22407_v47  ;;  %v23717_v47 = vrot.slane %v13042_v60, %v629_v8  ;;  %v22523_v60 = vld [vmem:[#allocation12 + $0x18] sm:$0xff]  }
 0x895   :  { %15417 = vmatpush1.bf16.msra.mxu0 %v22402_v51  ;;  %v22486_v51 = vld [vmem:[#allocation6 + $0xa50] ss:$8 sps:$4 sm:$0xff]  }
 0x896   :  { %16270 = vmatpush1.bf16.msra.mxu1 %v22405_v34  ;;  %15418 = vmatprep.subr.bf16.mxu0 %v22410_v38  ;;  %v22489_v34 = vld [vmem:[#allocation6 + $0xdd0] ss:$8 sps:$4 sm:$0xff]   ;;  %v22494_v38 = vld [vmem:[#allocation6 + $0xa64] ss:$8 sps:$4 sm:$0xff]  }
 0x897   :  { %16271 = vmatprep.subr.bf16.mxu1 %v22413_v40 }
 0x899   :  { %15419 = vmatpush1.bf16.msra.mxu0 %v22408_v55 }
 0x89a   :  { %16272 = vmatpush1.bf16.msra.mxu1 %v22411_v6  ;;  %15420 = vmatprep.subr.bf16.mxu0 %v22416_v43  ;;  %v22497_v6 = vld [vmem:[#allocation6 + $0xde4] ss:$8 sps:$4 sm:$0xff]  }
 0x89b   :  { %16273 = vmatprep.subr.bf16.mxu1 %v22419_v15 }
 0x89d   :  { %15421 = vmatpush1.bf16.msra.mxu0 %v22414_v42 }
 0x89e   :  { %16274 = vmatpush1.bf16.msra.mxu1 %v22417_v11  ;;  %15422 = vmatprep.subr.bf16.mxu0 %v22422_v3 }
 0x89f   :  { %16275 = vmatprep.subr.bf16.mxu1 %v22425_v25  ;;  %v22492_v25 = vld [vmem:[#allocation6 + $0xa60] ss:$8 sps:$4 sm:$0xff]  }
 0x8a1   :  { %15423 = vmatpush1.bf16.msra.mxu0 %v22420_v18  ;;  %v22495_v18 = vld [vmem:[#allocation6 + $0xde0] ss:$8 sps:$4 sm:$0xff]  }
 0x8a2   :  { %16276 = vmatpush1.bf16.msra.mxu1 %v22423_v7  ;;  %15424 = vmatprep.subr.bf16.mxu0 %v22428_v63 }
 0x8a3   :  { %16277 = vmatprep.subr.bf16.mxu1 %v22431_v35 }
 0x8a5   :  { %15425 = vmatpush1.bf16.msra.mxu0 %v22426_v44 }
 0x8a6   :  { %16278 = vmatpush1.bf16.msra.mxu1 %v22429_v45  ;;  %15426 = vmatprep.subr.bf16.mxu0 %v22434_v61 }
 0x8a7   :  { %16279 = vmatprep.subr.bf16.mxu1 %v22437_v28  ;;  %v22500_v28 = vld [vmem:[#allocation6 + $0xa74] ss:$8 sps:$4 sm:$0xff]  }
 0x8a9   :  { %15427 = vmatpush1.bf16.msra.mxu0 %v22432_v10 }
 0x8aa   :  { %16280 = vmatpush1.bf16.msra.mxu1 %v22435_v32  ;;  %15428 = vmatprep.subr.bf16.mxu0 %v22440_v5 }
 0x8ab   :  { %16281 = vmatprep.subr.bf16.mxu1 %v22443_v29 }
 0x8ad   :  { %15429 = vmatpush1.bf16.msra.mxu0 %v22438_v9  ;;  %v22503_v9 = vld [vmem:[#allocation6 + $0xdf4] ss:$8 sps:$4 sm:$0xff]  }
 0x8ae   :  { %16282 = vmatpush1.bf16.msra.mxu1 %v22441_v56  ;;  %15430 = vmatprep.subr.bf16.mxu0 %v22446_v36 }
 0x8af   :  { %16283 = vmatprep.subr.bf16.mxu1 %v22449_v54 }
 0x8b1   :  { %15431 = vmatpush1.bf16.msra.mxu0 %v22444_v13 }
 0x8b2   :  { %16284 = vmatpush1.bf16.msra.mxu1 %v22447_v37  ;;  %15432 = vmatprep.subr.bf16.mxu0 %v22452_v30 }
 0x8b3   :  { %16285 = vmatprep.subr.bf16.mxu1 %v22455_v27  ;;  %v22498_v27 = vld [vmem:[#allocation6 + $0xa70] ss:$8 sps:$4 sm:$0xff]  }
 0x8b5   :  { %15433 = vmatpush1.bf16.msra.mxu0 %v22450_v0 }
 0x8b6   :  { %16286 = vmatpush1.bf16.msra.mxu1 %v22453_v53  ;;  %15445 = vmatprep.subr.bf16.mxu0 %v22458_v26  ;;  %v22501_v53 = vld [vmem:[#allocation6 + $0xdf0] ss:$8 sps:$4 sm:$0xff]   ;;  %v22504_v26 = vld [vmem:[#allocation9 + $0x40] sm:$0xff]  }
 0x8b7   :  { %16298 = vmatprep.subr.bf16.mxu1 %v22461_v23 }
 0x8b8   :  { %15435 = vmatmul.mubr.bf16.vlgmr.msra.gmra.mrb[60].mxu0 %v23683_v1 }
 0x8b9   :  { %16288 = vmatmul.mubr.bf16.vlgmr.msra.gmra.mrb[60].mxu1 %v23683_v1  ;;  %15446 = vmatpush1.bf16.msra.mxu0 %v22456_v14  ;;  %v22479_v1 = vld [vmem:[#allocation6 + $0xdb4] ss:$8 sps:$4 sm:$0xff]   ;;  %v22505_v14 = vld [vmem:[#allocation9] sm:$0xff]  }
 0x8ba   :  { %16299 = vmatpush1.bf16.msra.mxu1 %v22459_v39  ;;  %15447 = vmatprep.subr.bf16.mxu0 %v22464_v20  ;;  %v22506_v39 = vld [vmem:[#allocation9 + $0x48] sm:$0xff]  }
 0x8bb   :  { %16300 = vmatprep.subr.bf16.mxu1 %v22467_v62  ;;  %15477 = vmatprep.mubr.bf16.mxu0 %v22841_v17  ;;  %v22507_v20 = vld [vmem:[#allocation9 + $0x8] sm:$0xff]   ;;  %v22508_v62 = vld [vmem:[#allocation9 + $0x50] sm:$0xff]  }
 0x8bc   :  { %16330 = vmatprep.mubr.bf16.mxu1 %v22841_v17  ;;  %v22483_v17 = vld [vmem:[#allocation6 + $0xdc0] ss:$8 sps:$4 sm:$0xff]  }
 0x8bd   :  { %15448 = vmatpush1.bf16.msra.mxu0 %v22462_v2  ;;  %v22509_v2 = vld [vmem:[#allocation9 + $0x10] sm:$0xff]  }
 0x8be   :  { %16301 = vmatpush1.bf16.msra.mxu1 %v22465_v48  ;;  %15449 = vmatprep.subr.bf16.mxu0 %v22470_v59  ;;  %v22510_v48 = vld [vmem:[#allocation9 + $0x58] sm:$0xff]  }
 0x8bf   :  { %16302 = vmatprep.subr.bf16.mxu1 %v22473_v12  ;;  %v22511_v59 = vld [vmem:[#allocation9 + $0x18] sm:$0xff]   ;;  %v22512_v12 = vld [vmem:[#allocation9 + $0x60] sm:$0xff]  }
 0x8c1   :  { %15450 = vmatpush1.bf16.msra.mxu0 %v22468_v46  ;;  %v22513_v46 = vld [vmem:[#allocation9 + $0x20] sm:$0xff]  }
 0x8c2   :  { %16303 = vmatpush1.bf16.msra.mxu1 %v22471_v21  ;;  %15451 = vmatprep.subr.bf16.mxu0 %v22476_v49  ;;  %v22515_v21 = vld [vmem:[#allocation9 + $0x28] sm:$0xff]   ;;  %v22516_v49 = vld [vmem:[#allocation9 + $0x70] sm:$0xff]  }
 0x8c3   :  { %16304 = vmatprep.subr.bf16.mxu1 %v22479_v1  ;;  %v22517_v1 = vld [vmem:[#allocation9 + $0x30] sm:$0xff]  }
 0x8c5   :  { %15452 = vmatpush1.bf16.msra.mxu0 %v22474_v24  ;;  %v22518_v24 = vld [vmem:[#allocation9 + $0x78] sm:$0xff]  }
 0x8c6   :  { %16305 = vmatpush1.bf16.msra.mxu1 %v22477_v50  ;;  %15453 = vmatprep.subr.bf16.mxu0 %v22482_v33  ;;  %v22519_v50 = vld [vmem:[#allocation9 + $0x38] sm:$0xff]   ;;  %v22520_v33 = vld [vmem:[#allocation12] sm:$0xff]  }
 0x8c7   :  { %16306 = vmatprep.subr.bf16.mxu1 %v22485_v4  ;;  %v22521_v4 = vld [vmem:[#allocation12 + $0x8] sm:$0xff]  }
 0x8c9   :  { %15454 = vmatpush1.bf16.msra.mxu0 %v22480_v16  ;;  %v22522_v16 = vld [vmem:[#allocation12 + $0x10] sm:$0xff]  }
 0x8ca   :  { %16307 = vmatpush1.bf16.msra.mxu1 %v22483_v17  ;;  %15455 = vmatprep.subr.bf16.mxu0 %v22488_v52  ;;  %v22524_v17 = vld [vmem:[#allocation12 + $0x20] sm:$0xff]  }
 0x8cb   :  { %v13777_v40 = vpop.f32.mrb[56].mxu0  ;;  %v14626_v55 = vpop.f32.mrb[56].mxu1  ;;  %16308 = vmatprep.subr.bf16.mxu1 %v22491_v58 }
 0x8cc   :  { %v19355_v43 = vadd.f32 %v13777_v40, %v23713_v57  ;;  %v19359_v15 = vadd.f32 %v14626_v55, %v23713_v57  ;;  %v13779_v41 = vpop.f32.mrb[57].mxu0  ;;  %v14628_v42 = vpop.f32.mrb[57].mxu1 }
 0x8cd   :  { %v19356_v11 = vadd.f32 %v13779_v41, %v23717_v47  ;;  %v19360_v31 = vadd.f32 %v14628_v42, %v23717_v47  ;;  %v13781_v8 = vpop.f32.mrb[58].mxu0  ;;  %v14630_v3 = vpop.f32.mrb[58].mxu1  ;;  %15456 = vmatpush1.bf16.msra.mxu0 %v22486_v51 }
 0x8ce   :  { %v13786_v7 = vmax.f32 %v19355_v43, 0.0  ;;  %v14635_v63 = vmax.f32 %v19359_v15, 0.0  ;;  %v19357_v35 = vadd.f32 %v13781_v8, %v23713_v57  ;;  %v19361_v44 = vadd.f32 %v14630_v3, %v23713_v57  ;;  %16309 = vmatpush1.bf16.msra.mxu1 %v22489_v34  ;;  %v13783_v45 = vpop.f32.mrb[59].mxu0  ;;  %v14632_v61 = vpop.f32.mrb[59].mxu1  ;;  %15457 = vmatprep.subr.bf16.mxu0 %v22494_v38 }
 0x8cf   :  { %v13787_v10 = vmax.f32 %v19356_v11, 0.0  ;;  %v14636_v32 = vmax.f32 %v19360_v31, 0.0  ;;  %v19358_v5 = vadd.f32 %v13783_v45, %v23717_v47  ;;  %v19362_v29 = vadd.f32 %v14632_v61, %v23717_v47  ;;  %16310 = vmatprep.subr.bf16.mxu1 %v22497_v6 }
 0x8d0   :  { %v23727_v56 = vmax.f32 %v13786_v7, %v14635_v63  ;;  %v13788_v36 = vmax.f32 %v19357_v35, 0.0  ;;  %v14637_v54 = vmax.f32 %v19361_v44, 0.0 }
 0x8d1   :  { %v23729_v13 = vmax.f32 %v13787_v10, %v14636_v32  ;;  %v13789_v37 = vmax.f32 %v19358_v5, 0.0  ;;  %v14638_v30 = vmax.f32 %v19362_v29, 0.0  ;;  %15458 = vmatpush1.bf16.msra.mxu0 %v22492_v25 }
 0x8d2   :  { %v23731_v0 = vmax.f32 %v13788_v36, %v14637_v54  ;;  %16311 = vmatpush1.bf16.msra.mxu1 %v22495_v18  ;;  %15459 = vmatprep.subr.bf16.mxu0 %v22500_v28 }
 0x8d3   :  { %v23733_v23 = vmax.f32 %v13789_v37, %v14638_v30  ;;  %16312 = vmatprep.subr.bf16.mxu1 %v22503_v9  ;;  %v22527_v37 = vld [vmem:[#allocation12 + $0x38] sm:$0xff]   ;;  %v22528_v30 = vld [vmem:[#allocation15] sm:$0xff]  }
 0x8d5   :  { %15460 = vmatpush1.bf16.msra.mxu0 %v22498_v27  ;;  %v22529_v27 = vld [vmem:[#allocation15 + $0x8] sm:$0xff]  }
 0x8d6   :  { %16313 = vmatpush1.bf16.msra.mxu1 %v22501_v53  ;;  %19147 = vmatprep.subr.bf16.mxu0 %v22504_v26  ;;  %v22531_v53 = vld [vmem:[#allocation15 + $0x18] sm:$0xff]   ;;  %v22532_v26 = vld [vmem:[#allocation15 + $0x20] sm:$0xff]  }
 0x8d7   :  { %19267 = vmatprep.subr.bf16.mxu1 %v22842_v22 }
 0x8d8   :  { %15478 = vmatmul.mubr.bf16.vlgmr.msra.gmra.mrb[60].mxu0 %v23685_v19 }
 0x8d9   :  { %16331 = vmatmul.mubr.bf16.vlgmr.msra.gmra.mrb[60].mxu1 %v23685_v19  ;;  %19148 = vmatpush3.bf16.msra.mxu0 %v22505_v14  ;;  %v22514_v19 = vld [vmem:[#allocation9 + $0x68] sm:$0xff]  }
 0x8da   :  { %19149 = vmatprep.subr.bf16.mxu0 %v22506_v39  ;;  %19283 = vmatprep.mubr.msk.bf16.mxu1 %vm22843_vm0, %v22842_v22  ;;  %v18812_v39 = vld [vmem:[#allocation10] ss:$0 sm:$0xff] }
 0x8db   :  { %19268 = vmatpush3.bf16.msra.mxu1 %v22520_v33 }
 0x8dc   :  { %19269 = vmatprep.subr.bf16.mxu1 %v22842_v22 }
 0x8dd   :  { %19150 = vmatpush3.bf16.msra.mxu0 %v22507_v20 }
 0x8de   :  { %19151 = vmatprep.subr.bf16.mxu0 %v22508_v62 }
 0x8df   :  { %19270 = vmatpush3.bf16.msra.mxu1 %v22521_v4 }
 0x8e0   :  { %19271 = vmatprep.subr.bf16.mxu1 %v22842_v22 }
 0x8e1   :  { %19152 = vmatpush3.bf16.msra.mxu0 %v22509_v2 }
 0x8e2   :  { %19153 = vmatprep.subr.bf16.mxu0 %v22510_v48 }
 0x8e3   :  { %19272 = vmatpush3.bf16.msra.mxu1 %v22522_v16 }
 0x8e4   :  { %19273 = vmatprep.subr.bf16.mxu1 %v22842_v22 }
 0x8e5   :  { %19154 = vmatpush3.bf16.msra.mxu0 %v22511_v59 }
 0x8e6   :  { %19155 = vmatprep.subr.bf16.mxu0 %v22512_v12 }
 0x8e7   :  { %19274 = vmatpush3.bf16.msra.mxu1 %v22523_v60 }
 0x8e8   :  { %19275 = vmatprep.subr.bf16.mxu1 %v22842_v22 }
 0x8e9   :  { %19156 = vmatpush3.bf16.msra.mxu0 %v22513_v46 }
 0x8ea   :  { %19157 = vmatprep.subr.bf16.mxu0 %v22514_v19 }
 0x8eb   :  { %19276 = vmatpush3.bf16.msra.mxu1 %v22524_v17 }
 0x8ec   :  { %19277 = vmatprep.subr.bf16.mxu1 %v22842_v22 }
 0x8ed   :  { %19158 = vmatpush3.bf16.msra.mxu0 %v22515_v21 }
 0x8ee   :  { %19159 = vmatprep.subr.bf16.mxu0 %v22516_v49 }
 0x8f1   :  { %19160 = vmatpush3.bf16.msra.mxu0 %v22517_v1  ;;  %v22534_v1 = vld [vmem:[#allocation15 + $0x30] sm:$0xff]  }
 0x8f2   :  { %19161 = vmatprep.subr.bf16.mxu0 %v22518_v24  ;;  %v22535_v24 = vld [vmem:[#allocation15 + $0x38] sm:$0xff]  }
 0x8f5   :  { %19162 = vmatpush3.bf16.msra.mxu0 %v22519_v50  ;;  %v18829_v50 = vld [vmem:[#allocation13] ss:$0 sm:$0xff] }
 0x8f6   :  { %19287 = vmatprep.subr.bf16.mxu0 %v22842_v22 }
 0x9ab   :  { %v15479_v52 = vpop.f32.mrb[60].mxu0 }
 0x9ac   :  { %v19363_v58 = vadd.f32 %v15479_v52, %v23713_v57  ;;  %v16332_v51 = vpop.f32.mrb[60].mxu1  ;;  %v15481_v34 = vpop.f32.mrb[61].mxu0 }
 0x9ad   :  { %v19367_v38 = vadd.f32 %v16332_v51, %v23713_v57  ;;  %v19364_v40 = vadd.f32 %v15481_v34, %v23717_v47  ;;  %v16334_v55 = vpop.f32.mrb[61].mxu1  ;;  %v15483_v6 = vpop.f32.mrb[62].mxu0 }
 0x9ae   :  { %v15488_v43 = vmax.f32 %v19363_v58, 0.0  ;;  %v19368_v15 = vadd.f32 %v16334_v55, %v23717_v47  ;;  %v19365_v41 = vadd.f32 %v15483_v6, %v23713_v57  ;;  %v16336_v42 = vpop.f32.mrb[62].mxu1  ;;  %v15485_v11 = vpop.f32.mrb[63].mxu0 }
 0x9af   :  { %v15489_v31 = vmax.f32 %v19364_v40, 0.0  ;;  %v19369_v8 = vadd.f32 %v16336_v42, %v23713_v57  ;;  %v19366_v3 = vadd.f32 %v15485_v11, %v23717_v47  ;;  %v16338_v25 = vpop.f32.mrb[63].mxu1  ;;  %v16341_v7 = vmax.f32 %v19367_v38, 0.0  ;;  %v18838_v38 = vld [vmem:[#allocation16] ss:$0 sm:$0xff] }
 0x9b0   :  { %v15492_v18 = vmax.f32 %v23727_v56, %v15488_v43  ;;  %v15490_v63 = vmax.f32 %v19365_v41, 0.0  ;;  %v19370_v35 = vadd.f32 %v16338_v25, %v23717_v47  ;;  %v16342_v45 = vmax.f32 %v19368_v15, 0.0  ;;  %v22525_v47 = vld [vmem:[#allocation12 + $0x28] sm:$0xff]  }
 0x9b1   :  { %v15493_v44 = vmax.f32 %v23729_v13, %v15489_v31  ;;  %v15491_v61 = vmax.f32 %v19366_v3, 0.0  ;;  %v16343_v32 = vmax.f32 %v19369_v8, 0.0  ;;  %19278 = vmatpush3.bf16.msra.mxu1 %v22525_v47  ;;  %v22526_v13 = vld [vmem:[#allocation12 + $0x30] sm:$0xff]  }
 0x9b2   :  { %v16345_v28 = vmax.f32 %v15492_v18, %v16341_v7  ;;  %v15494_v10 = vmax.f32 %v23731_v0, %v15490_v63  ;;  %v16344_v29 = vmax.f32 %v19370_v35, 0.0  ;;  %19279 = vmatprep.subr.bf16.mxu1 %v22842_v22  ;;  %v22530_v0 = vld [vmem:[#allocation15 + $0x10] sm:$0xff]  }
 0x9b3   :  { %v16346_v5 = vmax.f32 %v15493_v44, %v16342_v45  ;;  %v15495_v57 = vmax.f32 %v23733_v23, %v15491_v61  ;;  %v22533_v23 = vld [vmem:[#allocation15 + $0x28] sm:$0xff]  }
 0x9b4   :  { %v16347_v9 = vmax.f32 %v15494_v10, %v16343_v32 }
 0x9b5   :  { %v16348_v36 = vmax.f32 %v15495_v57, %v16344_v29  ;;  %19280 = vmatpush3.bf16.msra.mxu1 %v22526_v13 }
 0x9b6   :  { %v16349_v54 = vpack.c.bf16 %v16347_v9, %v16345_v28  ;;  %19281 = vmatprep.subr.bf16.mxu1 %v22842_v22 }
 0x9b7   :  { %v16350_v56 = vpack.c.bf16 %v16348_v36, %v16346_v5 }
 0x9b9   :  { %16518 = vmatprep.mubr.bf16.mxu0 %v16350_v56  ;;  %19282 = vmatpush3.bf16.msra.mxu1 %v22527_v37 }
 0x9ba   :  { %16519 = vmatmul.mubr.bf16.vlgmr.msra.gmra.mrb[64].mxu0 %v16349_v54 }
 0x9bb   :  { %19303 = vmatprep.mubr.msk.bf16.mxu0 %vm22843_vm0, %v22842_v22  ;;  %19288 = vmatpush3.bf16.msra.mxu0 %v22528_v30 }
 0x9bc   :  { %19289 = vmatprep.subr.bf16.mxu0 %v22842_v22 }
 0x9bf   :  { %19290 = vmatpush3.bf16.msra.mxu0 %v22529_v27 }
 0x9c0   :  { %19291 = vmatprep.subr.bf16.mxu0 %v22842_v22 }
 0x9c3   :  { %19292 = vmatpush3.bf16.msra.mxu0 %v22530_v0 }
 0x9c4   :  { %19293 = vmatprep.subr.bf16.mxu0 %v22842_v22 }
 0x9c7   :  { %19294 = vmatpush3.bf16.msra.mxu0 %v22531_v53 }
 0x9c8   :  { %19295 = vmatprep.subr.bf16.mxu0 %v22842_v22 }
 0x9cb   :  { %19296 = vmatpush3.bf16.msra.mxu0 %v22532_v26 }
 0x9cc   :  { %19297 = vmatprep.subr.bf16.mxu0 %v22842_v22 }
 0x9cf   :  { %19298 = vmatpush3.bf16.msra.mxu0 %v22533_v23 }
 0x9d0   :  { %19299 = vmatprep.subr.bf16.mxu0 %v22842_v22 }
 0x9d3   :  { %19300 = vmatpush3.bf16.msra.mxu0 %v22534_v1 }
 0x9d4   :  { %19301 = vmatprep.subr.bf16.mxu0 %v22842_v22 }
 0x9d7   :  { %19302 = vmatpush3.bf16.msra.mxu0 %v22535_v24 }
 0xa8d   :  { %v19163_v14 = vpop.f32.mrb[64].mxu0 }
 0xa8e   :  { %v19164_v20 = vpop.f32.mrb[65].mxu0 }
 0xa8f   :  { %v19165_v62 = vadd.f32 %v19164_v20, %v19163_v14  ;;  %v19166_v2 = vpop.f32.mrb[66].mxu0 }
 0xa90   :  { %v19167_v48 = vpop.f32.mrb[67].mxu0 }
 0xa91   :  { %v16521_v59 = vadd.f32 %v19165_v62, %v18812_v39  ;;  %v19168_v12 = vadd.f32 %v19167_v48, %v19166_v2 }
 0xa93   :  { %v16524_v46 = vadd.f32 %v19168_v12, %v18812_v39  ;;  %v16527_v19 = vmax.f32 %v16521_v59, 0.0 }
 0xa95   :  { %v16528_v21 = vmax.f32 %v16524_v46, 0.0 }
 0xa97   :  { %v16529_v49 = vpack.c.bf16 %v16528_v21, %v16527_v19 }
 0xa99   :  { %19284 = vmatmul.mubr.bf16.vlgmr.msra.gmra.mrb[64].mxu1 %v16529_v49 }
 0xb6c   :  { %v16635_v33 = vpop.f32.mrb[64].mxu1 }
 0xb6d   :  { %v16636_v4 = vadd.f32 %v18829_v50, %v16635_v33  ;;  %v19285_v16 = vpop.f32.mrb[65].mxu1 }
 0xb6e   :  { %v16638_v60 = vpop.f32.mrb[66].mxu1 }
 0xb6f   :  { %v16639_v17 = vadd.f32 %v18829_v50, %v16638_v60  ;;  %v19286_v52 = vpop.f32.mrb[67].mxu1  ;;  %v16642_v58 = vmax.f32 %v16636_v4, 0.0 }
 0xb71   :  { %v16643_v51 = vmax.f32 %v16639_v17, 0.0 }
 0xb73   :  { %v16644_v34 = vpack.c.bf16 %v16643_v51, %v16642_v58 }
 0xb75   :  { %19304 = vmatmul.mubr.bf16.vlgmr.msra.gmra.mrb[68].mxu0 %v16644_v34 }
 0xc48   :  { %v16750_v40 = vpop.f32.mrb[68].mxu0 }
 0xc49   :  { %v16751_v55 = vadd.f32 %v18838_v38, %v16750_v40  ;;  %v19305_v6 = vpop.f32.mrb[69].mxu0 }
 0xc4a   :  { %v16753_v43 = vpop.f32.mrb[70].mxu0 }
 0xc4b   :  { %16757 = vmax.xlane.f32.xlu0 %v16751_v55  ;;  %v19306_v22 = vpop.f32.mrb[71].mxu0  ;;  %v16754_v15 = vadd.f32 %v18838_v38, %v16753_v43 }
 0xc4f   :  { %16759 = vmax.xlane.f32.xlu0 %v16754_v15 }
 0xcd8   :  { %v16758_v41 = vpop.xlane.xlu0 %16757 }
 0xcd9   :  { %v16761_v42 = vsub.f32 %v16751_v55, %v16758_v41 }
 0xcdb   :  { %v16763_v11 = vmul.f32 1.442695, %v16761_v42 }
 0xcdc   :  { %v16760_v31 = vpop.xlane.xlu0 %16759 }
 0xcdd   :  { %v16762_v8 = vsub.f32 %v16754_v15, %v16760_v31  ;;  %22536 = vpow2.f32 %v16763_v11 }
 0xcdf   :  { %v16765_v3 = vmul.f32 1.442695, %v16762_v8 }
 0xce1   :  { %22538 = vpow2.f32 %v16765_v3 }
 0xce7   :  { %v22537_v25 = vpop.eup %22536 }
 0xce8   :  { %16767 = vadd.xlane.f32.xlu1 %v22537_v25 }
 0xceb   :  { %v22539_v18 = vpop.eup %22538 }
 0xcec   :  { %16769 = vadd.xlane.f32.xlu1 %v22539_v18 }
 0xd75   :  { %v16768_v7 = vpop.xlane.xlu1 %16767 }
 0xd76   :  { %22540 = vlog2.f32 %v16768_v7 }
 0xd79   :  { %v16770_v63 = vpop.xlane.xlu1 %16769 }
 0xd7a   :  { %22542 = vlog2.f32 %v16770_v63 }
 0xd80   :  { %v22541_v35 = vpop.eup %22540 }
 0xd81   :  { %v16772_v44 = vmul.f32 0.6931472, %v22541_v35 }
 0xd83   :  { %v16775_v45 = vsub.f32 %v16761_v42, %v16772_v44 }
 0xd84   :  { %v22543_v61 = vpop.eup %22542 }
 0xd85   :  { %16777 = vst [vmem:[%s23786_s11] sm:$0xff] %v16775_v45  ;;  %v16774_v28 = vmul.f32 0.6931472, %v22543_v61 }
 0xd87   :  { %v16776_v10 = vsub.f32 %v16762_v8, %v16774_v28 }
 0xd89   :  { %16778 = vst [vmem:[%s23786_s11 + $0x8] sm:$0xff] %v16776_v10 }
 0xd8a   :  { %16783 = vsyncpa [#allocation3], 1 }
 0xd8b   :  { %16784 = vsyncpa [#allocation5], 1 }
 0xd8c   :  { %16785 = vsyncpa [#allocation8], 1 }
 0xd8d   :  { %16786 = vsyncpa [#allocation11], 1 }
 0xd8e   :  { %16787 = vsyncpa [#allocation14], 1 }
 0xd8f   :  { %16788 = vsyncpa [#allocation17], 1 }

</bundles_post_ra>
